<compile_context>
chip_gen: v5e
topology: v5e:2x2
jax: 0.10.0
libtpu: 0.0.40
codegen_flags: <defaults>
</compile_context>

<pallas_src>
import math

import jax
import jax.numpy as jnp
from jax import lax
from jax.experimental import pallas as pl
from jax.experimental.pallas import tpu as pltpu

_BN_EPS = 1e-5
_LANE = 128
_VMEM_LIMIT = 32 * 1024 * 1024


def _round_up(n, m):
    return ((n + m - 1) // m) * m


def _vmem():
    return pl.BlockSpec(memory_space=pltpu.MemorySpace.VMEM)


def _tile_m(m, block_m=1024):
    """M tile: multiple of 8, <= block_m, and (when possible) >=2 grid steps (v7x)."""
    half = _round_up(max(-(-m // 2), 8), 8)
    return max(8, min(block_m, half))


# ----------------------------------------------------------------------------
# Pallas kernels (matmul-style, gridded over M)
# ----------------------------------------------------------------------------

def _preact_matmul_kernel(x_ref, s_ref, b_ref, w_ref, o_ref):
    """o = relu(x*scale + shift) @ w  -- BN+ReLU prologue fused (transition 1x1)."""
    a = jnp.maximum(x_ref[...].astype(jnp.float32) * s_ref[...] + b_ref[...], 0.0)
    o_ref[...] = jnp.dot(a.astype(jnp.bfloat16), w_ref[...],
                         preferred_element_type=jnp.float32).astype(o_ref.dtype)


def _matmul_postact_kernel(x_ref, w_ref, s_ref, b_ref, o_ref):
    """o = relu((x @ w)*scale + shift) -- BN+ReLU epilogue fused (init 7x7 conv)."""
    acc = jnp.dot(x_ref[...], w_ref[...], preferred_element_type=jnp.float32)
    o_ref[...] = jnp.maximum(acc * s_ref[...] + b_ref[...], 0.0).astype(o_ref.dtype)


def _head_kernel(x_ref, m_ref, s_ref, b_ref, w_ref, fb_ref, o_ref):
    """post BN+ReLU -> halo-masked global avg-pool (1/HW folded into w) -> Linear."""
    a = jnp.maximum(x_ref[...].astype(jnp.float32) * s_ref[...] + b_ref[...], 0.0)
    a = a * m_ref[...]
    pooled = jnp.sum(a, axis=1).astype(jnp.bfloat16)           # (N, C)
    o_ref[...] = jnp.dot(pooled, w_ref[...],
                         preferred_element_type=jnp.float32) + fb_ref[...]


# ----------------------------------------------------------------------------
# Pallas-call wrappers
# ----------------------------------------------------------------------------

def fused_preact_matmul(x2, scale, shift, w, *, block_m=1024):
    m, k = x2.shape
    n = w.shape[1]
    tm = _tile_m(m, block_m)
    return pl.pallas_call(
        _preact_matmul_kernel,
        out_shape=jax.ShapeDtypeStruct((m, n), jnp.bfloat16),
        grid=(pl.cdiv(m, tm),),
        in_specs=[pl.BlockSpec((tm, k), lambda i: (i, 0)),
                  pl.BlockSpec((1, k), lambda i: (0, 0)),
                  pl.BlockSpec((1, k), lambda i: (0, 0)),
                  pl.BlockSpec((k, n), lambda i: (0, 0))],
        out_specs=pl.BlockSpec((tm, n), lambda i: (i, 0)),
        compiler_params=pltpu.CompilerParams(dimension_semantics=("parallel",),
                                             vmem_limit_bytes=_VMEM_LIMIT),
        cost_estimate=pl.CostEstimate(flops=2 * m * k * n, transcendentals=0,
                                      bytes_accessed=m * k * 2 + k * n * 2 + m * n * 2),
    )(x2, scale, shift, w)


def fused_matmul_postact(x2, w, scale, shift, *, block_m=1024):
    m, k = x2.shape
    n = w.shape[1]
    tm = _tile_m(m, block_m)
    return pl.pallas_call(
        _matmul_postact_kernel,
        out_shape=jax.ShapeDtypeStruct((m, n), jnp.bfloat16),
        grid=(pl.cdiv(m, tm),),
        in_specs=[pl.BlockSpec((tm, k), lambda i: (i, 0)),
                  pl.BlockSpec((k, n), lambda i: (0, 0)),
                  pl.BlockSpec((1, n), lambda i: (0, 0)),
                  pl.BlockSpec((1, n), lambda i: (0, 0))],
        out_specs=pl.BlockSpec((tm, n), lambda i: (i, 0)),
        compiler_params=pltpu.CompilerParams(dimension_semantics=("parallel",),
                                             vmem_limit_bytes=_VMEM_LIMIT),
        cost_estimate=pl.CostEstimate(flops=2 * m * k * n, transcendentals=0,
                                      bytes_accessed=m * k * 2 + k * n * 2 + m * n * 2),
    )(x2, w, scale, shift)


def dense_unit(x_flat, mask, s1, b1, w1, s2, b2, w2, *, hw):
    """One fused dense unit: BN+ReLU+1x1 XConv -> BN+ReLU+3x3 XConv -> concat-as-add.

    x_flat: (nb, P, 128) bf16, P = (H+2)*(W+2) flattened with zero halo ring.
    mask:   (P, 1) f32, 1 on the interior HxW, 0 on the halo ring.
    w1:     (128, 128) bf16 (cin padded rows, mid cols at offset 0).
    w2:     (9, 128, 128) bf16; output columns placed at channel offset c_in so
            `x + y` realizes torch.cat((identity, new), dim=1).
    """
    h, w = hw
    nb, p, c = x_flat.shape
    wp = w + 2
    m0 = _round_up(wp + 1, 8)          # 8-aligned interior-store offset in the scratch
    rows = m0 + p + wp + 1             # scratch rows (covers all 9 shifted reads)

    def kernel(x_ref, m_ref, s1_ref, b1_ref, w1_ref, s2_ref, b2_ref, w2_ref,
               o_ref, a2_ref):
        x2 = x_ref[0]                                            # (P, 128) bf16
        msk = m_ref[...]                                         # (P, 1) f32
        # --- PreXConvBlock #1: BN + ReLU + 1x1 XConv (mask folded into w1) ---
        a1 = jnp.maximum(x2.astype(jnp.float32) * s1_ref[...] + b1_ref[...], 0.0)
        mid = jnp.dot(a1.astype(jnp.bfloat16), w1_ref[...],
                      preferred_element_type=jnp.float32)        # (P, 128) f32
        # --- PreXConvBlock #2 prologue: BN + ReLU; conv zero-pad => mask halo ---
        a2 = jnp.maximum(mid * s2_ref[...] + b2_ref[...], 0.0) * msk
        a2_ref[...] = jnp.zeros(a2_ref.shape, a2_ref.dtype)      # zero the margins
        a2_ref[pl.ds(m0, p), :] = a2                             # aligned interior store
        # --- 3x3 XConv: 9 whole-plane shifted dots, f32 accumulation ---
        acc = jnp.zeros((p, c), jnp.float32)
        for di in range(3):
            for dj in range(3):
                off = m0 - wp - 1 + di * wp + dj                 # static offset
                lhs = a2_ref[pl.ds(off, p), :].astype(jnp.bfloat16)
                acc = acc + jnp.dot(lhs, w2_ref[3 * di + dj],
                                    preferred_element_type=jnp.float32)
        # --- DenseNet concat fused as an add (identity channels of acc are 0) ---
        o_ref[0] = (x2.astype(jnp.float32) + acc * msk).astype(o_ref.dtype)

    flops = nb * 2 * p * c * c * 10
    return pl.pallas_call(
        kernel,
        out_shape=jax.ShapeDtypeStruct((nb, p, c), jnp.bfloat16),
        grid=(nb,),
        in_specs=[pl.BlockSpec((1, p, c), lambda i: (i, 0, 0)),
                  pl.BlockSpec((p, 1), lambda i: (0, 0)),
                  pl.BlockSpec((1, c), lambda i: (0, 0)),
                  pl.BlockSpec((1, c), lambda i: (0, 0)),
                  pl.BlockSpec((c, c), lambda i: (0, 0)),
                  pl.BlockSpec((1, c), lambda i: (0, 0)),
                  pl.BlockSpec((1, c), lambda i: (0, 0)),
                  pl.BlockSpec((9, c, c), lambda i: (0, 0, 0))],
        out_specs=pl.BlockSpec((1, p, c), lambda i: (i, 0, 0)),
        scratch_shapes=[pltpu.VMEM((rows, c), jnp.float32)],
        compiler_params=pltpu.CompilerParams(dimension_semantics=("parallel",),
                                             vmem_limit_bytes=_VMEM_LIMIT),
        cost_estimate=pl.CostEstimate(
            flops=flops, transcendentals=0,
            bytes_accessed=2 * nb * p * c * 2 + 10 * c * c * 2),
    )(x_flat, mask, s1, b1, w1, s2, b2, w2)


def head_forward(x_flat, mask, scale, shift, fc_w, fc_b):
    nb, p, c = x_flat.shape
    ncp = fc_w.shape[-1]
    return pl.pallas_call(
        _head_kernel,
        out_shape=jax.ShapeDtypeStruct((nb, ncp), jnp.float32),
        in_specs=[_vmem() for _ in range(6)],
        out_specs=_vmem(),
        compiler_params=pltpu.CompilerParams(vmem_limit_bytes=_VMEM_LIMIT),
    )(x_flat, mask, scale, shift, fc_w, fc_b)


# ----------------------------------------------------------------------------
# Thin XLA glue (layout-only / tiny one-off ops)
# ----------------------------------------------------------------------------

def _im2col(x_nhwc, kh, kw, stride, padding):
    """Only used once, for the 7x7 stride-2 init conv; emitted in bf16, K padded to 8."""
    n, h, w, c = x_nhwc.shape
    xp = jnp.pad(x_nhwc, ((0, 0), (padding, padding), (padding, padding), (0, 0)))
    hp, wp = h + 2 * padding, w + 2 * padding
    oh = (hp - kh) // stride + 1
    ow = (wp - kw) // stride + 1
    cols = []
    for i in range(kh):
        for j in range(kw):
            cols.append(xp[:, i:i + stride * oh:stride, j:j + stride * ow:stride, :])
    cols = jnp.concatenate(cols, axis=-1)            # patch order (kh, kw, cin)
    k = kh * kw * c
    kp = _round_up(k, 8)
    cols = jnp.pad(cols, ((0, 0), (0, 0), (0, 0), (0, kp - k)))
    return cols.reshape(n * oh * ow, kp), (n, oh, ow)


# TODO(synk): max/avg pooling stay as XLA reduce_window / reshape-mean (tiny,
# layout-bound); they could be folded into the neighbouring kernels later.
def maxpool_3x3_s2_p1(x_nhwc):
    y = lax.reduce_window(x_nhwc.astype(jnp.float32), -jnp.inf, lax.max,
                          window_dimensions=(1, 3, 3, 1),
                          window_strides=(1, 2, 2, 1),
                          padding=[(0, 0), (1, 1), (1, 1), (0, 0)])
    return y.astype(jnp.bfloat16)


def avgpool_2x2(x_nhwc):
    n, h, w, c = x_nhwc.shape
    y = x_nhwc.astype(jnp.float32).reshape(n, h // 2, 2, w // 2, 2, c).mean(axis=(2, 4))
    return y.astype(jnp.bfloat16)


def embed_halo(x_nhwc):
    """(N, H, W, C) -> (N, (H+2)*(W+2), C) bf16 with an embedded zero halo ring."""
    n, h, w, c = x_nhwc.shape
    xp = jnp.pad(x_nhwc, ((0, 0), (1, 1), (1, 1), (0, 0)))
    return xp.reshape(n, (h + 2) * (w + 2), c)


def halo_mask(h, w):
    m = jnp.pad(jnp.ones((h, w, 1), jnp.float32), ((1, 1), (1, 1), (0, 0)))
    return m.reshape((h + 2) * (w + 2), 1)


# ----------------------------------------------------------------------------
# Deterministic parameter construction (synthetic, matches module shapes)
# ----------------------------------------------------------------------------

def _bn_params(c, cp=_LANE):
    gamma = jnp.ones((c,), jnp.float32)
    beta = jnp.zeros((c,), jnp.float32)
    mean = jnp.zeros((c,), jnp.float32)
    var = jnp.ones((c,), jnp.float32)
    scale = gamma / jnp.sqrt(var + _BN_EPS)
    shift = beta - mean * scale
    scale = jnp.pad(scale, (0, cp - c)).reshape(1, cp)   # zero on padded channels
    shift = jnp.pad(shift, (0, cp - c)).reshape(1, cp)
    return scale, shift


def _expander_mask(key, cout, cin, expand_ratio):
    expand_size = max(cin // expand_ratio, 1)
    rows = []
    for k in jax.random.split(key, cout):
        idx = jax.random.permutation(k, cin)[:expand_size]
        rows.append(jnp.zeros((cin,), jnp.float32).at[idx].set(1.0))
    return jnp.stack(rows)                               # (cout, cin)


def _init_conv_weight(key, cout, cin, k):
    fan_in = cin * k * k
    bound = math.sqrt(6.0 / fan_in)
    w = jax.random.uniform(key, (cout, cin, k, k), jnp.float32, -bound, bound)
    w2 = jnp.transpose(w, (2, 3, 1, 0)).reshape(k * k * cin, cout)
    kp = _round_up(k * k * cin, 8)
    w2 = jnp.pad(w2, ((0, kp - k * k * cin), (0, _LANE - cout)))
    return w2.astype(jnp.bfloat16)


def _conv1x1_weight(key, cout, cin):
    bound = math.sqrt(6.0 / cin)
    w = jax.random.uniform(key, (cout, cin), jnp.float32, -bound, bound)
    w2 = jnp.pad(jnp.transpose(w), ((0, _LANE - cin), (0, _LANE - cout)))
    return w2.astype(jnp.bfloat16)


def _xconv_weight_1x1(key, cout, cin, expand_ratio=2):
    kw_, km_ = jax.random.split(key)
    bound = math.sqrt(6.0 / cin)
    w = jax.random.uniform(kw_, (cout, cin), jnp.float32, -bound, bound)
    w = w * _expander_mask(km_, cout, cin, expand_ratio)
    w2 = jnp.pad(jnp.transpose(w), ((0, _LANE - cin), (0, _LANE - cout)))
    return w2.astype(jnp.bfloat16)


def _xconv_weight_3x3(key, cout, cin, col_offset, expand_ratio=2):
    """(9, 128, 128) bf16; output columns live at [col_offset, col_offset+cout)."""
    kw_, km_ = jax.random.split(key)
    fan_in = cin * 9
    bound = math.sqrt(6.0 / fan_in)
    w = jax.random.uniform(kw_, (cout, cin, 3, 3), jnp.float32, -bound, bound)
    w = w * _expander_mask(km_, cout, cin, expand_ratio)[:, :, None, None]
    w4 = jnp.transpose(w, (2, 3, 1, 0))                  # (3, 3, cin, cout)
    w4 = jnp.pad(w4, ((0, 0), (0, 0), (0, _LANE - cin),
                      (col_offset, _LANE - col_offset - cout)))
    return w4.reshape(9, _LANE, _LANE).astype(jnp.bfloat16)


def build_params(key, in_channels, init_block_channels, channels, num_classes,
                 expand_ratio=2, final_spatial=7):
    keys = iter(jax.random.split(key, 64))
    nk = lambda: next(keys)

    params = {}
    arch = {'init_channels': init_block_channels, 'num_classes': num_classes,
            'final_spatial': final_spatial, 'stages': []}

    # PreResInitBlock: conv7x7 s2 p3 -> BN -> ReLU -> MaxPool3x3 s2 p1
    params['init_conv_w'] = _init_conv_weight(nk(), init_block_channels, in_channels, 7)
    params['init_bn_scale'], params['init_bn_shift'] = _bn_params(init_block_channels)

    pstages = []
    c_in = init_block_channels
    for si, stage_channels in enumerate(channels):
        sa = {'trans_cout': None, 'units': []}
        sp = {'trans': None, 'units': []}
        if si != 0:
            c_out = c_in // 2
            ts, tb = _bn_params(c_in)
            sp['trans'] = {'scale': ts, 'shift': tb,
                           'w': _conv1x1_weight(nk(), c_out, c_in)}
            sa['trans_cout'] = c_out
            c_in = c_out
        for c_out in stage_channels:
            inc = c_out - c_in
            mid = inc * 4                              # bn_size = 4
            s1, b1 = _bn_params(c_in)
            s2, b2 = _bn_params(mid)
            sp['units'].append({
                's1': s1, 'b1': b1,
                'w1': _xconv_weight_1x1(nk(), mid, c_in, expand_ratio),
                's2': s2, 'b2': b2,
                'w2': _xconv_weight_3x3(nk(), inc, mid, c_in, expand_ratio)})
            sa['units'].append((mid, inc))
            c_in = c_out
        arch['stages'].append(sa)
        pstages.append(sp)
    params['stages'] = pstages

    params['post_scale'], params['post_shift'] = _bn_params(c_in)

    # Linear head; 1/(H*W) of the global average pool folded into fc_w.
    bound = 1.0 / math.sqrt(c_in)
    fc_w = jax.random.uniform(nk(), (num_classes, c_in), jnp.float32, -bound, bound)
    fc_b = jax.random.uniform(nk(), (num_classes,), jnp.float32, -bound, bound)
    w = jnp.transpose(fc_w) / float(final_spatial * final_spatial)
    params['fc_w'] = jnp.pad(w, ((0, _LANE - c_in),
                                 (0, _LANE - num_classes))).astype(jnp.bfloat16)
    params['fc_b'] = jnp.pad(fc_b, (0, _LANE - num_classes)).reshape(1, _LANE)
    return params, arch


# ----------------------------------------------------------------------------
# Forward pass
# ----------------------------------------------------------------------------

def make_forward(arch):
    num_classes = arch['num_classes']
    final_spatial = arch['final_spatial']

    @jax.jit
    def forward(params, x_nchw):
        x = jnp.transpose(x_nchw, (0, 2, 3, 1)).astype(jnp.bfloat16)   # NCHW -> NHWC

        # ---- init block: conv7x7 s2 p3 (+ fused BN+ReLU epilogue) -> maxpool
        cols, (n, oh, ow) = _im2col(x, 7, 7, stride=2, padding=3)
        y = fused_matmul_postact(cols, params['init_conv_w'],
                                 params['init_bn_scale'], params['init_bn_shift'])
        y = y.reshape(n, oh, ow, _LANE)
        y = maxpool_3x3_s2_p1(y)
        h, w = y.shape[1], y.shape[2]
        x = embed_halo(y)                         # (n, (h+2)*(w+2), 128) bf16

        # ---- dense stages: each unit is one fused Pallas kernel
        for sa, sp in zip(arch['stages'], params['stages']):
            if sa['trans_cout'] is not None:
                t = sp['trans']
                p = (h + 2) * (w + 2)
                y = fused_preact_matmul(x.reshape(n * p, _LANE),
                                        t['scale'], t['shift'], t['w'])
                y = y.reshape(n, h + 2, w + 2, _LANE)[:, 1:h + 1, 1:w + 1, :]
                y = avgpool_2x2(y)
                h, w = h // 2, w // 2
                x = embed_halo(y)
            mask = halo_mask(h, w)
            for _unit_arch, up in zip(sa['units'], sp['units']):
                # dropout_rate = 0.0 -> Dropout is the identity
                x = dense_unit(x, mask, up['s1'], up['b1'], up['w1'],
                               up['s2'], up['b2'], up['w2'], hw=(h, w))

        # ---- post BN+ReLU + masked global avgpool + Linear (one fused kernel)
        assert h == final_spatial and w == final_spatial, (h, w, final_spatial)
        head_mask = halo_mask(h, w).reshape(1, (h + 2) * (w + 2), 1)
        logits = head_forward(x, head_mask, params['post_scale'], params['post_shift'],
                              params['fc_w'], params['fc_b'])
        return logits[:, :num_classes]

    return forward


# ----------------------------------------------------------------------------

if __name__ == "__main__":
    key = jax.random.PRNGKey(0)
    pkey, xkey = jax.random.split(key)

    # Small synthetic XDenseNet config (spatial flow: 56 -> 28 -> 14 -> 7 -> 1)
    in_channels = 3
    init_block_channels = 16
    channels = [[24, 32], [24, 32]]        # two stages, growth 8, 2 units each
    num_classes = 10

    params, arch = build_params(pkey, in_channels, init_block_channels, channels,
                                num_classes, expand_ratio=2, final_spatial=7)
    forward = make_forward(arch)

    x = jax.random.normal(xkey, (2, in_channels, 56, 56), dtype=jnp.float32)

    out = jax.block_until_ready(forward(params, x))

    assert out.shape == (2, num_classes), out.shape
    assert bool(jnp.all(jnp.isfinite(out)))
    print("KERNEL_OK")
</pallas_src>

<mosaic_0001>
module attributes {stable_mosaic.version = 11 : i64} {
  func.func @_matmul_postact_kernel(%arg0: i32, %arg1: memref<784x152xbf16, #tpu.memory_space<vmem>>, %arg2: memref<152x128xbf16, #tpu.memory_space<vmem>>, %arg3: memref<1x128xf32, #tpu.memory_space<vmem>>, %arg4: memref<1x128xf32, #tpu.memory_space<vmem>>, %arg5: memref<784x128xbf16, #tpu.memory_space<vmem>>) attributes {dimension_semantics = [#tpu.dimension_semantics<parallel>], iteration_bounds = array<i64: 2>, scalar_prefetch = 0 : i64, scratch_operands = 0 : i64, tpu.core_type = #tpu.core_type<tc>, window_params = [{transform_indices = @transform_0, window_bounds = array<i64: 784, 152>}, {pipeline_mode = #tpu.pipeline_mode<synchronous>, transform_indices = @transform_1, window_bounds = array<i64: 152, 128>}, {pipeline_mode = #tpu.pipeline_mode<synchronous>, transform_indices = @transform_2, window_bounds = array<i64: 1, 128>}, {pipeline_mode = #tpu.pipeline_mode<synchronous>, transform_indices = @transform_3, window_bounds = array<i64: 1, 128>}, {transform_indices = @transform_4, window_bounds = array<i64: 784, 128>}]} {
    %c0 = arith.constant 0 : index
    %c0_0 = arith.constant 0 : index
    %0 = vector.load %arg1[%c0, %c0_0] : memref<784x152xbf16, #tpu.memory_space<vmem>>, vector<784x152xbf16>
    %c0_1 = arith.constant 0 : index
    %c0_2 = arith.constant 0 : index
    %1 = vector.load %arg2[%c0_1, %c0_2] : memref<152x128xbf16, #tpu.memory_space<vmem>>, vector<152x128xbf16>
    %cst = arith.constant dense<0.000000e+00> : vector<784x128xf32>
    %2 = tpu.matmul %0, %1, %cst {dimension_numbers = #tpu.dot_dimension_numbers<[1], [0], [0], [1], [0, 0, 1, 1], [], []>} : vector<784x152xbf16>, vector<152x128xbf16>, vector<784x128xf32> -> vector<784x128xf32>
    %c0_3 = arith.constant 0 : index
    %c0_4 = arith.constant 0 : index
    %3 = vector.load %arg3[%c0_3, %c0_4] : memref<1x128xf32, #tpu.memory_space<vmem>>, vector<1x128xf32>
    %4 = vector.broadcast %3 : vector<1x128xf32> to vector<784x128xf32>
    %5 = arith.mulf %2, %4 : vector<784x128xf32>
    %c0_5 = arith.constant 0 : index
    %c0_6 = arith.constant 0 : index
    %6 = vector.load %arg4[%c0_5, %c0_6] : memref<1x128xf32, #tpu.memory_space<vmem>>, vector<1x128xf32>
    %7 = vector.broadcast %6 : vector<1x128xf32> to vector<784x128xf32>
    %8 = arith.addf %5, %7 : vector<784x128xf32>
    %cst_7 = arith.constant 0.000000e+00 : f32
    %9 = vector.broadcast %cst_7 : f32 to vector<784x128xf32>
    %10 = arith.maximumf %8, %9 : vector<784x128xf32>
    %11 = arith.truncf %10 : vector<784x128xf32> to vector<784x128xbf16>
    %c0_8 = arith.constant 0 : index
    %c0_9 = arith.constant 0 : index
    %12 = vector.load %arg5[%c0_8, %c0_9] : memref<784x128xbf16, #tpu.memory_space<vmem>>, vector<784x128xbf16>
    tpu.vector_store %arg5[%c0_8, %c0_9], %11 {strides = array<i32>} : memref<784x128xbf16, #tpu.memory_space<vmem>>, vector<784x128xbf16>,
    return
  }
  func.func @transform_0(%arg0: i32) -> (i32, i32) {
    %c0_i32 = arith.constant 0 : i32
    %c0_i32_0 = arith.constant 0 : i32
    return %arg0, %c0_i32 : i32, i32
  }
  func.func @transform_1(%arg0: i32) -> (i32, i32) {
    %c0_i32 = arith.constant 0 : i32
    %c0_i32_0 = arith.constant 0 : i32
    %c0_i32_1 = arith.constant 0 : i32
    return %c0_i32, %c0_i32_0 : i32, i32
  }
  func.func @transform_2(%arg0: i32) -> (i32, i32) {
    %c0_i32 = arith.constant 0 : i32
    %c0_i32_0 = arith.constant 0 : i32
    %c0_i32_1 = arith.constant 0 : i32
    return %c0_i32, %c0_i32_0 : i32, i32
  }
  func.func @transform_3(%arg0: i32) -> (i32, i32) {
    %c0_i32 = arith.constant 0 : i32
    %c0_i32_0 = arith.constant 0 : i32
    %c0_i32_1 = arith.constant 0 : i32
    return %c0_i32, %c0_i32_0 : i32, i32
  }
  func.func @transform_4(%arg0: i32) -> (i32, i32) {
    %c0_i32 = arith.constant 0 : i32
    %c0_i32_0 = arith.constant 0 : i32
    return %arg0, %c0_i32 : i32, i32
  }
}

module attributes {stable_mosaic.version = 11 : i64} {
  func.func @kernel(%arg0: i32, %arg1: memref<1x256x128xbf16, #tpu.memory_space<vmem>>, %arg2: memref<256x1xf32, #tpu.memory_space<vmem>>, %arg3: memref<1x128xf32, #tpu.memory_space<vmem>>, %arg4: memref<1x128xf32, #tpu.memory_space<vmem>>, %arg5: memref<128x128xbf16, #tpu.memory_space<vmem>>, %arg6: memref<1x128xf32, #tpu.memory_space<vmem>>, %arg7: memref<1x128xf32, #tpu.memory_space<vmem>>, %arg8: memref<9x128x128xbf16, #tpu.memory_space<vmem>>, %arg9: memref<1x256x128xbf16, #tpu.memory_space<vmem>>, %arg10: memref<297x128xf32, #tpu.memory_space<vmem>>) attributes {dimension_semantics = [#tpu.dimension_semantics<parallel>], iteration_bounds = array<i64: 2>, scalar_prefetch = 0 : i64, scratch_operands = 1 : i64, tpu.core_type = #tpu.core_type<tc>, window_params = [{transform_indices = @transform_0, window_bounds = array<i64: 1, 256, 128>}, {pipeline_mode = #tpu.pipeline_mode<synchronous>, transform_indices = @transform_1, window_bounds = array<i64: 256, 1>}, {pipeline_mode = #tpu.pipeline_mode<synchronous>, transform_indices = @transform_2, window_bounds = array<i64: 1, 128>}, {pipeline_mode = #tpu.pipeline_mode<synchronous>, transform_indices = @transform_3, window_bounds = array<i64: 1, 128>}, {pipeline_mode = #tpu.pipeline_mode<synchronous>, transform_indices = @transform_4, window_bounds = array<i64: 128, 128>}, {pipeline_mode = #tpu.pipeline_mode<synchronous>, transform_indices = @transform_5, window_bounds = array<i64: 1, 128>}, {pipeline_mode = #tpu.pipeline_mode<synchronous>, transform_indices = @transform_6, window_bounds = array<i64: 1, 128>}, {pipeline_mode = #tpu.pipeline_mode<synchronous>, transform_indices = @transform_7, window_bounds = array<i64: 9, 128, 128>}, {transform_indices = @transform_8, window_bounds = array<i64: 1, 256, 128>}]} {
    %c0 = arith.constant 0 : index
    %c0_0 = arith.constant 0 : index
    %c0_1 = arith.constant 0 : index
    %0 = vector.load %arg1[%c0, %c0_0, %c0_1] : memref<1x256x128xbf16, #tpu.memory_space<vmem>>, vector<1x256x128xbf16>
    %1 = vector.shape_cast %0 : vector<1x256x128xbf16> to vector<256x128xbf16>
    %c0_2 = arith.constant 0 : index
    %c0_3 = arith.constant 0 : index
    %2 = vector.load %arg2[%c0_2, %c0_3] : memref<256x1xf32, #tpu.memory_space<vmem>>, vector<256x1xf32>
    %3 = arith.extf %1 : vector<256x128xbf16> to vector<256x128xf32>
    %c0_4 = arith.constant 0 : index
    %c0_5 = arith.constant 0 : index
    %4 = vector.load %arg3[%c0_4, %c0_5] : memref<1x128xf32, #tpu.memory_space<vmem>>, vector<1x128xf32>
    %5 = vector.broadcast %4 : vector<1x128xf32> to vector<256x128xf32>
    %6 = arith.mulf %3, %5 : vector<256x128xf32>
    %c0_6 = arith.constant 0 : index
    %c0_7 = arith.constant 0 : index
    %7 = vector.load %arg4[%c0_6, %c0_7] : memref<1x128xf32, #tpu.memory_space<vmem>>, vector<1x128xf32>
    %8 = vector.broadcast %7 : vector<1x128xf32> to vector<256x128xf32>
    %9 = arith.addf %6, %8 : vector<256x128xf32>
    %cst = arith.constant 0.000000e+00 : f32
    %10 = vector.broadcast %cst : f32 to vector<256x128xf32>
    %11 = arith.maximumf %9, %10 : vector<256x128xf32>
    %12 = arith.truncf %11 : vector<256x128xf32> to vector<256x128xbf16>
    %c0_8 = arith.constant 0 : index
    %c0_9 = arith.constant 0 : index
    %13 = vector.load %arg5[%c0_8, %c0_9] : memref<128x128xbf16, #tpu.memory_space<vmem>>, vector<128x128xbf16>
    %cst_10 = arith.constant dense<0.000000e+00> : vector<256x128xf32>
    %14 = tpu.matmul %12, %13, %cst_10 {dimension_numbers = #tpu.dot_dimension_numbers<[1], [0], [0], [1], [0, 0, 1, 1], [], []>} : vector<256x128xbf16>, vector<128x128xbf16>, vector<256x128xf32> -> vector<256x128xf32>
    %c0_11 = arith.constant 0 : index
    %c0_12 = arith.constant 0 : index
    %15 = vector.load %arg6[%c0_11, %c0_12] : memref<1x128xf32, #tpu.memory_space<vmem>>, vector<1x128xf32>
    %16 = vector.broadcast %15 : vector<1x128xf32> to vector<256x128xf32>
    %17 = arith.mulf %14, %16 : vector<256x128xf32>
    %c0_13 = arith.constant 0 : index
    %c0_14 = arith.constant 0 : index
    %18 = vector.load %arg7[%c0_13, %c0_14] : memref<1x128xf32, #tpu.memory_space<vmem>>, vector<1x128xf32>
    %19 = vector.broadcast %18 : vector<1x128xf32> to vector<256x128xf32>
    %20 = arith.addf %17, %19 : vector<256x128xf32>
    %cst_15 = arith.constant 0.000000e+00 : f32
    %21 = vector.broadcast %cst_15 : f32 to vector<256x128xf32>
    %22 = arith.maximumf %20, %21 : vector<256x128xf32>
    %23 = vector.broadcast %2 : vector<256x1xf32> to vector<256x128xf32>
    %24 = arith.mulf %22, %23 : vector<256x128xf32>
    %cst_16 = arith.constant 0.000000e+00 : f32
    %25 = vector.broadcast %cst_16 : f32 to vector<297x128xf32>
    %c0_17 = arith.constant 0 : index
    %c0_18 = arith.constant 0 : index
    %26 = vector.load %arg10[%c0_17, %c0_18] : memref<297x128xf32, #tpu.memory_space<vmem>>, vector<297x128xf32>
    tpu.vector_store %arg10[%c0_17, %c0_18], %25 {strides = array<i32>} : memref<297x128xf32, #tpu.memory_space<vmem>>, vector<297x128xf32>,
    %c24 = arith.constant 24 : index
    %c0_19 = arith.constant 0 : index
    %27 = vector.load %arg10[%c24, %c0_19] : memref<297x128xf32, #tpu.memory_space<vmem>>, vector<256x128xf32>
    tpu.vector_store %arg10[%c24, %c0_19], %24 {strides = array<i32>} : memref<297x128xf32, #tpu.memory_space<vmem>>, vector<256x128xf32>,
    %cst_20 = arith.constant 0.000000e+00 : f32
    %28 = vector.broadcast %cst_20 : f32 to vector<256x128xf32>
    %c7 = arith.constant 7 : index
    %c0_21 = arith.constant 0 : index
    %29 = vector.load %arg10[%c7, %c0_21] : memref<297x128xf32, #tpu.memory_space<vmem>>, vector<256x128xf32>
    %30 = arith.truncf %29 : vector<256x128xf32> to vector<256x128xbf16>
    %c0_22 = arith.constant 0 : index
    %c0_23 = arith.constant 0 : index
    %c0_24 = arith.constant 0 : index
    %31 = vector.load %arg8[%c0_22, %c0_23, %c0_24] : memref<9x128x128xbf16, #tpu.memory_space<vmem>>, vector<1x128x128xbf16>
    %32 = vector.shape_cast %31 : vector<1x128x128xbf16> to vector<128x128xbf16>
    %cst_25 = arith.constant dense<0.000000e+00> : vector<256x128xf32>
    %33 = tpu.matmul %30, %32, %cst_25 {dimension_numbers = #tpu.dot_dimension_numbers<[1], [0], [0], [1], [0, 0, 1, 1], [], []>} : vector<256x128xbf16>, vector<128x128xbf16>, vector<256x128xf32> -> vector<256x128xf32>
    %34 = arith.addf %28, %33 : vector<256x128xf32>
    %c8 = arith.constant 8 : index
    %c0_26 = arith.constant 0 : index
    %35 = vector.load %arg10[%c8, %c0_26] : memref<297x128xf32, #tpu.memory_space<vmem>>, vector<256x128xf32>
    %36 = arith.truncf %35 : vector<256x128xf32> to vector<256x128xbf16>
    %c1 = arith.constant 1 : index
    %c0_27 = arith.constant 0 : index
    %c0_28 = arith.constant 0 : index
    %37 = vector.load %arg8[%c1, %c0_27, %c0_28] : memref<9x128x128xbf16, #tpu.memory_space<vmem>>, vector<1x128x128xbf16>
    %38 = vector.shape_cast %37 : vector<1x128x128xbf16> to vector<128x128xbf16>
    %cst_29 = arith.constant dense<0.000000e+00> : vector<256x128xf32>
    %39 = tpu.matmul %36, %38, %cst_29 {dimension_numbers = #tpu.dot_dimension_numbers<[1], [0], [0], [1], [0, 0, 1, 1], [], []>} : vector<256x128xbf16>, vector<128x128xbf16>, vector<256x128xf32> -> vector<256x128xf32>
    %40 = arith.addf %34, %39 : vector<256x128xf32>
    %c9 = arith.constant 9 : index
    %c0_30 = arith.constant 0 : index
    %41 = vector.load %arg10[%c9, %c0_30] : memref<297x128xf32, #tpu.memory_space<vmem>>, vector<256x128xf32>
    %42 = arith.truncf %41 : vector<256x128xf32> to vector<256x128xbf16>
    %c2 = arith.constant 2 : index
    %c0_31 = arith.constant 0 : index
    %c0_32 = arith.constant 0 : index
    %43 = vector.load %arg8[%c2, %c0_31, %c0_32] : memref<9x128x128xbf16, #tpu.memory_space<vmem>>, vector<1x128x128xbf16>
    %44 = vector.shape_cast %43 : vector<1x128x128xbf16> to vector<128x128xbf16>
    %cst_33 = arith.constant dense<0.000000e+00> : vector<256x128xf32>
    %45 = tpu.matmul %42, %44, %cst_33 {dimension_numbers = #tpu.dot_dimension_numbers<[1], [0], [0], [1], [0, 0, 1, 1], [], []>} : vector<256x128xbf16>, vector<128x128xbf16>, vector<256x128xf32> -> vector<256x128xf32>
    %46 = arith.addf %40, %45 : vector<256x128xf32>
    %c23 = arith.constant 23 : index
    %c0_34 = arith.constant 0 : index
    %47 = vector.load %arg10[%c23, %c0_34] : memref<297x128xf32, #tpu.memory_space<vmem>>, vector<256x128xf32>
    %48 = arith.truncf %47 : vector<256x128xf32> to vector<256x128xbf16>
    %c3 = arith.constant 3 : index
    %c0_35 = arith.constant 0 : index
    %c0_36 = arith.constant 0 : index
    %49 = vector.load %arg8[%c3, %c0_35, %c0_36] : memref<9x128x128xbf16, #tpu.memory_space<vmem>>, vector<1x128x128xbf16>
    %50 = vector.shape_cast %49 : vector<1x128x128xbf16> to vector<128x128xbf16>
    %cst_37 = arith.constant dense<0.000000e+00> : vector<256x128xf32>
    %51 = tpu.matmul %48, %50, %cst_37 {dimension_numbers = #tpu.dot_dimension_numbers<[1], [0], [0], [1], [0, 0, 1, 1], [], []>} : vector<256x128xbf16>, vector<128x128xbf16>, vector<256x128xf32> -> vector<256x128xf32>
    %52 = arith.addf %46, %51 : vector<256x128xf32>
    %c24_38 = arith.constant 24 : index
    %c0_39 = arith.constant 0 : index
    %53 = vector.load %arg10[%c24_38, %c0_39] : memref<297x128xf32, #tpu.memory_space<vmem>>, vector<256x128xf32>
    %54 = arith.truncf %53 : vector<256x128xf32> to vector<256x128xbf16>
    %c4 = arith.constant 4 : index
    %c0_40 = arith.constant 0 : index
    %c0_41 = arith.constant 0 : index
    %55 = vector.load %arg8[%c4, %c0_40, %c0_41] : memref<9x128x128xbf16, #tpu.memory_space<vmem>>, vector<1x128x128xbf16>
    %56 = vector.shape_cast %55 : vector<1x128x128xbf16> to vector<128x128xbf16>
    %cst_42 = arith.constant dense<0.000000e+00> : vector<256x128xf32>
    %57 = tpu.matmul %54, %56, %cst_42 {dimension_numbers = #tpu.dot_dimension_numbers<[1], [0], [0], [1], [0, 0, 1, 1], [], []>} : vector<256x128xbf16>, vector<128x128xbf16>, vector<256x128xf32> -> vector<256x128xf32>
    %58 = arith.addf %52, %57 : vector<256x128xf32>
    %c25 = arith.constant 25 : index
    %c0_43 = arith.constant 0 : index
    %59 = vector.load %arg10[%c25, %c0_43] : memref<297x128xf32, #tpu.memory_space<vmem>>, vector<256x128xf32>
    %60 = arith.truncf %59 : vector<256x128xf32> to vector<256x128xbf16>
    %c5 = arith.constant 5 : index
    %c0_44 = arith.constant 0 : index
    %c0_45 = arith.constant 0 : index
    %61 = vector.load %arg8[%c5, %c0_44, %c0_45] : memref<9x128x128xbf16, #tpu.memory_space<vmem>>, vector<1x128x128xbf16>
    %62 = vector.shape_cast %61 : vector<1x128x128xbf16> to vector<128x128xbf16>
    %cst_46 = arith.constant dense<0.000000e+00> : vector<256x128xf32>
    %63 = tpu.matmul %60, %62, %cst_46 {dimension_numbers = #tpu.dot_dimension_numbers<[1], [0], [0], [1], [0, 0, 1, 1], [], []>} : vector<256x128xbf16>, vector<128x128xbf16>, vector<256x128xf32> -> vector<256x128xf32>
    %64 = arith.addf %58, %63 : vector<256x128xf32>
    %c39 = arith.constant 39 : index
    %c0_47 = arith.constant 0 : index
    %65 = vector.load %arg10[%c39, %c0_47] : memref<297x128xf32, #tpu.memory_space<vmem>>, vector<256x128xf32>
    %66 = arith.truncf %65 : vector<256x128xf32> to vector<256x128xbf16>
    %c6 = arith.constant 6 : index
    %c0_48 = arith.constant 0 : index
    %c0_49 = arith.constant 0 : index
    %67 = vector.load %arg8[%c6, %c0_48, %c0_49] : memref<9x128x128xbf16, #tpu.memory_space<vmem>>, vector<1x128x128xbf16>
    %68 = vector.shape_cast %67 : vector<1x128x128xbf16> to vector<128x128xbf16>
    %cst_50 = arith.constant dense<0.000000e+00> : vector<256x128xf32>
    %69 = tpu.matmul %66, %68, %cst_50 {dimension_numbers = #tpu.dot_dimension_numbers<[1], [0], [0], [1], [0, 0, 1, 1], [], []>} : vector<256x128xbf16>, vector<128x128xbf16>, vector<256x128xf32> -> vector<256x128xf32>
    %70 = arith.addf %64, %69 : vector<256x128xf32>
    %c40 = arith.constant 40 : index
    %c0_51 = arith.constant 0 : index
    %71 = vector.load %arg10[%c40, %c0_51] : memref<297x128xf32, #tpu.memory_space<vmem>>, vector<256x128xf32>
    %72 = arith.truncf %71 : vector<256x128xf32> to vector<256x128xbf16>
    %c7_52 = arith.constant 7 : index
    %c0_53 = arith.constant 0 : index
    %c0_54 = arith.constant 0 : index
    %73 = vector.load %arg8[%c7_52, %c0_53, %c0_54] : memref<9x128x128xbf16, #tpu.memory_space<vmem>>, vector<1x128x128xbf16>
    %74 = vector.shape_cast %73 : vector<1x128x128xbf16> to vector<128x128xbf16>
    %cst_55 = arith.constant dense<0.000000e+00> : vector<256x128xf32>
    %75 = tpu.matmul %72, %74, %cst_55 {dimension_numbers = #tpu.dot_dimension_numbers<[1], [0], [0], [1], [0, 0, 1, 1], [], []>} : vector<256x128xbf16>, vector<128x128xbf16>, vector<256x128xf32> -> vector<256x128xf32>
    %76 = arith.addf %70, %75 : vector<256x128xf32>
    %c41 = arith.constant 41 : index
    %c0_56 = arith.constant 0 : index
    %77 = vector.load %arg10[%c41, %c0_56] : memref<297x128xf32, #tpu.memory_space<vmem>>, vector<256x128xf32>
    %78 = arith.truncf %77 : vector<256x128xf32> to vector<256x128xbf16>
    %c8_57 = arith.constant 8 : index
    %c0_58 = arith.constant 0 : index
    %c0_59 = arith.constant 0 : index
    %79 = vector.load %arg8[%c8_57, %c0_58, %c0_59] : memref<9x128x128xbf16, #tpu.memory_space<vmem>>, vector<1x128x128xbf16>
    %80 = vector.shape_cast %79 : vector<1x128x128xbf16> to vector<128x128xbf16>
    %cst_60 = arith.constant dense<0.000000e+00> : vector<256x128xf32>
    %81 = tpu.matmul %78, %80, %cst_60 {dimension_numbers = #tpu.dot_dimension_numbers<[1], [0], [0], [1], [0, 0, 1, 1], [], []>} : vector<256x128xbf16>, vector<128x128xbf16>, vector<256x128xf32> -> vector<256x128xf32>
    %82 = arith.addf %76, %81 : vector<256x128xf32>
    %83 = arith.extf %1 : vector<256x128xbf16> to vector<256x128xf32>
    %84 = vector.broadcast %2 : vector<256x1xf32> to vector<256x128xf32>
    %85 = arith.mulf %82, %84 : vector<256x128xf32>
    %86 = arith.addf %83, %85 : vector<256x128xf32>
    %87 = arith.truncf %86 : vector<256x128xf32> to vector<256x128xbf16>
    %c0_61 = arith.constant 0 : index
    %c0_62 = arith.constant 0 : index
    %c0_63 = arith.constant 0 : index
    %88 = vector.load %arg9[%c0_61, %c0_62, %c0_63] : memref<1x256x128xbf16, #tpu.memory_space<vmem>>, vector<1x256x128xbf16>
    %89 = vector.shape_cast %88 : vector<1x256x128xbf16> to vector<256x128xbf16>
    %90 = vector.shape_cast %87 : vector<256x128xbf16> to vector<1x256x128xbf16>
    tpu.vector_store %arg9[%c0_61, %c0_62, %c0_63], %90 {strides = array<i32>} : memref<1x256x128xbf16, #tpu.memory_space<vmem>>, vector<1x256x128xbf16>,
    return
  }
  func.func @transform_0(%arg0: i32) -> (i32, i32, i32) {
    %c0_i32 = arith.constant 0 : i32
    %c0_i32_0 = arith.constant 0 : i32
    %c0_i32_1 = arith.constant 0 : i32
    return %arg0, %c0_i32, %c0_i32_0 : i32, i32, i32
  }
  func.func @transform_1(%arg0: i32) -> (i32, i32) {
    %c0_i32 = arith.constant 0 : i32
    %c0_i32_0 = arith.constant 0 : i32
    %c0_i32_1 = arith.constant 0 : i32
    return %c0_i32, %c0_i32_0 : i32, i32
  }
  func.func @transform_2(%arg0: i32) -> (i32, i32) {
    %c0_i32 = arith.constant 0 : i32
    %c0_i32_0 = arith.constant 0 : i32
    %c0_i32_1 = arith.constant 0 : i32
    return %c0_i32, %c0_i32_0 : i32, i32
  }
  func.func @transform_3(%arg0: i32) -> (i32, i32) {
    %c0_i32 = arith.constant 0 : i32
    %c0_i32_0 = arith.constant 0 : i32
    %c0_i32_1 = arith.constant 0 : i32
    return %c0_i32, %c0_i32_0 : i32, i32
  }
  func.func @transform_4(%arg0: i32) -> (i32, i32) {
    %c0_i32 = arith.constant 0 : i32
    %c0_i32_0 = arith.constant 0 : i32
    %c0_i32_1 = arith.constant 0 : i32
    return %c0_i32, %c0_i32_0 : i32, i32
  }
  func.func @transform_5(%arg0: i32) -> (i32, i32) {
    %c0_i32 = arith.constant 0 : i32
    %c0_i32_0 = arith.constant 0 : i32
    %c0_i32_1 = arith.constant 0 : i32
    return %c0_i32, %c0_i32_0 : i32, i32
  }
  func.func @transform_6(%arg0: i32) -> (i32, i32) {
    %c0_i32 = arith.constant 0 : i32
    %c0_i32_0 = arith.constant 0 : i32
    %c0_i32_1 = arith.constant 0 : i32
    return %c0_i32, %c0_i32_0 : i32, i32
  }
  func.func @transform_7(%arg0: i32) -> (i32, i32, i32) {
    %c0_i32 = arith.constant 0 : i32
    %c0_i32_0 = arith.constant 0 : i32
    %c0_i32_1 = arith.constant 0 : i32
    %c0_i32_2 = arith.constant 0 : i32
    return %c0_i32, %c0_i32_0, %c0_i32_1 : i32, i32, i32
  }
  func.func @transform_8(%arg0: i32) -> (i32, i32, i32) {
    %c0_i32 = arith.constant 0 : i32
    %c0_i32_0 = arith.constant 0 : i32
    %c0_i32_1 = arith.constant 0 : i32
    return %arg0, %c0_i32, %c0_i32_0 : i32, i32, i32
  }
}

module attributes {stable_mosaic.version = 11 : i64} {
  func.func @_preact_matmul_kernel(%arg0: i32, %arg1: memref<256x128xbf16, #tpu.memory_space<vmem>>, %arg2: memref<1x128xf32, #tpu.memory_space<vmem>>, %arg3: memref<1x128xf32, #tpu.memory_space<vmem>>, %arg4: memref<128x128xbf16, #tpu.memory_space<vmem>>, %arg5: memref<256x128xbf16, #tpu.memory_space<vmem>>) attributes {dimension_semantics = [#tpu.dimension_semantics<parallel>], iteration_bounds = array<i64: 2>, scalar_prefetch = 0 : i64, scratch_operands = 0 : i64, tpu.core_type = #tpu.core_type<tc>, window_params = [{transform_indices = @transform_0, window_bounds = array<i64: 256, 128>}, {pipeline_mode = #tpu.pipeline_mode<synchronous>, transform_indices = @transform_1, window_bounds = array<i64: 1, 128>}, {pipeline_mode = #tpu.pipeline_mode<synchronous>, transform_indices = @transform_2, window_bounds = array<i64: 1, 128>}, {pipeline_mode = #tpu.pipeline_mode<synchronous>, transform_indices = @transform_3, window_bounds = array<i64: 128, 128>}, {transform_indices = @transform_4, window_bounds = array<i64: 256, 128>}]} {
    %c0 = arith.constant 0 : index
    %c0_0 = arith.constant 0 : index
    %0 = vector.load %arg1[%c0, %c0_0] : memref<256x128xbf16, #tpu.memory_space<vmem>>, vector<256x128xbf16>
    %1 = arith.extf %0 : vector<256x128xbf16> to vector<256x128xf32>
    %c0_1 = arith.constant 0 : index
    %c0_2 = arith.constant 0 : index
    %2 = vector.load %arg2[%c0_1, %c0_2] : memref<1x128xf32, #tpu.memory_space<vmem>>, vector<1x128xf32>
    %3 = vector.broadcast %2 : vector<1x128xf32> to vector<256x128xf32>
    %4 = arith.mulf %1, %3 : vector<256x128xf32>
    %c0_3 = arith.constant 0 : index
    %c0_4 = arith.constant 0 : index
    %5 = vector.load %arg3[%c0_3, %c0_4] : memref<1x128xf32, #tpu.memory_space<vmem>>, vector<1x128xf32>
    %6 = vector.broadcast %5 : vector<1x128xf32> to vector<256x128xf32>
    %7 = arith.addf %4, %6 : vector<256x128xf32>
    %cst = arith.constant 0.000000e+00 : f32
    %8 = vector.broadcast %cst : f32 to vector<256x128xf32>
    %9 = arith.maximumf %7, %8 : vector<256x128xf32>
    %10 = arith.truncf %9 : vector<256x128xf32> to vector<256x128xbf16>
    %c0_5 = arith.constant 0 : index
    %c0_6 = arith.constant 0 : index
    %11 = vector.load %arg4[%c0_5, %c0_6] : memref<128x128xbf16, #tpu.memory_space<vmem>>, vector<128x128xbf16>
    %cst_7 = arith.constant dense<0.000000e+00> : vector<256x128xf32>
    %12 = tpu.matmul %10, %11, %cst_7 {dimension_numbers = #tpu.dot_dimension_numbers<[1], [0], [0], [1], [0, 0, 1, 1], [], []>} : vector<256x128xbf16>, vector<128x128xbf16>, vector<256x128xf32> -> vector<256x128xf32>
    %13 = arith.truncf %12 : vector<256x128xf32> to vector<256x128xbf16>
    %c0_8 = arith.constant 0 : index
    %c0_9 = arith.constant 0 : index
    %14 = vector.load %arg5[%c0_8, %c0_9] : memref<256x128xbf16, #tpu.memory_space<vmem>>, vector<256x128xbf16>
    tpu.vector_store %arg5[%c0_8, %c0_9], %13 {strides = array<i32>} : memref<256x128xbf16, #tpu.memory_space<vmem>>, vector<256x128xbf16>,
    return
  }
  func.func @transform_0(%arg0: i32) -> (i32, i32) {
    %c0_i32 = arith.constant 0 : i32
    %c0_i32_0 = arith.constant 0 : i32
    return %arg0, %c0_i32 : i32, i32
  }
  func.func @transform_1(%arg0: i32) -> (i32, i32) {
    %c0_i32 = arith.constant 0 : i32
    %c0_i32_0 = arith.constant 0 : i32
    %c0_i32_1 = arith.constant 0 : i32
    return %c0_i32, %c0_i32_0 : i32, i32
  }
  func.func @transform_2(%arg0: i32) -> (i32, i32) {
    %c0_i32 = arith.constant 0 : i32
    %c0_i32_0 = arith.constant 0 : i32
    %c0_i32_1 = arith.constant 0 : i32
    return %c0_i32, %c0_i32_0 : i32, i32
  }
  func.func @transform_3(%arg0: i32) -> (i32, i32) {
    %c0_i32 = arith.constant 0 : i32
    %c0_i32_0 = arith.constant 0 : i32
    %c0_i32_1 = arith.constant 0 : i32
    return %c0_i32, %c0_i32_0 : i32, i32
  }
  func.func @transform_4(%arg0: i32) -> (i32, i32) {
    %c0_i32 = arith.constant 0 : i32
    %c0_i32_0 = arith.constant 0 : i32
    return %arg0, %c0_i32 : i32, i32
  }
}

module attributes {stable_mosaic.version = 11 : i64} {
  func.func @_head_kernel(%arg0: memref<2x81x128xbf16, #tpu.memory_space<vmem>>, %arg1: memref<1x81x1xf32, #tpu.memory_space<vmem>>, %arg2: memref<1x128xf32, #tpu.memory_space<vmem>>, %arg3: memref<1x128xf32, #tpu.memory_space<vmem>>, %arg4: memref<128x128xbf16, #tpu.memory_space<vmem>>, %arg5: memref<1x128xf32, #tpu.memory_space<vmem>>, %arg6: memref<2x128xf32, #tpu.memory_space<vmem>>) attributes {dimension_semantics = [], scalar_prefetch = 0 : i64, scratch_operands = 0 : i64, tpu.core_type = #tpu.core_type<tc>} {
    %c0 = arith.constant 0 : index
    %c0_0 = arith.constant 0 : index
    %c0_1 = arith.constant 0 : index
    %0 = vector.load %arg0[%c0, %c0_0, %c0_1] : memref<2x81x128xbf16, #tpu.memory_space<vmem>>, vector<2x81x128xbf16>
    %1 = arith.extf %0 : vector<2x81x128xbf16> to vector<2x81x128xf32>
    %c0_2 = arith.constant 0 : index
    %c0_3 = arith.constant 0 : index
    %2 = vector.load %arg2[%c0_2, %c0_3] : memref<1x128xf32, #tpu.memory_space<vmem>>, vector<1x128xf32>
    %3 = vector.shape_cast %2 : vector<1x128xf32> to vector<1x1x128xf32>
    %4 = vector.broadcast %3 : vector<1x1x128xf32> to vector<2x81x128xf32>
    %5 = arith.mulf %1, %4 : vector<2x81x128xf32>
    %c0_4 = arith.constant 0 : index
    %c0_5 = arith.constant 0 : index
    %6 = vector.load %arg3[%c0_4, %c0_5] : memref<1x128xf32, #tpu.memory_space<vmem>>, vector<1x128xf32>
    %7 = vector.shape_cast %6 : vector<1x128xf32> to vector<1x1x128xf32>
    %8 = vector.broadcast %7 : vector<1x1x128xf32> to vector<2x81x128xf32>
    %9 = arith.addf %5, %8 : vector<2x81x128xf32>
    %cst = arith.constant 0.000000e+00 : f32
    %10 = vector.broadcast %cst : f32 to vector<2x81x128xf32>
    %11 = arith.maximumf %9, %10 : vector<2x81x128xf32>
    %c0_6 = arith.constant 0 : index
    %c0_7 = arith.constant 0 : index
    %c0_8 = arith.constant 0 : index
    %12 = vector.load %arg1[%c0_6, %c0_7, %c0_8] : memref<1x81x1xf32, #tpu.memory_space<vmem>>, vector<1x81x1xf32>
    %13 = vector.broadcast %12 : vector<1x81x1xf32> to vector<2x81x128xf32>
    %14 = arith.mulf %11, %13 : vector<2x81x128xf32>
    %cst_9 = arith.constant dense<0.000000e+00> : vector<2x128xf32>
    %15 = vector.multi_reduction <add>, %14, %cst_9 [1] : vector<2x81x128xf32> to vector<2x128xf32>
    %16 = arith.truncf %15 : vector<2x128xf32> to vector<2x128xbf16>
    %c0_10 = arith.constant 0 : index
    %c0_11 = arith.constant 0 : index
    %17 = vector.load %arg4[%c0_10, %c0_11] : memref<128x128xbf16, #tpu.memory_space<vmem>>, vector<128x128xbf16>
    %cst_12 = arith.constant dense<0.000000e+00> : vector<2x128xf32>
    %18 = tpu.matmul %16, %17, %cst_12 {dimension_numbers = #tpu.dot_dimension_numbers<[1], [0], [0], [1], [0, 0, 1, 1], [], []>} : vector<2x128xbf16>, vector<128x128xbf16>, vector<2x128xf32> -> vector<2x128xf32>
    %c0_13 = arith.constant 0 : index
    %c0_14 = arith.constant 0 : index
    %19 = vector.load %arg5[%c0_13, %c0_14] : memref<1x128xf32, #tpu.memory_space<vmem>>, vector<1x128xf32>
    %20 = vector.broadcast %19 : vector<1x128xf32> to vector<2x128xf32>
    %21 = arith.addf %18, %20 : vector<2x128xf32>
    %c0_15 = arith.constant 0 : index
    %c0_16 = arith.constant 0 : index
    %22 = vector.load %arg6[%c0_15, %c0_16] : memref<2x128xf32, #tpu.memory_space<vmem>>, vector<2x128xf32>
    tpu.vector_store %arg6[%c0_15, %c0_16], %21 {strides = array<i32>} : memref<2x128xf32, #tpu.memory_space<vmem>>, vector<2x128xf32>,
    return
  }
}

module attributes {stable_mosaic.version = 11 : i64} {
  func.func @kernel(%arg0: i32, %arg1: memref<1x81x128xbf16, #tpu.memory_space<vmem>>, %arg2: memref<81x1xf32, #tpu.memory_space<vmem>>, %arg3: memref<1x128xf32, #tpu.memory_space<vmem>>, %arg4: memref<1x128xf32, #tpu.memory_space<vmem>>, %arg5: memref<128x128xbf16, #tpu.memory_space<vmem>>, %arg6: memref<1x128xf32, #tpu.memory_space<vmem>>, %arg7: memref<1x128xf32, #tpu.memory_space<vmem>>, %arg8: memref<9x128x128xbf16, #tpu.memory_space<vmem>>, %arg9: memref<1x81x128xbf16, #tpu.memory_space<vmem>>, %arg10: memref<107x128xf32, #tpu.memory_space<vmem>>) attributes {dimension_semantics = [#tpu.dimension_semantics<parallel>], iteration_bounds = array<i64: 2>, scalar_prefetch = 0 : i64, scratch_operands = 1 : i64, tpu.core_type = #tpu.core_type<tc>, window_params = [{transform_indices = @transform_0, window_bounds = array<i64: 1, 81, 128>}, {pipeline_mode = #tpu.pipeline_mode<synchronous>, transform_indices = @transform_1, window_bounds = array<i64: 81, 1>}, {pipeline_mode = #tpu.pipeline_mode<synchronous>, transform_indices = @transform_2, window_bounds = array<i64: 1, 128>}, {pipeline_mode = #tpu.pipeline_mode<synchronous>, transform_indices = @transform_3, window_bounds = array<i64: 1, 128>}, {pipeline_mode = #tpu.pipeline_mode<synchronous>, transform_indices = @transform_4, window_bounds = array<i64: 128, 128>}, {pipeline_mode = #tpu.pipeline_mode<synchronous>, transform_indices = @transform_5, window_bounds = array<i64: 1, 128>}, {pipeline_mode = #tpu.pipeline_mode<synchronous>, transform_indices = @transform_6, window_bounds = array<i64: 1, 128>}, {pipeline_mode = #tpu.pipeline_mode<synchronous>, transform_indices = @transform_7, window_bounds = array<i64: 9, 128, 128>}, {transform_indices = @transform_8, window_bounds = array<i64: 1, 81, 128>}]} {
    %c0 = arith.constant 0 : index
    %c0_0 = arith.constant 0 : index
    %c0_1 = arith.constant 0 : index
    %0 = vector.load %arg1[%c0, %c0_0, %c0_1] : memref<1x81x128xbf16, #tpu.memory_space<vmem>>, vector<1x81x128xbf16>
    %1 = vector.shape_cast %0 : vector<1x81x128xbf16> to vector<81x128xbf16>
    %c0_2 = arith.constant 0 : index
    %c0_3 = arith.constant 0 : index
    %2 = vector.load %arg2[%c0_2, %c0_3] : memref<81x1xf32, #tpu.memory_space<vmem>>, vector<81x1xf32>
    %3 = arith.extf %1 : vector<81x128xbf16> to vector<81x128xf32>
    %c0_4 = arith.constant 0 : index
    %c0_5 = arith.constant 0 : index
    %4 = vector.load %arg3[%c0_4, %c0_5] : memref<1x128xf32, #tpu.memory_space<vmem>>, vector<1x128xf32>
    %5 = vector.broadcast %4 : vector<1x128xf32> to vector<81x128xf32>
    %6 = arith.mulf %3, %5 : vector<81x128xf32>
    %c0_6 = arith.constant 0 : index
    %c0_7 = arith.constant 0 : index
    %7 = vector.load %arg4[%c0_6, %c0_7] : memref<1x128xf32, #tpu.memory_space<vmem>>, vector<1x128xf32>
    %8 = vector.broadcast %7 : vector<1x128xf32> to vector<81x128xf32>
    %9 = arith.addf %6, %8 : vector<81x128xf32>
    %cst = arith.constant 0.000000e+00 : f32
    %10 = vector.broadcast %cst : f32 to vector<81x128xf32>
    %11 = arith.maximumf %9, %10 : vector<81x128xf32>
    %12 = arith.truncf %11 : vector<81x128xf32> to vector<81x128xbf16>
    %c0_8 = arith.constant 0 : index
    %c0_9 = arith.constant 0 : index
    %13 = vector.load %arg5[%c0_8, %c0_9] : memref<128x128xbf16, #tpu.memory_space<vmem>>, vector<128x128xbf16>
    %cst_10 = arith.constant dense<0.000000e+00> : vector<81x128xf32>
    %14 = tpu.matmul %12, %13, %cst_10 {dimension_numbers = #tpu.dot_dimension_numbers<[1], [0], [0], [1], [0, 0, 1, 1], [], []>} : vector<81x128xbf16>, vector<128x128xbf16>, vector<81x128xf32> -> vector<81x128xf32>
    %c0_11 = arith.constant 0 : index
    %c0_12 = arith.constant 0 : index
    %15 = vector.load %arg6[%c0_11, %c0_12] : memref<1x128xf32, #tpu.memory_space<vmem>>, vector<1x128xf32>
    %16 = vector.broadcast %15 : vector<1x128xf32> to vector<81x128xf32>
    %17 = arith.mulf %14, %16 : vector<81x128xf32>
    %c0_13 = arith.constant 0 : index
    %c0_14 = arith.constant 0 : index
    %18 = vector.load %arg7[%c0_13, %c0_14] : memref<1x128xf32, #tpu.memory_space<vmem>>, vector<1x128xf32>
    %19 = vector.broadcast %18 : vector<1x128xf32> to vector<81x128xf32>
    %20 = arith.addf %17, %19 : vector<81x128xf32>
    %cst_15 = arith.constant 0.000000e+00 : f32
    %21 = vector.broadcast %cst_15 : f32 to vector<81x128xf32>
    %22 = arith.maximumf %20, %21 : vector<81x128xf32>
    %23 = vector.broadcast %2 : vector<81x1xf32> to vector<81x128xf32>
    %24 = arith.mulf %22, %23 : vector<81x128xf32>
    %cst_16 = arith.constant 0.000000e+00 : f32
    %25 = vector.broadcast %cst_16 : f32 to vector<107x128xf32>
    %c0_17 = arith.constant 0 : index
    %c0_18 = arith.constant 0 : index
    %26 = vector.load %arg10[%c0_17, %c0_18] : memref<107x128xf32, #tpu.memory_space<vmem>>, vector<107x128xf32>
    tpu.vector_store %arg10[%c0_17, %c0_18], %25 {strides = array<i32>} : memref<107x128xf32, #tpu.memory_space<vmem>>, vector<107x128xf32>,
    %c16 = arith.constant 16 : index
    %c0_19 = arith.constant 0 : index
    %27 = vector.load %arg10[%c16, %c0_19] : memref<107x128xf32, #tpu.memory_space<vmem>>, vector<81x128xf32>
    tpu.vector_store %arg10[%c16, %c0_19], %24 {strides = array<i32>} : memref<107x128xf32, #tpu.memory_space<vmem>>, vector<81x128xf32>,
    %cst_20 = arith.constant 0.000000e+00 : f32
    %28 = vector.broadcast %cst_20 : f32 to vector<81x128xf32>
    %c6 = arith.constant 6 : index
    %c0_21 = arith.constant 0 : index
    %29 = vector.load %arg10[%c6, %c0_21] : memref<107x128xf32, #tpu.memory_space<vmem>>, vector<81x128xf32>
    %30 = arith.truncf %29 : vector<81x128xf32> to vector<81x128xbf16>
    %c0_22 = arith.constant 0 : index
    %c0_23 = arith.constant 0 : index
    %c0_24 = arith.constant 0 : index
    %31 = vector.load %arg8[%c0_22, %c0_23, %c0_24] : memref<9x128x128xbf16, #tpu.memory_space<vmem>>, vector<1x128x128xbf16>
    %32 = vector.shape_cast %31 : vector<1x128x128xbf16> to vector<128x128xbf16>
    %cst_25 = arith.constant dense<0.000000e+00> : vector<81x128xf32>
    %33 = tpu.matmul %30, %32, %cst_25 {dimension_numbers = #tpu.dot_dimension_numbers<[1], [0], [0], [1], [0, 0, 1, 1], [], []>} : vector<81x128xbf16>, vector<128x128xbf16>, vector<81x128xf32> -> vector<81x128xf32>
    %34 = arith.addf %28, %33 : vector<81x128xf32>
    %c7 = arith.constant 7 : index
    %c0_26 = arith.constant 0 : index
    %35 = vector.load %arg10[%c7, %c0_26] : memref<107x128xf32, #tpu.memory_space<vmem>>, vector<81x128xf32>
    %36 = arith.truncf %35 : vector<81x128xf32> to vector<81x128xbf16>
    %c1 = arith.constant 1 : index
    %c0_27 = arith.constant 0 : index
    %c0_28 = arith.constant 0 : index
    %37 = vector.load %arg8[%c1, %c0_27, %c0_28] : memref<9x128x128xbf16, #tpu.memory_space<vmem>>, vector<1x128x128xbf16>
    %38 = vector.shape_cast %37 : vector<1x128x128xbf16> to vector<128x128xbf16>
    %cst_29 = arith.constant dense<0.000000e+00> : vector<81x128xf32>
    %39 = tpu.matmul %36, %38, %cst_29 {dimension_numbers = #tpu.dot_dimension_numbers<[1], [0], [0], [1], [0, 0, 1, 1], [], []>} : vector<81x128xbf16>, vector<128x128xbf16>, vector<81x128xf32> -> vector<81x128xf32>
    %40 = arith.addf %34, %39 : vector<81x128xf32>
    %c8 = arith.constant 8 : index
    %c0_30 = arith.constant 0 : index
    %41 = vector.load %arg10[%c8, %c0_30] : memref<107x128xf32, #tpu.memory_space<vmem>>, vector<81x128xf32>
    %42 = arith.truncf %41 : vector<81x128xf32> to vector<81x128xbf16>
    %c2 = arith.constant 2 : index
    %c0_31 = arith.constant 0 : index
    %c0_32 = arith.constant 0 : index
    %43 = vector.load %arg8[%c2, %c0_31, %c0_32] : memref<9x128x128xbf16, #tpu.memory_space<vmem>>, vector<1x128x128xbf16>
    %44 = vector.shape_cast %43 : vector<1x128x128xbf16> to vector<128x128xbf16>
    %cst_33 = arith.constant dense<0.000000e+00> : vector<81x128xf32>
    %45 = tpu.matmul %42, %44, %cst_33 {dimension_numbers = #tpu.dot_dimension_numbers<[1], [0], [0], [1], [0, 0, 1, 1], [], []>} : vector<81x128xbf16>, vector<128x128xbf16>, vector<81x128xf32> -> vector<81x128xf32>
    %46 = arith.addf %40, %45 : vector<81x128xf32>
    %c15 = arith.constant 15 : index
    %c0_34 = arith.constant 0 : index
    %47 = vector.load %arg10[%c15, %c0_34] : memref<107x128xf32, #tpu.memory_space<vmem>>, vector<81x128xf32>
    %48 = arith.truncf %47 : vector<81x128xf32> to vector<81x128xbf16>
    %c3 = arith.constant 3 : index
    %c0_35 = arith.constant 0 : index
    %c0_36 = arith.constant 0 : index
    %49 = vector.load %arg8[%c3, %c0_35, %c0_36] : memref<9x128x128xbf16, #tpu.memory_space<vmem>>, vector<1x128x128xbf16>
    %50 = vector.shape_cast %49 : vector<1x128x128xbf16> to vector<128x128xbf16>
    %cst_37 = arith.constant dense<0.000000e+00> : vector<81x128xf32>
    %51 = tpu.matmul %48, %50, %cst_37 {dimension_numbers = #tpu.dot_dimension_numbers<[1], [0], [0], [1], [0, 0, 1, 1], [], []>} : vector<81x128xbf16>, vector<128x128xbf16>, vector<81x128xf32> -> vector<81x128xf32>
    %52 = arith.addf %46, %51 : vector<81x128xf32>
    %c16_38 = arith.constant 16 : index
    %c0_39 = arith.constant 0 : index
    %53 = vector.load %arg10[%c16_38, %c0_39] : memref<107x128xf32, #tpu.memory_space<vmem>>, vector<81x128xf32>
    %54 = arith.truncf %53 : vector<81x128xf32> to vector<81x128xbf16>
    %c4 = arith.constant 4 : index
    %c0_40 = arith.constant 0 : index
    %c0_41 = arith.constant 0 : index
    %55 = vector.load %arg8[%c4, %c0_40, %c0_41] : memref<9x128x128xbf16, #tpu.memory_space<vmem>>, vector<1x128x128xbf16>
    %56 = vector.shape_cast %55 : vector<1x128x128xbf16> to vector<128x128xbf16>
    %cst_42 = arith.constant dense<0.000000e+00> : vector<81x128xf32>
    %57 = tpu.matmul %54, %56, %cst_42 {dimension_numbers = #tpu.dot_dimension_numbers<[1], [0], [0], [1], [0, 0, 1, 1], [], []>} : vector<81x128xbf16>, vector<128x128xbf16>, vector<81x128xf32> -> vector<81x128xf32>
    %58 = arith.addf %52, %57 : vector<81x128xf32>
    %c17 = arith.constant 17 : index
    %c0_43 = arith.constant 0 : index
    %59 = vector.load %arg10[%c17, %c0_43] : memref<107x128xf32, #tpu.memory_space<vmem>>, vector<81x128xf32>
    %60 = arith.truncf %59 : vector<81x128xf32> to vector<81x128xbf16>
    %c5 = arith.constant 5 : index
    %c0_44 = arith.constant 0 : index
    %c0_45 = arith.constant 0 : index
    %61 = vector.load %arg8[%c5, %c0_44, %c0_45] : memref<9x128x128xbf16, #tpu.memory_space<vmem>>, vector<1x128x128xbf16>
    %62 = vector.shape_cast %61 : vector<1x128x128xbf16> to vector<128x128xbf16>
    %cst_46 = arith.constant dense<0.000000e+00> : vector<81x128xf32>
    %63 = tpu.matmul %60, %62, %cst_46 {dimension_numbers = #tpu.dot_dimension_numbers<[1], [0], [0], [1], [0, 0, 1, 1], [], []>} : vector<81x128xbf16>, vector<128x128xbf16>, vector<81x128xf32> -> vector<81x128xf32>
    %64 = arith.addf %58, %63 : vector<81x128xf32>
    %c24 = arith.constant 24 : index
    %c0_47 = arith.constant 0 : index
    %65 = vector.load %arg10[%c24, %c0_47] : memref<107x128xf32, #tpu.memory_space<vmem>>, vector<81x128xf32>
    %66 = arith.truncf %65 : vector<81x128xf32> to vector<81x128xbf16>
    %c6_48 = arith.constant 6 : index
    %c0_49 = arith.constant 0 : index
    %c0_50 = arith.constant 0 : index
    %67 = vector.load %arg8[%c6_48, %c0_49, %c0_50] : memref<9x128x128xbf16, #tpu.memory_space<vmem>>, vector<1x128x128xbf16>
    %68 = vector.shape_cast %67 : vector<1x128x128xbf16> to vector<128x128xbf16>
    %cst_51 = arith.constant dense<0.000000e+00> : vector<81x128xf32>
    %69 = tpu.matmul %66, %68, %cst_51 {dimension_numbers = #tpu.dot_dimension_numbers<[1], [0], [0], [1], [0, 0, 1, 1], [], []>} : vector<81x128xbf16>, vector<128x128xbf16>, vector<81x128xf32> -> vector<81x128xf32>
    %70 = arith.addf %64, %69 : vector<81x128xf32>
    %c25 = arith.constant 25 : index
    %c0_52 = arith.constant 0 : index
    %71 = vector.load %arg10[%c25, %c0_52] : memref<107x128xf32, #tpu.memory_space<vmem>>, vector<81x128xf32>
    %72 = arith.truncf %71 : vector<81x128xf32> to vector<81x128xbf16>
    %c7_53 = arith.constant 7 : index
    %c0_54 = arith.constant 0 : index
    %c0_55 = arith.constant 0 : index
    %73 = vector.load %arg8[%c7_53, %c0_54, %c0_55] : memref<9x128x128xbf16, #tpu.memory_space<vmem>>, vector<1x128x128xbf16>
    %74 = vector.shape_cast %73 : vector<1x128x128xbf16> to vector<128x128xbf16>
    %cst_56 = arith.constant dense<0.000000e+00> : vector<81x128xf32>
    %75 = tpu.matmul %72, %74, %cst_56 {dimension_numbers = #tpu.dot_dimension_numbers<[1], [0], [0], [1], [0, 0, 1, 1], [], []>} : vector<81x128xbf16>, vector<128x128xbf16>, vector<81x128xf32> -> vector<81x128xf32>
    %76 = arith.addf %70, %75 : vector<81x128xf32>
    %c26 = arith.constant 26 : index
    %c0_57 = arith.constant 0 : index
    %77 = vector.load %arg10[%c26, %c0_57] : memref<107x128xf32, #tpu.memory_space<vmem>>, vector<81x128xf32>
    %78 = arith.truncf %77 : vector<81x128xf32> to vector<81x128xbf16>
    %c8_58 = arith.constant 8 : index
    %c0_59 = arith.constant 0 : index
    %c0_60 = arith.constant 0 : index
    %79 = vector.load %arg8[%c8_58, %c0_59, %c0_60] : memref<9x128x128xbf16, #tpu.memory_space<vmem>>, vector<1x128x128xbf16>
    %80 = vector.shape_cast %79 : vector<1x128x128xbf16> to vector<128x128xbf16>
    %cst_61 = arith.constant dense<0.000000e+00> : vector<81x128xf32>
    %81 = tpu.matmul %78, %80, %cst_61 {dimension_numbers = #tpu.dot_dimension_numbers<[1], [0], [0], [1], [0, 0, 1, 1], [], []>} : vector<81x128xbf16>, vector<128x128xbf16>, vector<81x128xf32> -> vector<81x128xf32>
    %82 = arith.addf %76, %81 : vector<81x128xf32>
    %83 = arith.extf %1 : vector<81x128xbf16> to vector<81x128xf32>
    %84 = vector.broadcast %2 : vector<81x1xf32> to vector<81x128xf32>
    %85 = arith.mulf %82, %84 : vector<81x128xf32>
    %86 = arith.addf %83, %85 : vector<81x128xf32>
    %87 = arith.truncf %86 : vector<81x128xf32> to vector<81x128xbf16>
    %c0_62 = arith.constant 0 : index
    %c0_63 = arith.constant 0 : index
    %c0_64 = arith.constant 0 : index
    %88 = vector.load %arg9[%c0_62, %c0_63, %c0_64] : memref<1x81x128xbf16, #tpu.memory_space<vmem>>, vector<1x81x128xbf16>
    %89 = vector.shape_cast %88 : vector<1x81x128xbf16> to vector<81x128xbf16>
    %90 = vector.shape_cast %87 : vector<81x128xbf16> to vector<1x81x128xbf16>
    tpu.vector_store %arg9[%c0_62, %c0_63, %c0_64], %90 {strides = array<i32>} : memref<1x81x128xbf16, #tpu.memory_space<vmem>>, vector<1x81x128xbf16>,
    return
  }
  func.func @transform_0(%arg0: i32) -> (i32, i32, i32) {
    %c0_i32 = arith.constant 0 : i32
    %c0_i32_0 = arith.constant 0 : i32
    %c0_i32_1 = arith.constant 0 : i32
    return %arg0, %c0_i32, %c0_i32_0 : i32, i32, i32
  }
  func.func @transform_1(%arg0: i32) -> (i32, i32) {
    %c0_i32 = arith.constant 0 : i32
    %c0_i32_0 = arith.constant 0 : i32
    %c0_i32_1 = arith.constant 0 : i32
    return %c0_i32, %c0_i32_0 : i32, i32
  }
  func.func @transform_2(%arg0: i32) -> (i32, i32) {
    %c0_i32 = arith.constant 0 : i32
    %c0_i32_0 = arith.constant 0 : i32
    %c0_i32_1 = arith.constant 0 : i32
    return %c0_i32, %c0_i32_0 : i32, i32
  }
  func.func @transform_3(%arg0: i32) -> (i32, i32) {
    %c0_i32 = arith.constant 0 : i32
    %c0_i32_0 = arith.constant 0 : i32
    %c0_i32_1 = arith.constant 0 : i32
    return %c0_i32, %c0_i32_0 : i32, i32
  }
  func.func @transform_4(%arg0: i32) -> (i32, i32) {
    %c0_i32 = arith.constant 0 : i32
    %c0_i32_0 = arith.constant 0 : i32
    %c0_i32_1 = arith.constant 0 : i32
    return %c0_i32, %c0_i32_0 : i32, i32
  }
  func.func @transform_5(%arg0: i32) -> (i32, i32) {
    %c0_i32 = arith.constant 0 : i32
    %c0_i32_0 = arith.constant 0 : i32
    %c0_i32_1 = arith.constant 0 : i32
    return %c0_i32, %c0_i32_0 : i32, i32
  }
  func.func @transform_6(%arg0: i32) -> (i32, i32) {
    %c0_i32 = arith.constant 0 : i32
    %c0_i32_0 = arith.constant 0 : i32
    %c0_i32_1 = arith.constant 0 : i32
    return %c0_i32, %c0_i32_0 : i32, i32
  }
  func.func @transform_7(%arg0: i32) -> (i32, i32, i32) {
    %c0_i32 = arith.constant 0 : i32
    %c0_i32_0 = arith.constant 0 : i32
    %c0_i32_1 = arith.constant 0 : i32
    %c0_i32_2 = arith.constant 0 : i32
    return %c0_i32, %c0_i32_0, %c0_i32_1 : i32, i32, i32
  }
  func.func @transform_8(%arg0: i32) -> (i32, i32, i32) {
    %c0_i32 = arith.constant 0 : i32
    %c0_i32_0 = arith.constant 0 : i32
    %c0_i32_1 = arith.constant 0 : i32
    return %arg0, %c0_i32, %c0_i32_0 : i32, i32, i32
  }
}

</mosaic_0001>

<bundles_post_ra>
// kernel: forward.7
= control target key start
LH: loop header
LB: loop body
LE: loop exit
PB: predicated region body
PF: predicated region fallthrough
CT: control target
= control target key end

     0   :  { %s2977_s15 = smov 0   ;;  %s3680_s0 = inlined_call_operand.vmem [shape: bf16[1568,152], index: 0, kind: input, shape index: {}]   ;;  %s3681_s1 = inlined_call_operand.vmem [shape: bf16[152,128], index: 1, kind: input, shape index: {}]   ;;  %s3682_s2 = inlined_call_operand.vmem [shape: f32[1,128], index: 2, kind: input, shape index: {}]   ;;  %s3683_s3 = inlined_call_operand.vmem [shape: f32[1,128], index: 3, kind: input, shape index: {}]   ;;  %s3684_s4 = inlined_call_operand.vmem [shape: bf16[1568,128], index: 4, kind: output, shape index: {}]  }
   0x1 LB: > { %s2034_s16 = sadd.s32 4294967295, %s2950_s15   ;;  %p2038_p0 = scmp.ge.s32.totalorder %s2950_s15, 1  ;;  %s2950_s15 = sphi %s2977_s15, %s14_s15  }
   0x2   : > { %p164_p1 = scmp.lt.s32.totalorder %s2950_s15, 3 }
   0x4   : > { %p165_p2 = pnand %p2038_p0, %p164_p1 }
   0x5   : > { %s191_s21 = smul.u32 (!%p165_p2), 98, %s2034_s16 }
   0x6   : > { %168 = sbr.rel (%p165_p2) target bundleno = 579 (0x243), region = 36 }
   0x7   : > { %p192_p3 = scmp.lt.s32.totalorder (!%p165_p2), %s191_s21, 195 }
   0xb   : > { %v2627_v0 = vld [vmem:[%s3681_s1 + $0x38] sm:$0xff]  ;;  %v321_v1 = vld [vmem:[%s3681_s1 + $0x48] sm:$0xf]  ;;  %vm968_vm0 = vcmask 1043456   ;;  %v2626_v3 = vld [vmem:[%s3681_s1 + $0x30] sm:$0xff]  ;;  %s3686_s21 = smov (!%p192_p3, %s191_s21), 195 }
   0xc   : > { %v800_v2 = vunpack.c.l.b16 %v321_v1  ;;  %972 = vmatpush.bf16.msra.mxu0 %v2627_v0  ;;  %2922 = vmatpush.bf16.msra.mxu2 %v2627_v0  ;;  %v2628_v6 = vld [vmem:[%s3681_s1 + $0x40] sm:$0xff]  ;;  %v2625_v7 = vld [vmem:[%s3681_s1 + $0x28] sm:$0xff]  ;;  %s2521_s28 = sshll.u32 %s3686_s21, 3  ;;  %vm820_vm1 = vcmask 195584   ;;  %v2623_v12 = vld [vmem:[%s3681_s1 + $0x18] sm:$0xff]  ;;  %s2041_s22 = sshll.u32 %s3686_s21, 2 }
   0xd   : > { %s3006_s5 = scalar_lea.vmem %s3680_s0, %s2521_s28  ;;  %v2624_v11 = vld [vmem:[%s3681_s1 + $0x20] sm:$0xff]  ;;  %v2622_v13 = vld [vmem:[%s3681_s1 + $0x10] sm:$0xff]  ;;  %v2621_v17 = vld [vmem:[%s3681_s1 + $0x8] sm:$0xff]  ;;  %s3154_s25 = scalar_lea.vmem %s3684_s4, %s2041_s22 }
   0xe   : > { %v810_v4 = vpack.c.b16 %v800_v2, %v800_v2  ;;  %v2522_v8 = vld [vmem:[%s3006_s5 + $0x4] sm:$0xf]  ;;  %v2046_v9 = vld [vmem:[%s3006_s5 + $0x8] sm:$0xf0]  ;;  %v2524_v18 = vld [vmem:[%s3006_s5 + $0x14] sm:$0xf] }
   0xf   : > { %v2049_v10 = vor.u32 %v2522_v8, %v2046_v9  ;;  %v2574_v14 = vld [vmem:[%s3006_s5 + $0x1a4] sm:$0xf]  ;;  %v2254_v15 = vld [vmem:[%s3006_s5 + $0x1a8] sm:$0xf0]  ;;  %v2054_v19 = vld [vmem:[%s3006_s5 + $0x18] sm:$0xf0] }
  0x10   : > { %v970_v5 = vsel %vm968_vm0, %v810_v4, 0  ;;  %973 = vmatpush.bf16.msra.mxu0 %v2626_v3  ;;  %2923 = vmatpush.bf16.msra.mxu2 %v2626_v3  ;;  %v2257_v16 = vor.u32 %v2574_v14, %v2254_v15  ;;  %v2057_v20 = vor.u32 %v2524_v18, %v2054_v19  ;;  %v2620_v21 = vld [vmem:[%s3681_s1] sm:$0xff]  ;;  %v2523_v23 = vld [vmem:[%s3006_s5 + $0x4] sm:$0xf0]  ;;  %v2576_v28 = vld [vmem:[%s3006_s5 + $0x1b4] sm:$0xf] }
  0x11   : > { %1232 = vmatpush.bf16.msra.mxu1 %v970_v5  ;;  %2930 = vmatpush.bf16.msra.mxu3 %v970_v5  ;;  %v2044_v22 = vld [vmem:[%s3006_s5] sm:$0xf]  ;;  %v2571_v25 = vld [vmem:[%s3006_s5 + $0x184] sm:$0xf0]  ;;  %v2262_v29 = vld [vmem:[%s3006_s5 + $0x1b8] sm:$0xf0] }
  0x12   : > { %v2236_v24 = vld [vmem:[%s3006_s5 + $0x180] sm:$0xf]  ;;  %v2045_v26 = vor.u32 %v2523_v23, %v2044_v22  ;;  %v2265_v30 = vor.u32 %v2576_v28, %v2262_v29  ;;  %v2526_v31 = vld [vmem:[%s3006_s5 + $0x24] sm:$0xf]  ;;  %v2062_v32 = vld [vmem:[%s3006_s5 + $0x28] sm:$0xf0] }
  0x13   : > { %v2237_v27 = vor.u32 %v2571_v25, %v2236_v24  ;;  %v2065_v33 = vor.u32 %v2526_v31, %v2062_v32  ;;  %v2052_v34 = vld [vmem:[%s3006_s5 + $0x10] sm:$0xf]  ;;  %v2525_v35 = vld [vmem:[%s3006_s5 + $0x14] sm:$0xf0]  ;;  %v2578_v40 = vld [vmem:[%s3006_s5 + $0x1c4] sm:$0xf] }
  0x14   : > { %974 = vmatpush.bf16.msra.mxu0 %v2625_v7  ;;  %2924 = vmatpush.bf16.msra.mxu2 %v2625_v7  ;;  %v2244_v36 = vld [vmem:[%s3006_s5 + $0x190] sm:$0xf]  ;;  %v2573_v37 = vld [vmem:[%s3006_s5 + $0x194] sm:$0xf0]  ;;  %v2053_v38 = vor.u32 %v2525_v35, %v2052_v34  ;;  %v2270_v41 = vld [vmem:[%s3006_s5 + $0x1c8] sm:$0xf0] }
  0x15   : > { %1233 = vmatpush.bf16.msra.mxu1 %v2628_v6  ;;  %2931 = vmatpush.bf16.msra.mxu3 %v2628_v6  ;;  %v2245_v39 = vor.u32 %v2573_v37, %v2244_v36  ;;  %v2273_v42 = vor.u32 %v2578_v40, %v2270_v41  ;;  %v2528_v43 = vld [vmem:[%s3006_s5 + $0x34] sm:$0xf]  ;;  %v2070_v44 = vld [vmem:[%s3006_s5 + $0x38] sm:$0xf0]  ;;  %v2060_v46 = vld [vmem:[%s3006_s5 + $0x20] sm:$0xf] }
  0x16   : > { %v2073_v45 = vor.u32 %v2528_v43, %v2070_v44  ;;  %v2527_v47 = vld [vmem:[%s3006_s5 + $0x24] sm:$0xf0]  ;;  %v2252_v48 = vld [vmem:[%s3006_s5 + $0x1a0] sm:$0xf]  ;;  %v2580_v52 = vld [vmem:[%s3006_s5 + $0x1d4] sm:$0xf] }
  0x17   : > { %v2575_v49 = vld [vmem:[%s3006_s5 + $0x1a4] sm:$0xf0]  ;;  %v2061_v50 = vor.u32 %v2527_v47, %v2060_v46  ;;  %v2278_v53 = vld [vmem:[%s3006_s5 + $0x1d8] sm:$0xf0]  ;;  %v2530_v55 = vld [vmem:[%s3006_s5 + $0x44] sm:$0xf] }
  0x18   : > { %2470 = vmatmul.msk.bf16.vlgmr.msra.gmra.mxu1 %vm820_vm1, %v2049_v10  ;;  %975 = vmatpush.bf16.msra.mxu0 %v2624_v11  ;;  %v2253_v51 = vor.u32 %v2575_v49, %v2252_v48  ;;  %v2281_v54 = vor.u32 %v2580_v52, %v2278_v53  ;;  %v2078_v56 = vld [vmem:[%s3006_s5 + $0x48] sm:$0xf0]  ;;  %v2068_v58 = vld [vmem:[%s3006_s5 + $0x30] sm:$0xf]  ;;  %v2529_v59 = vld [vmem:[%s3006_s5 + $0x34] sm:$0xf0] }
  0x19   : > { %2925 = vmatpush.bf16.msra.mxu2 %v2624_v11  ;;  %2496 = vmatmul.msk.bf16.vlgmr.msra.gmra.mxu3 %vm820_vm1, %v2257_v16  ;;  %v2081_v57 = vor.u32 %v2530_v55, %v2078_v56  ;;  %v2260_v60 = vld [vmem:[%s3006_s5 + $0x1b0] sm:$0xf]  ;;  %v2577_v61 = vld [vmem:[%s3006_s5 + $0x1b4] sm:$0xf0]  ;;  %v2069_v62 = vor.u32 %v2529_v59, %v2068_v58  ;;  %v2582_v0 = vld [vmem:[%s3006_s5 + $0x1e4] sm:$0xf] }
  0x1a   : > { %v2261_v63 = vor.u32 %v2577_v61, %v2260_v60  ;;  %v2286_v1 = vld [vmem:[%s3006_s5 + $0x1e8] sm:$0xf0]  ;;  %v2532_v3 = vld [vmem:[%s3006_s5 + $0x54] sm:$0xf]  ;;  %v2086_v4 = vld [vmem:[%s3006_s5 + $0x58] sm:$0xf0] }
  0x1b   : > { %v2289_v2 = vor.u32 %v2582_v0, %v2286_v1  ;;  %v2089_v5 = vor.u32 %v2532_v3, %v2086_v4  ;;  %v2076_v6 = vld [vmem:[%s3006_s5 + $0x40] sm:$0xf]  ;;  %v2531_v7 = vld [vmem:[%s3006_s5 + $0x44] sm:$0xf0]  ;;  %v2584_v14 = vld [vmem:[%s3006_s5 + $0x1f4] sm:$0xf] }
  0x1c   : > { %976 = vmatpush.bf16.msra.mxu0 %v2623_v12  ;;  %v2268_v8 = vld [vmem:[%s3006_s5 + $0x1c0] sm:$0xf]  ;;  %v2579_v9 = vld [vmem:[%s3006_s5 + $0x1c4] sm:$0xf0]  ;;  %v2077_v10 = vor.u32 %v2531_v7, %v2076_v6  ;;  %v2294_v15 = vld [vmem:[%s3006_s5 + $0x1f8] sm:$0xf0] }
  0x1d   : > { %2926 = vmatpush.bf16.msra.mxu2 %v2623_v12  ;;  %v2269_v11 = vor.u32 %v2579_v9, %v2268_v8  ;;  %v2534_v12 = vld [vmem:[%s3006_s5 + $0x64] sm:$0xf]  ;;  %v2297_v16 = vor.u32 %v2584_v14, %v2294_v15  ;;  %v2084_v18 = vld [vmem:[%s3006_s5 + $0x50] sm:$0xf]  ;;  %v2533_v19 = vld [vmem:[%s3006_s5 + $0x54] sm:$0xf0] }
  0x1e   : > { %v2085_v22 = vor.u32 %v2533_v19, %v2084_v18  ;;  %v2536_v24 = vld [vmem:[%s3006_s5 + $0x74] sm:$0xf]  ;;  %v2102_v25 = vld [vmem:[%s3006_s5 + $0x78] sm:$0xf0]  ;;  %v2535_v31 = vld [vmem:[%s3006_s5 + $0x64] sm:$0xf0] }
  0x1f   : > { %v2105_v29 = vor.u32 %v2536_v24, %v2102_v25  ;;  %v2284_v32 = vld [vmem:[%s3006_s5 + $0x1e0] sm:$0xf]  ;;  %v2538_v36 = vld [vmem:[%s3006_s5 + $0x84] sm:$0xf]  ;;  %v2110_v37 = vld [vmem:[%s3006_s5 + $0x88] sm:$0xf0] }
  0x20   : > { %977 = vmatpush.bf16.msra.mxu0 %v2622_v13  ;;  %v2113_v41 = vor.u32 %v2538_v36, %v2110_v37  ;;  %v2100_v43 = vld [vmem:[%s3006_s5 + $0x70] sm:$0xf]  ;;  %v2537_v44 = vld [vmem:[%s3006_s5 + $0x74] sm:$0xf0]  ;;  %v2590_v52 = vld [vmem:[%s3006_s5 + $0x224] sm:$0xf] }
  0x21   : > { %2927 = vmatpush.bf16.msra.mxu2 %v2622_v13  ;;  %v2094_v13 = vld [vmem:[%s3006_s5 + $0x68] sm:$0xf0]  ;;  %v2585_v46 = vld [vmem:[%s3006_s5 + $0x1f4] sm:$0xf0]  ;;  %v2101_v47 = vor.u32 %v2537_v44, %v2100_v43  ;;  %v2539_v58 = vld [vmem:[%s3006_s5 + $0x84] sm:$0xf0] }
  0x22   : > { %v2318_v53 = vld [vmem:[%s3006_s5 + $0x228] sm:$0xf0]  ;;  %v2300_v59 = vld [vmem:[%s3006_s5 + $0x200] sm:$0xf]  ;;  %v2587_v60 = vld [vmem:[%s3006_s5 + $0x204] sm:$0xf0] }
  0x23   : > { %v2301_v0 = vor.u32 %v2587_v60, %v2300_v59  ;;  %v2542_v9 = vld [vmem:[%s3006_s5 + $0xa4] sm:$0xf]  ;;  %v2116_v19 = vld [vmem:[%s3006_s5 + $0x90] sm:$0xf] }
  0x24   : > { %978 = vmatpush.bf16.msra.mxu0 %v2621_v17 }
  0x25   : > { %2928 = vmatpush.bf16.msra.mxu2 %v2621_v17  ;;  %v2097_v17 = vor.u32 %v2534_v12, %v2094_v13  ;;  %v2592_v12 = vld [vmem:[%s3006_s5 + $0x234] sm:$0xf]  ;;  %v2326_v13 = vld [vmem:[%s3006_s5 + $0x238] sm:$0xf0] }
  0x26   : > { %v2329_v14 = vor.u32 %v2592_v12, %v2326_v13  ;;  %v2342_v12 = vld [vmem:[%s3006_s5 + $0x258] sm:$0xf0] }
  0x28   : > { %2471 = vmatmul.msk.bf16.gmra.mxu1 %vm820_vm1, %v2057_v20  ;;  %979 = vmatpush.bf16.msra.mxu0 %v2620_v21  ;;  %v2276_v20 = vld [vmem:[%s3006_s5 + $0x1d0] sm:$0xf] }
  0x29   : > { %2929 = vmatpush.bf16.msra.mxu2 %v2620_v21  ;;  %2497 = vmatmul.msk.bf16.gmra.mxu3 %vm820_vm1, %v2265_v30  ;;  %v2581_v21 = vld [vmem:[%s3006_s5 + $0x1d4] sm:$0xf0]  ;;  %v2092_v30 = vld [vmem:[%s3006_s5 + $0x60] sm:$0xf] }
  0x2a   : > { %v2277_v23 = vor.u32 %v2581_v21, %v2276_v20  ;;  %v2093_v34 = vor.u32 %v2535_v31, %v2092_v30  ;;  %v2541_v20 = vld [vmem:[%s3006_s5 + $0x94] sm:$0xf0] }
  0x2b   : > { %980 = vmatmul.bf16.vlgmr.msra.gmra.mxu0 %v2045_v26  ;;  %v2586_v26 = vld [vmem:[%s3006_s5 + $0x204] sm:$0xf] }
  0x2c   : > { %1100 = vmatmul.bf16.vlgmr.msra.gmra.mxu2 %v2237_v27  ;;  %v2302_v27 = vld [vmem:[%s3006_s5 + $0x208] sm:$0xf0] }
  0x2d   : > { %v2305_v28 = vor.u32 %v2586_v26, %v2302_v27  ;;  %v2117_v27 = vor.u32 %v2541_v20, %v2116_v19  ;;  %v2132_v19 = vld [vmem:[%s3006_s5 + $0xb0] sm:$0xf]  ;;  %v2545_v20 = vld [vmem:[%s3006_s5 + $0xb4] sm:$0xf0] }
  0x38   : > { %2472 = vmatmul.msk.bf16.gmra.mxu1 %vm820_vm1, %v2065_v33  ;;  %v2583_v33 = vld [vmem:[%s3006_s5 + $0x1e4] sm:$0xf0] }
  0x39   : > { %2498 = vmatmul.msk.bf16.gmra.mxu3 %vm820_vm1, %v2273_v42  ;;  %v2285_v35 = vor.u32 %v2583_v33, %v2284_v32 }
  0x3b   : > { %985 = vmatmul.bf16.gmra.mxu0 %v2053_v38  ;;  %v2588_v38 = vld [vmem:[%s3006_s5 + $0x214] sm:$0xf] }
  0x3c   : > { %1105 = vmatmul.bf16.gmra.mxu2 %v2245_v39  ;;  %v2310_v39 = vld [vmem:[%s3006_s5 + $0x218] sm:$0xf0] }
  0x3d   : > { %v2313_v40 = vor.u32 %v2588_v38, %v2310_v39  ;;  %v2544_v38 = vld [vmem:[%s3006_s5 + $0xb4] sm:$0xf]  ;;  %v2134_v39 = vld [vmem:[%s3006_s5 + $0xb8] sm:$0xf0] }
  0x48   : > { %2473 = vmatmul.msk.bf16.gmra.mxu1 %vm820_vm1, %v2073_v45  ;;  %v2292_v45 = vld [vmem:[%s3006_s5 + $0x1f0] sm:$0xf] }
  0x49   : > { %2499 = vmatmul.msk.bf16.gmra.mxu3 %vm820_vm1, %v2281_v54  ;;  %v2293_v48 = vor.u32 %v2585_v46, %v2292_v45  ;;  %v2321_v54 = vor.u32 %v2590_v52, %v2318_v53  ;;  %v2137_v46 = vor.u32 %v2544_v38, %v2134_v39  ;;  %v2591_v52 = vld [vmem:[%s3006_s5 + $0x224] sm:$0xf0] }
  0x4b   : > { %990 = vmatmul.bf16.gmra.mxu0 %v2061_v50  ;;  %v2540_v50 = vld [vmem:[%s3006_s5 + $0x94] sm:$0xf] }
  0x4c   : > { %1110 = vmatmul.bf16.gmra.mxu2 %v2253_v51  ;;  %v2118_v51 = vld [vmem:[%s3006_s5 + $0x98] sm:$0xf0] }
  0x4d   : > { %v2121_v55 = vor.u32 %v2540_v50, %v2118_v51  ;;  %v2316_v51 = vld [vmem:[%s3006_s5 + $0x220] sm:$0xf] }
  0x4e   : > { %v2317_v59 = vor.u32 %v2591_v52, %v2316_v51  ;;  %v2598_v51 = vld [vmem:[%s3006_s5 + $0x264] sm:$0xf]  ;;  %v2350_v52 = vld [vmem:[%s3006_s5 + $0x268] sm:$0xf0] }
  0x58   : > { %2474 = vmatmul.msk.bf16.gmra.mxu1 %vm820_vm1, %v2081_v57  ;;  %v2108_v57 = vld [vmem:[%s3006_s5 + $0x80] sm:$0xf] }
  0x59   : > { %2500 = vmatmul.msk.bf16.gmra.mxu3 %vm820_vm1, %v2289_v2  ;;  %v2109_v61 = vor.u32 %v2539_v58, %v2108_v57  ;;  %v3121_v2 = vld [vmem:[%s3682_s2] ss:$0 sm:$0xff] }
  0x5b   : > { %995 = vmatmul.bf16.gmra.mxu0 %v2069_v62 }
  0x5c   : > { %1115 = vmatmul.bf16.gmra.mxu2 %v2261_v63 }
  0x68   : > { %2475 = vmatmul.msk.bf16.gmra.mxu1 %vm820_vm1, %v2089_v5  ;;  %v3127_v5 = vld [vmem:[%s3683_s3] ss:$0 sm:$0xff] }
  0x69   : > { %2501 = vmatmul.msk.bf16.gmra.mxu3 %vm820_vm1, %v2297_v16 }
  0x6b   : > { %1000 = vmatmul.bf16.gmra.mxu0 %v2077_v10  ;;  %v2126_v10 = vld [vmem:[%s3006_s5 + $0xa8] sm:$0xf0] }
  0x6c   : > { %1120 = vmatmul.bf16.gmra.mxu2 %v2269_v11 }
  0x78   : > { %2476 = vmatmul.msk.bf16.gmra.mxu1 %vm820_vm1, %v2097_v17  ;;  %v2129_v17 = vor.u32 %v2542_v9, %v2126_v10  ;;  %v2142_v9 = vld [vmem:[%s3006_s5 + $0xc8] sm:$0xf0] }
  0x79   : > { %2502 = vmatmul.msk.bf16.gmra.mxu3 %vm820_vm1, %v2305_v28 }
  0x7b   : > { %1005 = vmatmul.bf16.gmra.mxu0 %v2085_v22  ;;  %v2308_v22 = vld [vmem:[%s3006_s5 + $0x210] sm:$0xf] }
  0x7c   : > { %1125 = vmatmul.bf16.gmra.mxu2 %v2277_v23  ;;  %v2589_v23 = vld [vmem:[%s3006_s5 + $0x214] sm:$0xf0] }
  0x7d   : > { %v2309_v30 = vor.u32 %v2589_v23, %v2308_v22  ;;  %v2324_v22 = vld [vmem:[%s3006_s5 + $0x230] sm:$0xf]  ;;  %v2593_v23 = vld [vmem:[%s3006_s5 + $0x234] sm:$0xf0] }
  0x88   : > { %2477 = vmatmul.msk.bf16.gmra.mxu1 %vm820_vm1, %v2105_v29 }
  0x89   : > { %2503 = vmatmul.msk.bf16.gmra.mxu3 %vm820_vm1, %v2313_v40 }
  0x8b   : > { %1010 = vmatmul.bf16.gmra.mxu0 %v2093_v34 }
  0x8c   : > { %1130 = vmatmul.bf16.gmra.mxu2 %v2285_v35 }
  0x95   : > { %v1235_v42 = vpop.f32.mrf.mxu1 }
  0x98   : > { %2478 = vmatmul.msk.bf16.gmra.mxu1 %vm820_vm1, %v2113_v41  ;;  %v2594_v41 = vld [vmem:[%s3006_s5 + $0x244] sm:$0xf] }
  0x99   : > { %2504 = vmatmul.msk.bf16.gmra.mxu3 %vm820_vm1, %v2321_v54 }
  0x9b   : > { %1015 = vmatmul.bf16.gmra.mxu0 %v2101_v47 }
  0x9c   : > { %1135 = vmatmul.bf16.gmra.mxu2 %v2293_v48  ;;  %v3116_v62 = vpop.f32.mrf.mxu3  ;;  %v2124_v48 = vld [vmem:[%s3006_s5 + $0xa0] sm:$0xf] }
  0x9d   : > { %v1237_v49 = vpop.f32.mrf.mxu1 }
  0xa4   : > { %v3131_v7 = vpop.f32.mrf.mxu3 }
  0xa5   : > { %v1240_v56 = vpop.f32.mrf.mxu1 }
  0xa8   : > { %2479 = vmatmul.msk.bf16.gmra.mxu1 %vm820_vm1, %v2121_v55  ;;  %v981_v63 = vpop.f32.mrf.mxu0 }
  0xa9   : > { %v1236_v1 = vadd.f32 %v1235_v42, %v981_v63  ;;  %2505 = vmatmul.msk.bf16.gmra.mxu3 %vm820_vm1, %v2329_v14  ;;  %v2334_v42 = vld [vmem:[%s3006_s5 + $0x248] sm:$0xf0] }
  0xaa   : > { %v2337_v43 = vor.u32 %v2594_v41, %v2334_v42 }
  0xab   : > { %1020 = vmatmul.bf16.gmra.mxu0 %v2109_v61  ;;  %v1484_v4 = vmul.f32 %v3121_v2, %v1236_v1 }
  0xac   : > { %1140 = vmatmul.bf16.gmra.mxu2 %v2301_v0  ;;  %v3149_v28 = vpop.f32.mrf.mxu3 }
  0xad   : > { %v1242_v3 = vpop.f32.mrf.mxu1  ;;  %v1586_v15 = vadd.f32 %v3127_v5, %v1484_v4 }
  0xaf   : > { %v3129_v6 = vpop.f32.mrf.mxu2  ;;  %v1684_v24 = vmax.f32 %v1586_v15, 0.0 }
  0xb0   : > { %v983_v8 = vpop.f32.mrf.mxu0 }
  0xb1   : > { %v1238_v11 = vadd.f32 %v1237_v49, %v983_v8  ;;  %v2543_v49 = vld [vmem:[%s3006_s5 + $0xa4] sm:$0xf0]  ;;  %v2546_v8 = vld [vmem:[%s3006_s5 + $0xc4] sm:$0xf] }
  0xb3   : > { %v1485_v16 = vmul.f32 %v3121_v2, %v1238_v11  ;;  %v2596_v11 = vld [vmem:[%s3006_s5 + $0x254] sm:$0xf] }
  0xb4   : > { %v3160_v36 = vpop.f32.mrf.mxu3  ;;  %v2345_v14 = vor.u32 %v2596_v11, %v2342_v12 }
  0xb5   : > { %v1245_v18 = vpop.f32.mrf.mxu1  ;;  %v1587_v21 = vadd.f32 %v3127_v5, %v1485_v16 }
  0xb7   : > { %v1685_v25 = vmax.f32 %v1587_v21, 0.0  ;;  %v3146_v26 = vpop.f32.mrf.mxu2 }
  0xb8   : > { %2480 = vmatmul.msk.bf16.gmra.mxu1 %vm820_vm1, %v2129_v17  ;;  %v986_v29 = vpop.f32.mrf.mxu0  ;;  %v2145_v17 = vor.u32 %v2546_v8, %v2142_v9 }
  0xb9   : > { %v2632_v31 = vpack.c.bf16 %v1685_v25, %v1684_v24  ;;  %v1241_v32 = vadd.f32 %v1240_v56, %v986_v29  ;;  %2506 = vmatmul.msk.bf16.gmra.mxu3 %vm820_vm1, %v2337_v43  ;;  %v2125_v56 = vor.u32 %v2543_v49, %v2124_v48  ;;  %v2133_v29 = vor.u32 %v2545_v20, %v2132_v19  ;;  %v2548_v49 = vld [vmem:[%s3006_s5 + $0xd4] sm:$0xf] }
  0xbb   : > { %2633 = vst [vmem:[%s3154_s25] sm:$0xff] %v2632_v31   ;;  %1025 = vmatmul.bf16.gmra.mxu0 %v2117_v27  ;;  %v1486_v34 = vmul.f32 %v3121_v2, %v1241_v32 }
  0xbc   : > { %1145 = vmatmul.bf16.gmra.mxu2 %v2309_v30  ;;  %v3177_v57 = vpop.f32.mrf.mxu3 }
  0xbd   : > { %v1247_v33 = vpop.f32.mrf.mxu1  ;;  %v1588_v44 = vadd.f32 %v3127_v5, %v1486_v34 }
  0xbf   : > { %v3158_v35 = vpop.f32.mrf.mxu2  ;;  %v1686_v53 = vmax.f32 %v1588_v44, 0.0 }
  0xc0   : > { %v988_v37 = vpop.f32.mrf.mxu0 }
  0xc1   : > { %v1243_v40 = vadd.f32 %v1242_v3, %v988_v37 }
  0xc3   : > { %v1487_v45 = vmul.f32 %v3121_v2, %v1243_v40 }
  0xc4   : > { %v3181_v3 = vpop.f32.mrf.mxu3 }
  0xc5   : > { %v1250_v47 = vpop.f32.mrf.mxu1  ;;  %v1589_v50 = vadd.f32 %v3127_v5, %v1487_v45 }
  0xc7   : > { %v1687_v54 = vmax.f32 %v1589_v50, 0.0  ;;  %v3174_v55 = vpop.f32.mrf.mxu2 }
  0xc8   : > { %2481 = vmatmul.msk.bf16.gmra.mxu1 %vm820_vm1, %v2137_v46  ;;  %v991_v58 = vpop.f32.mrf.mxu0 }
  0xc9   : > { %v2637_v60 = vpack.c.bf16 %v1687_v54, %v1686_v53  ;;  %v1246_v61 = vadd.f32 %v1245_v18, %v991_v58  ;;  %2507 = vmatmul.msk.bf16.gmra.mxu3 %vm820_vm1, %v2345_v14  ;;  %v2353_v54 = vor.u32 %v2598_v51, %v2350_v52 }
  0xcb   : > { %2874 = vst [vmem:[%s3154_s25 + $0x8] sm:$0xff] %v2637_v60   ;;  %1030 = vmatmul.bf16.gmra.mxu0 %v2125_v56  ;;  %v1488_v0 = vmul.f32 %v3121_v2, %v1246_v61  ;;  %v2140_v61 = vld [vmem:[%s3006_s5 + $0xc0] sm:$0xf] }
  0xcc   : > { %1150 = vmatmul.bf16.gmra.mxu2 %v2317_v59  ;;  %v3200_v30 = vpop.f32.mrf.mxu3 }
  0xcd   : > { %v1252_v63 = vpop.f32.mrf.mxu1  ;;  %v1590_v15 = vadd.f32 %v3127_v5, %v1488_v0  ;;  %v2547_v0 = vld [vmem:[%s3006_s5 + $0xc4] sm:$0xf0] }
  0xce   : > { %v2141_v11 = vor.u32 %v2547_v0, %v2140_v61 }
  0xcf   : > { %v1111_v1 = vpop.f32.mrf.mxu2 }
  0xd0   : > { %v993_v4 = vpop.f32.mrf.mxu0  ;;  %v1366_v13 = vadd.f32 %v3116_v62, %v1111_v1  ;;  %v1688_v62 = vmax.f32 %v1590_v15, 0.0 }
  0xd1   : > { %v1248_v10 = vadd.f32 %v1247_v33, %v993_v4  ;;  %v2325_v33 = vor.u32 %v2593_v23, %v2324_v22  ;;  %v2595_v4 = vld [vmem:[%s3006_s5 + $0x244] sm:$0xf0] }
  0xd2   : > { %v1536_v24 = vmul.f32 %v3121_v2, %v1366_v13 }
  0xd3   : > { %v1489_v16 = vmul.f32 %v3121_v2, %v1248_v10 }
  0xd4   : > { %v1638_v37 = vadd.f32 %v3127_v5, %v1536_v24  ;;  %v3208_v45 = vpop.f32.mrf.mxu3 }
  0xd5   : > { %v3190_v18 = vpop.f32.mrf.mxu1  ;;  %v1591_v21 = vadd.f32 %v3127_v5, %v1489_v16 }
  0xd7   : > { %v1689_v25 = vmax.f32 %v1591_v21, 0.0  ;;  %v1113_v27 = vpop.f32.mrf.mxu2 }
  0xd8   : > { %2482 = vmatmul.msk.bf16.gmra.mxu1 %vm820_vm1, %v2145_v17  ;;  %v1368_v31 = vadd.f32 %v3131_v7, %v1113_v27  ;;  %v996_v32 = vpop.f32.mrf.mxu0  ;;  %v1736_v7 = vmax.f32 %v1638_v37, 0.0 }
  0xd9   : > { %v2642_v34 = vpack.c.bf16 %v1689_v25, %v1688_v62  ;;  %v1251_v39 = vadd.f32 %v1250_v47, %v996_v32  ;;  %v2150_v47 = vld [vmem:[%s3006_s5 + $0xd8] sm:$0xf0]  ;;  %2508 = vmatmul.msk.bf16.gmra.mxu3 %vm820_vm1, %v2353_v54 }
  0xda   : > { %v1537_v38 = vmul.f32 %v3121_v2, %v1368_v31  ;;  %v2153_v59 = vor.u32 %v2548_v49, %v2150_v47  ;;  %v2550_v31 = vld [vmem:[%s3006_s5 + $0xe4] sm:$0xf] }
  0xdb   : > { %2875 = vst [vmem:[%s3154_s25 + $0x10] sm:$0xff] %v2642_v34   ;;  %1035 = vmatmul.bf16.gmra.mxu0 %v2133_v29  ;;  %v1490_v43 = vmul.f32 %v3121_v2, %v1251_v39  ;;  %v2358_v34 = vld [vmem:[%s3006_s5 + $0x278] sm:$0xf0] }
  0xdc   : > { %v1639_v40 = vadd.f32 %v3127_v5, %v1537_v38  ;;  %1155 = vmatmul.bf16.gmra.mxu2 %v2325_v33  ;;  %v3228_v12 = vpop.f32.mrf.mxu3  ;;  %v2600_v33 = vld [vmem:[%s3006_s5 + $0x274] sm:$0xf] }
  0xdd   : > { %v1257_v41 = vpop.f32.mrf.mxu1  ;;  %v1592_v56 = vadd.f32 %v3127_v5, %v1490_v43  ;;  %v2361_v38 = vor.u32 %v2600_v33, %v2358_v34  ;;  %v2148_v43 = vld [vmem:[%s3006_s5 + $0xd0] sm:$0xf] }
  0xde   : > { %v1737_v42 = vmax.f32 %v1639_v40, 0.0 }
  0xdf   : > { %v1116_v44 = vpop.f32.mrf.mxu2 }
  0xe0   : > { %v2762_v46 = vpack.c.bf16 %v1737_v42, %v1736_v7  ;;  %v998_v48 = vpop.f32.mrf.mxu0  ;;  %v1371_v53 = vadd.f32 %v3149_v28, %v1116_v44  ;;  %v1690_v28 = vmax.f32 %v1592_v56, 0.0  ;;  %v2549_v44 = vld [vmem:[%s3006_s5 + $0xd4] sm:$0xf0] }
  0xe1   : > { %v1253_v50 = vadd.f32 %v1252_v63, %v998_v48  ;;  %v2332_v63 = vld [vmem:[%s3006_s5 + $0x240] sm:$0xf]  ;;  %v2597_v48 = vld [vmem:[%s3006_s5 + $0x254] sm:$0xf0]  ;;  %v2149_v51 = vor.u32 %v2549_v44, %v2148_v43 }
  0xe2   : > { %2899 = vst [vmem:[%s3154_s25 + $0xd0] sm:$0xff] %v2762_v46   ;;  %v1538_v8 = vmul.f32 %v3121_v2, %v1371_v53  ;;  %v2333_v15 = vor.u32 %v2595_v4, %v2332_v63 }
  0xe3   : > { %v1491_v58 = vmul.f32 %v3121_v2, %v1253_v50 }
  0xe4   : > { %v1640_v17 = vadd.f32 %v3127_v5, %v1538_v8  ;;  %v3237_v25 = vpop.f32.mrf.mxu3 }
  0xe5   : > { %v3218_v60 = vpop.f32.mrf.mxu1  ;;  %v1593_v1 = vadd.f32 %v3127_v5, %v1491_v58 }
  0xe6   : > { %v1738_v22 = vmax.f32 %v1640_v17, 0.0 }
  0xe7   : > { %v1691_v9 = vmax.f32 %v1593_v1, 0.0  ;;  %v1118_v10 = vpop.f32.mrf.mxu2 }
  0xe8   : > { %2483 = vmatmul.msk.bf16.gmra.mxu1 %vm820_vm1, %v2153_v59  ;;  %v1373_v13 = vadd.f32 %v3160_v36, %v1118_v10  ;;  %v1001_v14 = vpop.f32.mrf.mxu0 }
  0xe9   : > { %v2647_v16 = vpack.c.bf16 %v1691_v9, %v1690_v28  ;;  %v1256_v20 = vadd.f32 %v3190_v18, %v1001_v14  ;;  %v2158_v18 = vld [vmem:[%s3006_s5 + $0xe8] sm:$0xf0]  ;;  %2509 = vmatmul.msk.bf16.gmra.mxu3 %vm820_vm1, %v2361_v38 }
  0xea   : > { %v1539_v19 = vmul.f32 %v3121_v2, %v1373_v13  ;;  %v2161_v7 = vor.u32 %v2550_v31, %v2158_v18  ;;  %v2552_v13 = vld [vmem:[%s3006_s5 + $0xf4] sm:$0xf] }
  0xeb   : > { %2876 = vst [vmem:[%s3154_s25 + $0x18] sm:$0xff] %v2647_v16   ;;  %1040 = vmatmul.bf16.gmra.mxu0 %v2141_v11  ;;  %v1492_v24 = vmul.f32 %v3121_v2, %v1256_v20  ;;  %v2366_v16 = vld [vmem:[%s3006_s5 + $0x288] sm:$0xf0] }
  0xec   : > { %v1641_v21 = vadd.f32 %v3127_v5, %v1539_v19  ;;  %1160 = vmatmul.bf16.gmra.mxu2 %v2333_v15  ;;  %v3257_v52 = vpop.f32.mrf.mxu3  ;;  %v2602_v15 = vld [vmem:[%s3006_s5 + $0x284] sm:$0xf] }
  0xed   : > { %v1262_v36 = vpop.f32.mrf.mxu1  ;;  %v1594_v39 = vadd.f32 %v3127_v5, %v1492_v24  ;;  %v2369_v19 = vor.u32 %v2602_v15, %v2366_v16  ;;  %v2156_v24 = vld [vmem:[%s3006_s5 + $0xe0] sm:$0xf] }
  0xee   : > { %v1739_v23 = vmax.f32 %v1641_v21, 0.0 }
  0xef   : > { %v1121_v62 = vpop.f32.mrf.mxu2 }
  0xf0   : > { %v2767_v27 = vpack.c.bf16 %v1739_v23, %v1738_v22  ;;  %v1003_v29 = vpop.f32.mrf.mxu0  ;;  %v1376_v37 = vadd.f32 %v3177_v57, %v1121_v62  ;;  %v1692_v57 = vmax.f32 %v1594_v39, 0.0  ;;  %v2551_v62 = vld [vmem:[%s3006_s5 + $0xe4] sm:$0xf0] }
  0xf1   : > { %v1258_v32 = vadd.f32 %v1257_v41, %v1003_v29  ;;  %v2340_v41 = vld [vmem:[%s3006_s5 + $0x250] sm:$0xf]  ;;  %v2599_v29 = vld [vmem:[%s3006_s5 + $0x264] sm:$0xf0]  ;;  %v2157_v33 = vor.u32 %v2551_v62, %v2156_v24 }
  0xf2   : > { %2900 = vst [vmem:[%s3154_s25 + $0xd8] sm:$0xff] %v2767_v27   ;;  %v1540_v49 = vmul.f32 %v3121_v2, %v1376_v37  ;;  %v2341_v56 = vor.u32 %v2597_v48, %v2340_v41 }
  0xf3   : > { %v1493_v40 = vmul.f32 %v3121_v2, %v1258_v32 }
  0xf4   : > { %v1642_v59 = vadd.f32 %v3127_v5, %v1540_v49  ;;  %v3266_v9 = vpop.f32.mrf.mxu3 }
  0xf5   : > { %v3247_v42 = vpop.f32.mrf.mxu1  ;;  %v1595_v46 = vadd.f32 %v3127_v5, %v1493_v40 }
  0xf6   : > { %v1740_v63 = vmax.f32 %v1642_v59, 0.0 }
  0xf7   : > { %v1693_v47 = vmax.f32 %v1595_v46, 0.0  ;;  %v1123_v50 = vpop.f32.mrf.mxu2 }
  0xf8   : > { %2484 = vmatmul.msk.bf16.gmra.mxu1 %vm820_vm1, %v2161_v7  ;;  %v1378_v53 = vadd.f32 %v3181_v3, %v1123_v50  ;;  %v1006_v54 = vpop.f32.mrf.mxu0 }
  0xf9   : > { %v2652_v58 = vpack.c.bf16 %v1693_v47, %v1692_v57  ;;  %v1261_v0 = vadd.f32 %v3218_v60, %v1006_v54  ;;  %v2166_v60 = vld [vmem:[%s3006_s5 + $0xf8] sm:$0xf0]  ;;  %2510 = vmatmul.msk.bf16.gmra.mxu3 %vm820_vm1, %v2369_v19 }
  0xfa   : > { %v1541_v61 = vmul.f32 %v3121_v2, %v1378_v53  ;;  %v2169_v22 = vor.u32 %v2552_v13, %v2166_v60  ;;  %v2554_v53 = vld [vmem:[%s3006_s5 + $0x104] sm:$0xf] }
  0xfb   : > { %2877 = vst [vmem:[%s3154_s25 + $0x20] sm:$0xff] %v2652_v58   ;;  %1045 = vmatmul.bf16.gmra.mxu0 %v2149_v51  ;;  %v1494_v8 = vmul.f32 %v3121_v2, %v1261_v0  ;;  %v2374_v58 = vld [vmem:[%s3006_s5 + $0x298] sm:$0xf0] }
  0xfc   : > { %v1643_v1 = vadd.f32 %v3127_v5, %v1541_v61  ;;  %1165 = vmatmul.bf16.gmra.mxu2 %v2341_v56  ;;  %v3286_v34 = vpop.f32.mrf.mxu3  ;;  %v2604_v56 = vld [vmem:[%s3006_s5 + $0x294] sm:$0xf] }
  0xfd   : > { %v1267_v3 = vpop.f32.mrf.mxu1  ;;  %v1596_v20 = vadd.f32 %v3127_v5, %v1494_v8  ;;  %v2377_v61 = vor.u32 %v2604_v56, %v2374_v58  ;;  %v2164_v8 = vld [vmem:[%s3006_s5 + $0xf0] sm:$0xf] }
  0xfe   : > { %v1741_v4 = vmax.f32 %v1643_v1, 0.0 }
  0xff   : > { %v1126_v28 = vpop.f32.mrf.mxu2 }
 0x100   : > { %v2772_v10 = vpack.c.bf16 %v1741_v4, %v1740_v63  ;;  %v1008_v11 = vpop.f32.mrf.mxu0  ;;  %v1381_v17 = vadd.f32 %v3200_v30, %v1126_v28  ;;  %v1694_v30 = vmax.f32 %v1596_v20, 0.0  ;;  %v2553_v28 = vld [vmem:[%s3006_s5 + $0xf4] sm:$0xf0] }
 0x101   : > { %v1263_v14 = vadd.f32 %v1262_v36, %v1008_v11  ;;  %v2348_v36 = vld [vmem:[%s3006_s5 + $0x260] sm:$0xf]  ;;  %v2601_v11 = vld [vmem:[%s3006_s5 + $0x274] sm:$0xf0]  ;;  %v2165_v15 = vor.u32 %v2553_v28, %v2164_v8 }
 0x102   : > { %2901 = vst [vmem:[%s3154_s25 + $0xe0] sm:$0xff] %v2772_v10   ;;  %v1542_v31 = vmul.f32 %v3121_v2, %v1381_v17  ;;  %v2349_v39 = vor.u32 %v2599_v29, %v2348_v36 }
 0x103   : > { %v1495_v21 = vmul.f32 %v3121_v2, %v1263_v14 }
 0x104   : > { %v1644_v7 = vadd.f32 %v3127_v5, %v1542_v31  ;;  %v3295_v47 = vpop.f32.mrf.mxu3 }
 0x105   : > { %v3276_v23 = vpop.f32.mrf.mxu1  ;;  %v1597_v27 = vadd.f32 %v3127_v5, %v1495_v21 }
 0x106   : > { %v1742_v41 = vmax.f32 %v1644_v7, 0.0 }
 0x107   : > { %v1695_v18 = vmax.f32 %v1597_v27, 0.0  ;;  %v1128_v32 = vpop.f32.mrf.mxu2 }
 0x108   : > { %2485 = vmatmul.msk.bf16.gmra.mxu1 %vm820_vm1, %v2169_v22  ;;  %v1383_v37 = vadd.f32 %v3208_v45, %v1128_v32  ;;  %v1011_v38 = vpop.f32.mrf.mxu0 }
 0x109   : > { %v2657_v40 = vpack.c.bf16 %v1695_v18, %v1694_v30  ;;  %v1266_v44 = vadd.f32 %v3247_v42, %v1011_v38  ;;  %v2174_v42 = vld [vmem:[%s3006_s5 + $0x108] sm:$0xf0]  ;;  %2511 = vmatmul.msk.bf16.gmra.mxu3 %vm820_vm1, %v2377_v61 }
 0x10a   : > { %v1543_v43 = vmul.f32 %v3121_v2, %v1383_v37  ;;  %v2177_v63 = vor.u32 %v2554_v53, %v2174_v42  ;;  %v2556_v37 = vld [vmem:[%s3006_s5 + $0x114] sm:$0xf] }
 0x10b   : > { %2878 = vst [vmem:[%s3154_s25 + $0x28] sm:$0xff] %v2657_v40   ;;  %1050 = vmatmul.bf16.gmra.mxu0 %v2157_v33  ;;  %v1496_v49 = vmul.f32 %v3121_v2, %v1266_v44  ;;  %v2382_v40 = vld [vmem:[%s3006_s5 + $0x2a8] sm:$0xf0] }
 0x10c   : > { %v1645_v46 = vadd.f32 %v3127_v5, %v1543_v43  ;;  %1170 = vmatmul.bf16.gmra.mxu2 %v2349_v39  ;;  %v3315_v16 = vpop.f32.mrf.mxu3  ;;  %v2606_v39 = vld [vmem:[%s3006_s5 + $0x2a4] sm:$0xf] }
 0x10d   : > { %v1272_v45 = vpop.f32.mrf.mxu1  ;;  %v1598_v0 = vadd.f32 %v3127_v5, %v1496_v49  ;;  %v2385_v43 = vor.u32 %v2606_v39, %v2382_v40  ;;  %v2172_v49 = vld [vmem:[%s3006_s5 + $0x100] sm:$0xf] }
 0x10e   : > { %v1743_v48 = vmax.f32 %v1645_v46, 0.0 }
 0x10f   : > { %v1131_v57 = vpop.f32.mrf.mxu2 }
 0x110   : > { %v2777_v50 = vpack.c.bf16 %v1743_v48, %v1742_v41  ;;  %v1013_v51 = vpop.f32.mrf.mxu0  ;;  %v1386_v59 = vadd.f32 %v3228_v12, %v1131_v57  ;;  %v1696_v12 = vmax.f32 %v1598_v0, 0.0  ;;  %v2555_v57 = vld [vmem:[%s3006_s5 + $0x104] sm:$0xf0] }
 0x111   : > { %v1268_v54 = vadd.f32 %v1267_v3, %v1013_v51  ;;  %v2356_v3 = vld [vmem:[%s3006_s5 + $0x270] sm:$0xf]  ;;  %v2603_v51 = vld [vmem:[%s3006_s5 + $0x284] sm:$0xf0]  ;;  %v2173_v56 = vor.u32 %v2555_v57, %v2172_v49 }
 0x112   : > { %2902 = vst [vmem:[%s3154_s25 + $0xe8] sm:$0xff] %v2777_v50   ;;  %v1544_v13 = vmul.f32 %v3121_v2, %v1386_v59  ;;  %v2357_v20 = vor.u32 %v2601_v11, %v2356_v3 }
 0x113   : > { %v1497_v1 = vmul.f32 %v3121_v2, %v1268_v54 }
 0x114   : > { %v1646_v22 = vadd.f32 %v3127_v5, %v1544_v13  ;;  %v3324_v18 = vpop.f32.mrf.mxu3 }
 0x115   : > { %v3305_v4 = vpop.f32.mrf.mxu1  ;;  %v1599_v10 = vadd.f32 %v3127_v5, %v1497_v1 }
 0x116   : > { %v1744_v36 = vmax.f32 %v1646_v22, 0.0 }
 0x117   : > { %v1697_v60 = vmax.f32 %v1599_v10, 0.0  ;;  %v1133_v14 = vpop.f32.mrf.mxu2 }
 0x118   : > { %2486 = vmatmul.msk.bf16.gmra.mxu1 %vm820_vm1, %v2177_v63  ;;  %v1388_v17 = vadd.f32 %v3237_v25, %v1133_v14  ;;  %v1016_v19 = vpop.f32.mrf.mxu0 }
 0x119   : > { %v2662_v21 = vpack.c.bf16 %v1697_v60, %v1696_v12  ;;  %v1271_v62 = vadd.f32 %v3276_v23, %v1016_v19  ;;  %v2182_v23 = vld [vmem:[%s3006_s5 + $0x118] sm:$0xf0]  ;;  %2512 = vmatmul.msk.bf16.gmra.mxu3 %vm820_vm1, %v2385_v43 }
 0x11a   : > { %v1545_v24 = vmul.f32 %v3121_v2, %v1388_v17  ;;  %v2185_v41 = vor.u32 %v2556_v37, %v2182_v23  ;;  %v2558_v17 = vld [vmem:[%s3006_s5 + $0x124] sm:$0xf] }
 0x11b   : > { %2879 = vst [vmem:[%s3154_s25 + $0x30] sm:$0xff] %v2662_v21   ;;  %1055 = vmatmul.bf16.gmra.mxu0 %v2165_v15  ;;  %v1498_v31 = vmul.f32 %v3121_v2, %v1271_v62  ;;  %v2390_v21 = vld [vmem:[%s3006_s5 + $0x2b8] sm:$0xf0] }
 0x11c   : > { %v1647_v27 = vadd.f32 %v3127_v5, %v1545_v24  ;;  %1175 = vmatmul.bf16.gmra.mxu2 %v2357_v20  ;;  %v3344_v58 = vpop.f32.mrf.mxu3  ;;  %v2608_v20 = vld [vmem:[%s3006_s5 + $0x2b4] sm:$0xf] }
 0x11d   : > { %v1277_v25 = vpop.f32.mrf.mxu1  ;;  %v1600_v44 = vadd.f32 %v3127_v5, %v1498_v31  ;;  %v2393_v24 = vor.u32 %v2608_v20, %v2390_v21  ;;  %v2180_v31 = vld [vmem:[%s3006_s5 + $0x110] sm:$0xf] }
 0x11e   : > { %v1745_v29 = vmax.f32 %v1647_v27, 0.0 }
 0x11f   : > { %v1136_v30 = vpop.f32.mrf.mxu2 }
 0x120   : > { %v2782_v32 = vpack.c.bf16 %v1745_v29, %v1744_v36  ;;  %v1018_v33 = vpop.f32.mrf.mxu0  ;;  %v1391_v7 = vadd.f32 %v3257_v52, %v1136_v30  ;;  %v1698_v52 = vmax.f32 %v1600_v44, 0.0  ;;  %v2557_v30 = vld [vmem:[%s3006_s5 + $0x114] sm:$0xf0] }
 0x121   : > { %v1273_v38 = vadd.f32 %v1272_v45, %v1018_v33  ;;  %v2364_v45 = vld [vmem:[%s3006_s5 + $0x280] sm:$0xf]  ;;  %v2605_v33 = vld [vmem:[%s3006_s5 + $0x294] sm:$0xf0]  ;;  %v2181_v39 = vor.u32 %v2557_v30, %v2180_v31 }
 0x122   : > { %2903 = vst [vmem:[%s3154_s25 + $0xf0] sm:$0xff] %v2782_v32   ;;  %v1546_v53 = vmul.f32 %v3121_v2, %v1391_v7  ;;  %v2365_v0 = vor.u32 %v2603_v51, %v2364_v45 }
 0x123   : > { %v1499_v46 = vmul.f32 %v3121_v2, %v1273_v38 }
 0x124   : > { %v1648_v63 = vadd.f32 %v3127_v5, %v1546_v53  ;;  %v3353_v60 = vpop.f32.mrf.mxu3 }
 0x125   : > { %v3334_v48 = vpop.f32.mrf.mxu1  ;;  %v1601_v50 = vadd.f32 %v3127_v5, %v1499_v46 }
 0x126   : > { %v1746_v3 = vmax.f32 %v1648_v63, 0.0 }
 0x127   : > { %v1699_v42 = vmax.f32 %v1601_v50, 0.0  ;;  %v1138_v54 = vpop.f32.mrf.mxu2 }
 0x128   : > { %2487 = vmatmul.msk.bf16.gmra.mxu1 %vm820_vm1, %v2185_v41  ;;  %v1393_v59 = vadd.f32 %v3266_v9, %v1138_v54  ;;  %v1021_v61 = vpop.f32.mrf.mxu0 }
 0x129   : > { %v2667_v1 = vpack.c.bf16 %v1699_v42, %v1698_v52  ;;  %v1276_v28 = vadd.f32 %v3305_v4, %v1021_v61  ;;  %v2190_v4 = vld [vmem:[%s3006_s5 + $0x128] sm:$0xf0]  ;;  %2513 = vmatmul.msk.bf16.gmra.mxu3 %vm820_vm1, %v2393_v24 }
 0x12a   : > { %v1547_v8 = vmul.f32 %v3121_v2, %v1393_v59  ;;  %v2193_v36 = vor.u32 %v2558_v17, %v2190_v4  ;;  %v2560_v59 = vld [vmem:[%s3006_s5 + $0x134] sm:$0xf] }
 0x12b   : > { %2880 = vst [vmem:[%s3154_s25 + $0x38] sm:$0xff] %v2667_v1   ;;  %1060 = vmatmul.bf16.gmra.mxu0 %v2173_v56  ;;  %v1500_v13 = vmul.f32 %v3121_v2, %v1276_v28  ;;  %v2398_v1 = vld [vmem:[%s3006_s5 + $0x2c8] sm:$0xf0] }
 0x12c   : > { %v1649_v10 = vadd.f32 %v3127_v5, %v1547_v8  ;;  %1180 = vmatmul.bf16.gmra.mxu2 %v2365_v0  ;;  %v3373_v40 = vpop.f32.mrf.mxu3  ;;  %v2610_v0 = vld [vmem:[%s3006_s5 + $0x2c4] sm:$0xf] }
 0x12d   : > { %v1282_v9 = vpop.f32.mrf.mxu1  ;;  %v1602_v62 = vadd.f32 %v3127_v5, %v1500_v13  ;;  %v2401_v8 = vor.u32 %v2610_v0, %v2398_v1  ;;  %v2188_v13 = vld [vmem:[%s3006_s5 + $0x120] sm:$0xf] }
 0x12e   : > { %v1747_v11 = vmax.f32 %v1649_v10, 0.0 }
 0x12f   : > { %v1141_v12 = vpop.f32.mrf.mxu2 }
 0x130   : > { %v2787_v14 = vpack.c.bf16 %v1747_v11, %v1746_v3  ;;  %v1023_v15 = vpop.f32.mrf.mxu0  ;;  %v1396_v22 = vadd.f32 %v3286_v34, %v1141_v12  ;;  %v1700_v34 = vmax.f32 %v1602_v62, 0.0  ;;  %v2559_v12 = vld [vmem:[%s3006_s5 + $0x124] sm:$0xf0] }
 0x131   : > { %v1278_v19 = vadd.f32 %v1277_v25, %v1023_v15  ;;  %v2372_v25 = vld [vmem:[%s3006_s5 + $0x290] sm:$0xf]  ;;  %v2607_v15 = vld [vmem:[%s3006_s5 + $0x2a4] sm:$0xf0]  ;;  %v2189_v20 = vor.u32 %v2559_v12, %v2188_v13 }
 0x132   : > { %2904 = vst [vmem:[%s3154_s25 + $0xf8] sm:$0xff] %v2787_v14   ;;  %v1548_v37 = vmul.f32 %v3121_v2, %v1396_v22  ;;  %v2373_v44 = vor.u32 %v2605_v33, %v2372_v25 }
 0x133   : > { %v1501_v27 = vmul.f32 %v3121_v2, %v1278_v19 }
 0x134   : > { %v1650_v41 = vadd.f32 %v3127_v5, %v1548_v37  ;;  %v3382_v42 = vpop.f32.mrf.mxu3 }
 0x135   : > { %v3363_v29 = vpop.f32.mrf.mxu1  ;;  %v1603_v32 = vadd.f32 %v3127_v5, %v1501_v27 }
 0x136   : > { %v1748_v45 = vmax.f32 %v1650_v41, 0.0 }
 0x137   : > { %v1701_v23 = vmax.f32 %v1603_v32, 0.0  ;;  %v1143_v38 = vpop.f32.mrf.mxu2 }
 0x138   : > { %2488 = vmatmul.msk.bf16.gmra.mxu1 %vm820_vm1, %v2193_v36  ;;  %v1398_v7 = vadd.f32 %v3295_v47, %v1143_v38  ;;  %v1026_v43 = vpop.f32.mrf.mxu0 }
 0x139   : > { %v2672_v46 = vpack.c.bf16 %v1701_v23, %v1700_v34  ;;  %v1281_v57 = vadd.f32 %v3334_v48, %v1026_v43  ;;  %v2198_v48 = vld [vmem:[%s3006_s5 + $0x138] sm:$0xf0]  ;;  %2514 = vmatmul.msk.bf16.gmra.mxu3 %vm820_vm1, %v2401_v8 }
 0x13a   : > { %v1549_v49 = vmul.f32 %v3121_v2, %v1398_v7  ;;  %v2201_v3 = vor.u32 %v2560_v59, %v2198_v48  ;;  %v2562_v7 = vld [vmem:[%s3006_s5 + $0x144] sm:$0xf] }
 0x13b   : > { %2881 = vst [vmem:[%s3154_s25 + $0x40] sm:$0xff] %v2672_v46   ;;  %1065 = vmatmul.bf16.gmra.mxu0 %v2181_v39  ;;  %v1502_v53 = vmul.f32 %v3121_v2, %v1281_v57  ;;  %v2406_v46 = vld [vmem:[%s3006_s5 + $0x2d8] sm:$0xf0] }
 0x13c   : > { %v1651_v50 = vadd.f32 %v3127_v5, %v1549_v49  ;;  %1185 = vmatmul.bf16.gmra.mxu2 %v2373_v44  ;;  %v3402_v21 = vpop.f32.mrf.mxu3  ;;  %v2612_v44 = vld [vmem:[%s3006_s5 + $0x2d4] sm:$0xf] }
 0x13d   : > { %v1287_v47 = vpop.f32.mrf.mxu1  ;;  %v1604_v28 = vadd.f32 %v3127_v5, %v1502_v53  ;;  %v2409_v49 = vor.u32 %v2612_v44, %v2406_v46  ;;  %v2196_v53 = vld [vmem:[%s3006_s5 + $0x130] sm:$0xf] }
 0x13e   : > { %v1749_v51 = vmax.f32 %v1651_v50, 0.0 }
 0x13f   : > { %v1146_v52 = vpop.f32.mrf.mxu2 }
 0x140   : > { %v2792_v54 = vpack.c.bf16 %v1749_v51, %v1748_v45  ;;  %v1028_v56 = vpop.f32.mrf.mxu0  ;;  %v1401_v63 = vadd.f32 %v3315_v16, %v1146_v52  ;;  %v1702_v16 = vmax.f32 %v1604_v28, 0.0  ;;  %v2561_v52 = vld [vmem:[%s3006_s5 + $0x134] sm:$0xf0] }
 0x141   : > { %v1283_v61 = vadd.f32 %v1282_v9, %v1028_v56  ;;  %v2380_v9 = vld [vmem:[%s3006_s5 + $0x2a0] sm:$0xf]  ;;  %v2609_v56 = vld [vmem:[%s3006_s5 + $0x2b4] sm:$0xf0]  ;;  %v2197_v0 = vor.u32 %v2561_v52, %v2196_v53 }
 0x142   : > { %2905 = vst [vmem:[%s3154_s25 + $0x100] sm:$0xff] %v2792_v54   ;;  %v1550_v17 = vmul.f32 %v3121_v2, %v1401_v63  ;;  %v2381_v62 = vor.u32 %v2607_v15, %v2380_v9 }
 0x143   : > { %v1503_v10 = vmul.f32 %v3121_v2, %v1283_v61 }
 0x144   : > { %v1652_v36 = vadd.f32 %v3127_v5, %v1550_v17  ;;  %v3411_v23 = vpop.f32.mrf.mxu3 }
 0x145   : > { %v3392_v11 = vpop.f32.mrf.mxu1  ;;  %v1605_v14 = vadd.f32 %v3127_v5, %v1503_v10 }
 0x146   : > { %v1750_v25 = vmax.f32 %v1652_v36, 0.0 }
 0x147   : > { %v1703_v4 = vmax.f32 %v1605_v14, 0.0  ;;  %v1148_v19 = vpop.f32.mrf.mxu2 }
 0x148   : > { %2489 = vmatmul.msk.bf16.gmra.mxu1 %vm820_vm1, %v2201_v3  ;;  %v1403_v22 = vadd.f32 %v3324_v18, %v1148_v19  ;;  %v1031_v24 = vpop.f32.mrf.mxu0 }
 0x149   : > { %v2677_v27 = vpack.c.bf16 %v1703_v4, %v1702_v16  ;;  %v1286_v30 = vadd.f32 %v3363_v29, %v1031_v24  ;;  %v2206_v29 = vld [vmem:[%s3006_s5 + $0x148] sm:$0xf0]  ;;  %2515 = vmatmul.msk.bf16.gmra.mxu3 %vm820_vm1, %v2409_v49 }
 0x14a   : > { %v1551_v31 = vmul.f32 %v3121_v2, %v1403_v22  ;;  %v2209_v45 = vor.u32 %v2562_v7, %v2206_v29  ;;  %v2564_v22 = vld [vmem:[%s3006_s5 + $0x154] sm:$0xf] }
 0x14b   : > { %2882 = vst [vmem:[%s3154_s25 + $0x48] sm:$0xff] %v2677_v27   ;;  %1070 = vmatmul.bf16.gmra.mxu0 %v2189_v20  ;;  %v1504_v37 = vmul.f32 %v3121_v2, %v1286_v30  ;;  %v2414_v27 = vld [vmem:[%s3006_s5 + $0x2e8] sm:$0xf0] }
 0x14c   : > { %v1653_v32 = vadd.f32 %v3127_v5, %v1551_v31  ;;  %1190 = vmatmul.bf16.gmra.mxu2 %v2381_v62  ;;  %v3431_v1 = vpop.f32.mrf.mxu3  ;;  %v2614_v62 = vld [vmem:[%s3006_s5 + $0x2e4] sm:$0xf] }
 0x14d   : > { %v1292_v18 = vpop.f32.mrf.mxu1  ;;  %v1606_v57 = vadd.f32 %v3127_v5, %v1504_v37  ;;  %v2417_v31 = vor.u32 %v2614_v62, %v2414_v27  ;;  %v2204_v37 = vld [vmem:[%s3006_s5 + $0x140] sm:$0xf] }
 0x14e   : > { %v1751_v33 = vmax.f32 %v1653_v32, 0.0 }
 0x14f   : > { %v1151_v34 = vpop.f32.mrf.mxu2 }
 0x150   : > { %v2797_v38 = vpack.c.bf16 %v1751_v33, %v1750_v25  ;;  %v1033_v39 = vpop.f32.mrf.mxu0  ;;  %v1406_v41 = vadd.f32 %v3344_v58, %v1151_v34  ;;  %v1704_v58 = vmax.f32 %v1606_v57, 0.0  ;;  %v2563_v34 = vld [vmem:[%s3006_s5 + $0x144] sm:$0xf0] }
 0x151   : > { %v1288_v43 = vadd.f32 %v1287_v47, %v1033_v39  ;;  %v2388_v47 = vld [vmem:[%s3006_s5 + $0x2b0] sm:$0xf]  ;;  %v2611_v39 = vld [vmem:[%s3006_s5 + $0x2c4] sm:$0xf0]  ;;  %v2205_v44 = vor.u32 %v2563_v34, %v2204_v37 }
 0x152   : > { %2906 = vst [vmem:[%s3154_s25 + $0x108] sm:$0xff] %v2797_v38   ;;  %v1552_v59 = vmul.f32 %v3121_v2, %v1406_v41  ;;  %v2389_v28 = vor.u32 %v2609_v56, %v2388_v47 }
 0x153   : > { %v1505_v50 = vmul.f32 %v3121_v2, %v1288_v43 }
 0x154   : > { %v1654_v3 = vadd.f32 %v3127_v5, %v1552_v59  ;;  %v3440_v4 = vpop.f32.mrf.mxu3  ;;  %v3471_v59 = vld [vmem:[%s3682_s2] ss:$0 sm:$0xff] }
 0x155   : > { %v3421_v51 = vpop.f32.mrf.mxu1  ;;  %v1607_v54 = vadd.f32 %v3127_v5, %v1505_v50 }
 0x156   : > { %v1752_v9 = vmax.f32 %v1654_v3, 0.0 }
 0x157   : > { %v1705_v48 = vmax.f32 %v1607_v54, 0.0  ;;  %v1153_v61 = vpop.f32.mrf.mxu2 }
 0x158   : > { %2490 = vmatmul.msk.bf16.gmra.mxu1 %vm820_vm1, %v2209_v45  ;;  %v1408_v63 = vadd.f32 %v3353_v60, %v1153_v61  ;;  %v1036_v8 = vpop.f32.mrf.mxu0 }
 0x159   : > { %v2682_v10 = vpack.c.bf16 %v1705_v48, %v1704_v58  ;;  %v1291_v12 = vadd.f32 %v3392_v11, %v1036_v8  ;;  %v2214_v11 = vld [vmem:[%s3006_s5 + $0x158] sm:$0xf0]  ;;  %2516 = vmatmul.msk.bf16.gmra.mxu3 %vm820_vm1, %v2417_v31  ;;  %v2616_v8 = vld [vmem:[%s3006_s5 + $0x2f4] sm:$0xf] }
 0x15a   : > { %v1553_v13 = vmul.f32 %v3121_v2, %v1408_v63  ;;  %v2217_v25 = vor.u32 %v2564_v22, %v2214_v11 }
 0x15b   : > { %2883 = vst [vmem:[%s3154_s25 + $0x50] sm:$0xff] %v2682_v10   ;;  %1075 = vmatmul.bf16.gmra.mxu0 %v2197_v0  ;;  %v1506_v17 = vmul.f32 %v3121_v2, %v1291_v12  ;;  %v2222_v0 = vld [vmem:[%s3006_s5 + $0x168] sm:$0xf0] }
 0x15c   : > { %v1655_v14 = vadd.f32 %v3127_v5, %v1553_v13  ;;  %1195 = vmatmul.bf16.gmra.mxu2 %v2389_v28  ;;  %v3460_v46 = vpop.f32.mrf.mxu3  ;;  %v2422_v28 = vld [vmem:[%s3006_s5 + $0x2f8] sm:$0xf0]  ;;  %v3485_v13 = vld [vmem:[%s3683_s3] ss:$0 sm:$0xff] }
 0x15d   : > { %v1297_v60 = vpop.f32.mrf.mxu1  ;;  %v1608_v30 = vadd.f32 %v3127_v5, %v1506_v17  ;;  %v2425_v3 = vor.u32 %v2616_v8, %v2422_v28  ;;  %v2565_v17 = vld [vmem:[%s3006_s5 + $0x154] sm:$0xf0] }
 0x15e   : > { %v1753_v15 = vmax.f32 %v1655_v14, 0.0 }
 0x15f   : > { %v1156_v16 = vpop.f32.mrf.mxu2 }
 0x160   : > { %v2802_v19 = vpack.c.bf16 %v1753_v15, %v1752_v9  ;;  %v1038_v20 = vpop.f32.mrf.mxu0  ;;  %v1411_v36 = vadd.f32 %v3373_v40, %v1156_v16  ;;  %v1706_v40 = vmax.f32 %v1608_v30, 0.0 }
 0x161   : > { %v1293_v24 = vadd.f32 %v1292_v18, %v1038_v20  ;;  %v2396_v18 = vld [vmem:[%s3006_s5 + $0x2c0] sm:$0xf] }
 0x162   : > { %2907 = vst [vmem:[%s3154_s25 + $0x110] sm:$0xff] %v2802_v19   ;;  %v1554_v7 = vmul.f32 %v3121_v2, %v1411_v36  ;;  %v2397_v57 = vor.u32 %v2611_v39, %v2396_v18  ;;  %v2613_v19 = vld [vmem:[%s3006_s5 + $0x2d4] sm:$0xf0] }
 0x163   : > { %v1507_v32 = vmul.f32 %v3121_v2, %v1293_v24 }
 0x164   : > { %v1656_v45 = vadd.f32 %v3127_v5, %v1554_v7  ;;  %v3474_v48 = vpop.f32.mrf.mxu3 }
 0x165   : > { %v3450_v33 = vpop.f32.mrf.mxu1  ;;  %v1609_v38 = vadd.f32 %v3127_v5, %v1507_v32 }
 0x166   : > { %v1754_v47 = vmax.f32 %v1656_v45, 0.0 }
 0x167   : > { %v1707_v29 = vmax.f32 %v1609_v38, 0.0  ;;  %v1158_v43 = vpop.f32.mrf.mxu2 }
 0x168   : > { %2491 = vmatmul.msk.bf16.gmra.mxu1 %vm820_vm1, %v2217_v25  ;;  %v1413_v41 = vadd.f32 %v3382_v42, %v1158_v43  ;;  %v1041_v49 = vpop.f32.mrf.mxu0 }
 0x169   : > { %v2687_v50 = vpack.c.bf16 %v1707_v29, %v1706_v40  ;;  %v1296_v52 = vadd.f32 %v3421_v51, %v1041_v49  ;;  %2517 = vmatmul.msk.bf16.gmra.mxu3 %vm820_vm1, %v2425_v3 }
 0x16a   : > { %v1555_v53 = vmul.f32 %v3121_v2, %v1413_v41  ;;  %v2230_v41 = vld [vmem:[%s3006_s5 + $0x178] sm:$0xf0] }
 0x16b   : > { %2884 = vst [vmem:[%s3154_s25 + $0x58] sm:$0xff] %v2687_v50   ;;  %1080 = vmatmul.bf16.gmra.mxu0 %v2205_v44  ;;  %v1508_v2 = vmul.f32 %v3471_v59, %v1296_v52  ;;  %v2568_v44 = vld [vmem:[%s3006_s5 + $0x174] sm:$0xf] }
 0x16c   : > { %v1657_v54 = vadd.f32 %v3127_v5, %v1555_v53  ;;  %1200 = vmatmul.bf16.gmra.mxu2 %v2397_v57  ;;  %v2566_v5 = vld [vmem:[%s3006_s5 + $0x164] sm:$0xf]  ;;  %v3500_v32 = vpop.f32.mrf.mxu3  ;;  %v2430_v57 = vld [vmem:[%s3006_s5 + $0x308] sm:$0xf0] }
 0x16d   : > { %v1302_v42 = vpop.f32.mrf.mxu1  ;;  %v1610_v12 = vadd.f32 %v3485_v13, %v1508_v2  ;;  %v2225_v9 = vor.u32 %v2566_v5, %v2222_v0  ;;  %v2220_v2 = vld [vmem:[%s3006_s5 + $0x160] sm:$0xf] }
 0x16e   : > { %v1755_v56 = vmax.f32 %v1657_v54, 0.0  ;;  %v2233_v54 = vor.u32 %v2568_v44, %v2230_v41 }
 0x16f   : > { %v1161_v58 = vpop.f32.mrf.mxu2  ;;  %v1708_v22 = vmax.f32 %v1610_v12, 0.0 }
 0x170   : > { %v2807_v51 = vpack.c.bf16 %v1755_v56, %v1754_v47  ;;  %v1043_v61 = vpop.f32.mrf.mxu0  ;;  %v1416_v10 = vadd.f32 %v3402_v21, %v1161_v58  ;;  %v2404_v21 = vld [vmem:[%s3006_s5 + $0x2d0] sm:$0xf]  ;;  %v2567_v58 = vld [vmem:[%s3006_s5 + $0x164] sm:$0xf0] }
 0x171   : > { %v1298_v63 = vadd.f32 %v1297_v60, %v1043_v61  ;;  %v2212_v60 = vld [vmem:[%s3006_s5 + $0x150] sm:$0xf]  ;;  %v2405_v31 = vor.u32 %v2613_v19, %v2404_v21  ;;  %v2615_v61 = vld [vmem:[%s3006_s5 + $0x2e4] sm:$0xf0]  ;;  %v2221_v8 = vor.u32 %v2567_v58, %v2220_v2 }
 0x172   : > { %2908 = vst [vmem:[%s3154_s25 + $0x118] sm:$0xff] %v2807_v51   ;;  %v1556_v20 = vmul.f32 %v3471_v59, %v1416_v10  ;;  %v2213_v62 = vor.u32 %v2565_v17, %v2212_v60  ;;  %v2412_v51 = vld [vmem:[%s3006_s5 + $0x2e0] sm:$0xf] }
 0x173   : > { %v1509_v14 = vmul.f32 %v3471_v59, %v1298_v63  ;;  %v2413_v3 = vor.u32 %v2615_v61, %v2412_v51 }
 0x174   : > { %v1658_v25 = vadd.f32 %v3485_v13, %v1556_v20  ;;  %v3516_v47 = vpop.f32.mrf.mxu3 }
 0x175   : > { %v3489_v15 = vpop.f32.mrf.mxu1  ;;  %v1611_v16 = vadd.f32 %v3485_v13, %v1509_v14 }
 0x176   : > { %v1756_v18 = vmax.f32 %v1658_v25, 0.0 }
 0x177   : > { %v1709_v11 = vmax.f32 %v1611_v16, 0.0  ;;  %v1163_v24 = vpop.f32.mrf.mxu2 }
 0x178   : > { %2492 = vmatmul.msk.bf16.gmra.mxu1 %vm820_vm1, %v2225_v9  ;;  %v1418_v27 = vadd.f32 %v3411_v23, %v1163_v24  ;;  %v1046_v36 = vpop.f32.mrf.mxu0 }
 0x179   : > { %v2692_v30 = vpack.c.bf16 %v1709_v11, %v1708_v22  ;;  %v1301_v34 = vadd.f32 %v3450_v33, %v1046_v36  ;;  %v2618_v33 = vld [vmem:[%s3006_s5 + $0x304] sm:$0xf] }
 0x17a   : > { %v1557_v37 = vmul.f32 %v3471_v59, %v1418_v27  ;;  %v2433_v45 = vor.u32 %v2618_v33, %v2430_v57 }
 0x17b   : > { %2885 = vst [vmem:[%s3154_s25 + $0x60] sm:$0xff] %v2692_v30   ;;  %1085 = vmatmul.bf16.gmra.mxu0 %v2213_v62  ;;  %v1510_v7 = vmul.f32 %v3471_v59, %v1301_v34  ;;  %v2570_v62 = vld [vmem:[%s3006_s5 + $0x184] sm:$0xf]  ;;  %v2228_v34 = vld [vmem:[%s3006_s5 + $0x170] sm:$0xf] }
 0x17c   : > { %v1659_v23 = vadd.f32 %v3485_v13, %v1557_v37  ;;  %1205 = vmatmul.bf16.gmra.mxu2 %v2405_v31  ;;  %2518 = vmatmul.msk.bf16.gmra.mxu3 %vm820_vm1, %v2433_v45  ;;  %v3532_v21 = vpop.f32.mrf.mxu3 }
 0x17d   : > { %v1307_v38 = vpop.f32.mrf.mxu1  ;;  %v1612_v53 = vadd.f32 %v3485_v13, %v1510_v7  ;;  %v2617_v7 = vld [vmem:[%s3006_s5 + $0x2f4] sm:$0xf0] }
 0x17e   : > { %v1757_v39 = vmax.f32 %v1659_v23, 0.0  ;;  %v2569_v23 = vld [vmem:[%s3006_s5 + $0x174] sm:$0xf0] }
 0x17f   : > { %v1166_v40 = vpop.f32.mrf.mxu2  ;;  %v1710_v5 = vmax.f32 %v1612_v53, 0.0 }
 0x180   : > { %v2812_v29 = vpack.c.bf16 %v1757_v39, %v1756_v18  ;;  %v1048_v43 = vpop.f32.mrf.mxu0  ;;  %v1421_v50 = vadd.f32 %v3431_v1, %v1166_v40  ;;  %v2420_v39 = vld [vmem:[%s3006_s5 + $0x2f0] sm:$0xf] }
 0x181   : > { %v1303_v49 = vadd.f32 %v1302_v42, %v1048_v43  ;;  %v2421_v33 = vor.u32 %v2617_v7, %v2420_v39 }
 0x182   : > { %2909 = vst [vmem:[%s3154_s25 + $0x120] sm:$0xff] %v2812_v29   ;;  %v1558_v1 = vmul.f32 %v3471_v59, %v1421_v50 }
 0x183   : > { %v1511_v52 = vmul.f32 %v3471_v59, %v1303_v49 }
 0x184   : > { %v1660_v14 = vadd.f32 %v3485_v13, %v1558_v1  ;;  %v3548_v44 = vpop.f32.mrf.mxu3  ;;  %v2572_v1 = vld [vmem:[%s3006_s5 + $0x194] sm:$0xf] }
 0x185   : > { %v1310_v56 = vpop.f32.mrf.mxu1  ;;  %v1613_v42 = vadd.f32 %v3485_v13, %v1511_v52 }
 0x187   : > { %v1711_v0 = vmax.f32 %v1613_v42, 0.0  ;;  %v1168_v63 = vpop.f32.mrf.mxu2 }
 0x188   : > { %2493 = vmatmul.msk.bf16.gmra.mxu1 %vm820_vm1, %v2233_v54  ;;  %v1423_v28 = vadd.f32 %v3440_v4, %v1168_v63  ;;  %v1051_v10 = vpop.f32.mrf.mxu0  ;;  %v1758_v4 = vmax.f32 %v1660_v14, 0.0  ;;  %v2428_v14 = vld [vmem:[%s3006_s5 + $0x300] sm:$0xf] }
 0x189   : > { %v2697_v12 = vpack.c.bf16 %v1711_v0, %v1710_v5  ;;  %v1306_v60 = vadd.f32 %v3489_v15, %v1051_v10  ;;  %v2238_v15 = vld [vmem:[%s3006_s5 + $0x188] sm:$0xf0]  ;;  %v2246_v5 = vld [vmem:[%s3006_s5 + $0x198] sm:$0xf0] }
 0x18a   : > { %v1559_v9 = vmul.f32 %v3471_v59, %v1423_v28  ;;  %v2241_v25 = vor.u32 %v2570_v62, %v2238_v15  ;;  %v2249_v10 = vor.u32 %v2572_v1, %v2246_v5 }
 0x18b   : > { %2886 = vst [vmem:[%s3154_s25 + $0x68] sm:$0xff] %v2697_v12   ;;  %1090 = vmatmul.bf16.gmra.mxu0 %v2221_v8  ;;  %v1512_v20 = vmul.f32 %v3471_v59, %v1306_v60 }
 0x18c   : > { %v1661_v17 = vadd.f32 %v3485_v13, %v1559_v9  ;;  %1210 = vmatmul.bf16.gmra.mxu2 %v2413_v3  ;;  %v3558_v63 = vpop.f32.mrf.mxu3  ;;  %v2619_v9 = vld [vmem:[%s3006_s5 + $0x304] sm:$0xf0] }
 0x18d   : > { %v1312_v16 = vpop.f32.mrf.mxu1  ;;  %v1614_v31 = vadd.f32 %v3485_v13, %v1512_v20  ;;  %v2429_v20 = vor.u32 %v2619_v9, %v2428_v14 }
 0x18e   : > { %v1759_v19 = vmax.f32 %v1661_v17, 0.0 }
 0x18f   : > { %v1171_v22 = vpop.f32.mrf.mxu2  ;;  %v1712_v29 = vmax.f32 %v1614_v31, 0.0 }
 0x190   : > { %v2817_v11 = vpack.c.bf16 %v1759_v19, %v1758_v4  ;;  %v1053_v24 = vpop.f32.mrf.mxu0  ;;  %v1426_v36 = vadd.f32 %v3460_v46, %v1171_v22  ;;  %v2229_v46 = vor.u32 %v2569_v23, %v2228_v34 }
 0x191   : > { %v1308_v27 = vadd.f32 %v1307_v38, %v1053_v24 }
 0x192   : > { %2910 = vst [vmem:[%s3154_s25 + $0x128] sm:$0xff] %v2817_v11   ;;  %v1560_v40 = vmul.f32 %v3471_v59, %v1426_v36 }
 0x193   : > { %v1513_v30 = vmul.f32 %v3471_v59, %v1308_v27 }
 0x194   : > { %v1662_v50 = vadd.f32 %v3485_v13, %v1560_v40  ;;  %v1442_v15 = vpop.f32.mrf.mxu3 }
 0x195   : > { %v1315_v37 = vpop.f32.mrf.mxu1  ;;  %v1615_v18 = vadd.f32 %v3485_v13, %v1513_v30 }
 0x196   : > { %v1760_v2 = vmax.f32 %v1662_v50, 0.0 }
 0x197   : > { %v1713_v38 = vmax.f32 %v1615_v18, 0.0  ;;  %v1173_v43 = vpop.f32.mrf.mxu2 }
 0x198   : > { %2494 = vmatmul.msk.bf16.gmra.mxu1 %vm820_vm1, %v2241_v25  ;;  %v1428_v41 = vadd.f32 %v3474_v48, %v1173_v43  ;;  %v1056_v49 = vpop.f32.mrf.mxu0 }
 0x199   : > { %v2702_v57 = vpack.c.bf16 %v1713_v38, %v1712_v29  ;;  %v1311_v53 = vadd.f32 %v1310_v56, %v1056_v49 }
 0x19a   : > { %v1561_v45 = vmul.f32 %v3471_v59, %v1428_v41 }
 0x19b   : > { %2887 = vst [vmem:[%s3154_s25 + $0x70] sm:$0xff] %v2702_v57   ;;  %1095 = vmatmul.bf16.gmra.mxu0 %v2229_v46  ;;  %v1514_v48 = vmul.f32 %v3471_v59, %v1311_v53 }
 0x19c   : > { %v1663_v52 = vadd.f32 %v3485_v13, %v1561_v45  ;;  %1215 = vmatmul.bf16.gmra.mxu2 %v2421_v33  ;;  %v1445_v38 = vpop.f32.mrf.mxu3 }
 0x19d   : > { %v1317_v54 = vpop.f32.mrf.mxu1  ;;  %v1616_v8 = vadd.f32 %v3485_v13, %v1514_v48 }
 0x19e   : > { %v1761_v58 = vmax.f32 %v1663_v52, 0.0 }
 0x19f   : > { %v1176_v42 = vpop.f32.mrf.mxu2  ;;  %v1714_v17 = vmax.f32 %v1616_v8, 0.0 }
 0x1a0   : > { %v2822_v51 = vpack.c.bf16 %v1761_v58, %v1760_v2  ;;  %v1058_v61 = vpop.f32.mrf.mxu0  ;;  %v1431_v56 = vadd.f32 %v3500_v32, %v1176_v42 }
 0x1a1   : > { %v1313_v0 = vadd.f32 %v1312_v16, %v1058_v61 }
 0x1a2   : > { %2911 = vst [vmem:[%s3154_s25 + $0x130] sm:$0xff] %v2822_v51   ;;  %v1562_v60 = vmul.f32 %v3471_v59, %v1431_v56 }
 0x1a3   : > { %v1515_v28 = vmul.f32 %v3471_v59, %v1313_v0 }
 0x1a4   : > { %v1664_v11 = vadd.f32 %v3485_v13, %v1562_v60  ;;  %v1447_v51 = vpop.f32.mrf.mxu3 }
 0x1a5   : > { %v1320_v3 = vpop.f32.mrf.mxu1  ;;  %v1617_v12 = vadd.f32 %v3485_v13, %v1515_v28 }
 0x1a6   : > { %v1762_v31 = vmax.f32 %v1664_v11, 0.0 }
 0x1a7   : > { %v1715_v16 = vmax.f32 %v1617_v12, 0.0  ;;  %v1178_v4 = vpop.f32.mrf.mxu2 }
 0x1a8   : > { %2495 = vmatmul.msk.bf16.gmra.mxu1 %vm820_vm1, %v2249_v10  ;;  %v1433_v32 = vadd.f32 %v3516_v47, %v1178_v4  ;;  %v1061_v19 = vpop.f32.mrf.mxu0 }
 0x1a9   : > { %v2707_v22 = vpack.c.bf16 %v1715_v16, %v1714_v17  ;;  %v1316_v62 = vadd.f32 %v1315_v37, %v1061_v19 }
 0x1aa   : > { %v1563_v24 = vmul.f32 %v3471_v59, %v1433_v32 }
 0x1ab   : > { %2888 = vst [vmem:[%s3154_s25 + $0x78] sm:$0xff] %v2707_v22   ;;  %v1516_v25 = vmul.f32 %v3471_v59, %v1316_v62 }
 0x1ac   : > { %v1665_v27 = vadd.f32 %v3485_v13, %v1563_v24  ;;  %1220 = vmatmul.bf16.gmra.mxu2 %v2429_v20  ;;  %v1450_v16 = vpop.f32.mrf.mxu3 }
 0x1ad   : > { %v1322_v36 = vpop.f32.mrf.mxu1  ;;  %v1618_v7 = vadd.f32 %v3485_v13, %v1516_v25 }
 0x1ae   : > { %v1763_v30 = vmax.f32 %v1665_v27, 0.0 }
 0x1af   : > { %v1181_v47 = vpop.f32.mrf.mxu2  ;;  %v1716_v46 = vmax.f32 %v1618_v7, 0.0 }
 0x1b0   : > { %v2827_v34 = vpack.c.bf16 %v1763_v30, %v1762_v31  ;;  %v1063_v23 = vpop.f32.mrf.mxu0  ;;  %v1436_v39 = vadd.f32 %v3532_v21, %v1181_v47 }
 0x1b1   : > { %v1318_v18 = vadd.f32 %v1317_v54, %v1063_v23 }
 0x1b2   : > { %2912 = vst [vmem:[%s3154_s25 + $0x138] sm:$0xff] %v2827_v34   ;;  %v1564_v43 = vmul.f32 %v3471_v59, %v1436_v39 }
 0x1b3   : > { %v1517_v37 = vmul.f32 %v3471_v59, %v1318_v18 }
 0x1b4   : > { %v1666_v21 = vadd.f32 %v3485_v13, %v1564_v43  ;;  %v1452_v47 = vpop.f32.mrf.mxu3 }
 0x1b5   : > { %v1325_v40 = vpop.f32.mrf.mxu1  ;;  %v1619_v29 = vadd.f32 %v3485_v13, %v1517_v37 }
 0x1b6   : > { %v1764_v2 = vmax.f32 %v1666_v21, 0.0 }
 0x1b7   : > { %v1717_v41 = vmax.f32 %v1619_v29, 0.0  ;;  %v1183_v49 = vpop.f32.mrf.mxu2 }
 0x1b8   : > { %v1438_v33 = vadd.f32 %v3548_v44, %v1183_v49  ;;  %v1066_v57 = vpop.f32.mrf.mxu0 }
 0x1b9   : > { %v2712_v50 = vpack.c.bf16 %v1717_v41, %v1716_v46  ;;  %v1321_v53 = vadd.f32 %v1320_v3, %v1066_v57 }
 0x1ba   : > { %v1565_v45 = vmul.f32 %v3471_v59, %v1438_v33 }
 0x1bb   : > { %2889 = vst [vmem:[%s3154_s25 + $0x80] sm:$0xff] %v2712_v50   ;;  %v1518_v48 = vmul.f32 %v3471_v59, %v1321_v53 }
 0x1bc   : > { %v1667_v52 = vadd.f32 %v3485_v13, %v1565_v45  ;;  %v1455_v57 = vpop.f32.mrf.mxu3 }
 0x1bd   : > { %v1327_v54 = vpop.f32.mrf.mxu1  ;;  %v1620_v0 = vadd.f32 %v3485_v13, %v1518_v48 }
 0x1be   : > { %v1765_v58 = vmax.f32 %v1667_v52, 0.0 }
 0x1bf   : > { %v1186_v42 = vpop.f32.mrf.mxu2  ;;  %v1718_v3 = vmax.f32 %v1620_v0, 0.0 }
 0x1c0   : > { %v2832_v61 = vpack.c.bf16 %v1765_v58, %v1764_v2  ;;  %v1068_v44 = vpop.f32.mrf.mxu0  ;;  %v1441_v5 = vadd.f32 %v3558_v63, %v1186_v42 }
 0x1c1   : > { %v1323_v1 = vadd.f32 %v1322_v36, %v1068_v44 }
 0x1c2   : > { %2913 = vst [vmem:[%s3154_s25 + $0x140] sm:$0xff] %v2832_v61   ;;  %v1566_v10 = vmul.f32 %v3471_v59, %v1441_v5 }
 0x1c3   : > { %v1519_v56 = vmul.f32 %v3471_v59, %v1323_v1 }
 0x1c4   : > { %v1668_v4 = vadd.f32 %v3485_v13, %v1566_v10 }
 0x1c5   : > { %v1330_v8 = vpop.f32.mrf.mxu1  ;;  %v1621_v28 = vadd.f32 %v3485_v13, %v1519_v56  ;;  %v1457_v56 = vpop.f32.mrf.mxu3 }
 0x1c6   : > { %v1766_v22 = vmax.f32 %v1668_v4, 0.0 }
 0x1c7   : > { %v1719_v12 = vmax.f32 %v1621_v28, 0.0  ;;  %v1188_v14 = vpop.f32.mrf.mxu2 }
 0x1c8   : > { %v1443_v9 = vadd.f32 %v1442_v15, %v1188_v14  ;;  %v1071_v60 = vpop.f32.mrf.mxu0 }
 0x1c9   : > { %v2717_v17 = vpack.c.bf16 %v1719_v12, %v1718_v3  ;;  %v1326_v32 = vadd.f32 %v1325_v40, %v1071_v60 }
 0x1ca   : > { %v1567_v63 = vmul.f32 %v3471_v59, %v1443_v9 }
 0x1cb   : > { %2890 = vst [vmem:[%s3154_s25 + $0x88] sm:$0xff] %v2717_v17   ;;  %v1520_v24 = vmul.f32 %v3471_v59, %v1326_v32 }
 0x1cc   : > { %v1669_v19 = vadd.f32 %v3485_v13, %v1567_v63 }
 0x1cd   : > { %v1332_v20 = vpop.f32.mrf.mxu1  ;;  %v1622_v30 = vadd.f32 %v3485_v13, %v1520_v24 }
 0x1ce   : > { %v1767_v11 = vmax.f32 %v1669_v19, 0.0 }
 0x1cf   : > { %v1191_v62 = vpop.f32.mrf.mxu2  ;;  %v1720_v39 = vmax.f32 %v1622_v30, 0.0 }
 0x1d0   : > { %v2837_v27 = vpack.c.bf16 %v1767_v11, %v1766_v22  ;;  %v1073_v15 = vpop.f32.mrf.mxu0  ;;  %v1446_v31 = vadd.f32 %v1445_v38, %v1191_v62  ;;  %v1460_v22 = vpop.f32.mrf.mxu3 }
 0x1d1   : > { %v1328_v36 = vadd.f32 %v1327_v54, %v1073_v15 }
 0x1d2   : > { %2914 = vst [vmem:[%s3154_s25 + $0x148] sm:$0xff] %v2837_v27   ;;  %v1568_v18 = vmul.f32 %v3471_v59, %v1446_v31 }
 0x1d3   : > { %v1521_v25 = vmul.f32 %v3471_v59, %v1328_v36 }
 0x1d4   : > { %v1670_v46 = vadd.f32 %v3485_v13, %v1568_v18 }
 0x1d5   : > { %v1335_v34 = vpop.f32.mrf.mxu1  ;;  %v1623_v23 = vadd.f32 %v3485_v13, %v1521_v25 }
 0x1d6   : > { %v1768_v50 = vmax.f32 %v1670_v46, 0.0 }
 0x1d7   : > { %v1721_v7 = vmax.f32 %v1623_v23, 0.0  ;;  %v1193_v37 = vpop.f32.mrf.mxu2 }
 0x1d8   : > { %v1448_v40 = vadd.f32 %v1447_v51, %v1193_v37  ;;  %v1076_v29 = vpop.f32.mrf.mxu0  ;;  %v1462_v37 = vpop.f32.mrf.mxu3 }
 0x1d9   : > { %v2722_v43 = vpack.c.bf16 %v1721_v7, %v1720_v39  ;;  %v1331_v41 = vadd.f32 %v1330_v8, %v1076_v29 }
 0x1da   : > { %v1569_v38 = vmul.f32 %v3471_v59, %v1448_v40 }
 0x1db   : > { %2891 = vst [vmem:[%s3154_s25 + $0x90] sm:$0xff] %v2722_v43   ;;  %v1522_v45 = vmul.f32 %v3471_v59, %v1331_v41 }
 0x1dc   : > { %v1671_v49 = vadd.f32 %v3485_v13, %v1569_v38 }
 0x1dd   : > { %v1337_v33 = vpop.f32.mrf.mxu1  ;;  %v1624_v48 = vadd.f32 %v3485_v13, %v1522_v45 }
 0x1de   : > { %v1769_v21 = vmax.f32 %v1671_v49, 0.0 }
 0x1df   : > { %v1196_v53 = vpop.f32.mrf.mxu2  ;;  %v1722_v1 = vmax.f32 %v1624_v48, 0.0 }
 0x1e0   : > { %v2842_v52 = vpack.c.bf16 %v1769_v21, %v1768_v50  ;;  %v1078_v54 = vpop.f32.mrf.mxu0  ;;  %v1451_v58 = vadd.f32 %v1450_v16, %v1196_v53 }
 0x1e1   : > { %v1333_v2 = vadd.f32 %v1332_v20, %v1078_v54  ;;  %v1465_v54 = vpop.f32.mrf.mxu3 }
 0x1e2   : > { %2915 = vst [vmem:[%s3154_s25 + $0x150] sm:$0xff] %v2842_v52   ;;  %v1570_v44 = vmul.f32 %v3471_v59, %v1451_v58 }
 0x1e3   : > { %v1523_v42 = vmul.f32 %v3471_v59, %v1333_v2 }
 0x1e4   : > { %v1672_v3 = vadd.f32 %v3485_v13, %v1570_v44 }
 0x1e5   : > { %v1340_v51 = vpop.f32.mrf.mxu1  ;;  %v1625_v61 = vadd.f32 %v3485_v13, %v1523_v42 }
 0x1e6   : > { %v1770_v17 = vmax.f32 %v1672_v3, 0.0 }
 0x1e7   : > { %v1723_v5 = vmax.f32 %v1625_v61, 0.0  ;;  %v1198_v0 = vpop.f32.mrf.mxu2 }
 0x1e8   : > { %v1453_v8 = vadd.f32 %v1452_v47, %v1198_v0  ;;  %v1081_v28 = vpop.f32.mrf.mxu0 }
 0x1e9   : > { %v2727_v10 = vpack.c.bf16 %v1723_v5, %v1722_v1  ;;  %v1336_v14 = vadd.f32 %v1335_v34, %v1081_v28 }
 0x1ea   : > { %v1571_v12 = vmul.f32 %v3471_v59, %v1453_v8 }
 0x1eb   : > { %2892 = vst [vmem:[%s3154_s25 + $0x98] sm:$0xff] %v2727_v10   ;;  %v1524_v4 = vmul.f32 %v3471_v59, %v1336_v14  ;;  %v1467_v14 = vpop.f32.mrf.mxu3 }
 0x1ec   : > { %v1673_v9 = vadd.f32 %v3485_v13, %v1571_v12 }
 0x1ed   : > { %v1342_v60 = vpop.f32.mrf.mxu1  ;;  %v1626_v24 = vadd.f32 %v3485_v13, %v1524_v4 }
 0x1ee   : > { %v1771_v16 = vmax.f32 %v1673_v9, 0.0 }
 0x1ef   : > { %v1201_v63 = vpop.f32.mrf.mxu2  ;;  %v1724_v31 = vmax.f32 %v1626_v24, 0.0 }
 0x1f0   : > { %v2847_v32 = vpack.c.bf16 %v1771_v16, %v1770_v17  ;;  %v1083_v19 = vpop.f32.mrf.mxu0  ;;  %v1456_v11 = vadd.f32 %v1455_v57, %v1201_v63 }
 0x1f1   : > { %v1338_v20 = vadd.f32 %v1337_v33, %v1083_v19 }
 0x1f2   : > { %2916 = vst [vmem:[%s3154_s25 + $0x158] sm:$0xff] %v2847_v32   ;;  %v1572_v36 = vmul.f32 %v3471_v59, %v1456_v11 }
 0x1f3   : > { %v1525_v62 = vmul.f32 %v3471_v59, %v1338_v20 }
 0x1f4   : > { %v1674_v18 = vadd.f32 %v3485_v13, %v1572_v36 }
 0x1f5   : > { %v1345_v27 = vpop.f32.mrf.mxu1  ;;  %v1627_v15 = vadd.f32 %v3485_v13, %v1525_v62 }
 0x1f6   : > { %v1772_v43 = vmax.f32 %v1674_v18, 0.0 }
 0x1f7   : > { %v1725_v30 = vmax.f32 %v1627_v15, 0.0  ;;  %v1203_v25 = vpop.f32.mrf.mxu2 }
 0x1f8   : > { %v1458_v47 = vadd.f32 %v1457_v56, %v1203_v25  ;;  %v1086_v34 = vpop.f32.mrf.mxu0 }
 0x1f9   : > { %v2732_v23 = vpack.c.bf16 %v1725_v30, %v1724_v31  ;;  %v1341_v7 = vadd.f32 %v1340_v51, %v1086_v34  ;;  %v1470_v31 = vpop.f32.mrf.mxu3 }
 0x1fa   : > { %v1573_v39 = vmul.f32 %v3471_v59, %v1458_v47 }
 0x1fb   : > { %2893 = vst [vmem:[%s3154_s25 + $0xa0] sm:$0xff] %v2732_v23   ;;  %v1526_v38 = vmul.f32 %v3471_v59, %v1341_v7 }
 0x1fc   : > { %v1675_v40 = vadd.f32 %v3485_v13, %v1573_v39 }
 0x1fd   : > { %v1347_v29 = vpop.f32.mrf.mxu1  ;;  %v1628_v21 = vadd.f32 %v3485_v13, %v1526_v38 }
 0x1fe   : > { %v1773_v46 = vmax.f32 %v1675_v40, 0.0 }
 0x1ff   : > { %v1206_v41 = vpop.f32.mrf.mxu2  ;;  %v1726_v58 = vmax.f32 %v1628_v21, 0.0 }
 0x200   : > { %v2852_v49 = vpack.c.bf16 %v1773_v46, %v1772_v43  ;;  %v1088_v33 = vpop.f32.mrf.mxu0  ;;  %v1461_v50 = vadd.f32 %v1460_v22, %v1206_v41 }
 0x201   : > { %v1343_v57 = vadd.f32 %v1342_v60, %v1088_v33  ;;  %v1472_v21 = vpop.f32.mrf.mxu3 }
 0x202   : > { %2917 = vst [vmem:[%s3154_s25 + $0x160] sm:$0xff] %v2852_v49   ;;  %v1574_v2 = vmul.f32 %v3471_v59, %v1461_v50 }
 0x203   : > { %v1527_v45 = vmul.f32 %v3471_v59, %v1343_v57 }
 0x204   : > { %v1676_v1 = vadd.f32 %v3485_v13, %v1574_v2 }
 0x205   : > { %v1350_v53 = vpop.f32.mrf.mxu1  ;;  %v1629_v52 = vadd.f32 %v3485_v13, %v1527_v45 }
 0x206   : > { %v1774_v28 = vmax.f32 %v1676_v1, 0.0 }
 0x207   : > { %v1727_v48 = vmax.f32 %v1629_v52, 0.0  ;;  %v1208_v42 = vpop.f32.mrf.mxu2 }
 0x208   : > { %v1463_v51 = vadd.f32 %v1462_v37, %v1208_v42  ;;  %v1091_v61 = vpop.f32.mrf.mxu0 }
 0x209   : > { %v2737_v44 = vpack.c.bf16 %v1727_v48, %v1726_v58  ;;  %v1346_v0 = vadd.f32 %v1345_v27, %v1091_v61 }
 0x20a   : > { %v1575_v5 = vmul.f32 %v3471_v59, %v1463_v51 }
 0x20b   : > { %2894 = vst [vmem:[%s3154_s25 + $0xa8] sm:$0xff] %v2737_v44   ;;  %v1528_v3 = vmul.f32 %v3471_v59, %v1346_v0 }
 0x20c   : > { %v1677_v56 = vadd.f32 %v3485_v13, %v1575_v5 }
 0x20d   : > { %v1352_v8 = vpop.f32.mrf.mxu1  ;;  %v1630_v4 = vadd.f32 %v3485_v13, %v1528_v3 }
 0x20e   : > { %v1775_v10 = vmax.f32 %v1677_v56, 0.0 }
 0x20f   : > { %v1211_v12 = vpop.f32.mrf.mxu2  ;;  %v1728_v22 = vmax.f32 %v1630_v4, 0.0 }
 0x210   : > { %v2857_v9 = vpack.c.bf16 %v1775_v10, %v1774_v28  ;;  %v1093_v60 = vpop.f32.mrf.mxu0  ;;  %v1466_v16 = vadd.f32 %v1465_v54, %v1211_v12  ;;  %v1475_v28 = vpop.f32.mrf.mxu3 }
 0x211   : > { %v1348_v17 = vadd.f32 %v1347_v29, %v1093_v60 }
 0x212   : > { %2918 = vst [vmem:[%s3154_s25 + $0x168] sm:$0xff] %v2857_v9   ;;  %v1576_v20 = vmul.f32 %v3471_v59, %v1466_v16 }
 0x213   : > { %v1529_v63 = vmul.f32 %v3471_v59, %v1348_v17 }
 0x214   : > { %v1678_v30 = vadd.f32 %v3485_v13, %v1576_v20 }
 0x215   : > { %v1355_v32 = vpop.f32.mrf.mxu1  ;;  %v1631_v19 = vadd.f32 %v3485_v13, %v1529_v63 }
 0x216   : > { %v1356_v24 = vadd.f32 %v1355_v32, %v3129_v6  ;;  %v1776_v6 = vmax.f32 %v1678_v30, 0.0 }
 0x217   : > { %v1729_v11 = vmax.f32 %v1631_v19, 0.0  ;;  %v1213_v62 = vpop.f32.mrf.mxu2 }
 0x218   : > { %v1468_v27 = vadd.f32 %v1467_v14, %v1213_v62  ;;  %v1096_v15 = vpop.f32.mrf.mxu0  ;;  %v1532_v47 = vmul.f32 %v3471_v59, %v1356_v24 }
 0x219   : > { %v2742_v36 = vpack.c.bf16 %v1729_v11, %v1728_v22  ;;  %v1351_v34 = vadd.f32 %v1350_v53, %v1096_v15 }
 0x21a   : > { %v1577_v25 = vmul.f32 %v3471_v59, %v1468_v27  ;;  %v1634_v37 = vadd.f32 %v3485_v13, %v1532_v47 }
 0x21b   : > { %2895 = vst [vmem:[%s3154_s25 + $0xb0] sm:$0xff] %v2742_v36   ;;  %v1530_v40 = vmul.f32 %v3471_v59, %v1351_v34 }
 0x21c   : > { %v1679_v23 = vadd.f32 %v3485_v13, %v1577_v25  ;;  %v1732_v57 = vmax.f32 %v1634_v37, 0.0 }
 0x21d   : > { %v1357_v18 = vpop.f32.mrf.mxu1 }
 0x21e   : > { %v1358_v39 = vadd.f32 %v1357_v18, %v3146_v26  ;;  %v1777_v7 = vmax.f32 %v1679_v23, 0.0  ;;  %v1632_v26 = vadd.f32 %v3485_v13, %v1530_v40 }
 0x21f   : > { %v1216_v43 = vpop.f32.mrf.mxu2 }
 0x220   : > { %v1533_v29 = vmul.f32 %v3471_v59, %v1358_v39  ;;  %v2862_v46 = vpack.c.bf16 %v1777_v7, %v1776_v6  ;;  %v1098_v38 = vpop.f32.mrf.mxu0  ;;  %v1471_v33 = vadd.f32 %v1470_v31, %v1216_v43  ;;  %v1730_v58 = vmax.f32 %v1632_v26, 0.0 }
 0x221   : > { %v1353_v49 = vadd.f32 %v1352_v8, %v1098_v38 }
 0x222   : > { %v1635_v41 = vadd.f32 %v3485_v13, %v1533_v29  ;;  %2919 = vst [vmem:[%s3154_s25 + $0x170] sm:$0xff] %v2862_v46   ;;  %v1578_v2 = vmul.f32 %v3471_v59, %v1471_v33 }
 0x223   : > { %v1531_v45 = vmul.f32 %v3471_v59, %v1353_v49 }
 0x224   : > { %v1733_v50 = vmax.f32 %v1635_v41, 0.0  ;;  %v1680_v1 = vadd.f32 %v3485_v13, %v1578_v2 }
 0x225   : > { %v1360_v53 = vpop.f32.mrf.mxu1  ;;  %v1633_v54 = vadd.f32 %v3485_v13, %v1531_v45 }
 0x226   : > { %v2752_v52 = vpack.c.bf16 %v1733_v50, %v1732_v57  ;;  %v1361_v42 = vadd.f32 %v1360_v53, %v3158_v35  ;;  %v1778_v3 = vmax.f32 %v1680_v1, 0.0 }
 0x227   : > { %v1731_v48 = vmax.f32 %v1633_v54, 0.0  ;;  %v1218_v51 = vpop.f32.mrf.mxu2 }
 0x228   : > { %2897 = vst [vmem:[%s3154_s25 + $0xc0] sm:$0xff] %v2752_v52   ;;  %v1473_v61 = vadd.f32 %v1472_v21, %v1218_v51  ;;  %v1534_v0 = vmul.f32 %v3471_v59, %v1361_v42 }
 0x229   : > { %v2747_v44 = vpack.c.bf16 %v1731_v48, %v1730_v58 }
 0x22a   : > { %v1579_v5 = vmul.f32 %v3471_v59, %v1473_v61  ;;  %v1636_v12 = vadd.f32 %v3485_v13, %v1534_v0 }
 0x22b   : > { %2896 = vst [vmem:[%s3154_s25 + $0xb8] sm:$0xff] %v2747_v44  }
 0x22c   : > { %v1681_v56 = vadd.f32 %v3485_v13, %v1579_v5  ;;  %v1734_v4 = vmax.f32 %v1636_v12, 0.0 }
 0x22d   : > { %v1362_v8 = vpop.f32.mrf.mxu1 }
 0x22e   : > { %v1363_v10 = vadd.f32 %v1362_v8, %v3174_v55  ;;  %v1779_v35 = vmax.f32 %v1681_v56, 0.0  ;;  %v1477_v55 = vpop.f32.mrf.mxu3 }
 0x22f   : > { %v1221_v9 = vpop.f32.mrf.mxu2 }
 0x230   : > { %v1535_v14 = vmul.f32 %v3471_v59, %v1363_v10  ;;  %v2867_v60 = vpack.c.bf16 %v1779_v35, %v1778_v3  ;;  %v1476_v16 = vadd.f32 %v1475_v28, %v1221_v9 }
 0x232   : > { %v1637_v17 = vadd.f32 %v3485_v13, %v1535_v14  ;;  %2920 = vst [vmem:[%s3154_s25 + $0x178] sm:$0xff] %v2867_v60   ;;  %v1580_v19 = vmul.f32 %v3471_v59, %v1476_v16 }
 0x234   : > { %v1735_v63 = vmax.f32 %v1637_v17, 0.0  ;;  %v1682_v11 = vadd.f32 %v3485_v13, %v1580_v19 }
 0x236   : > { %v2757_v32 = vpack.c.bf16 %v1735_v63, %v1734_v4  ;;  %v1780_v27 = vmax.f32 %v1682_v11, 0.0 }
 0x237   : > { %v1223_v20 = vpop.f32.mrf.mxu2 }
 0x238   : > { %2898 = vst [vmem:[%s3154_s25 + $0xc8] sm:$0xff] %v2757_v32   ;;  %v1478_v22 = vadd.f32 %v1477_v55, %v1223_v20 }
 0x23a   : > { %v1581_v24 = vmul.f32 %v3471_v59, %v1478_v22 }
 0x23c   : > { %v1683_v62 = vadd.f32 %v3485_v13, %v1581_v24 }
 0x23e   : > { %v1781_v15 = vmax.f32 %v1683_v62, 0.0 }
 0x240   : > { %v2872_v36 = vpack.c.bf16 %v1781_v15, %v1780_v27 }
 0x242   : > { %2921 = vst [vmem:[%s3154_s25 + $0x180] sm:$0xff] %v2872_v36  }
 0x243 PF: > { %s14_s15 = sadd.s32 1, %s2950_s15  }
 0x244   : > { %p11_p4 = scmp.ge.s32.totalorder %s14_s15, 4  }
 0x246   :  { %13 = sbr.rel (!%p11_p4) target bundleno = 1 (0x1), region = 66 }

// kernel: forward.10
= control target key start
LH: loop header
LB: loop body
LE: loop exit
PB: predicated region body
PF: predicated region fallthrough
CT: control target
= control target key end

     0   :  { %s950_s15 = smov 0   ;;  %s1108_s0 = inlined_call_operand.vmem [shape: bf16[512,128], index: 0, kind: input, shape index: {}]   ;;  %s1109_s1 = inlined_call_operand.vmem [shape: f32[1,128], index: 1, kind: input, shape index: {}]   ;;  %s1110_s2 = inlined_call_operand.vmem [shape: f32[1,128], index: 2, kind: input, shape index: {}]   ;;  %s1111_s3 = inlined_call_operand.vmem [shape: bf16[128,128], index: 3, kind: input, shape index: {}]   ;;  %s1112_s4 = inlined_call_operand.vmem [shape: bf16[512,128], index: 4, kind: output, shape index: {}]  }
   0x1 LB: > { %s658_s16 = sadd.s32 4294967295, %s923_s15   ;;  %p662_p0 = scmp.ge.s32.totalorder %s923_s15, 1  ;;  %s923_s15 = sphi %s950_s15, %s14_s15  }
   0x2   : > { %p163_p1 = scmp.lt.s32.totalorder %s923_s15, 3 }
   0x4   : > { %p164_p2 = pnand %p662_p0, %p163_p1 }
   0x5   : > { %s663_s19 = sshll.u32 (!%p164_p2), %s658_s16, 5 }
   0x6   : > { %167 = sbr.rel (%p164_p2) target bundleno = 236 (0xec), region = 36  ;;  %p190_p3 = scmp.lt.s32.totalorder (!%p164_p2), %s663_s19, 63 }
   0xb   : > { %v708_v0 = vld [vmem:[%s1111_s3 + $0x38] sm:$0xff]  ;;  %v707_v1 = vld [vmem:[%s1111_s3 + $0x30] sm:$0xff]  ;;  %s1114_s19 = smov (!%p190_p3, %s663_s19), 63  ;;  %v706_v2 = vld [vmem:[%s1111_s3 + $0x28] sm:$0xff] }
   0xc   : > { %449 = vmatpush.bf16.msra.mxu0 %v708_v0  ;;  %883 = vmatpush.bf16.msra.mxu1 %v708_v0  ;;  %s664_s22 = sshll.u32 %s1114_s19, 2  ;;  %v705_v5 = vld [vmem:[%s1111_s3 + $0x20] sm:$0xff]  ;;  %v704_v15 = vld [vmem:[%s1111_s3 + $0x18] sm:$0xff]  ;;  %v703_v25 = vld [vmem:[%s1111_s3 + $0x10] sm:$0xff] }
   0xd   : > { %884 = vmatpush.bf16.msra.mxu2 %v708_v0  ;;  %885 = vmatpush.bf16.msra.mxu3 %v708_v0  ;;  %s975_s27 = scalar_lea.vmem %s1108_s0, %s664_s22  ;;  %v987_v10 = vld [vmem:[%s1109_s1] ss:$0 sm:$0xff]  ;;  %v702_v34 = vld [vmem:[%s1111_s3 + $0x8] sm:$0xff]  ;;  %s1087_s20 = scalar_lea.vmem %s1112_s4, %s664_s22 }
   0xe   : > { %v710_v3 = vld [vmem:[%s975_s27] sm:$0xff]   ;;  %v853_v43 = vld [vmem:[%s975_s27 + $0x8] sm:$0xff]  }
   0xf   : > { %v856_v4 = vld [vmem:[%s975_s27 + $0x20] sm:$0xff]   ;;  %v711_v8 = vunpack.c.l.bf16 %v710_v3  ;;  %v712_v9 = vunpack.c.h.bf16 %v710_v3  ;;  %v857_v47 = vld [vmem:[%s975_s27 + $0x28] sm:$0xff]   ;;  %v715_v52 = vunpack.c.l.bf16 %v853_v43  ;;  %v716_v53 = vunpack.c.h.bf16 %v853_v43 }
  0x10   : > { %450 = vmatpush.bf16.msra.mxu0 %v707_v1  ;;  %886 = vmatpush.bf16.msra.mxu1 %v707_v1  ;;  %v860_v6 = vld [vmem:[%s975_s27 + $0x40] sm:$0xff]   ;;  %v727_v11 = vunpack.c.l.bf16 %v856_v4  ;;  %v728_v12 = vunpack.c.h.bf16 %v856_v4  ;;  %v861_v48 = vld [vmem:[%s975_s27 + $0x48] sm:$0xff]   ;;  %v731_v55 = vunpack.c.l.bf16 %v857_v47  ;;  %v732_v56 = vunpack.c.h.bf16 %v857_v47 }
  0x11   : > { %887 = vmatpush.bf16.msra.mxu2 %v707_v1  ;;  %888 = vmatpush.bf16.msra.mxu3 %v707_v1  ;;  %v864_v7 = vld [vmem:[%s975_s27 + $0x60] sm:$0xff]   ;;  %v743_v13 = vunpack.c.l.bf16 %v860_v6  ;;  %v744_v14 = vunpack.c.h.bf16 %v860_v6  ;;  %v269_v18 = vmul.f32 %v987_v10, %v711_v8  ;;  %v270_v19 = vmul.f32 %v987_v10, %v712_v9  ;;  %v865_v49 = vld [vmem:[%s975_s27 + $0x68] sm:$0xff]  }
  0x12   : > { %v759_v16 = vunpack.c.l.bf16 %v864_v7  ;;  %v760_v17 = vunpack.c.h.bf16 %v864_v7  ;;  %v997_v20 = vld [vmem:[%s1110_s2] ss:$0 sm:$0xff]  ;;  %v277_v21 = vmul.f32 %v987_v10, %v727_v11  ;;  %v278_v22 = vmul.f32 %v987_v10, %v728_v12 }
  0x13   : > { %v285_v23 = vmul.f32 %v987_v10, %v743_v13  ;;  %v286_v24 = vmul.f32 %v987_v10, %v744_v14  ;;  %v305_v28 = vadd.f32 %v997_v20, %v269_v18  ;;  %v306_v29 = vadd.f32 %v997_v20, %v270_v19  ;;  %v701_v44 = vld [vmem:[%s1111_s3] sm:$0xff]  ;;  %v854_v19 = vld [vmem:[%s975_s27 + $0x10] sm:$0xff]  }
  0x14   : > { %451 = vmatpush.bf16.msra.mxu0 %v706_v2  ;;  %889 = vmatpush.bf16.msra.mxu1 %v706_v2  ;;  %v293_v26 = vmul.f32 %v987_v10, %v759_v16  ;;  %v294_v27 = vmul.f32 %v987_v10, %v760_v17  ;;  %v313_v30 = vadd.f32 %v997_v20, %v277_v21  ;;  %v747_v57 = vunpack.c.l.bf16 %v861_v48  ;;  %v858_v21 = vld [vmem:[%s975_s27 + $0x30] sm:$0xff]  }
  0x15   : > { %890 = vmatpush.bf16.msra.mxu2 %v706_v2  ;;  %891 = vmatpush.bf16.msra.mxu3 %v706_v2  ;;  %v314_v31 = vadd.f32 %v997_v20, %v278_v22  ;;  %v321_v32 = vadd.f32 %v997_v20, %v285_v23  ;;  %v322_v33 = vadd.f32 %v997_v20, %v286_v24  ;;  %v337_v37 = vmax.f32 %v305_v28, 0.0 }
  0x16   : > { %v329_v35 = vadd.f32 %v997_v20, %v293_v26  ;;  %v330_v36 = vadd.f32 %v997_v20, %v294_v27  ;;  %v338_v38 = vmax.f32 %v306_v29, 0.0  ;;  %v345_v39 = vmax.f32 %v313_v30, 0.0  ;;  %v862_v26 = vld [vmem:[%s975_s27 + $0x50] sm:$0xff]  }
  0x17   : > { %v346_v40 = vmax.f32 %v314_v31, 0.0  ;;  %v353_v41 = vmax.f32 %v321_v32, 0.0  ;;  %v354_v42 = vmax.f32 %v322_v33, 0.0  ;;  %v748_v59 = vunpack.c.h.bf16 %v861_v48  ;;  %v866_v27 = vld [vmem:[%s975_s27 + $0x70] sm:$0xff]  }
  0x18   : > { %452 = vmatpush.bf16.msra.mxu0 %v705_v5  ;;  %892 = vmatpush.bf16.msra.mxu1 %v705_v5  ;;  %v361_v45 = vmax.f32 %v329_v35, 0.0  ;;  %v362_v46 = vmax.f32 %v330_v36, 0.0  ;;  %v369_v50 = vpack.c.bf16 %v338_v38, %v337_v37  ;;  %v763_v60 = vunpack.c.l.bf16 %v865_v49 }
  0x19   : > { %893 = vmatpush.bf16.msra.mxu2 %v705_v5  ;;  %894 = vmatpush.bf16.msra.mxu3 %v705_v5  ;;  %v373_v51 = vpack.c.bf16 %v346_v40, %v345_v39  ;;  %v377_v54 = vpack.c.bf16 %v354_v42, %v353_v41  ;;  %v764_v61 = vunpack.c.h.bf16 %v865_v49  ;;  %v271_v62 = vmul.f32 %v987_v10, %v715_v52 }
  0x1a   : > { %v381_v58 = vpack.c.bf16 %v362_v46, %v361_v45  ;;  %v272_v63 = vmul.f32 %v987_v10, %v716_v53  ;;  %v279_v0 = vmul.f32 %v987_v10, %v731_v55  ;;  %v280_v1 = vmul.f32 %v987_v10, %v732_v56 }
  0x1b   : > { %v287_v2 = vmul.f32 %v987_v10, %v747_v57  ;;  %v288_v3 = vmul.f32 %v987_v10, %v748_v59  ;;  %v295_v4 = vmul.f32 %v987_v10, %v763_v60  ;;  %v296_v5 = vmul.f32 %v987_v10, %v764_v61 }
  0x1c   : > { %453 = vmatpush.bf16.msra.mxu0 %v704_v15  ;;  %895 = vmatpush.bf16.msra.mxu1 %v704_v15  ;;  %v307_v6 = vadd.f32 %v997_v20, %v271_v62  ;;  %v308_v7 = vadd.f32 %v997_v20, %v272_v63  ;;  %v315_v8 = vadd.f32 %v997_v20, %v279_v0  ;;  %v719_v28 = vunpack.c.l.bf16 %v854_v19  ;;  %v855_v62 = vld [vmem:[%s975_s27 + $0x18] sm:$0xff]  }
  0x1d   : > { %896 = vmatpush.bf16.msra.mxu2 %v704_v15  ;;  %897 = vmatpush.bf16.msra.mxu3 %v704_v15  ;;  %v316_v9 = vadd.f32 %v997_v20, %v280_v1  ;;  %v323_v11 = vadd.f32 %v997_v20, %v287_v2  ;;  %v324_v12 = vadd.f32 %v997_v20, %v288_v3  ;;  %v720_v29 = vunpack.c.h.bf16 %v854_v19  ;;  %v859_v1 = vld [vmem:[%s975_s27 + $0x38] sm:$0xff]  }
  0x1e   : > { %v331_v13 = vadd.f32 %v997_v20, %v295_v4  ;;  %v332_v14 = vadd.f32 %v997_v20, %v296_v5  ;;  %v339_v15 = vmax.f32 %v307_v6, 0.0  ;;  %v340_v16 = vmax.f32 %v308_v7, 0.0  ;;  %v863_v2 = vld [vmem:[%s975_s27 + $0x58] sm:$0xff]  }
  0x1f   : > { %v347_v17 = vmax.f32 %v315_v8, 0.0  ;;  %v348_v18 = vmax.f32 %v316_v9, 0.0  ;;  %v355_v22 = vmax.f32 %v323_v11, 0.0  ;;  %v356_v23 = vmax.f32 %v324_v12, 0.0  ;;  %v867_v3 = vld [vmem:[%s975_s27 + $0x78] sm:$0xff]  }
  0x20   : > { %454 = vmatpush.bf16.msra.mxu0 %v703_v25  ;;  %898 = vmatpush.bf16.msra.mxu1 %v703_v25  ;;  %v363_v24 = vmax.f32 %v331_v13, 0.0  ;;  %v735_v30 = vunpack.c.l.bf16 %v858_v21  ;;  %v736_v31 = vunpack.c.h.bf16 %v858_v21  ;;  %v370_v32 = vpack.c.bf16 %v340_v16, %v339_v15 }
  0x21   : > { %899 = vmatpush.bf16.msra.mxu2 %v703_v25  ;;  %900 = vmatpush.bf16.msra.mxu3 %v703_v25  ;;  %v364_v25 = vmax.f32 %v332_v14, 0.0  ;;  %v374_v33 = vpack.c.bf16 %v348_v18, %v347_v17  ;;  %v752_v35 = vunpack.c.h.bf16 %v862_v26  ;;  %v378_v36 = vpack.c.bf16 %v356_v23, %v355_v22 }
  0x22   : > { %v767_v38 = vunpack.c.l.bf16 %v866_v27  ;;  %v768_v39 = vunpack.c.h.bf16 %v866_v27  ;;  %v273_v40 = vmul.f32 %v987_v10, %v719_v28  ;;  %v274_v41 = vmul.f32 %v987_v10, %v720_v29 }
  0x23   : > { %v382_v37 = vpack.c.bf16 %v364_v25, %v363_v24  ;;  %v281_v42 = vmul.f32 %v987_v10, %v735_v30  ;;  %v282_v43 = vmul.f32 %v987_v10, %v736_v31  ;;  %v290_v45 = vmul.f32 %v987_v10, %v752_v35 }
  0x24   : > { %455 = vmatpush.bf16.msra.mxu0 %v702_v34  ;;  %901 = vmatpush.bf16.msra.mxu1 %v702_v34  ;;  %v297_v46 = vmul.f32 %v987_v10, %v767_v38  ;;  %v298_v47 = vmul.f32 %v987_v10, %v768_v39  ;;  %v309_v48 = vadd.f32 %v997_v20, %v273_v40  ;;  %v723_v6 = vunpack.c.l.bf16 %v855_v62 }
  0x25   : > { %902 = vmatpush.bf16.msra.mxu2 %v702_v34  ;;  %903 = vmatpush.bf16.msra.mxu3 %v702_v34  ;;  %v751_v34 = vunpack.c.l.bf16 %v862_v26  ;;  %v310_v49 = vadd.f32 %v997_v20, %v274_v41  ;;  %v326_v53 = vadd.f32 %v997_v20, %v290_v45  ;;  %v724_v7 = vunpack.c.h.bf16 %v855_v62 }
  0x26   : > { %v334_v55 = vadd.f32 %v997_v20, %v298_v47  ;;  %v341_v56 = vmax.f32 %v309_v48, 0.0  ;;  %v739_v9 = vunpack.c.l.bf16 %v859_v1  ;;  %v740_v11 = vunpack.c.h.bf16 %v859_v1 }
  0x27   : > { %v342_v57 = vmax.f32 %v310_v49, 0.0  ;;  %v358_v61 = vmax.f32 %v326_v53, 0.0  ;;  %v755_v12 = vunpack.c.l.bf16 %v863_v2  ;;  %v756_v14 = vunpack.c.h.bf16 %v863_v2 }
  0x28   : > { %456 = vmatpush.bf16.msra.mxu0 %v701_v44  ;;  %904 = vmatpush.bf16.msra.mxu1 %v701_v44  ;;  %v366_v0 = vmax.f32 %v334_v55, 0.0  ;;  %v771_v15 = vunpack.c.l.bf16 %v867_v3  ;;  %v772_v16 = vunpack.c.h.bf16 %v867_v3  ;;  %v275_v17 = vmul.f32 %v987_v10, %v723_v6 }
  0x29   : > { %905 = vmatpush.bf16.msra.mxu2 %v701_v44  ;;  %906 = vmatpush.bf16.msra.mxu3 %v701_v44  ;;  %v289_v44 = vmul.f32 %v987_v10, %v751_v34  ;;  %v371_v4 = vpack.c.bf16 %v342_v57, %v341_v56  ;;  %v276_v18 = vmul.f32 %v987_v10, %v724_v7 }
  0x2a   : > { %v283_v19 = vmul.f32 %v987_v10, %v739_v9  ;;  %v284_v21 = vmul.f32 %v987_v10, %v740_v11  ;;  %v291_v22 = vmul.f32 %v987_v10, %v755_v12  ;;  %v292_v23 = vmul.f32 %v987_v10, %v756_v14 }
  0x2b   : > { %457 = vmatmul.bf16.vlgmr.msra.gmra.mxu0 %v369_v50  ;;  %477 = vmatmul.bf16.vlgmr.msra.gmra.mxu1 %v373_v51  ;;  %v317_v50 = vadd.f32 %v997_v20, %v281_v42  ;;  %v318_v51 = vadd.f32 %v997_v20, %v282_v43  ;;  %v325_v52 = vadd.f32 %v997_v20, %v289_v44 }
  0x2c   : > { %497 = vmatmul.bf16.vlgmr.msra.gmra.mxu2 %v377_v54  ;;  %517 = vmatmul.bf16.vlgmr.msra.gmra.mxu3 %v381_v58  ;;  %v333_v54 = vadd.f32 %v997_v20, %v297_v46  ;;  %v299_v24 = vmul.f32 %v987_v10, %v771_v15  ;;  %v300_v25 = vmul.f32 %v987_v10, %v772_v16 }
  0x2d   : > { %v349_v58 = vmax.f32 %v317_v50, 0.0  ;;  %v350_v59 = vmax.f32 %v318_v51, 0.0  ;;  %v357_v60 = vmax.f32 %v325_v52, 0.0  ;;  %v311_v26 = vadd.f32 %v997_v20, %v275_v17 }
  0x2e   : > { %v365_v63 = vmax.f32 %v333_v54, 0.0  ;;  %v312_v27 = vadd.f32 %v997_v20, %v276_v18  ;;  %v319_v28 = vadd.f32 %v997_v20, %v283_v19  ;;  %v320_v29 = vadd.f32 %v997_v20, %v284_v21 }
  0x2f   : > { %v375_v5 = vpack.c.bf16 %v350_v59, %v349_v58  ;;  %v379_v8 = vpack.c.bf16 %v358_v61, %v357_v60  ;;  %v327_v30 = vadd.f32 %v997_v20, %v291_v22  ;;  %v328_v31 = vadd.f32 %v997_v20, %v292_v23 }
  0x30   : > { %v383_v13 = vpack.c.bf16 %v366_v0, %v365_v63  ;;  %v343_v34 = vmax.f32 %v311_v26, 0.0  ;;  %v344_v35 = vmax.f32 %v312_v27, 0.0  ;;  %v352_v10 = vmax.f32 %v320_v29, 0.0 }
  0x31   : > { %v360_v38 = vmax.f32 %v328_v31, 0.0 }
  0x32   : > { %v372_v41 = vpack.c.bf16 %v344_v35, %v343_v34 }
  0x3b   : > { %462 = vmatmul.bf16.gmra.mxu0 %v370_v32  ;;  %482 = vmatmul.bf16.gmra.mxu1 %v374_v33  ;;  %v335_v32 = vadd.f32 %v997_v20, %v299_v24  ;;  %v336_v33 = vadd.f32 %v997_v20, %v300_v25 }
  0x3c   : > { %502 = vmatmul.bf16.gmra.mxu2 %v378_v36  ;;  %522 = vmatmul.bf16.gmra.mxu3 %v382_v37  ;;  %v351_v36 = vmax.f32 %v319_v28, 0.0  ;;  %v359_v37 = vmax.f32 %v327_v30, 0.0 }
  0x3d   : > { %v367_v39 = vmax.f32 %v335_v32, 0.0  ;;  %v368_v40 = vmax.f32 %v336_v33, 0.0 }
  0x3e   : > { %v376_v42 = vpack.c.bf16 %v352_v10, %v351_v36  ;;  %v380_v43 = vpack.c.bf16 %v360_v38, %v359_v37 }
  0x3f   : > { %v384_v44 = vpack.c.bf16 %v368_v40, %v367_v39 }
  0x4b   : > { %467 = vmatmul.bf16.gmra.mxu0 %v371_v4  ;;  %487 = vmatmul.bf16.gmra.mxu1 %v375_v5 }
  0x4c   : > { %507 = vmatmul.bf16.gmra.mxu2 %v379_v8  ;;  %527 = vmatmul.bf16.gmra.mxu3 %v383_v13 }
  0x5b   : > { %472 = vmatmul.bf16.gmra.mxu0 %v372_v41  ;;  %492 = vmatmul.bf16.gmra.mxu1 %v376_v42 }
  0x5c   : > { %512 = vmatmul.bf16.gmra.mxu2 %v380_v43  ;;  %532 = vmatmul.bf16.gmra.mxu3 %v384_v44 }
  0xa8   : > { %v458_v45 = vpop.f32.mrf.mxu0  ;;  %v478_v46 = vpop.f32.mrf.mxu1 }
  0xaf   : > { %v498_v20 = vpop.f32.mrf.mxu2  ;;  %v518_v47 = vpop.f32.mrf.mxu3 }
  0xb0   : > { %v460_v48 = vpop.f32.mrf.mxu0  ;;  %v480_v49 = vpop.f32.mrf.mxu1 }
  0xb1   : > { %v776_v50 = vpack.c.bf16 %v460_v48, %v458_v45  ;;  %v796_v51 = vpack.c.bf16 %v480_v49, %v478_v46 }
  0xb3   : > { %777 = vst [vmem:[%s1087_s20] sm:$0xff] %v776_v50  }
  0xb4   : > { %871 = vst [vmem:[%s1087_s20 + $0x20] sm:$0xff] %v796_v51  }
  0xb7   : > { %v500_v52 = vpop.f32.mrf.mxu2  ;;  %v520_v53 = vpop.f32.mrf.mxu3 }
  0xb8   : > { %v816_v54 = vpack.c.bf16 %v500_v52, %v498_v20  ;;  %v836_v55 = vpack.c.bf16 %v520_v53, %v518_v47  ;;  %v463_v56 = vpop.f32.mrf.mxu0  ;;  %v483_v57 = vpop.f32.mrf.mxu1 }
  0xba   : > { %875 = vst [vmem:[%s1087_s20 + $0x40] sm:$0xff] %v816_v54  }
  0xbb   : > { %879 = vst [vmem:[%s1087_s20 + $0x60] sm:$0xff] %v836_v55  }
  0xbf   : > { %v503_v58 = vpop.f32.mrf.mxu2  ;;  %v523_v59 = vpop.f32.mrf.mxu3 }
  0xc0   : > { %v465_v60 = vpop.f32.mrf.mxu0  ;;  %v485_v61 = vpop.f32.mrf.mxu1 }
  0xc1   : > { %v781_v62 = vpack.c.bf16 %v465_v60, %v463_v56  ;;  %v801_v63 = vpack.c.bf16 %v485_v61, %v483_v57 }
  0xc3   : > { %868 = vst [vmem:[%s1087_s20 + $0x8] sm:$0xff] %v781_v62  }
  0xc4   : > { %872 = vst [vmem:[%s1087_s20 + $0x28] sm:$0xff] %v801_v63  }
  0xc7   : > { %v505_v0 = vpop.f32.mrf.mxu2  ;;  %v525_v1 = vpop.f32.mrf.mxu3 }
  0xc8   : > { %v821_v2 = vpack.c.bf16 %v505_v0, %v503_v58  ;;  %v841_v3 = vpack.c.bf16 %v525_v1, %v523_v59  ;;  %v468_v4 = vpop.f32.mrf.mxu0  ;;  %v488_v5 = vpop.f32.mrf.mxu1 }
  0xca   : > { %876 = vst [vmem:[%s1087_s20 + $0x48] sm:$0xff] %v821_v2  }
  0xcb   : > { %880 = vst [vmem:[%s1087_s20 + $0x68] sm:$0xff] %v841_v3  }
  0xcf   : > { %v508_v6 = vpop.f32.mrf.mxu2  ;;  %v528_v7 = vpop.f32.mrf.mxu3 }
  0xd0   : > { %v470_v8 = vpop.f32.mrf.mxu0  ;;  %v490_v9 = vpop.f32.mrf.mxu1 }
  0xd1   : > { %v786_v11 = vpack.c.bf16 %v470_v8, %v468_v4  ;;  %v806_v12 = vpack.c.bf16 %v490_v9, %v488_v5 }
  0xd3   : > { %869 = vst [vmem:[%s1087_s20 + $0x10] sm:$0xff] %v786_v11  }
  0xd4   : > { %873 = vst [vmem:[%s1087_s20 + $0x30] sm:$0xff] %v806_v12  }
  0xd7   : > { %v510_v13 = vpop.f32.mrf.mxu2  ;;  %v530_v14 = vpop.f32.mrf.mxu3 }
  0xd8   : > { %v826_v15 = vpack.c.bf16 %v510_v13, %v508_v6  ;;  %v846_v16 = vpack.c.bf16 %v530_v14, %v528_v7  ;;  %v473_v17 = vpop.f32.mrf.mxu0  ;;  %v493_v18 = vpop.f32.mrf.mxu1 }
  0xda   : > { %877 = vst [vmem:[%s1087_s20 + $0x50] sm:$0xff] %v826_v15  }
  0xdb   : > { %881 = vst [vmem:[%s1087_s20 + $0x70] sm:$0xff] %v846_v16  }
  0xdf   : > { %v513_v19 = vpop.f32.mrf.mxu2  ;;  %v533_v21 = vpop.f32.mrf.mxu3 }
  0xe0   : > { %v475_v22 = vpop.f32.mrf.mxu0  ;;  %v495_v23 = vpop.f32.mrf.mxu1 }
  0xe1   : > { %v791_v24 = vpack.c.bf16 %v475_v22, %v473_v17  ;;  %v811_v25 = vpack.c.bf16 %v495_v23, %v493_v18 }
  0xe3   : > { %870 = vst [vmem:[%s1087_s20 + $0x18] sm:$0xff] %v791_v24  }
  0xe4   : > { %874 = vst [vmem:[%s1087_s20 + $0x38] sm:$0xff] %v811_v25  }
  0xe7   : > { %v515_v26 = vpop.f32.mrf.mxu2  ;;  %v535_v27 = vpop.f32.mrf.mxu3 }
  0xe8   : > { %v831_v28 = vpack.c.bf16 %v515_v26, %v513_v19  ;;  %v851_v29 = vpack.c.bf16 %v535_v27, %v533_v21 }
  0xea   : > { %878 = vst [vmem:[%s1087_s20 + $0x58] sm:$0xff] %v831_v28  }
  0xeb   : > { %882 = vst [vmem:[%s1087_s20 + $0x78] sm:$0xff] %v851_v29  }
  0xec PF: > { %s14_s15 = sadd.s32 1, %s923_s15  }
  0xed   : > { %p11_p4 = scmp.ge.s32.totalorder %s14_s15, 4  }
  0xef   :  { %13 = sbr.rel (!%p11_p4) target bundleno = 1 (0x1), region = 66 }

// kernel: forward.8
= control target key start
LH: loop header
LB: loop body
LE: loop exit
PB: predicated region body
PF: predicated region fallthrough
CT: control target
= control target key end

     0   :  { %s4070_s27 = smov 0   ;;  %s5638_s0 = inlined_call_operand.vmem [shape: bf16[2,256,128], index: 0, kind: input, shape index: {}]   ;;  %s5639_s1 = inlined_call_operand.vmem [shape: f32[256,1], index: 1, kind: input, shape index: {}]   ;;  %s5640_s2 = inlined_call_operand.vmem [shape: f32[1,128], index: 2, kind: input, shape index: {}]   ;;  %s5641_s3 = inlined_call_operand.vmem [shape: f32[1,128], index: 3, kind: input, shape index: {}]   ;;  %s5642_s4 = inlined_call_operand.vmem [shape: bf16[128,128], index: 4, kind: input, shape index: {}]   ;;  %s5643_s5 = inlined_call_operand.vmem [shape: f32[1,128], index: 5, kind: input, shape index: {}]   ;;  %s5644_s6 = inlined_call_operand.vmem [shape: f32[1,128], index: 6, kind: input, shape index: {}]   ;;  %s5645_s7 = inlined_call_operand.vmem [shape: bf16[9,128,128], index: 7, kind: input, shape index: {}]   ;;  %s5646_s8 = inlined_call_operand.vmem [shape: bf16[2,256,128], index: 8, kind: output, shape index: {}]  }
   0x1 LB: > { %s3265_s28 = sadd.s32 4294967295, %s4020_s27   ;;  %p3269_p0 = scmp.ge.s32.totalorder %s4020_s27, 1  ;;  %s4020_s27 = sphi %s4070_s27, %s18_s27  }
   0x2   : > { %p262_p1 = scmp.lt.s32.totalorder %s4020_s27, 3 }
   0x4   : > { %p263_p2 = pnand %p3269_p0, %p262_p1 }
   0x6   : > { %266 = sbr.rel (%p263_p2) target bundleno = 1076 (0x434), region = 52 }
   0xb   : > { %v3733_v0 = vld [vmem:[%s5642_s4 + $0x38] sm:$0xff]  ;;  %p296_p3 = scmp.lt.s32.totalorder %s3265_s28, 1  ;;  %v3732_v1 = vld [vmem:[%s5642_s4 + $0x30] sm:$0xff]  ;;  %v4022_v2 = vmov 0   ;;  %v3731_v3 = vld [vmem:[%s5642_s4 + $0x28] sm:$0xff] }
   0xc   : > { %586 = vmatpush.bf16.msra.mxu0 %v3733_v0  ;;  %3980 = vmatpush.bf16.msra.mxu2 %v3733_v0  ;;  %v3730_v4 = vld [vmem:[%s5642_s4 + $0x20] sm:$0xff]  ;;  %v3729_v12 = vld [vmem:[%s5642_s4 + $0x18] sm:$0xff]  ;;  %v352_v18 = vld [vmem:[%s5639_s1 + $0x70] sm:$0xff] }
   0xd   : > { %s5992_s28 = smov (!%p296_p3, %s3265_s28), 1  ;;  %4006 = vset.pattern.permute.xlu0 %v4022_v2  ;;  %4007 = vset.pattern.permute.xlu1 %v4022_v2  ;;  %v4111_v9 = vld [vmem:[%s5640_s2] ss:$0 sm:$0xff]  ;;  %v3728_v20 = vld [vmem:[%s5642_s4 + $0x10] sm:$0xff]  ;;  %v3727_v25 = vld [vmem:[%s5642_s4 + $0x8] sm:$0xff] }
   0xe   : > { %s3724_s11 = sshll.u32 %s5992_s28, 7  ;;  %4008 = vset.pattern.permute.xlu2 %v4022_v2  ;;  %v4127_v15 = vld [vmem:[%s5641_s3] ss:$0 sm:$0xff]  ;;  %851 = vperm.xlu0 %4006, %v352_v18   ;;  %v353_v26 = vld [vmem:[%s5639_s1 + $0x78] sm:$0xff]  ;;  %v355_v44 = vld [vmem:[%s5639_s1 + $0x88] sm:$0xff] }
   0xf   : > { %s4095_s16 = scalar_lea.vmem %s5638_s0, %s3724_s11  ;;  %v354_v19 = vld [vmem:[%s5639_s1 + $0x80] sm:$0xff]  ;;  %v356_v45 = vld [vmem:[%s5639_s1 + $0x90] sm:$0xff]  ;;  %v357_v51 = vld [vmem:[%s5639_s1 + $0x98] sm:$0xff]  ;;  %s5374_s22 = scalar_lea.vmem %s5646_s8, %s3724_s11 }
  0x10   : > { %587 = vmatpush.bf16.msra.mxu0 %v3732_v1  ;;  %3981 = vmatpush.bf16.msra.mxu2 %v3732_v1  ;;  %v4101_v5 = vld [vmem:[%s4095_s16] sm:$0xff]   ;;  %v4155_v31 = vld [vmem:[%s4095_s16 + $0x8] sm:$0xff]   ;;  %v341_v52 = vld [vmem:[%s5639_s1 + $0x18] sm:$0xff] }
  0x11   : > { %5743 = vst [vmem:[#allocation3_spill] sm:$0xff] %v4101_v5  ;;  %v4104_v6 = vld [vmem:[%s4095_s16 + $0x40] sm:$0xff]   ;;  %v5678_v7 = vunpack.c.l.bf16 %v4101_v5  ;;  %v5677_v8 = vunpack.c.h.bf16 %v4101_v5  ;;  %861 = vperm.xlu1 %4007, %v354_v19   ;;  %v4161_v33 = vld [vmem:[%s4095_s16 + $0x48] sm:$0xff]   ;;  %v5676_v34 = vunpack.c.l.bf16 %v4155_v31  ;;  %v5675_v35 = vunpack.c.h.bf16 %v4155_v31  ;;  %v4199_v57 = vld [vmem:[%s4095_s16 + $0x10] sm:$0xff]  }
  0x12   : > { %5744 = vst [vmem:[#allocation4_spill] sm:$0xff] %v4104_v6  ;;  %v5662_v10 = vunpack.c.l.bf16 %v4104_v6  ;;  %v5661_v11 = vunpack.c.h.bf16 %v4104_v6  ;;  %v3726_v32 = vld [vmem:[%s5642_s4] sm:$0xff]  ;;  %v5660_v38 = vunpack.c.l.bf16 %v4161_v33  ;;  %v5659_v39 = vunpack.c.h.bf16 %v4161_v33  ;;  %v4202_v58 = vld [vmem:[%s4095_s16 + $0x50] sm:$0xff]  }
  0x13   : > { %v406_v13 = vmul.f32 %v4111_v9, %v5678_v7  ;;  %v407_v14 = vmul.f32 %v4111_v9, %v5677_v8  ;;  %5745 = vst [vmem:[#allocation5_spill] sm:$0xff] %v4155_v31  ;;  %v408_v40 = vmul.f32 %v4111_v9, %v5676_v34  ;;  %v409_v41 = vmul.f32 %v4111_v9, %v5675_v35  ;;  %v338_v46 = vld [vmem:[%s5639_s1] sm:$0xff]  ;;  %v3771_v7 = vld [vmem:[%s5645_s7 + $0x128] sm:$0xff] }
  0x14   : > { %588 = vmatpush.bf16.msra.mxu0 %v3731_v3  ;;  %3982 = vmatpush.bf16.msra.mxu2 %v3731_v3  ;;  %v422_v16 = vmul.f32 %v4111_v9, %v5662_v10  ;;  %v423_v17 = vmul.f32 %v4111_v9, %v5661_v11  ;;  %5746 = vst [vmem:[#allocation6_spill] sm:$0xff] %v4161_v33  ;;  %v5674_v59 = vunpack.c.l.bf16 %v4199_v57  ;;  %v5673_v60 = vunpack.c.h.bf16 %v4199_v57 }
  0x15   : > { %v442_v21 = vadd.f32 %v4127_v15, %v406_v13  ;;  %v443_v22 = vadd.f32 %v4127_v15, %v407_v14  ;;  %v424_v42 = vmul.f32 %v4111_v9, %v5660_v38  ;;  %v425_v43 = vmul.f32 %v4111_v9, %v5659_v39  ;;  %781 = vperm.xlu2 %4008, %v338_v46   ;;  %v342_v13 = vld [vmem:[%s5639_s1 + $0x20] sm:$0xff]  ;;  %v339_v14 = vld [vmem:[%s5639_s1 + $0x8] sm:$0xff] }
  0x16   : > { %v458_v23 = vadd.f32 %v4127_v15, %v422_v16  ;;  %v459_v24 = vadd.f32 %v4127_v15, %v423_v17  ;;  %856 = vperm.xlu0 %4006, %v353_v26   ;;  %v444_v47 = vadd.f32 %v4127_v15, %v408_v40  ;;  %v445_v48 = vadd.f32 %v4127_v15, %v409_v41  ;;  %v4240_v26 = vld [vmem:[%s4095_s16 + $0x18] sm:$0xff]  }
  0x17   : > { %v474_v27 = vmax.f32 %v442_v21, 0.0  ;;  %v475_v28 = vmax.f32 %v443_v22, 0.0  ;;  %v460_v49 = vadd.f32 %v4127_v15, %v424_v42  ;;  %v461_v50 = vadd.f32 %v4127_v15, %v425_v43  ;;  %5747 = vst [vmem:[#allocation7_spill] sm:$0xff] %v4199_v57  ;;  %v340_v21 = vld [vmem:[%s5639_s1 + $0x10] sm:$0xff] }
  0x18   : > { %589 = vmatpush.bf16.msra.mxu0 %v3730_v4  ;;  %3983 = vmatpush.bf16.msra.mxu2 %v3730_v4  ;;  %v490_v29 = vmax.f32 %v458_v23, 0.0  ;;  %v491_v30 = vmax.f32 %v459_v24, 0.0  ;;  %v476_v53 = vmax.f32 %v444_v47, 0.0  ;;  %v477_v54 = vmax.f32 %v445_v48, 0.0  ;;  %5748 = vst [vmem:[#allocation8_spill] sm:$0xff] %v4202_v58 }
  0x19   : > { %v506_v36 = vpack.c.bf16 %v475_v28, %v474_v27  ;;  %866 = vperm.xlu1 %4007, %v355_v44   ;;  %v492_v55 = vmax.f32 %v460_v49, 0.0  ;;  %v493_v56 = vmax.f32 %v461_v50, 0.0  ;;  %v5658_v63 = vunpack.c.l.bf16 %v4202_v58  ;;  %5749 = vst [vmem:[#allocation9_spill] sm:$0xff] %v4240_v26  ;;  %v4243_v27 = vld [vmem:[%s4095_s16 + $0x58] sm:$0xff]   ;;  %v344_v44 = vld [vmem:[%s5639_s1 + $0x30] sm:$0xff] }
  0x1a   : > { %v514_v37 = vpack.c.bf16 %v491_v30, %v490_v29  ;;  %v507_v61 = vpack.c.bf16 %v477_v54, %v476_v53  ;;  %v5657_v0 = vunpack.c.h.bf16 %v4202_v58  ;;  %v410_v1 = vmul.f32 %v4111_v9, %v5674_v59  ;;  %5750 = vst [vmem:[#allocation10_spill] sm:$0xff] %v4243_v27  ;;  %v4272_v54 = vld [vmem:[%s4095_s16 + $0x20] sm:$0xff]  }
  0x1b   : > { %v515_v62 = vpack.c.bf16 %v493_v56, %v492_v55  ;;  %v411_v2 = vmul.f32 %v4111_v9, %v5673_v60  ;;  %v426_v3 = vmul.f32 %v4111_v9, %v5658_v63  ;;  %v5672_v29 = vunpack.c.l.bf16 %v4240_v26  ;;  %5751 = vst [vmem:[#allocation11_spill] sm:$0xff] %v4272_v54  ;;  %v4275_v55 = vld [vmem:[%s4095_s16 + $0x60] sm:$0xff]  }
  0x1c   : > { %590 = vmatpush.bf16.msra.mxu0 %v3729_v12  ;;  %3984 = vmatpush.bf16.msra.mxu2 %v3729_v12  ;;  %v427_v4 = vmul.f32 %v4111_v9, %v5657_v0  ;;  %v358_v12 = vld [vmem:[%s5639_s1 + $0xa0] sm:$0xff]  ;;  %v446_v16 = vadd.f32 %v4127_v15, %v410_v1  ;;  %5752 = vst [vmem:[#allocation12_spill] sm:$0xff] %v4275_v55  ;;  %v5670_v56 = vunpack.c.l.bf16 %v4272_v54 }
  0x1d   : > { %786 = vperm.xlu2 %4008, %v339_v14   ;;  %v447_v17 = vadd.f32 %v4127_v15, %v411_v2  ;;  %v462_v18 = vadd.f32 %v4127_v15, %v426_v3  ;;  %v412_v40 = vmul.f32 %v4111_v9, %v5672_v29  ;;  %v5654_v2 = vunpack.c.l.bf16 %v4275_v55 }
  0x1e   : > { %871 = vperm.xlu0 %4006, %v356_v45   ;;  %v463_v19 = vadd.f32 %v4127_v15, %v427_v4  ;;  %v478_v22 = vmax.f32 %v446_v16, 0.0  ;;  %v361_v45 = vld [vmem:[%s5639_s1 + $0xb8] sm:$0xff]  ;;  %v5653_v3 = vunpack.c.h.bf16 %v4275_v55  ;;  %v414_v4 = vmul.f32 %v4111_v9, %v5670_v56  ;;  %v362_v16 = vld [vmem:[%s5639_s1 + $0xc0] sm:$0xff] }
  0x1f   : > { %v479_v23 = vmax.f32 %v447_v17, 0.0  ;;  %v494_v24 = vmax.f32 %v462_v18, 0.0  ;;  %v448_v46 = vadd.f32 %v4127_v15, %v412_v40  ;;  %v359_v17 = vld [vmem:[%s5639_s1 + $0xa8] sm:$0xff] }
  0x20   : > { %591 = vmatpush.bf16.msra.mxu0 %v3728_v20  ;;  %3985 = vmatpush.bf16.msra.mxu2 %v3728_v20  ;;  %v343_v20 = vld [vmem:[%s5639_s1 + $0x28] sm:$0xff]  ;;  %v431_v14 = vmul.f32 %v4111_v9, %v5653_v3 }
  0x21   : > { %876 = vperm.xlu1 %4007, %v357_v51   ;;  %v508_v28 = vpack.c.bf16 %v479_v23, %v478_v22  ;;  %v480_v50 = vmax.f32 %v448_v46, 0.0  ;;  %v363_v18 = vld [vmem:[%s5639_s1 + $0xc8] sm:$0xff] }
  0x22   : > { %v467_v22 = vadd.f32 %v4127_v15, %v431_v14  ;;  %v347_v23 = vld [vmem:[%s5639_s1 + $0x48] sm:$0xff]  ;;  %v3740_v14 = vld [vmem:[%s5645_s7 + $0x30] sm:$0xff] }
  0x24   : > { %592 = vmatpush.bf16.msra.mxu0 %v3727_v25  ;;  %3986 = vmatpush.bf16.msra.mxu2 %v3727_v25  ;;  %v495_v25 = vmax.f32 %v463_v19, 0.0  ;;  %v450_v19 = vadd.f32 %v4127_v15, %v414_v4  ;;  %v499_v40 = vmax.f32 %v467_v22, 0.0  ;;  %v345_v4 = vld [vmem:[%s5639_s1 + $0x38] sm:$0xff]  ;;  %v3747_v22 = vld [vmem:[%s5645_s7 + $0x68] sm:$0xff] }
  0x25   : > { %791 = vperm.xlu2 %4008, %v340_v21  }
  0x26   : > { %796 = vperm.xlu0 %4006, %v341_v52   ;;  %v516_v30 = vpack.c.bf16 %v495_v25, %v494_v24  ;;  %v360_v24 = vld [vmem:[%s5639_s1 + $0xb0] sm:$0xff]  ;;  %v482_v25 = vmax.f32 %v450_v19, 0.0 }
  0x28   : > { %593 = vmatpush.bf16.msra.mxu0 %v3726_v32  ;;  %3987 = vmatpush.bf16.msra.mxu2 %v3726_v32  ;;  %v5671_v32 = vunpack.c.h.bf16 %v4240_v26 }
  0x29   : > { %881 = vperm.xlu1 %4007, %v358_v12  }
  0x2a   : > { %v413_v41 = vmul.f32 %v4111_v9, %v5671_v32 }
  0x2b   : > { %594 = vmatmul.bf16.vlgmr.msra.gmra.mxu0 %v506_v36  ;;  %634 = vmatmul.bf16.vlgmr.msra.gmra.mxu2 %v514_v37  ;;  %v5656_v36 = vunpack.c.l.bf16 %v4243_v27  ;;  %v5655_v37 = vunpack.c.h.bf16 %v4243_v27 }
  0x2c   : > { %v449_v47 = vadd.f32 %v4127_v15, %v413_v41  ;;  %v4313_v41 = vld [vmem:[%s4095_s16 + $0x28] sm:$0xff]  }
  0x2d   : > { %v428_v42 = vmul.f32 %v4111_v9, %v5656_v36  ;;  %v429_v43 = vmul.f32 %v4111_v9, %v5655_v37  ;;  %886 = vperm.xlu2 %4008, %v359_v17   ;;  %5753 = vst [vmem:[#allocation13_spill] sm:$0xff] %v4313_v41  ;;  %v5667_v46 = vunpack.c.h.bf16 %v4313_v41 }
  0x2e   : > { %801 = vperm.xlu0 %4006, %v342_v13   ;;  %v481_v51 = vmax.f32 %v449_v47, 0.0  ;;  %v430_v13 = vmul.f32 %v4111_v9, %v5654_v2 }
  0x2f   : > { %v464_v48 = vadd.f32 %v4127_v15, %v428_v42  ;;  %v465_v49 = vadd.f32 %v4127_v15, %v429_v43  ;;  %v4316_v42 = vld [vmem:[%s4095_s16 + $0x68] sm:$0xff]  }
  0x30   : > { %v466_v21 = vadd.f32 %v4127_v15, %v430_v13  ;;  %5754 = vst [vmem:[#allocation14_spill] sm:$0xff] %v4316_v42  ;;  %v5652_v47 = vunpack.c.l.bf16 %v4316_v42  ;;  %v3748_v13 = vld [vmem:[%s5645_s7 + $0x70] sm:$0xff] }
  0x31   : > { %806 = vperm.xlu1 %4007, %v343_v20   ;;  %v496_v52 = vmax.f32 %v464_v48, 0.0  ;;  %v497_v53 = vmax.f32 %v465_v49, 0.0  ;;  %v5651_v48 = vunpack.c.h.bf16 %v4316_v42 }
  0x33   : > { %v517_v1 = vpack.c.bf16 %v497_v53, %v496_v52  ;;  %v432_v52 = vmul.f32 %v4111_v9, %v5652_v47  ;;  %v433_v53 = vmul.f32 %v4111_v9, %v5651_v48 }
  0x35   : > { %891 = vperm.xlu2 %4008, %v360_v24   ;;  %v469_v19 = vadd.f32 %v4127_v15, %v433_v53 }
  0x36   : > { %896 = vperm.xlu0 %4006, %v361_v45  }
  0x39   : > { %811 = vperm.xlu1 %4007, %v344_v44   ;;  %v5668_v44 = vunpack.c.l.bf16 %v4313_v41 }
  0x3b   : > { %599 = vmatmul.bf16.gmra.mxu0 %v507_v61  ;;  %639 = vmatmul.bf16.gmra.mxu2 %v515_v62  ;;  %v5669_v61 = vunpack.c.h.bf16 %v4272_v54  ;;  %v509_v62 = vpack.c.bf16 %v481_v51, %v480_v50  ;;  %v416_v49 = vmul.f32 %v4111_v9, %v5668_v44  ;;  %v3749_v50 = vld [vmem:[%s5645_s7 + $0x78] sm:$0xff]  ;;  %v417_v51 = vmul.f32 %v4111_v9, %v5667_v46 }
  0x3c   : > { %1218 = vmatpush.bf16.msra.mxu1 %v3749_v50  ;;  %3988 = vmatpush.bf16.msra.mxu3 %v3749_v50 }
  0x3d   : > { %v415_v12 = vmul.f32 %v4111_v9, %v5669_v61  ;;  %816 = vperm.xlu2 %4008, %v345_v4   ;;  %v453_v17 = vadd.f32 %v4127_v15, %v417_v51  ;;  %v3739_v4 = vld [vmem:[%s5645_s7 + $0x28] sm:$0xff] }
  0x3e   : > { %901 = vperm.xlu0 %4006, %v362_v16   ;;  %v452_v16 = vadd.f32 %v4127_v15, %v416_v49  ;;  %v3746_v49 = vld [vmem:[%s5645_s7 + $0x60] sm:$0xff] }
  0x3f   : > { %v451_v20 = vadd.f32 %v4127_v15, %v415_v12  ;;  %v3741_v12 = vld [vmem:[%s5645_s7 + $0x38] sm:$0xff]  ;;  %v485_v24 = vmax.f32 %v453_v17, 0.0  ;;  %v3738_v17 = vld [vmem:[%s5645_s7 + $0x20] sm:$0xff] }
  0x40   : > { %1355 = vmatpush.bf16.msrb.mxu2 %v3741_v12  ;;  %1219 = vmatpush.bf16.msra.mxu1 %v3748_v13  ;;  %v3745_v12 = vld [vmem:[%s5645_s7 + $0x58] sm:$0xff] }
  0x41   : > { %906 = vperm.xlu1 %4007, %v363_v18   ;;  %v468_v18 = vadd.f32 %v4127_v15, %v432_v52  ;;  %3989 = vmatpush.bf16.msra.mxu3 %v3748_v13 }
  0x44   : > { %1356 = vmatpush.bf16.msrb.mxu2 %v3740_v14  ;;  %1220 = vmatpush.bf16.msra.mxu1 %v3747_v22 }
  0x45   : > { %3990 = vmatpush.bf16.msra.mxu3 %v3747_v22  ;;  %v3744_v22 = vld [vmem:[%s5645_s7 + $0x50] sm:$0xff] }
  0x46   : > { %826 = vperm.xlu0 %4006, %v347_v23   ;;  %v484_v23 = vmax.f32 %v452_v16, 0.0  ;;  %v350_v16 = vld [vmem:[%s5639_s1 + $0x60] sm:$0xff] }
  0x48   : > { %v511_v50 = vpack.c.bf16 %v485_v24, %v484_v23  ;;  %1221 = vmatpush.bf16.msra.mxu1 %v3746_v49  ;;  %1357 = vmatpush.bf16.msrb.mxu2 %v3739_v4  ;;  %v4428_v4 = vld [vmem:[%s4095_s16 + $0x78] sm:$0xff]  }
  0x49   : > { %3991 = vmatpush.bf16.msra.mxu3 %v3746_v49  ;;  %5758 = vst [vmem:[#allocation18_spill] sm:$0xff] %v4428_v4 }
  0x4b   : > { %604 = vmatmul.bf16.gmra.mxu0 %v508_v28  ;;  %644 = vmatmul.bf16.gmra.mxu2 %v516_v30  ;;  %v483_v28 = vmax.f32 %v451_v20, 0.0  ;;  %v498_v30 = vmax.f32 %v466_v21, 0.0  ;;  %v349_v20 = vld [vmem:[%s5639_s1 + $0x58] sm:$0xff]  ;;  %v346_v21 = vld [vmem:[%s5639_s1 + $0x40] sm:$0xff] }
  0x4c   : > { %821 = vperm.xlu2 %4008, %v346_v21   ;;  %1222 = vmatpush.bf16.msra.mxu1 %v3745_v12 }
  0x4d   : > { %v510_v43 = vpack.c.bf16 %v483_v28, %v482_v25  ;;  %v518_v45 = vpack.c.bf16 %v499_v40, %v498_v30  ;;  %v500_v25 = vmax.f32 %v468_v18, 0.0  ;;  %v501_v28 = vmax.f32 %v469_v19, 0.0  ;;  %v4369_v30 = vld [vmem:[%s4095_s16 + $0x30] sm:$0xff]   ;;  %v3765_v18 = vld [vmem:[%s5645_s7 + $0xf8] sm:$0xff]  ;;  %v367_v19 = vld [vmem:[%s5639_s1 + $0xe8] sm:$0xff]  ;;  %3992 = vmatpush.bf16.msra.mxu3 %v3745_v12  ;;  %1358 = vmatpush.bf16.msrb.mxu2 %v3738_v17 }
  0x4e   : > { %5755 = vst [vmem:[#allocation15_spill] sm:$0xff] %v4369_v30  ;;  %v4372_v40 = vld [vmem:[%s4095_s16 + $0x70] sm:$0xff]   ;;  %1791 = vmatpush.bf16.msrb.mxu0 %v3765_v18  ;;  %v3742_v17 = vld [vmem:[%s5645_s7 + $0x40] sm:$0xff] }
  0x4f   : > { %5756 = vst [vmem:[#allocation16_spill] sm:$0xff] %v4372_v40  ;;  %v519_v51 = vpack.c.bf16 %v501_v28, %v500_v25  ;;  %v5650_v52 = vunpack.c.l.bf16 %v4372_v40  ;;  %v5649_v53 = vunpack.c.h.bf16 %v4372_v40  ;;  %v3737_v25 = vld [vmem:[%s5645_s7 + $0x18] sm:$0xff] }
  0x50   : > { %1223 = vmatpush.bf16.msra.mxu1 %v3744_v22 }
  0x51   : > { %v434_v13 = vmul.f32 %v4111_v9, %v5650_v52  ;;  %v435_v14 = vmul.f32 %v4111_v9, %v5649_v53  ;;  %3993 = vmatpush.bf16.msra.mxu3 %v3744_v22  ;;  %1359 = vmatpush.bf16.msrb.mxu2 %v3737_v25  ;;  %v4023_v22 = vmov 0.0   ;;  %v3763_v25 = vld [vmem:[%s5645_s7 + $0xe8] sm:$0xff] }
  0x52   : > { %971 = vst [vmem:[#allocation2] sm:$0xff] %v4023_v22 }
  0x53   : > { %v470_v23 = vadd.f32 %v4127_v15, %v434_v13  ;;  %v471_v24 = vadd.f32 %v4127_v15, %v435_v14  ;;  %v3736_v14 = vld [vmem:[%s5645_s7 + $0x10] sm:$0xff]  ;;  %972 = vst [vmem:[#allocation2 + $0x8] sm:$0xff] %v4023_v22 }
  0x54   : > { %973 = vst [vmem:[#allocation2 + $0x10] sm:$0xff] %v4023_v22 }
  0x55   : > { %1360 = vmatpush.bf16.msrb.mxu2 %v3736_v14  ;;  %1006 = vst [vmem:[#allocation2 + $0x118] sm:$0xff] %v4023_v22  ;;  %v4024_v14 = vmov 0.0|0.0  }
  0x56   : > { %1007 = vst [vmem:[#allocation2 + $0x120] sm:$0xff] %v4023_v22 }
  0x57   : > { %1008 = vst [vmem:[#allocation2 + $0x128] sm:$0x1] %v4023_v22  ;;  %v3761_v22 = vld [vmem:[%s5645_s7 + $0xd8] sm:$0xff] }
  0x5b   : > { %609 = vmatmul.bf16.gmra.mxu0 %v509_v62  ;;  %649 = vmatmul.bf16.gmra.mxu2 %v517_v1  ;;  %v364_v62 = vld [vmem:[%s5639_s1 + $0xd0] sm:$0xff] }
  0x5c   : > { %v348_v1 = vld [vmem:[%s5639_s1 + $0x50] sm:$0xff]  ;;  %911 = vperm.xlu1 %4007, %v364_v62  }
  0x5d   : > { %831 = vperm.xlu0 %4006, %v348_v1  }
  0x64   : > { %836 = vperm.xlu1 %4007, %v349_v20  }
  0x65   : > { %926 = vperm.xlu0 %4006, %v367_v19  }
  0x6b   : > { %614 = vmatmul.bf16.gmra.mxu0 %v510_v43  ;;  %654 = vmatmul.bf16.gmra.mxu2 %v518_v45  ;;  %v5666_v43 = vunpack.c.l.bf16 %v4369_v30  ;;  %v5665_v45 = vunpack.c.h.bf16 %v4369_v30 }
  0x6c   : > { %841 = vperm.xlu1 %4007, %v350_v16   ;;  %v3764_v16 = vld [vmem:[%s5645_s7 + $0xf0] sm:$0xff] }
  0x6d   : > { %v418_v62 = vmul.f32 %v4111_v9, %v5666_v43  ;;  %v419_v1 = vmul.f32 %v4111_v9, %v5665_v45  ;;  %1792 = vmatpush.bf16.msrb.mxu0 %v3764_v16 }
  0x6f   : > { %v454_v20 = vadd.f32 %v4127_v15, %v418_v62  ;;  %v455_v21 = vadd.f32 %v4127_v15, %v419_v1  ;;  %v503_v62 = vmax.f32 %v471_v24, 0.0  ;;  %v4425_v1 = vld [vmem:[%s4095_s16 + $0x38] sm:$0xff]   ;;  %v3735_v24 = vld [vmem:[%s5645_s7 + $0x8] sm:$0xff] }
  0x70   : > { %5757 = vst [vmem:[#allocation17_spill] sm:$0xff] %v4425_v1  ;;  %v5664_v13 = vunpack.c.l.bf16 %v4425_v1  ;;  %v5663_v19 = vunpack.c.h.bf16 %v4425_v1  ;;  %1361 = vmatpush.bf16.msrb.mxu2 %v3735_v24 }
  0x71   : > { %v486_v28 = vmax.f32 %v454_v20, 0.0  ;;  %v487_v49 = vmax.f32 %v455_v21, 0.0  ;;  %v5648_v20 = vunpack.c.l.bf16 %v4428_v4  ;;  %v5647_v21 = vunpack.c.h.bf16 %v4428_v4  ;;  %1793 = vmatpush.bf16.msrb.mxu0 %v3763_v25 }
  0x73   : > { %v512_v12 = vpack.c.bf16 %v487_v49, %v486_v28  ;;  %v421_v28 = vmul.f32 %v4111_v9, %v5663_v19  ;;  %v436_v49 = vmul.f32 %v4111_v9, %v5648_v20 }
  0x7b   : > { %619 = vmatmul.bf16.gmra.mxu0 %v511_v50  ;;  %659 = vmatmul.bf16.gmra.mxu2 %v519_v51  ;;  %v3743_v50 = vld [vmem:[%s5645_s7 + $0x48] sm:$0xff]  ;;  %v502_v51 = vmax.f32 %v470_v23, 0.0  ;;  %v420_v23 = vmul.f32 %v4111_v9, %v5664_v13 }
  0x7c   : > { %1224 = vmatpush.bf16.msra.mxu1 %v3743_v50  ;;  %3994 = vmatpush.bf16.msra.mxu3 %v3743_v50  ;;  %v437_v50 = vmul.f32 %v4111_v9, %v5647_v21  ;;  %v3734_v9 = vld [vmem:[%s5645_s7] sm:$0xff] }
  0x7d   : > { %v520_v18 = vpack.c.bf16 %v503_v62, %v502_v51  ;;  %v368_v51 = vld [vmem:[%s5639_s1 + $0xf0] sm:$0xff]  ;;  %v365_v62 = vld [vmem:[%s5639_s1 + $0xd8] sm:$0xff]  ;;  %v456_v16 = vadd.f32 %v4127_v15, %v420_v23  ;;  %1362 = vmatpush.bf16.msrb.mxu2 %v3734_v9  ;;  %v366_v23 = vld [vmem:[%s5639_s1 + $0xe0] sm:$0xff] }
  0x7e   : > { %931 = vperm.xlu0 %4006, %v368_v51   ;;  %916 = vperm.xlu2 %4008, %v365_v62   ;;  %v473_v24 = vadd.f32 %v4127_v15, %v437_v50  ;;  %v369_v50 = vld [vmem:[%s5639_s1 + $0xf8] sm:$0xff]  ;;  %v3759_v9 = vld [vmem:[%s5645_s7 + $0xc8] sm:$0xff] }
  0x7f   : > { %v488_v25 = vmax.f32 %v456_v16, 0.0  ;;  %936 = vperm.xlu1 %4007, %v369_v50   ;;  %v1041_v16 = vld [vmem:[#allocation2 + $0x7] sm:$0xff] }
  0x80   : > { %1225 = vmatpush.bf16.msra.mxu1 %v3742_v17  ;;  %3995 = vmatpush.bf16.msra.mxu3 %v3742_v17  ;;  %v457_v17 = vadd.f32 %v4127_v15, %v421_v28  ;;  %v505_v21 = vmax.f32 %v473_v24, 0.0  ;;  %v4508_v24 = vld [vmem:[%s5644_s6] ss:$0 sm:$0xff] }
  0x82   : > { %v489_v51 = vmax.f32 %v457_v17, 0.0  ;;  %v1042_v17 = vld [vmem:[#allocation2 + $0xf] sm:$0xff] }
  0x83   : > { %1226 = vmatmul.bf16.vlgmr.msra.gmra.mxu1 %v4024_v14  ;;  %v4498_v14 = vpop.permute.xlu0 %851 }
  0x84   : > { %v513_v28 = vpack.c.bf16 %v489_v51, %v488_v25  ;;  %5759 = vst [vmem:[#allocation19_spill] sm:$0xff] %v4498_v14  ;;  %v4510_v51 = vpop.permute.xlu2 %781 }
  0x85   : > { %5760 = vst [vmem:[#allocation20_spill] sm:$0xff] %v4510_v51 }
  0x86   : > { %921 = vperm.xlu2 %4008, %v366_v23   ;;  %v4513_v23 = vpop.permute.xlu1 %861 }
  0x87   : > { %5761 = vst [vmem:[#allocation21_spill] sm:$0xff] %v4513_v23 }
  0x8b   : > { %624 = vmatmul.bf16.gmra.mxu0 %v512_v12  ;;  %664 = vmatmul.bf16.gmra.mxu2 %v520_v18  ;;  %v3762_v12 = vld [vmem:[%s5645_s7 + $0xe0] sm:$0xff]  ;;  %v472_v18 = vadd.f32 %v4127_v15, %v436_v49  ;;  %v3760_v15 = vld [vmem:[%s5645_s7 + $0xd0] sm:$0xff]  ;;  %v4516_v50 = vpop.permute.xlu0 %856 }
  0x8c   : > { %1794 = vmatpush.bf16.msrb.mxu0 %v3762_v12  ;;  %v351_v12 = vld [vmem:[%s5639_s1 + $0x68] sm:$0xff]  ;;  %5762 = vst [vmem:[#allocation22_spill] sm:$0xff] %v4516_v50 }
  0x8d   : > { %v504_v62 = vmax.f32 %v472_v18, 0.0  ;;  %v4503_v18 = vld [vmem:[%s5643_s5] ss:$0 sm:$0xff] }
  0x8e   : > { %846 = vperm.xlu2 %4008, %v351_v12  }
  0x8f   : > { %v521_v49 = vpack.c.bf16 %v505_v21, %v504_v62  ;;  %v3758_v21 = vld [vmem:[%s5645_s7 + $0xc0] sm:$0xff] }
  0x90   : > { %1795 = vmatpush.bf16.msrb.mxu0 %v3761_v22  ;;  %v1073_v22 = vpack.c.bf16 %v1042_v17, %v1041_v16 }
  0x94   : > { %1796 = vmatpush.bf16.msrb.mxu0 %v3760_v15 }
  0x98   : > { %1797 = vmatpush.bf16.msrb.mxu0 %v3759_v9 }
  0x9b   : > { %629 = vmatmul.bf16.gmra.mxu0 %v513_v28  ;;  %669 = vmatmul.bf16.gmra.mxu2 %v521_v49 }
  0x9c   : > { %1798 = vmatpush.bf16.msrb.mxu0 %v3758_v21 }
  0xa8   : > { %v595_v25 = vpop.f32.mrf.mxu0 }
  0xa9   : > { %v679_v62 = vmul.f32 %v4503_v18, %v595_v25  ;;  %v4522_v25 = vpop.permute.xlu2 %786 }
  0xaa   : > { %5763 = vst [vmem:[#allocation23_spill] sm:$0xff] %v4522_v25 }
  0xab   : > { %v715_v15 = vadd.f32 %v4508_v24, %v679_v62  ;;  %1363 = vmatmul.bf16.vlgmr.msrb.gmra.mxu2 %v1073_v22  ;;  %v4525_v22 = vpop.permute.xlu1 %866 }
  0xac   : > { %5764 = vst [vmem:[#allocation24_spill] sm:$0xff] %v4525_v22 }
  0xad   : > { %v747_v28 = vmax.f32 %v715_v15, 0.0 }
  0xae   : > { %v635_v49 = vpop.f32.mrf.mxu2 }
  0xaf   : > { %v939_v9 = vmul.f32 %v4510_v51, %v747_v28  ;;  %v695_v12 = vmul.f32 %v4503_v18, %v635_v49 }
  0xb0   : > { %v597_v21 = vpop.f32.mrf.mxu0 }
  0xb1   : > { %1009 = vst [vmem:[#allocation2 + $0x18] sm:$0xff] %v939_v9  ;;  %v731_v16 = vadd.f32 %v4508_v24, %v695_v12  ;;  %v680_v17 = vmul.f32 %v4503_v18, %v597_v21  ;;  %v4533_v21 = vpop.permute.xlu0 %871  ;;  %v4541_v47 = vpop.permute.xlu2 %791 }
  0xb2   : > { %5765 = vst [vmem:[#allocation25_spill] sm:$0xff] %v4533_v21 }
  0xb3   : > { %v763_v20 = vmax.f32 %v731_v16, 0.0  ;;  %v716_v62 = vadd.f32 %v4508_v24, %v680_v17  ;;  %5766 = vst [vmem:[#allocation26_spill] sm:$0xff] %v4541_v47  ;;  %v4546_v2 = vpop.permute.xlu1 %876 }
  0xb4   : > { %5767 = vst [vmem:[#allocation27_spill] sm:$0xff] %v4546_v2 }
  0xb5   : > { %v4528_v15 = vmul.f32 %v4513_v23, %v763_v20  ;;  %v748_v53 = vmax.f32 %v716_v62, 0.0 }
  0xb6   : > { %v637_v28 = vpop.f32.mrf.mxu2 }
  0xb7   : > { %1025 = vst [vmem:[#allocation2 + $0x98] sm:$0xff] %v4528_v15  ;;  %v940_v49 = vmul.f32 %v4522_v25, %v748_v53  ;;  %v696_v12 = vmul.f32 %v4503_v18, %v637_v28 }
  0xb8   : > { %v600_v52 = vpop.f32.mrf.mxu0 }
  0xb9   : > { %1010 = vst [vmem:[#allocation2 + $0x20] sm:$0xff] %v940_v49  ;;  %v732_v16 = vadd.f32 %v4508_v24, %v696_v12  ;;  %v681_v17 = vmul.f32 %v4503_v18, %v600_v52  ;;  %v4537_v48 = vpack.c.bf16 %v940_v49, %v939_v9  ;;  %v1043_v12 = vld [vmem:[#allocation2 + $0x17] sm:$0xff]  ;;  %v4575_v11 = vpop.permute.xlu2 %886 }
  0xba   : > { %5771 = vst [vmem:[#allocation31_spill] sm:$0xff] %v4575_v11 }
  0xbb   : > { %v717_v20 = vadd.f32 %v4508_v24, %v681_v17  ;;  %v764_v62 = vmax.f32 %v732_v16, 0.0  ;;  %1231 = vmatmul.bf16.gmra.mxu1 %v4537_v48 }
  0xbd   : > { %v749_v53 = vmax.f32 %v717_v20, 0.0  ;;  %v4544_v28 = vmul.f32 %v4525_v22, %v764_v62  ;;  %v4553_v62 = vpop.permute.xlu0 %796 }
  0xbe   : > { %v640_v3 = vpop.f32.mrf.mxu2  ;;  %5768 = vst [vmem:[#allocation28_spill] sm:$0xff] %v4553_v62 }
  0xbf   : > { %1026 = vst [vmem:[#allocation2 + $0xa0] sm:$0xff] %v4544_v28  ;;  %v941_v52 = vmul.f32 %v4541_v47, %v749_v53  ;;  %v697_v9 = vmul.f32 %v4503_v18, %v640_v3 }
  0xc0   : > { %v602_v49 = vpop.f32.mrf.mxu0  ;;  %v1044_v16 = vld [vmem:[#allocation2 + $0x1f] sm:$0xff] }
  0xc1   : > { %1011 = vst [vmem:[#allocation2 + $0x28] sm:$0xff] %v941_v52  ;;  %v733_v17 = vadd.f32 %v4508_v24, %v697_v9  ;;  %v682_v20 = vmul.f32 %v4503_v18, %v602_v49  ;;  %v1074_v37 = vpack.c.bf16 %v1044_v16, %v1043_v12  ;;  %v4562_v12 = vpop.permute.xlu1 %881 }
  0xc2   : > { %5769 = vst [vmem:[#allocation29_spill] sm:$0xff] %v4562_v12 }
  0xc3   : > { %v765_v36 = vmax.f32 %v733_v17, 0.0  ;;  %v718_v0 = vadd.f32 %v4508_v24, %v682_v20  ;;  %1368 = vmatmul.bf16.gmra.mxu2 %v1074_v37  ;;  %1799 = vmatmul.bf16.vlgmr.msrb.gmra.mxu0 %v1074_v37 }
  0xc5   : > { %v4557_v53 = vmul.f32 %v4533_v21, %v765_v36  ;;  %v750_v3 = vmax.f32 %v718_v0, 0.0  ;;  %v4570_v20 = vpop.permute.xlu0 %801 }
  0xc6   : > { %v642_v63 = vpop.f32.mrf.mxu2  ;;  %5770 = vst [vmem:[#allocation30_spill] sm:$0xff] %v4570_v20 }
  0xc7   : > { %1027 = vst [vmem:[#allocation2 + $0xa8] sm:$0xff] %v4557_v53  ;;  %v942_v39 = vmul.f32 %v4553_v62, %v750_v3  ;;  %v698_v9 = vmul.f32 %v4503_v18, %v642_v63 }
  0xc8   : > { %v605_v49 = vpop.f32.mrf.mxu0 }
  0xc9   : > { %1012 = vst [vmem:[#allocation2 + $0x30] sm:$0xff] %v942_v39  ;;  %v734_v16 = vadd.f32 %v4508_v24, %v698_v9  ;;  %v683_v17 = vmul.f32 %v4503_v18, %v605_v49  ;;  %v4566_v37 = vpack.c.bf16 %v942_v39, %v941_v52  ;;  %v1045_v49 = vld [vmem:[#allocation2 + $0x27] sm:$0xff]  ;;  %v4582_v19 = vpop.permute.xlu1 %806 }
  0xca   : > { %5772 = vst [vmem:[#allocation32_spill] sm:$0xff] %v4582_v19 }
  0xcb   : > { %v766_v36 = vmax.f32 %v734_v16, 0.0  ;;  %v719_v0 = vadd.f32 %v4508_v24, %v683_v17  ;;  %1236 = vmatmul.bf16.gmra.mxu1 %v4566_v37 }
  0xcd   : > { %v4573_v3 = vmul.f32 %v4546_v2, %v766_v36  ;;  %v751_v63 = vmax.f32 %v719_v0, 0.0  ;;  %v4604_v44 = vpop.permute.xlu0 %896 }
  0xce   : > { %v645_v38 = vpop.f32.mrf.mxu2  ;;  %5775 = vst [vmem:[#allocation35_spill] sm:$0xff] %v4604_v44 }
  0xcf   : > { %1028 = vst [vmem:[#allocation2 + $0xb0] sm:$0xff] %v4573_v3  ;;  %v943_v9 = vmul.f32 %v4570_v20, %v751_v63  ;;  %v699_v39 = vmul.f32 %v4503_v18, %v645_v38 }
  0xd0   : > { %v607_v52 = vpop.f32.mrf.mxu0  ;;  %v1046_v16 = vld [vmem:[#allocation2 + $0x2f] sm:$0xff] }
  0xd1   : > { %1013 = vst [vmem:[#allocation2 + $0x38] sm:$0xff] %v943_v9  ;;  %v735_v17 = vadd.f32 %v4508_v24, %v699_v39  ;;  %v684_v10 = vmul.f32 %v4503_v18, %v607_v52  ;;  %v1075_v36 = vpack.c.bf16 %v1046_v16, %v1045_v49  ;;  %v4591_v49 = vpop.permute.xlu2 %891 }
  0xd2   : > { %5773 = vst [vmem:[#allocation33_spill] sm:$0xff] %v4591_v49 }
  0xd3   : > { %v767_v0 = vmax.f32 %v735_v17, 0.0  ;;  %v720_v13 = vadd.f32 %v4508_v24, %v684_v10  ;;  %1373 = vmatmul.bf16.gmra.mxu2 %v1075_v36  ;;  %1804 = vmatmul.bf16.gmra.mxu0 %v1075_v36 }
  0xd5   : > { %v4586_v63 = vmul.f32 %v4562_v12, %v767_v0  ;;  %v752_v38 = vmax.f32 %v720_v13, 0.0  ;;  %v4599_v0 = vpop.permute.xlu1 %811 }
  0xd6   : > { %v647_v45 = vpop.f32.mrf.mxu2  ;;  %5774 = vst [vmem:[#allocation34_spill] sm:$0xff] %v4599_v0 }
  0xd7   : > { %1029 = vst [vmem:[#allocation2 + $0xb8] sm:$0xff] %v4586_v63  ;;  %v944_v43 = vmul.f32 %v4582_v19, %v752_v38  ;;  %v700_v39 = vmul.f32 %v4503_v18, %v647_v45 }
  0xd8   : > { %v610_v52 = vpop.f32.mrf.mxu0 }
  0xd9   : > { %1014 = vst [vmem:[#allocation2 + $0x40] sm:$0xff] %v944_v43  ;;  %v736_v16 = vadd.f32 %v4508_v24, %v700_v39  ;;  %v685_v10 = vmul.f32 %v4503_v18, %v610_v52  ;;  %v4595_v17 = vpack.c.bf16 %v944_v43, %v943_v9  ;;  %v1047_v52 = vld [vmem:[#allocation2 + $0x37] sm:$0xff]  ;;  %v4611_v56 = vpop.permute.xlu2 %816 }
  0xda   : > { %5776 = vst [vmem:[#allocation36_spill] sm:$0xff] %v4611_v56 }
  0xdb   : > { %v768_v36 = vmax.f32 %v736_v16, 0.0  ;;  %v721_v13 = vadd.f32 %v4508_v24, %v685_v10  ;;  %1241 = vmatmul.bf16.gmra.mxu1 %v4595_v17 }
  0xdd   : > { %v4602_v38 = vmul.f32 %v4575_v11, %v768_v36  ;;  %v753_v45 = vmax.f32 %v721_v13, 0.0 }
  0xde   : > { %v650_v46 = vpop.f32.mrf.mxu2 }
  0xdf   : > { %1030 = vst [vmem:[#allocation2 + $0xc0] sm:$0xff] %v4602_v38  ;;  %v945_v39 = vmul.f32 %v4599_v0, %v753_v45  ;;  %v701_v43 = vmul.f32 %v4503_v18, %v650_v46 }
  0xe0   : > { %v612_v9 = vpop.f32.mrf.mxu0  ;;  %v1048_v16 = vld [vmem:[#allocation2 + $0x3f] sm:$0xff] }
  0xe1   : > { %1015 = vst [vmem:[#allocation2 + $0x48] sm:$0xff] %v945_v39  ;;  %v737_v10 = vadd.f32 %v4508_v24, %v701_v43  ;;  %v686_v61 = vmul.f32 %v4503_v18, %v612_v9  ;;  %v1076_v36 = vpack.c.bf16 %v1048_v16, %v1047_v52  ;;  %v4620_v52 = vpop.permute.xlu0 %901 }
  0xe2   : > { %5777 = vst [vmem:[#allocation37_spill] sm:$0xff] %v4620_v52 }
  0xe3   : > { %v769_v13 = vmax.f32 %v737_v10, 0.0  ;;  %v722_v32 = vadd.f32 %v4508_v24, %v686_v61  ;;  %1378 = vmatmul.bf16.gmra.mxu2 %v1076_v36  ;;  %1809 = vmatmul.bf16.gmra.mxu0 %v1076_v36 }
  0xe5   : > { %v4615_v45 = vmul.f32 %v4591_v49, %v769_v13  ;;  %v754_v46 = vmax.f32 %v722_v32, 0.0  ;;  %v3773_v32 = vld [vmem:[%s5645_s7 + $0x138] sm:$0xff] }
  0xe6   : > { %v652_v29 = vpop.f32.mrf.mxu2  ;;  %2025 = vmatpush.bf16.msrb.mxu1 %v3773_v32 }
  0xe7   : > { %1031 = vst [vmem:[#allocation2 + $0xc8] sm:$0xff] %v4615_v45  ;;  %v946_v60 = vmul.f32 %v4611_v56, %v754_v46  ;;  %v702_v43 = vmul.f32 %v4503_v18, %v652_v29  ;;  %v4631_v29 = vpop.permute.xlu2 %821 }
  0xe8   : > { %v615_v9 = vpop.f32.mrf.mxu0  ;;  %5778 = vst [vmem:[#allocation38_spill] sm:$0xff] %v4631_v29  ;;  %v1049_v35 = vld [vmem:[#allocation2 + $0x47] sm:$0xff] }
  0xe9   : > { %1016 = vst [vmem:[#allocation2 + $0x50] sm:$0xff] %v946_v60  ;;  %v738_v16 = vadd.f32 %v4508_v24, %v702_v43  ;;  %v687_v61 = vmul.f32 %v4503_v18, %v615_v9  ;;  %v4624_v10 = vpack.c.bf16 %v946_v60, %v945_v39  ;;  %v4636_v9 = vpop.permute.xlu1 %906  ;;  %v3772_v60 = vld [vmem:[%s5645_s7 + $0x130] sm:$0xff]  ;;  %v4646_v8 = vpop.permute.xlu0 %826  ;;  %v2618_v0 = vld [vmem:[#allocation2 + $0x48] sm:$0xff] }
  0xea   : > { %5779 = vst [vmem:[#allocation39_spill] sm:$0xff] %v4636_v9  ;;  %2026 = vmatpush.bf16.msrb.mxu1 %v3772_v60 }
  0xeb   : > { %v770_v36 = vmax.f32 %v738_v16, 0.0  ;;  %v723_v13 = vadd.f32 %v4508_v24, %v687_v61  ;;  %1246 = vmatmul.bf16.gmra.mxu1 %v4624_v10  ;;  %5780 = vst [vmem:[#allocation40_spill] sm:$0xff] %v4646_v8 }
  0xed   : > { %v4634_v46 = vmul.f32 %v4604_v44, %v770_v36  ;;  %v755_v43 = vmax.f32 %v723_v13, 0.0 }
  0xee   : > { %v655_v59 = vpop.f32.mrf.mxu2  ;;  %2027 = vmatpush.bf16.msrb.mxu1 %v3771_v7 }
  0xef   : > { %1032 = vst [vmem:[#allocation2 + $0xd0] sm:$0xff] %v4634_v46  ;;  %v947_v39 = vmul.f32 %v4631_v29, %v755_v43  ;;  %v703_v16 = vmul.f32 %v4503_v18, %v655_v59  ;;  %v2616_v29 = vld [vmem:[#allocation2 + $0x38] sm:$0xff] }
  0xf0   : > { %v617_v61 = vpop.f32.mrf.mxu0  ;;  %v1050_v32 = vld [vmem:[#allocation2 + $0x4f] sm:$0xff] }
  0xf1   : > { %1017 = vst [vmem:[#allocation2 + $0x58] sm:$0xff] %v947_v39  ;;  %v739_v36 = vadd.f32 %v4508_v24, %v703_v16  ;;  %v688_v13 = vmul.f32 %v4503_v18, %v617_v61  ;;  %v1077_v34 = vpack.c.bf16 %v1050_v32, %v1049_v35  ;;  %v3770_v35 = vld [vmem:[%s5645_s7 + $0x120] sm:$0xff] }
  0xf2   : > { %2028 = vmatpush.bf16.msrb.mxu1 %v3770_v35 }
  0xf3   : > { %v771_v4 = vmax.f32 %v739_v36, 0.0  ;;  %v724_v43 = vadd.f32 %v4508_v24, %v688_v13  ;;  %1383 = vmatmul.bf16.gmra.mxu2 %v1077_v34  ;;  %1814 = vmatmul.bf16.gmra.mxu0 %v1077_v34  ;;  %v4661_v13 = vpop.permute.xlu1 %911 }
  0xf4   : > { %5781 = vst [vmem:[#allocation41_spill] sm:$0xff] %v4661_v13 }
  0xf5   : > { %v4653_v59 = vmul.f32 %v4620_v52, %v771_v4  ;;  %v756_v60 = vmax.f32 %v724_v43, 0.0  ;;  %v3769_v43 = vld [vmem:[%s5645_s7 + $0x118] sm:$0xff]  ;;  %v4683_v52 = vpop.permute.xlu2 %916 }
  0xf6   : > { %v657_v16 = vpop.f32.mrf.mxu2  ;;  %2029 = vmatpush.bf16.msrb.mxu1 %v3769_v43  ;;  %5783 = vst [vmem:[#allocation43_spill] sm:$0xff] %v4683_v52  ;;  %v1935_v26 = vld [vmem:[#allocation2 + $0xd0] sm:$0xff] }
  0xf7   : > { %1033 = vst [vmem:[#allocation2 + $0xd8] sm:$0xff] %v4653_v59  ;;  %v948_v61 = vmul.f32 %v4646_v8, %v756_v60  ;;  %v704_v32 = vmul.f32 %v4503_v18, %v657_v16  ;;  %v4672_v16 = vpop.permute.xlu0 %831  ;;  %v2150_v8 = vld [vmem:[#allocation2 + $0x39] sm:$0xff] }
  0xf8   : > { %v620_v36 = vpop.f32.mrf.mxu0  ;;  %5782 = vst [vmem:[#allocation42_spill] sm:$0xff] %v4672_v16  ;;  %v2620_v47 = vld [vmem:[#allocation2 + $0x58] sm:$0xff] }
  0xf9   : > { %1018 = vst [vmem:[#allocation2 + $0x60] sm:$0xff] %v948_v61  ;;  %v740_v7 = vadd.f32 %v4508_v24, %v704_v32  ;;  %v689_v34 = vmul.f32 %v4503_v18, %v620_v36  ;;  %v4665_v4 = vpack.c.bf16 %v948_v61, %v947_v39  ;;  %v3768_v39 = vld [vmem:[%s5645_s7 + $0x110] sm:$0xff] }
  0xfa   : > { %2030 = vmatpush.bf16.msrb.mxu1 %v3768_v39 }
  0xfb   : > { %v772_v40 = vmax.f32 %v740_v7, 0.0  ;;  %v725_v60 = vadd.f32 %v4508_v24, %v689_v34  ;;  %1251 = vmatmul.bf16.gmra.mxu1 %v4665_v4  ;;  %v1051_v34 = vld [vmem:[#allocation2 + $0x57] sm:$0xff]  ;;  %v4689_v27 = vpop.permute.xlu1 %836 }
  0xfc   : > { %5784 = vst [vmem:[#allocation44_spill] sm:$0xff] %v4689_v27 }
  0xfd   : > { %v4675_v35 = vmul.f32 %v4636_v9, %v772_v40  ;;  %v757_v32 = vmax.f32 %v725_v60, 0.0  ;;  %v3766_v9 = vld [vmem:[%s5645_s7 + $0x100] sm:$0xff] }
  0xfe   : > { %v660_v42 = vpop.f32.mrf.mxu2  ;;  %v1936_v19 = vld [vmem:[#allocation2 + $0xd8] sm:$0xff] }
  0xff   : > { %1034 = vst [vmem:[#allocation2 + $0xe0] sm:$0xff] %v4675_v35  ;;  %v949_v61 = vmul.f32 %v4672_v16, %v757_v32  ;;  %v705_v36 = vmul.f32 %v4503_v18, %v660_v42  ;;  %v3767_v42 = vld [vmem:[%s5645_s7 + $0x108] sm:$0xff]  ;;  %v4746_v33 = vpop.permute.xlu0 %926 }
 0x100   : > { %v622_v7 = vpop.f32.mrf.mxu0  ;;  %v1052_v55 = vld [vmem:[#allocation2 + $0x5f] sm:$0xff]  ;;  %2031 = vmatpush.bf16.msrb.mxu1 %v3767_v42  ;;  %v4712_v42 = vpop.permute.xlu2 %921  ;;  %5788 = vst [vmem:[#allocation48_spill] sm:$0xff] %v4746_v33 }
 0x101   : > { %1019 = vst [vmem:[#allocation2 + $0x68] sm:$0xff] %v949_v61  ;;  %v741_v40 = vadd.f32 %v4508_v24, %v705_v36  ;;  %v690_v43 = vmul.f32 %v4503_v18, %v622_v7  ;;  %v1078_v60 = vpack.c.bf16 %v1052_v55, %v1051_v34  ;;  %v2154_v62 = vld [vmem:[#allocation2 + $0x59] sm:$0xff] }
 0x102   : > { %5785 = vst [vmem:[#allocation45_spill] sm:$0xff] %v4712_v42 }
 0x103   : > { %v773_v44 = vmax.f32 %v741_v40, 0.0  ;;  %v726_v36 = vadd.f32 %v4508_v24, %v690_v43  ;;  %1388 = vmatmul.bf16.gmra.mxu2 %v1078_v60  ;;  %1819 = vmatmul.bf16.gmra.mxu0 %v1078_v60  ;;  %v4716_v49 = vpop.permute.xlu1 %841 }
 0x104   : > { %2032 = vmatpush.bf16.msrb.mxu1 %v3766_v9  ;;  %5786 = vst [vmem:[#allocation46_spill] sm:$0xff] %v4716_v49 }
 0x105   : > { %v4700_v55 = vmul.f32 %v4661_v13, %v773_v44  ;;  %v758_v7 = vmax.f32 %v726_v36, 0.0 }
 0x106   : > { %v662_v34 = vpop.f32.mrf.mxu2  ;;  %v1937_v20 = vld [vmem:[#allocation2 + $0xe0] sm:$0xff] }
 0x107   : > { %1035 = vst [vmem:[#allocation2 + $0xe8] sm:$0xff] %v4700_v55  ;;  %v950_v32 = vmul.f32 %v4689_v27, %v758_v7  ;;  %v706_v40 = vmul.f32 %v4503_v18, %v662_v34  ;;  %v2614_v27 = vld [vmem:[#allocation2 + $0x28] sm:$0xff] }
 0x108   : > { %v625_v39 = vpop.f32.mrf.mxu0  ;;  %v4734_v12 = vpop.permute.xlu2 %846 }
 0x109   : > { %1020 = vst [vmem:[#allocation2 + $0x70] sm:$0xff] %v950_v32  ;;  %v742_v43 = vadd.f32 %v4508_v24, %v706_v40  ;;  %v691_v44 = vmul.f32 %v4503_v18, %v625_v39  ;;  %v4710_v60 = vpack.c.bf16 %v950_v32, %v949_v61  ;;  %v1053_v40 = vld [vmem:[#allocation2 + $0x67] sm:$0xff] }
 0x10a   : > { %5787 = vst [vmem:[#allocation47_spill] sm:$0xff] %v4734_v12 }
 0x10b   : > { %v774_v36 = vmax.f32 %v742_v43, 0.0  ;;  %v727_v13 = vadd.f32 %v4508_v24, %v691_v44  ;;  %1256 = vmatmul.bf16.gmra.mxu1 %v4710_v60 }
 0x10d   : > { %v4719_v7 = vmul.f32 %v4683_v52, %v774_v36  ;;  %v759_v9 = vmax.f32 %v727_v13, 0.0 }
 0x10e   : > { %v665_v34 = vpop.f32.mrf.mxu2 }
 0x10f   : > { %1036 = vst [vmem:[#allocation2 + $0xf0] sm:$0xff] %v4719_v7  ;;  %v951_v39 = vmul.f32 %v4716_v49, %v759_v9  ;;  %v707_v61 = vmul.f32 %v4503_v18, %v665_v34  ;;  %v3757_v34 = vld [vmem:[%s5645_s7 + $0xb8] sm:$0xff] }
 0x110   : > { %v627_v32 = vpop.f32.mrf.mxu0  ;;  %v1054_v43 = vld [vmem:[#allocation2 + $0x6f] sm:$0xff]  ;;  %1557 = vmatpush.bf16.msrb.mxu3 %v3757_v34 }
 0x111   : > { %1021 = vst [vmem:[#allocation2 + $0x78] sm:$0xff] %v951_v39  ;;  %v743_v44 = vadd.f32 %v4508_v24, %v707_v61  ;;  %v692_v58 = vmul.f32 %v4503_v18, %v627_v32  ;;  %v1079_v11 = vpack.c.bf16 %v1054_v43, %v1053_v40 }
 0x113   : > { %v775_v52 = vmax.f32 %v743_v44, 0.0  ;;  %1393 = vmatmul.bf16.gmra.mxu2 %v1079_v11  ;;  %1824 = vmatmul.bf16.gmra.mxu0 %v1079_v11  ;;  %v728_v9 = vadd.f32 %v4508_v24, %v692_v58 }
 0x115   : > { %v4737_v61 = vmul.f32 %v4712_v42, %v775_v52  ;;  %v760_v32 = vmax.f32 %v728_v9, 0.0 }
 0x116   : > { %v667_v40 = vpop.f32.mrf.mxu2 }
 0x117   : > { %1037 = vst [vmem:[#allocation2 + $0xf8] sm:$0xff] %v4737_v61  ;;  %v952_v43 = vmul.f32 %v4734_v12, %v760_v32  ;;  %v708_v11 = vmul.f32 %v4503_v18, %v667_v40  ;;  %v2146_v12 = vld [vmem:[#allocation2 + $0x19] sm:$0xff] }
 0x118   : > { %v630_v44 = vpop.f32.mrf.mxu0 }
 0x119   : > { %1022 = vst [vmem:[#allocation2 + $0x80] sm:$0xff] %v952_v43  ;;  %v744_v58 = vadd.f32 %v4508_v24, %v708_v11  ;;  %v693_v13 = vmul.f32 %v4503_v18, %v630_v44  ;;  %v4744_v36 = vpack.c.bf16 %v952_v43, %v951_v39  ;;  %v1227_v39 = vpop.f32.mrf.mxu1 }
 0x11b   : > { %v776_v52 = vmax.f32 %v744_v58, 0.0  ;;  %v729_v9 = vadd.f32 %v4508_v24, %v693_v13  ;;  %1261 = vmatmul.bf16.gmra.mxu1 %v4744_v36  ;;  %v1055_v58 = vld [vmem:[#allocation2 + $0x77] sm:$0xff] }
 0x11d   : > { %v4751_v34 = vmul.f32 %v4746_v33, %v776_v52  ;;  %v761_v32 = vmax.f32 %v729_v9, 0.0 }
 0x11e   : > { %v670_v40 = vpop.f32.mrf.mxu2 }
 0x11f   : > { %1038 = vst [vmem:[#allocation2 + $0x100] sm:$0xff] %v4751_v34  ;;  %v953_v11 = vmul.f32 %v4498_v14, %v761_v32  ;;  %v709_v44 = vmul.f32 %v4503_v18, %v670_v40  ;;  %v3756_v32 = vld [vmem:[%s5645_s7 + $0xb0] sm:$0xff]  ;;  %v4764_v40 = vpop.permute.xlu0 %931 }
 0x120   : > { %v632_v43 = vpop.f32.mrf.mxu0  ;;  %v1056_v42 = vld [vmem:[#allocation2 + $0x7f] sm:$0xff]  ;;  %5789 = vst [vmem:[#allocation49_spill] sm:$0xff] %v4764_v40  ;;  %1558 = vmatpush.bf16.msrb.mxu3 %v3756_v32 }
 0x121   : > { %1023 = vst [vmem:[#allocation2 + $0x88] sm:$0xff] %v953_v11  ;;  %v745_v13 = vadd.f32 %v4508_v24, %v709_v44  ;;  %v694_v52 = vmul.f32 %v4503_v18, %v632_v43  ;;  %v1080_v33 = vpack.c.bf16 %v1056_v42, %v1055_v58 }
 0x123   : > { %v777_v9 = vmax.f32 %v745_v13, 0.0  ;;  %v730_v2 = vadd.f32 %v4508_v24, %v694_v52  ;;  %1398 = vmatmul.bf16.gmra.mxu2 %v1080_v33  ;;  %1829 = vmatmul.bf16.gmra.mxu0 %v1080_v33  ;;  %v4772_v13 = vpop.permute.xlu1 %936 }
 0x124   : > { %5790 = vst [vmem:[#allocation50_spill] sm:$0xff] %v4772_v13 }
 0x125   : > { %v969_v21 = vmul.f32 %v4764_v40, %v777_v9  ;;  %v762_v6 = vmax.f32 %v730_v2, 0.0 }
 0x126   : > { %v672_v44 = vpop.f32.mrf.mxu2 }
 0x127   : > { %1039 = vst [vmem:[#allocation2 + $0x108] sm:$0xff] %v969_v21  ;;  %v954_v42 = vmul.f32 %v4516_v50, %v762_v6  ;;  %v710_v43 = vmul.f32 %v4503_v18, %v672_v44  ;;  %v1229_v21 = vpop.f32.mrf.mxu1 }
 0x128   : > { %v1057_v18 = vld [vmem:[#allocation2 + $0x87] sm:$0xff] }
 0x129   : > { %1024 = vst [vmem:[#allocation2 + $0x90] sm:$0xff] %v954_v42  ;;  %v746_v33 = vadd.f32 %v4508_v24, %v710_v43  ;;  %v4770_v58 = vpack.c.bf16 %v954_v42, %v953_v11  ;;  %v3755_v24 = vld [vmem:[%s5645_s7 + $0xa8] sm:$0xff]  ;;  %v1146_v43 = vpack.c.bf16 %v4544_v28, %v4528_v15 }
 0x12a   : > { %1559 = vmatpush.bf16.msrb.mxu3 %v3755_v24  ;;  %v1061_v24 = vld [vmem:[#allocation2 + $0xa7] sm:$0xff] }
 0x12b   : > { %v778_v52 = vmax.f32 %v746_v33, 0.0  ;;  %1266 = vmatmul.bf16.vlgmr.msra.gmra.mxu3 %v4770_v58  ;;  %2033 = vmatmul.bf16.vlgmr.msrb.gmra.mxu1 %v4537_v48  ;;  %v1060_v33 = vld [vmem:[#allocation2 + $0x9f] sm:$0xff] }
 0x12d   : > { %v970_v2 = vmul.f32 %v4772_v13, %v778_v52 }
 0x12e   : > { %v1364_v9 = vpop.f32.mrf.mxu2 }
 0x12f   : > { %1040 = vst [vmem:[#allocation2 + $0x110] sm:$0xff] %v970_v2  ;;  %v4777_v6 = vadd.f32 %v1364_v9, %v1227_v39 }
 0x130   : > { %v1058_v32 = vld [vmem:[#allocation2 + $0x8f] sm:$0xff]  ;;  %v1059_v39 = vld [vmem:[#allocation2 + $0x97] sm:$0xff] }
 0x131   : > { %v1081_v44 = vpack.c.bf16 %v1058_v32, %v1057_v18  ;;  %v1082_v9 = vpack.c.bf16 %v1060_v33, %v1059_v39 }
 0x133   : > { %1403 = vmatmul.bf16.gmra.mxu2 %v1081_v44  ;;  %1834 = vmatmul.bf16.gmra.mxu0 %v1081_v44 }
 0x136   : > { %v1366_v11 = vpop.f32.mrf.mxu2 }
 0x137   : > { %v4782_v42 = vadd.f32 %v1366_v11, %v1229_v21  ;;  %v3754_v21 = vld [vmem:[%s5645_s7 + $0xa0] sm:$0xff]  ;;  %v1062_v11 = vld [vmem:[#allocation2 + $0xaf] sm:$0xff] }
 0x138   : > { %v1232_v48 = vpop.f32.mrf.mxu1  ;;  %1560 = vmatpush.bf16.msrb.mxu3 %v3754_v21 }
 0x13b   : > { %1271 = vmatmul.bf16.gmra.mxu3 %v1146_v43  ;;  %2038 = vmatmul.bf16.gmra.mxu1 %v4566_v37  ;;  %v5791_v37 = vpack.c.bf16 %v4573_v3, %v4557_v53 }
 0x140   : > { %v4787_v52 = vpop.f32.mrf.mxu0  ;;  %v1234_v2 = vpop.f32.mrf.mxu1 }
 0x143   : > { %1408 = vmatmul.bf16.gmra.mxu2 %v1082_v9  ;;  %1839 = vmatmul.bf16.gmra.mxu0 %v1082_v9  ;;  %v1083_v9 = vpack.c.bf16 %v1062_v11, %v1061_v24 }
 0x146   : > { %v1369_v18 = vpop.f32.mrf.mxu2 }
 0x147   : > { %v4792_v32 = vadd.f32 %v1369_v18, %v1232_v48  ;;  %v3753_v48 = vld [vmem:[%s5645_s7 + $0x98] sm:$0xff] }
 0x148   : > { %v4794_v15 = vpop.f32.mrf.mxu0  ;;  %v1237_v28 = vpop.f32.mrf.mxu1  ;;  %1561 = vmatpush.bf16.msrb.mxu3 %v3753_v48 }
 0x14b   : > { %1276 = vmatmul.bf16.gmra.mxu3 %v5791_v37  ;;  %2043 = vmatmul.bf16.gmra.mxu1 %v4595_v17  ;;  %v1063_v37 = vld [vmem:[#allocation2 + $0xb7] sm:$0xff] }
 0x14e   : > { %v1371_v44 = vpop.f32.mrf.mxu2 }
 0x14f   : > { %v4800_v43 = vadd.f32 %v1371_v44, %v1234_v2  ;;  %v5792_v2 = vpack.c.bf16 %v4602_v38, %v4586_v63  ;;  %v1064_v44 = vld [vmem:[#allocation2 + $0xbf] sm:$0xff] }
 0x150   : > { %v4802_v39 = vpop.f32.mrf.mxu0  ;;  %v1239_v33 = vpop.f32.mrf.mxu1  ;;  %v1084_v48 = vpack.c.bf16 %v1064_v44, %v1063_v37  ;;  %v1066_v37 = vld [vmem:[#allocation2 + $0xcf] sm:$0xff] }
 0x153   : > { %1413 = vmatmul.bf16.gmra.mxu2 %v1083_v9  ;;  %1844 = vmatmul.bf16.gmra.mxu0 %v1083_v9 }
 0x156   : > { %v1374_v53 = vpop.f32.mrf.mxu2 }
 0x157   : > { %v4807_v3 = vadd.f32 %v1374_v53, %v1237_v28  ;;  %v3752_v28 = vld [vmem:[%s5645_s7 + $0x90] sm:$0xff] }
 0x158   : > { %v4809_v17 = vpop.f32.mrf.mxu0  ;;  %v1242_v21 = vpop.f32.mrf.mxu1  ;;  %1562 = vmatpush.bf16.msrb.mxu3 %v3752_v28 }
 0x15b   : > { %1281 = vmatmul.bf16.gmra.mxu3 %v5792_v2  ;;  %2048 = vmatmul.bf16.gmra.mxu1 %v4624_v10 }
 0x15e   : > { %v1376_v18 = vpop.f32.mrf.mxu2 }
 0x15f   : > { %v4815_v24 = vadd.f32 %v1376_v18, %v1239_v33  ;;  %v5793_v33 = vpack.c.bf16 %v4634_v46, %v4615_v45  ;;  %v1065_v18 = vld [vmem:[#allocation2 + $0xc7] sm:$0xff] }
 0x160   : > { %v4817_v11 = vpop.f32.mrf.mxu0  ;;  %v1244_v9 = vpop.f32.mrf.mxu1  ;;  %v1085_v13 = vpack.c.bf16 %v1066_v37, %v1065_v18  ;;  %v3751_v45 = vld [vmem:[%s5645_s7 + $0x88] sm:$0xff]  ;;  %v1067_v37 = vld [vmem:[#allocation2 + $0xd7] sm:$0xff] }
 0x161   : > { %1563 = vmatpush.bf16.msrb.mxu3 %v3751_v45 }
 0x163   : > { %1418 = vmatmul.bf16.gmra.mxu2 %v1084_v48  ;;  %1849 = vmatmul.bf16.gmra.mxu0 %v1084_v48 }
 0x166   : > { %v1379_v63 = vpop.f32.mrf.mxu2 }
 0x167   : > { %v4822_v38 = vadd.f32 %v1379_v63, %v1242_v21  ;;  %v3781_v21 = vld [vmem:[%s5645_s7 + $0x178] sm:$0xff] }
 0x168   : > { %v4824_v10 = vpop.f32.mrf.mxu0  ;;  %v1247_v53 = vpop.f32.mrf.mxu1  ;;  %2259 = vmatpush.bf16.msra.mxu2 %v3781_v21  ;;  %v1068_v21 = vld [vmem:[#allocation2 + $0xdf] sm:$0xff] }
 0x169   : > { %v1086_v40 = vpack.c.bf16 %v1068_v21, %v1067_v37  ;;  %v3795_v21 = vld [vmem:[%s5645_s7 + $0x1e8] sm:$0xff] }
 0x16b   : > { %1286 = vmatmul.bf16.gmra.mxu3 %v5793_v33  ;;  %2053 = vmatmul.bf16.gmra.mxu1 %v4665_v4  ;;  %v3780_v4 = vld [vmem:[%s5645_s7 + $0x170] sm:$0xff] }
 0x16c   : > { %2260 = vmatpush.bf16.msra.mxu2 %v3780_v4 }
 0x16e   : > { %v1381_v2 = vpop.f32.mrf.mxu2 }
 0x16f   : > { %v4830_v44 = vadd.f32 %v1381_v2, %v1244_v9  ;;  %v5794_v2 = vpack.c.bf16 %v4675_v35, %v4653_v59  ;;  %v3777_v59 = vld [vmem:[%s5645_s7 + $0x158] sm:$0xff] }
 0x170   : > { %v4832_v48 = vpop.f32.mrf.mxu0  ;;  %v1249_v28 = vpop.f32.mrf.mxu1  ;;  %v3797_v35 = vld [vmem:[%s5645_s7 + $0x1f8] sm:$0xff] }
 0x171   : > { %2727 = vmatpush.bf16.msra.mxu0 %v3797_v35 }
 0x173   : > { %1423 = vmatmul.bf16.gmra.mxu2 %v1085_v13  ;;  %1854 = vmatmul.bf16.gmra.mxu0 %v1085_v13  ;;  %v3779_v13 = vld [vmem:[%s5645_s7 + $0x168] sm:$0xff] }
 0x174   : > { %2261 = vmatpush.bf16.msra.mxu2 %v3779_v13  ;;  %v3776_v13 = vld [vmem:[%s5645_s7 + $0x150] sm:$0xff] }
 0x176   : > { %v1384_v46 = vpop.f32.mrf.mxu2 }
 0x177   : > { %v4843_v9 = vadd.f32 %v1384_v46, %v1247_v53  ;;  %v3778_v53 = vld [vmem:[%s5645_s7 + $0x160] sm:$0xff] }
 0x178   : > { %v4845_v63 = vpop.f32.mrf.mxu0  ;;  %v1252_v33 = vpop.f32.mrf.mxu1  ;;  %2262 = vmatpush.bf16.msra.mxu2 %v3778_v53 }
 0x17b   : > { %1291 = vmatmul.bf16.gmra.mxu3 %v5794_v2  ;;  %2058 = vmatmul.bf16.gmra.mxu1 %v4710_v60  ;;  %v3750_v60 = vld [vmem:[%s5645_s7 + $0x80] sm:$0xff]  ;;  %v3796_v2 = vld [vmem:[%s5645_s7 + $0x1f0] sm:$0xff] }
 0x17c   : > { %2263 = vmatpush.bf16.msra.mxu2 %v3777_v59  ;;  %1564 = vmatpush.bf16.msrb.mxu3 %v3750_v60  ;;  %v5797_v59 = vpack.c.bf16 %v4719_v7, %v4700_v55  ;;  %v1070_v60 = vld [vmem:[#allocation2 + $0xef] sm:$0xff]  ;;  %v3793_v7 = vld [vmem:[%s5645_s7 + $0x1d8] sm:$0xff] }
 0x17d   : > { %2728 = vmatpush.bf16.msra.mxu0 %v3796_v2 }
 0x17e   : > { %v1386_v18 = vpop.f32.mrf.mxu2 }
 0x17f   : > { %v4857_v45 = vadd.f32 %v1386_v18, %v1249_v28 }
 0x180   : > { %v1254_v46 = vpop.f32.mrf.mxu1  ;;  %v4859_v4 = vpop.f32.mrf.mxu0  ;;  %2264 = vmatpush.bf16.msra.mxu2 %v3776_v13  ;;  %v3794_v13 = vld [vmem:[%s5645_s7 + $0x1e0] sm:$0xff] }
 0x181   : > { %5795 = vst [vmem:[#allocation51_spill] sm:$0xff] %v4859_v4  ;;  %2729 = vmatpush.bf16.msra.mxu0 %v3795_v21  ;;  %v3792_v21 = vld [vmem:[%s5645_s7 + $0x1d0] sm:$0xff] }
 0x183   : > { %1428 = vmatmul.bf16.gmra.mxu2 %v1086_v40  ;;  %1859 = vmatmul.bf16.gmra.mxu0 %v1086_v40  ;;  %v3775_v40 = vld [vmem:[%s5645_s7 + $0x148] sm:$0xff] }
 0x184   : > { %2265 = vmatpush.bf16.msra.mxu2 %v3775_v40 }
 0x185   : > { %2730 = vmatpush.bf16.msra.mxu0 %v3794_v13  ;;  %v1071_v13 = vld [vmem:[#allocation2 + $0xf7] sm:$0xff] }
 0x186   : > { %v1389_v28 = vpop.f32.mrf.mxu2 }
 0x187   : > { %v4876_v18 = vadd.f32 %v1389_v28, %v1252_v33  ;;  %v1069_v33 = vld [vmem:[#allocation2 + $0xe7] sm:$0xff] }
 0x188   : > { %v1257_v37 = vpop.f32.mrf.mxu1  ;;  %v4884_v53 = vpop.f32.mrf.mxu0  ;;  %v3774_v28 = vld [vmem:[%s5645_s7 + $0x140] sm:$0xff]  ;;  %v1087_v55 = vpack.c.bf16 %v1070_v60, %v1069_v33  ;;  %v3805_v60 = vld [vmem:[%s5645_s7 + $0x238] sm:$0xff] }
 0x189   : > { %5796 = vst [vmem:[#allocation52_spill] sm:$0xff] %v4884_v53  ;;  %2266 = vmatpush.bf16.msra.mxu2 %v3774_v28  ;;  %2731 = vmatpush.bf16.msra.mxu0 %v3793_v7  ;;  %v5799_v28 = vpack.c.bf16 %v4751_v34, %v4737_v61  ;;  %v3790_v7 = vld [vmem:[%s5645_s7 + $0x1c0] sm:$0xff]  ;;  %v1444_v61 = vld [vmem:[#allocation2 + $0x9] sm:$0xff] }
 0x18a   : > { %2961 = vmatpush.bf16.msra.mxu1 %v3805_v60 }
 0x18b   : > { %1296 = vmatmul.bf16.gmra.mxu3 %v5797_v59  ;;  %2063 = vmatmul.bf16.gmra.mxu1 %v4744_v36  ;;  %v3789_v36 = vld [vmem:[%s5645_s7 + $0x1b8] sm:$0xff] }
 0x18c   : > { %2493 = vmatpush.bf16.msra.mxu3 %v3789_v36 }
 0x18d   : > { %2732 = vmatpush.bf16.msra.mxu0 %v3792_v21 }
 0x18e   : > { %v1391_v35 = vpop.f32.mrf.mxu2 }
 0x18f   : > { %v4896_v2 = vadd.f32 %v1391_v35, %v1254_v46  ;;  %v3791_v35 = vld [vmem:[%s5645_s7 + $0x1c8] sm:$0xff] }
 0x190   : > { %v1259_v22 = vpop.f32.mrf.mxu1  ;;  %v4904_v40 = vpop.f32.mrf.mxu0 }
 0x191   : > { %5798 = vst [vmem:[#allocation53_spill] sm:$0xff] %v4904_v40  ;;  %2733 = vmatpush.bf16.msra.mxu0 %v3791_v35  ;;  %v1928_v35 = vld [vmem:[#allocation2 + $0x98] sm:$0xff] }
 0x193   : > { %1433 = vmatmul.bf16.gmra.mxu2 %v1087_v55  ;;  %1864 = vmatmul.bf16.gmra.mxu0 %v1087_v55  ;;  %v1072_v55 = vld [vmem:[#allocation2 + $0xff] sm:$0xff] }
 0x194   : > { %v1088_v60 = vpack.c.bf16 %v1072_v55, %v1071_v13  ;;  %v2147_v13 = vld [vmem:[#allocation2 + $0x21] sm:$0xff] }
 0x195   : > { %2734 = vmatpush.bf16.msra.mxu0 %v3790_v7  ;;  %v2178_v49 = vpack.c.bf16 %v2147_v13, %v2146_v12  ;;  %v3804_v12 = vld [vmem:[%s5645_s7 + $0x230] sm:$0xff] }
 0x196   : > { %v1394_v46 = vpop.f32.mrf.mxu2  ;;  %2962 = vmatpush.bf16.msra.mxu1 %v3804_v12  ;;  %v1932_v12 = vld [vmem:[#allocation2 + $0xb8] sm:$0xff] }
 0x197   : > { %v4909_v59 = vadd.f32 %v1394_v46, %v1257_v37 }
 0x198   : > { %v1262_v33 = vpop.f32.mrf.mxu1  ;;  %v4924_v36 = vpop.f32.mrf.mxu0 }
 0x199   : > { %5800 = vst [vmem:[#allocation54_spill] sm:$0xff] %v4924_v36 }
 0x19b   : > { %1301 = vmatmul.bf16.gmra.mxu3 %v5799_v28  ;;  %2068 = vmatmul.bf16.gmra.mxu1 %v4770_v58  ;;  %v1445_v58 = vld [vmem:[#allocation2 + $0x11] sm:$0xff]  ;;  %v1929_v28 = vld [vmem:[#allocation2 + $0xa0] sm:$0xff] }
 0x19c   : > { %v1476_v14 = vpack.c.bf16 %v1445_v58, %v1444_v61  ;;  %v4934_v30 = vpack.c.bf16 %v1929_v28, %v1928_v35  ;;  %v1930_v35 = vld [vmem:[#allocation2 + $0xa8] sm:$0xff] }
 0x19e   : > { %v1396_v37 = vpop.f32.mrf.mxu2 }
 0x19f   : > { %v4926_v46 = vadd.f32 %v1396_v37, %v1259_v22  ;;  %v1709_v37 = vld [vmem:[#allocation2 + $0x10f] sm:$0xff] }
 0x1a0   : > { %v1264_v21 = vpop.f32.mrf.mxu1  ;;  %v4932_v50 = vpop.f32.mrf.mxu0 }
 0x1a1   : > { %5801 = vst [vmem:[#allocation55_spill] sm:$0xff] %v4932_v50 }
 0x1a3   : > { %1438 = vmatmul.bf16.gmra.mxu2 %v1088_v60  ;;  %1869 = vmatmul.bf16.gmra.mxu0 %v1088_v60  ;;  %v1708_v60 = vld [vmem:[#allocation2 + $0x107] sm:$0xff] }
 0x1a6   : > { %v1399_v34 = vpop.f32.mrf.mxu2 }
 0x1a7   : > { %v4928_v23 = vadd.f32 %v1399_v34, %v1262_v33  ;;  %v1725_v34 = vpack.c.bf16 %v1709_v37, %v1708_v60 }
 0x1a8   : > { %v4930_v1 = vpop.f32.mrf.mxu1  ;;  %v4941_v41 = vpop.f32.mrf.mxu0 }
 0x1a9   : > { %5802 = vst [vmem:[#allocation56_spill] sm:$0xff] %v4941_v41 }
 0x1ab   : > { %1565 = vmatmul.bf16.vlgmr.msrb.gmra.mxu3 %v1476_v14  ;;  %2073 = vmatmul.bf16.gmra.mxu1 %v4934_v30  ;;  %v3788_v14 = vld [vmem:[%s5645_s7 + $0x1b0] sm:$0xff] }
 0x1ac   : > { %2494 = vmatpush.bf16.msra.mxu3 %v3788_v14  ;;  %v2615_v14 = vld [vmem:[#allocation2 + $0x30] sm:$0xff] }
 0x1ae   : > { %v1401_v22 = vpop.f32.mrf.mxu2  ;;  %v1267_v55 = vpop.f32.mrf.mxu3 }
 0x1af   : > { %v4937_v7 = vadd.f32 %v1401_v22, %v1264_v21  ;;  %v1931_v21 = vld [vmem:[#allocation2 + $0xb0] sm:$0xff] }
 0x1b0   : > { %v4939_v33 = vpop.f32.mrf.mxu1  ;;  %v4953_v37 = vpack.c.bf16 %v1931_v21, %v1930_v35  ;;  %v4956_v13 = vpop.f32.mrf.mxu0  ;;  %v2646_v35 = vpack.c.bf16 %v2615_v14, %v2614_v27  ;;  %v2617_v14 = vld [vmem:[#allocation2 + $0x40] sm:$0xff] }
 0x1b1   : > { %5803 = vst [vmem:[#allocation57_spill] sm:$0xff] %v4956_v13  ;;  %v1933_v13 = vld [vmem:[#allocation2 + $0xc0] sm:$0xff] }
 0x1b3   : > { %1874 = vmatmul.bf16.gmra.mxu0 %v1725_v34  ;;  %2267 = vmatmul.bf16.vlgmr.msra.gmra.mxu2 %v2178_v49  ;;  %v2149_v34 = vld [vmem:[#allocation2 + $0x31] sm:$0xff] }
 0x1b6   : > { %v1404_v61 = vpop.f32.mrf.mxu2  ;;  %v1269_v58 = vpop.f32.mrf.mxu3 }
 0x1b7   : > { %v4946_v28 = vadd.f32 %v1404_v61, %v1267_v55  ;;  %v2148_v61 = vld [vmem:[#allocation2 + $0x29] sm:$0xff] }
 0x1b8   : > { %v4948_v22 = vpop.f32.mrf.mxu1  ;;  %v4962_v50 = vpack.c.bf16 %v2149_v34, %v2148_v61  ;;  %v4965_v54 = vpop.f32.mrf.mxu0  ;;  %v2151_v34 = vld [vmem:[#allocation2 + $0x41] sm:$0xff] }
 0x1b9   : > { %5804 = vst [vmem:[#allocation58_spill] sm:$0xff] %v4965_v54 }
 0x1bb   : > { %1570 = vmatmul.bf16.gmra.mxu3 %v2178_v49  ;;  %2078 = vmatmul.bf16.gmra.mxu1 %v4953_v37 }
 0x1be   : > { %v1406_v60 = vpop.f32.mrf.mxu2  ;;  %v1272_v41 = vpop.f32.mrf.mxu3 }
 0x1bf   : > { %v4958_v55 = vadd.f32 %v1406_v60, %v1269_v58  ;;  %v4971_v60 = vpack.c.bf16 %v1933_v13, %v1932_v12  ;;  %v2647_v13 = vpack.c.bf16 %v2617_v14, %v2616_v29  ;;  %v3787_v12 = vld [vmem:[%s5645_s7 + $0x1a8] sm:$0xff] }
 0x1c0   : > { %v4960_v16 = vpop.f32.mrf.mxu1  ;;  %2495 = vmatpush.bf16.msra.mxu3 %v3787_v12  ;;  %v2619_v12 = vld [vmem:[#allocation2 + $0x50] sm:$0xff] }
 0x1c3   : > { %2272 = vmatmul.bf16.gmra.mxu2 %v4962_v50  ;;  %2735 = vmatmul.bf16.vlgmr.msra.gmra.mxu0 %v2646_v35 }
 0x1c6   : > { %v1409_v49 = vpop.f32.mrf.mxu2  ;;  %v1274_v21 = vpop.f32.mrf.mxu3 }
 0x1c7   : > { %v4967_v36 = vadd.f32 %v1409_v49, %v1272_v41  ;;  %v4979_v41 = vpop.f32.mrf.mxu0  ;;  %v4981_v49 = vpack.c.bf16 %v2151_v34, %v2150_v8  ;;  %v3803_v8 = vld [vmem:[%s5645_s7 + $0x228] sm:$0xff] }
 0x1c8   : > { %v4969_v58 = vpop.f32.mrf.mxu1  ;;  %5807 = vst [vmem:[#allocation61_spill] sm:$0xff] %v4979_v41  ;;  %2963 = vmatpush.bf16.msra.mxu1 %v3803_v8  ;;  %v2152_v41 = vld [vmem:[#allocation2 + $0x49] sm:$0xff] }
 0x1c9   : > { %5805 = vst [vmem:[#allocation59_spill] sm:$0xff] %v4967_v36 }
 0x1cb   : > { %1575 = vmatmul.bf16.gmra.mxu3 %v4962_v50  ;;  %2083 = vmatmul.bf16.gmra.mxu1 %v4971_v60 }
 0x1ce   : > { %v1411_v27 = vpop.f32.mrf.mxu2  ;;  %v1277_v61 = vpop.f32.mrf.mxu3 }
 0x1cf   : > { %v4975_v35 = vadd.f32 %v1411_v27, %v1274_v21  ;;  %v1934_v27 = vld [vmem:[#allocation2 + $0xc8] sm:$0xff]  ;;  %v4996_v34 = vpop.f32.mrf.mxu0 }
 0x1d0   : > { %v4977_v40 = vpop.f32.mrf.mxu1  ;;  %v4994_v29 = vpack.c.bf16 %v1935_v26, %v1934_v27  ;;  %5809 = vst [vmem:[#allocation63_spill] sm:$0xff] %v4996_v34  ;;  %v2648_v26 = vpack.c.bf16 %v2619_v12, %v2618_v0 }
 0x1d1   : > { %5806 = vst [vmem:[#allocation60_spill] sm:$0xff] %v4975_v35  ;;  %v2626_v35 = vld [vmem:[#allocation2 + $0x88] sm:$0xff] }
 0x1d3   : > { %2277 = vmatmul.bf16.gmra.mxu2 %v4981_v49  ;;  %2740 = vmatmul.bf16.gmra.mxu0 %v2647_v13  ;;  %v2153_v13 = vld [vmem:[#allocation2 + $0x51] sm:$0xff] }
 0x1d4   : > { %v5004_v57 = vpack.c.bf16 %v2153_v13, %v2152_v41  ;;  %v2155_v41 = vld [vmem:[#allocation2 + $0x61] sm:$0xff] }
 0x1d5   : > { %v2621_v13 = vld [vmem:[#allocation2 + $0x60] sm:$0xff] }
 0x1d6   : > { %v1414_v54 = vpop.f32.mrf.mxu2  ;;  %v1279_v21 = vpop.f32.mrf.mxu3 }
 0x1d7   : > { %v4987_v53 = vadd.f32 %v1414_v54, %v1277_v61  ;;  %v5007_v27 = vpop.f32.mrf.mxu0 }
 0x1d8   : > { %v4989_v56 = vpop.f32.mrf.mxu1  ;;  %5811 = vst [vmem:[#allocation65_spill] sm:$0xff] %v5007_v27 }
 0x1d9   : > { %5808 = vst [vmem:[#allocation62_spill] sm:$0xff] %v4987_v53 }
 0x1db   : > { %1580 = vmatmul.bf16.gmra.mxu3 %v4981_v49  ;;  %2088 = vmatmul.bf16.gmra.mxu1 %v4994_v29 }
 0x1de   : > { %v1416_v14 = vpop.f32.mrf.mxu2  ;;  %v1282_v54 = vpop.f32.mrf.mxu3 }
 0x1df   : > { %v5000_v61 = vadd.f32 %v1416_v14, %v1279_v21  ;;  %v5013_v14 = vpack.c.bf16 %v1937_v20, %v1936_v19  ;;  %v3786_v20 = vld [vmem:[%s5645_s7 + $0x1a0] sm:$0xff] }
 0x1e0   : > { %v5002_v4 = vpop.f32.mrf.mxu1  ;;  %2496 = vmatpush.bf16.msra.mxu3 %v3786_v20  ;;  %v2157_v20 = vld [vmem:[#allocation2 + $0x71] sm:$0xff] }
 0x1e1   : > { %5810 = vst [vmem:[#allocation64_spill] sm:$0xff] %v5000_v61  ;;  %v1943_v61 = vld [vmem:[#allocation2 + $0x110] sm:$0xff] }
 0x1e3   : > { %2282 = vmatmul.bf16.gmra.mxu2 %v5004_v57  ;;  %2745 = vmatmul.bf16.gmra.mxu0 %v2648_v26  ;;  %v5017_v26 = vpop.f32.mrf.mxu0 }
 0x1e4   : > { %5814 = vst [vmem:[#allocation68_spill] sm:$0xff] %v5017_v26  ;;  %v1938_v26 = vld [vmem:[#allocation2 + $0xe8] sm:$0xff] }
 0x1e6   : > { %v1419_v8 = vpop.f32.mrf.mxu2  ;;  %v1284_v34 = vpop.f32.mrf.mxu3 }
 0x1e7   : > { %v5009_v31 = vadd.f32 %v1419_v8, %v1282_v54  ;;  %v5021_v54 = vpack.c.bf16 %v2155_v41, %v2154_v62  ;;  %v2649_v8 = vpack.c.bf16 %v2621_v13, %v2620_v47  ;;  %v3802_v47 = vld [vmem:[%s5645_s7 + $0x220] sm:$0xff] }
 0x1e8   : > { %v5011_v21 = vpop.f32.mrf.mxu1  ;;  %2964 = vmatpush.bf16.msra.mxu1 %v3802_v47 }
 0x1e9   : > { %5812 = vst [vmem:[#allocation66_spill] sm:$0xff] %v5009_v31 }
 0x1ea   : > { %5813 = vst [vmem:[#allocation67_spill] sm:$0xff] %v5011_v21 }
 0x1eb   : > { %1585 = vmatmul.bf16.gmra.mxu3 %v5004_v57  ;;  %2093 = vmatmul.bf16.gmra.mxu1 %v5013_v14  ;;  %v5034_v62 = vpop.f32.mrf.mxu0 }
 0x1ec   : > { %5818 = vst [vmem:[#allocation72_spill] sm:$0xff] %v5034_v62  ;;  %v2156_v62 = vld [vmem:[#allocation2 + $0x69] sm:$0xff] }
 0x1ee   : > { %v1421_v0 = vpop.f32.mrf.mxu2  ;;  %v1287_v12 = vpop.f32.mrf.mxu3 }
 0x1ef   : > { %v5019_v27 = vadd.f32 %v1421_v0, %v1284_v34  ;;  %v1939_v34 = vld [vmem:[#allocation2 + $0xf0] sm:$0xff] }
 0x1f0   : > { %v5024_v19 = vpop.f32.mrf.mxu1  ;;  %v5036_v41 = vpack.c.bf16 %v1939_v34, %v1938_v26  ;;  %v2622_v26 = vld [vmem:[#allocation2 + $0x68] sm:$0xff]  ;;  %v5047_v34 = vpack.c.bf16 %v2157_v20, %v2156_v62 }
 0x1f1   : > { %5815 = vst [vmem:[#allocation69_spill] sm:$0xff] %v5019_v27  ;;  %v3799_v62 = vld [vmem:[%s5645_s7 + $0x208] sm:$0xff] }
 0x1f2   : > { %5816 = vst [vmem:[#allocation70_spill] sm:$0xff] %v5024_v19  ;;  %v2623_v19 = vld [vmem:[#allocation2 + $0x70] sm:$0xff] }
 0x1f3   : > { %2287 = vmatmul.bf16.gmra.mxu2 %v5021_v54  ;;  %2750 = vmatmul.bf16.gmra.mxu0 %v2649_v8  ;;  %v2650_v47 = vpack.c.bf16 %v2623_v19, %v2622_v26  ;;  %v5052_v51 = vpop.f32.mrf.mxu0  ;;  %v3798_v26 = vld [vmem:[%s5645_s7 + $0x200] sm:$0xff] }
 0x1f4   : > { %5821 = vst [vmem:[#allocation75_spill] sm:$0xff] %v5052_v51  ;;  %v2159_v51 = vld [vmem:[#allocation2 + $0x81] sm:$0xff] }
 0x1f6   : > { %v1424_v21 = vpop.f32.mrf.mxu2  ;;  %v1289_v5 = vpop.f32.mrf.mxu3 }
 0x1f7   : > { %v5029_v0 = vadd.f32 %v1424_v21, %v1287_v12  ;;  %v3801_v12 = vld [vmem:[%s5645_s7 + $0x218] sm:$0xff] }
 0x1f8   : > { %v5040_v13 = vpop.f32.mrf.mxu1  ;;  %2965 = vmatpush.bf16.msra.mxu1 %v3801_v12 }
 0x1f9   : > { %5817 = vst [vmem:[#allocation71_spill] sm:$0xff] %v5029_v0 }
 0x1fa   : > { %5819 = vst [vmem:[#allocation73_spill] sm:$0xff] %v5040_v13  ;;  %v3800_v13 = vld [vmem:[%s5645_s7 + $0x210] sm:$0xff] }
 0x1fb   : > { %1590 = vmatmul.bf16.gmra.mxu3 %v5021_v54  ;;  %2098 = vmatmul.bf16.gmra.mxu1 %v5036_v41 }
 0x1fc   : > { %2966 = vmatpush.bf16.msra.mxu1 %v3800_v13  ;;  %v5069_v13 = vpop.f32.mrf.mxu0 }
 0x1fd   : > { %5824 = vst [vmem:[#allocation78_spill] sm:$0xff] %v5069_v13 }
 0x1fe   : > { %v1426_v8 = vpop.f32.mrf.mxu2  ;;  %v1292_v21 = vpop.f32.mrf.mxu3 }
 0x1ff   : > { %v5045_v25 = vadd.f32 %v1426_v8, %v1289_v5  ;;  %v1940_v5 = vld [vmem:[#allocation2 + $0xf8] sm:$0xff]  ;;  %v1941_v8 = vld [vmem:[#allocation2 + $0x100] sm:$0xff] }
 0x200   : > { %v5060_v19 = vpop.f32.mrf.mxu1  ;;  %2967 = vmatpush.bf16.msra.mxu1 %v3799_v62  ;;  %v5062_v12 = vpack.c.bf16 %v1941_v8, %v1940_v5  ;;  %v2158_v62 = vld [vmem:[#allocation2 + $0x79] sm:$0xff] }
 0x201   : > { %5820 = vst [vmem:[#allocation74_spill] sm:$0xff] %v5045_v25  ;;  %v2624_v5 = vld [vmem:[#allocation2 + $0x78] sm:$0xff] }
 0x202   : > { %5823 = vst [vmem:[#allocation77_spill] sm:$0xff] %v5060_v19  ;;  %v5075_v19 = vpack.c.bf16 %v2159_v51, %v2158_v62  ;;  %v2161_v62 = vld [vmem:[#allocation2 + $0x91] sm:$0xff] }
 0x203   : > { %2292 = vmatmul.bf16.gmra.mxu2 %v5047_v34  ;;  %2755 = vmatmul.bf16.gmra.mxu0 %v2650_v47 }
 0x204   : > { %2968 = vmatpush.bf16.msra.mxu1 %v3798_v26  ;;  %v3785_v26 = vld [vmem:[%s5645_s7 + $0x198] sm:$0xff] }
 0x205   : > { %2497 = vmatpush.bf16.msra.mxu3 %v3785_v26 }
 0x206   : > { %v1429_v0 = vpop.f32.mrf.mxu2  ;;  %v1294_v27 = vpop.f32.mrf.mxu3 }
 0x207   : > { %v5058_v20 = vadd.f32 %v1429_v0, %v1292_v21  ;;  %v2625_v0 = vld [vmem:[#allocation2 + $0x80] sm:$0xff] }
 0x208   : > { %v5073_v8 = vpop.f32.mrf.mxu1  ;;  %v2651_v25 = vpack.c.bf16 %v2625_v0, %v2624_v5  ;;  %v2160_v0 = vld [vmem:[#allocation2 + $0x89] sm:$0xff] }
 0x209   : > { %5822 = vst [vmem:[#allocation76_spill] sm:$0xff] %v5058_v20  ;;  %v2627_v5 = vld [vmem:[#allocation2 + $0x90] sm:$0xff] }
 0x20a   : > { %5826 = vst [vmem:[#allocation80_spill] sm:$0xff] %v5073_v8 }
 0x20b   : > { %1595 = vmatmul.bf16.gmra.mxu3 %v5047_v34  ;;  %2103 = vmatmul.bf16.gmra.mxu1 %v5062_v12 }
 0x20e   : > { %v1431_v47 = vpop.f32.mrf.mxu2  ;;  %v1297_v21 = vpop.f32.mrf.mxu3 }
 0x20f   : > { %v5071_v20 = vadd.f32 %v1431_v47, %v1294_v27  ;;  %v5081_v27 = vpop.f32.mrf.mxu0 }
 0x210   : > { %5827 = vst [vmem:[#allocation81_spill] sm:$0xff] %v5081_v27  ;;  %v5087_v51 = vpop.f32.mrf.mxu1 }
 0x211   : > { %5825 = vst [vmem:[#allocation79_spill] sm:$0xff] %v5071_v20  ;;  %v1942_v20 = vld [vmem:[#allocation2 + $0x108] sm:$0xff] }
 0x212   : > { %v5085_v8 = vpack.c.bf16 %v1943_v61, %v1942_v20  ;;  %5829 = vst [vmem:[#allocation83_spill] sm:$0xff] %v5087_v51  ;;  %v2652_v61 = vpack.c.bf16 %v2627_v5, %v2626_v35 }
 0x213   : > { %2297 = vmatmul.bf16.gmra.mxu2 %v5075_v19  ;;  %2760 = vmatmul.bf16.gmra.mxu0 %v2651_v25 }
 0x216   : > { %v1434_v13 = vpop.f32.mrf.mxu2  ;;  %v1299_v31 = vpop.f32.mrf.mxu3 }
 0x217   : > { %v5083_v47 = vadd.f32 %v1434_v13, %v1297_v21  ;;  %v5093_v27 = vpop.f32.mrf.mxu0  ;;  %v5095_v13 = vpack.c.bf16 %v2161_v62, %v2160_v0  ;;  %v2163_v0 = vld [vmem:[#allocation2 + $0xa1] sm:$0xff] }
 0x218   : > { %5830 = vst [vmem:[#allocation84_spill] sm:$0xff] %v5093_v27  ;;  %v5098_v20 = vpop.f32.mrf.mxu1 }
 0x219   : > { %5828 = vst [vmem:[#allocation82_spill] sm:$0xff] %v5083_v47 }
 0x21b   : > { %1600 = vmatmul.bf16.gmra.mxu3 %v5075_v19  ;;  %2108 = vmatmul.bf16.gmra.mxu1 %v5085_v8 }
 0x21e   : > { %v1436_v25 = vpop.f32.mrf.mxu2  ;;  %v1302_v26 = vpop.f32.mrf.mxu3 }
 0x21f   : > { %v5091_v53 = vadd.f32 %v1436_v25, %v1299_v31  ;;  %v5102_v36 = vpop.f32.mrf.mxu0  ;;  %v2162_v25 = vld [vmem:[#allocation2 + $0x99] sm:$0xff] }
 0x220   : > { %5831 = vst [vmem:[#allocation85_spill] sm:$0xff] %v5102_v36  ;;  %v5106_v35 = vpop.f32.mrf.mxu1  ;;  %v5111_v27 = vpack.c.bf16 %v2163_v0, %v2162_v25 }
 0x223   : > { %2302 = vmatmul.bf16.gmra.mxu2 %v5095_v13  ;;  %2765 = vmatmul.bf16.gmra.mxu0 %v2652_v61 }
 0x226   : > { %v1439_v21 = vpop.f32.mrf.mxu2  ;;  %v1304_v51 = vpop.f32.mrf.mxu3 }
 0x227   : > { %v5100_v47 = vadd.f32 %v1439_v21, %v1302_v26  ;;  %v5119_v21 = vpop.f32.mrf.mxu0 }
 0x228   : > { %5832 = vst [vmem:[#allocation86_spill] sm:$0xff] %v5119_v21 }
 0x22b   : > { %1605 = vmatmul.bf16.gmra.mxu3 %v5095_v13  ;;  %2969 = vmatmul.bf16.vlgmr.msra.gmra.mxu1 %v4962_v50  ;;  %v3784_v50 = vld [vmem:[%s5645_s7 + $0x190] sm:$0xff] }
 0x22c   : > { %2498 = vmatpush.bf16.msra.mxu3 %v3784_v50 }
 0x22e   : > { %v1441_v31 = vpop.f32.mrf.mxu2  ;;  %v1566_v62 = vpop.f32.mrf.mxu3 }
 0x22f   : > { %v5108_v5 = vadd.f32 %v1441_v31, %v1304_v51  ;;  %v1646_v61 = vadd.f32 %v1566_v62, %v4777_v6  ;;  %v5131_v50 = vpop.f32.mrf.mxu0 }
 0x230   : > { %5833 = vst [vmem:[#allocation87_spill] sm:$0xff] %v5131_v50  ;;  %v2388_v50 = vld [vmem:[#allocation2 + $0x67] sm:$0xff] }
 0x231   : > { %v1880_v26 = vadd.f32 %v4787_v52, %v1646_v61  ;;  %v5125_v52 = vpop.f32.mrf.mxu1  ;;  %v2164_v61 = vld [vmem:[#allocation2 + $0xa9] sm:$0xff] }
 0x233   : > { %2307 = vmatmul.bf16.gmra.mxu2 %v5111_v27  ;;  %2770 = vmatmul.bf16.gmra.mxu0 %v4934_v30  ;;  %v2114_v36 = vadd.f32 %v4930_v1, %v1880_v26  ;;  %v2165_v1 = vld [vmem:[#allocation2 + $0xb1] sm:$0xff] }
 0x236   : > { %v2268_v51 = vpop.f32.mrf.mxu2  ;;  %v1568_v31 = vpop.f32.mrf.mxu3 }
 0x237   : > { %v5122_v6 = vadd.f32 %v2268_v51, %v2114_v36  ;;  %v1647_v25 = vadd.f32 %v1568_v31, %v4782_v42  ;;  %v5136_v51 = vpack.c.bf16 %v2165_v1, %v2164_v61  ;;  %v2167_v1 = vld [vmem:[#allocation2 + $0xc1] sm:$0xff] }
 0x239   : > { %v1881_v0 = vadd.f32 %v4794_v15, %v1647_v25  ;;  %v5139_v31 = vpop.f32.mrf.mxu1 }
 0x23b   : > { %1610 = vmatmul.bf16.gmra.mxu3 %v5111_v27  ;;  %2974 = vmatmul.bf16.gmra.mxu1 %v4981_v49  ;;  %v2115_v30 = vadd.f32 %v4939_v33, %v1881_v0 }
 0x23e   : > { %v2270_v62 = vpop.f32.mrf.mxu2  ;;  %v1571_v26 = vpop.f32.mrf.mxu3 }
 0x23f   : > { %v5133_v36 = vadd.f32 %v2270_v62, %v2115_v30  ;;  %v1648_v42 = vadd.f32 %v1571_v26, %v4792_v32  ;;  %v5147_v62 = vpop.f32.mrf.mxu0 }
 0x240   : > { %5834 = vst [vmem:[#allocation88_spill] sm:$0xff] %v5147_v62  ;;  %v2386_v62 = vld [vmem:[#allocation2 + $0x57] sm:$0xff] }
 0x241   : > { %v1882_v15 = vadd.f32 %v4802_v39, %v1648_v42  ;;  %v5152_v39 = vpop.f32.mrf.mxu1 }
 0x243   : > { %2312 = vmatmul.bf16.gmra.mxu2 %v5136_v51  ;;  %2775 = vmatmul.bf16.gmra.mxu0 %v4953_v37  ;;  %v2116_v33 = vadd.f32 %v4948_v22, %v1882_v15  ;;  %v2166_v22 = vld [vmem:[#allocation2 + $0xb9] sm:$0xff] }
 0x244   : > { %v5158_v15 = vpack.c.bf16 %v2167_v1, %v2166_v22  ;;  %v2169_v22 = vld [vmem:[#allocation2 + $0xd1] sm:$0xff] }
 0x246   : > { %v2273_v49 = vpop.f32.mrf.mxu2  ;;  %v1573_v25 = vpop.f32.mrf.mxu3 }
 0x247   : > { %v5144_v0 = vadd.f32 %v2273_v49, %v2116_v33  ;;  %v1649_v30 = vadd.f32 %v1573_v25, %v4800_v43  ;;  %v5161_v33 = vpop.f32.mrf.mxu0 }
 0x248   : > { %5835 = vst [vmem:[#allocation89_spill] sm:$0xff] %v5161_v33 }
 0x249   : > { %v1883_v32 = vadd.f32 %v4809_v17, %v1649_v30 }
 0x24b   : > { %1615 = vmatmul.bf16.gmra.mxu3 %v5136_v51  ;;  %2979 = vmatmul.bf16.gmra.mxu1 %v5004_v57  ;;  %v2117_v37 = vadd.f32 %v4960_v16, %v1883_v32  ;;  %v3783_v57 = vld [vmem:[%s5645_s7 + $0x188] sm:$0xff] }
 0x24c   : > { %2499 = vmatpush.bf16.msra.mxu3 %v3783_v57 }
 0x24e   : > { %v2275_v61 = vpop.f32.mrf.mxu2  ;;  %v1576_v26 = vpop.f32.mrf.mxu3 }
 0x24f   : > { %v5155_v42 = vadd.f32 %v2275_v61, %v2117_v37  ;;  %v1650_v43 = vadd.f32 %v1576_v26, %v4807_v3  ;;  %v5169_v3 = vpop.f32.mrf.mxu1  ;;  %v2168_v61 = vld [vmem:[#allocation2 + $0xc9] sm:$0xff] }
 0x251   : > { %v1884_v17 = vadd.f32 %v4817_v11, %v1650_v43 }
 0x253   : > { %2317 = vmatmul.bf16.gmra.mxu2 %v5158_v15  ;;  %2780 = vmatmul.bf16.gmra.mxu0 %v4971_v60  ;;  %v2118_v16 = vadd.f32 %v4969_v58, %v1884_v17  ;;  %v5177_v60 = vpop.f32.mrf.mxu0 }
 0x254   : > { %5836 = vst [vmem:[#allocation90_spill] sm:$0xff] %v5177_v60  ;;  %v2382_v60 = vld [vmem:[#allocation2 + $0x37] sm:$0xff] }
 0x256   : > { %v2278_v49 = vpop.f32.mrf.mxu2  ;;  %v1578_v25 = vpop.f32.mrf.mxu3 }
 0x257   : > { %v5171_v30 = vadd.f32 %v2278_v49, %v2118_v16  ;;  %v1651_v11 = vadd.f32 %v1578_v25, %v4815_v24  ;;  %v5183_v17 = vpop.f32.mrf.mxu1  ;;  %v5185_v24 = vpack.c.bf16 %v2169_v22, %v2168_v61 }
 0x259   : > { %v1885_v32 = vadd.f32 %v4824_v10, %v1651_v11 }
 0x25b   : > { %1620 = vmatmul.bf16.gmra.mxu3 %v5158_v15  ;;  %2984 = vmatmul.bf16.gmra.mxu1 %v5021_v54  ;;  %v2119_v37 = vadd.f32 %v4977_v40, %v1885_v32  ;;  %v5191_v16 = vpop.f32.mrf.mxu0  ;;  %v2171_v32 = vld [vmem:[#allocation2 + $0xe1] sm:$0xff] }
 0x25c   : > { %5837 = vst [vmem:[#allocation91_spill] sm:$0xff] %v5191_v16 }
 0x25e   : > { %v2280_v58 = vpop.f32.mrf.mxu2  ;;  %v1581_v1 = vpop.f32.mrf.mxu3 }
 0x25f   : > { %v5180_v26 = vadd.f32 %v2280_v58, %v2119_v37  ;;  %v1652_v43 = vadd.f32 %v1581_v1, %v4822_v38  ;;  %v5197_v11 = vpop.f32.mrf.mxu1 }
 0x261   : > { %v1886_v10 = vadd.f32 %v4832_v48, %v1652_v43  ;;  %v2172_v43 = vld [vmem:[#allocation2 + $0xe9] sm:$0xff] }
 0x263   : > { %2322 = vmatmul.bf16.gmra.mxu2 %v5185_v24  ;;  %2785 = vmatmul.bf16.gmra.mxu0 %v4994_v29  ;;  %v2120_v40 = vadd.f32 %v4989_v56, %v1886_v10  ;;  %v2170_v56 = vld [vmem:[#allocation2 + $0xd9] sm:$0xff]  ;;  %v2173_v10 = vld [vmem:[#allocation2 + $0xf1] sm:$0xff] }
 0x266   : > { %v2283_v54 = vpop.f32.mrf.mxu2  ;;  %v1583_v57 = vpop.f32.mrf.mxu3 }
 0x267   : > { %v5193_v49 = vadd.f32 %v2283_v54, %v2120_v40  ;;  %v1653_v38 = vadd.f32 %v1583_v57, %v4830_v44  ;;  %v5207_v44 = vpop.f32.mrf.mxu0  ;;  %v5230_v57 = vpack.c.bf16 %v2173_v10, %v2172_v43  ;;  %v2177_v43 = vld [vmem:[#allocation2 + $0x111] sm:$0xff] }
 0x269   : > { %v1887_v25 = vadd.f32 %v4845_v63, %v1653_v38  ;;  %v5209_v63 = vpack.c.bf16 %v2171_v32, %v2170_v56 }
 0x26b   : > { %1625 = vmatmul.bf16.gmra.mxu3 %v5185_v24  ;;  %2989 = vmatmul.bf16.gmra.mxu1 %v5047_v34  ;;  %v2121_v48 = vadd.f32 %v5002_v4, %v1887_v25  ;;  %v3782_v4 = vld [vmem:[%s5645_s7 + $0x180] sm:$0xff]  ;;  %v5216_v34 = vpop.f32.mrf.mxu1 }
 0x26c   : > { %2500 = vmatpush.bf16.msra.mxu3 %v3782_v4 }
 0x26e   : > { %v2285_v29 = vpop.f32.mrf.mxu2  ;;  %v1586_v37 = vpop.f32.mrf.mxu3 }
 0x26f   : > { %v5202_v58 = vadd.f32 %v2285_v29, %v2121_v48  ;;  %v5205_v61 = vadd.f32 %v1586_v37, %v4843_v9  ;;  %v5221_v9 = vpop.f32.mrf.mxu0 }
 0x273   : > { %2327 = vmatmul.bf16.gmra.mxu2 %v5209_v63  ;;  %2790 = vmatmul.bf16.gmra.mxu0 %v5013_v14  ;;  %v5225_v40 = vpop.f32.mrf.mxu1 }
 0x274   : > { %5838 = vst [vmem:[#allocation92_spill] sm:$0xff] %v5225_v40 }
 0x276   : > { %v1588_v22 = vpop.f32.mrf.mxu3 }
 0x277   : > { %v5219_v1 = vadd.f32 %v1588_v22, %v4857_v45  ;;  %v5234_v45 = vpop.f32.mrf.mxu0  ;;  %v2176_v22 = vld [vmem:[#allocation2 + $0x109] sm:$0xff] }
 0x27b   : > { %1630 = vmatmul.bf16.gmra.mxu3 %v5209_v63  ;;  %2994 = vmatmul.bf16.gmra.mxu1 %v5075_v19  ;;  %v5239_v19 = vpop.f32.mrf.mxu1 }
 0x27c   : > { %5839 = vst [vmem:[#allocation93_spill] sm:$0xff] %v5239_v19 }
 0x27e   : > { %v1591_v14 = vpop.f32.mrf.mxu3 }
 0x27f   : > { %v5228_v54 = vadd.f32 %v1591_v14, %v4876_v18  ;;  %v2175_v18 = vld [vmem:[#allocation2 + $0x101] sm:$0xff]  ;;  %v5243_v29 = vpop.f32.mrf.mxu0 }
 0x283   : > { %2332 = vmatmul.bf16.gmra.mxu2 %v5230_v57  ;;  %2795 = vmatmul.bf16.gmra.mxu0 %v5036_v41  ;;  %v2174_v41 = vld [vmem:[#allocation2 + $0xf9] sm:$0xff]  ;;  %v5250_v37 = vpop.f32.mrf.mxu1 }
 0x284   : > { %v5248_v32 = vpack.c.bf16 %v2175_v18, %v2174_v41  ;;  %5840 = vst [vmem:[#allocation94_spill] sm:$0xff] %v5250_v37  ;;  %v2381_v18 = vld [vmem:[#allocation2 + $0x2f] sm:$0xff]  ;;  %v2380_v41 = vld [vmem:[#allocation2 + $0x27] sm:$0xff] }
 0x285   : > { %v5858_v37 = vld [vmem:[#allocation79_spill] sm:$0xff] }
 0x286   : > { %v1593_v38 = vpop.f32.mrf.mxu3 }
 0x287   : > { %v5237_v25 = vadd.f32 %v1593_v38, %v4896_v2  ;;  %v5266_v38 = vpack.c.bf16 %v2177_v43, %v2176_v22 }
 0x28b   : > { %1635 = vmatmul.bf16.gmra.mxu3 %v5230_v57  ;;  %2999 = vmatmul.bf16.gmra.mxu1 %v5095_v13  ;;  %v5257_v13 = vpop.f32.mrf.mxu0 }
 0x28e   : > { %v1596_v48 = vpop.f32.mrf.mxu3 }
 0x28f   : > { %v5246_v56 = vadd.f32 %v1596_v48, %v4909_v59  ;;  %v5261_v59 = vpop.f32.mrf.mxu1 }
 0x290   : > { %5841 = vst [vmem:[#allocation95_spill] sm:$0xff] %v5261_v59 }
 0x293   : > { %2337 = vmatmul.bf16.gmra.mxu2 %v5248_v32  ;;  %2800 = vmatmul.bf16.gmra.mxu0 %v5062_v12  ;;  %v5268_v12 = vpop.f32.mrf.mxu0 }
 0x296   : > { %v1598_v2 = vpop.f32.mrf.mxu3 }
 0x297   : > { %v5255_v4 = vadd.f32 %v1598_v2, %v4926_v46  ;;  %v5272_v48 = vpop.f32.mrf.mxu1  ;;  %v2412_v2 = vpack.c.bf16 %v2381_v18, %v2380_v41 }
 0x298   : > { %5842 = vst [vmem:[#allocation96_spill] sm:$0xff] %v5272_v48 }
 0x29b   : > { %1640 = vmatmul.bf16.gmra.mxu3 %v5248_v32  ;;  %3004 = vmatmul.bf16.gmra.mxu1 %v5111_v27 }
 0x29e   : > { %v1601_v10 = vpop.f32.mrf.mxu3 }
 0x29f   : > { %v5264_v14 = vadd.f32 %v1601_v10, %v4928_v23  ;;  %v5281_v43 = vpop.f32.mrf.mxu1 }
 0x2a0   : > { %5843 = vst [vmem:[#allocation97_spill] sm:$0xff] %v5281_v43 }
 0x2a3   : > { %2342 = vmatmul.bf16.gmra.mxu2 %v5266_v38  ;;  %2805 = vmatmul.bf16.gmra.mxu0 %v5085_v8  ;;  %v2383_v8 = vld [vmem:[#allocation2 + $0x3f] sm:$0xff] }
 0x2a4   : > { %v2413_v33 = vpack.c.bf16 %v2383_v8, %v2382_v60 }
 0x2a6   : > { %v1603_v46 = vpop.f32.mrf.mxu3 }
 0x2a7   : > { %v5275_v27 = vadd.f32 %v1603_v46, %v4937_v7  ;;  %v5286_v7 = vpop.f32.mrf.mxu1 }
 0x2a8   : > { %5844 = vst [vmem:[#allocation98_spill] sm:$0xff] %v5286_v7  ;;  %v5850_v7 = vld [vmem:[#allocation64_spill] sm:$0xff] }
 0x2ab   : > { %2501 = vmatmul.bf16.vlgmr.msra.gmra.mxu3 %v2412_v2  ;;  %3009 = vmatmul.bf16.gmra.mxu1 %v5136_v51  ;;  %v5845_v51 = vld [vmem:[#allocation59_spill] sm:$0xff] }
 0x2ac   : > { %v2385_v2 = vld [vmem:[#allocation2 + $0x4f] sm:$0xff] }
 0x2ae   : > { %v1606_v23 = vpop.f32.mrf.mxu3 }
 0x2af   : > { %v5279_v22 = vadd.f32 %v1606_v23, %v4946_v28  ;;  %v5292_v28 = vpop.f32.mrf.mxu1  ;;  %v5847_v23 = vld [vmem:[#allocation60_spill] sm:$0xff] }
 0x2b0   : > { %5846 = vst [vmem:[#allocation59_spill] sm:$0xff] %v5292_v28 }
 0x2b6   : > { %v1608_v10 = vpop.f32.mrf.mxu3 }
 0x2b7   : > { %v5284_v16 = vadd.f32 %v1608_v10, %v4958_v55  ;;  %v2384_v55 = vld [vmem:[#allocation2 + $0x47] sm:$0xff] }
 0x2b8   : > { %v2414_v10 = vpack.c.bf16 %v2385_v2, %v2384_v55 }
 0x2bb   : > { %2506 = vmatmul.bf16.gmra.mxu3 %v2413_v33  ;;  %3014 = vmatmul.bf16.gmra.mxu1 %v5158_v15  ;;  %v5298_v33 = vpop.f32.mrf.mxu1  ;;  %v5849_v15 = vld [vmem:[#allocation62_spill] sm:$0xff] }
 0x2bc   : > { %5848 = vst [vmem:[#allocation60_spill] sm:$0xff] %v5298_v33  ;;  %v2389_v33 = vld [vmem:[#allocation2 + $0x6f] sm:$0xff] }
 0x2bd   : > { %v2416_v59 = vpack.c.bf16 %v2389_v33, %v2388_v50 }
 0x2be   : > { %v1611_v46 = vpop.f32.mrf.mxu3 }
 0x2bf   : > { %v5290_v18 = vadd.f32 %v1611_v46, %v5845_v51  ;;  %v2387_v51 = vld [vmem:[#allocation2 + $0x5f] sm:$0xff] }
 0x2c3   : > { %v2970_v48 = vpop.f32.mrf.mxu1 }
 0x2c6   : > { %v1613_v41 = vpop.f32.mrf.mxu3 }
 0x2c7   : > { %v5295_v43 = vadd.f32 %v1613_v41, %v5847_v23  ;;  %v2415_v41 = vpack.c.bf16 %v2387_v51, %v2386_v62  ;;  %v5851_v23 = vld [vmem:[#allocation66_spill] sm:$0xff] }
 0x2cb   : > { %2511 = vmatmul.bf16.gmra.mxu3 %v2414_v10  ;;  %3019 = vmatmul.bf16.gmra.mxu1 %v5185_v24  ;;  %v2972_v55 = vpop.f32.mrf.mxu1 }
 0x2ce   : > { %v1616_v60 = vpop.f32.mrf.mxu3 }
 0x2cf   : > { %v5301_v8 = vadd.f32 %v1616_v60, %v5849_v15  ;;  %v5852_v60 = vld [vmem:[#allocation69_spill] sm:$0xff] }
 0x2d6   : > { %v1618_v46 = vpop.f32.mrf.mxu3 }
 0x2d7   : > { %v5304_v28 = vadd.f32 %v1618_v46, %v5850_v7  ;;  %v5314_v7 = vpop.f32.mrf.mxu1  ;;  %v5853_v46 = vld [vmem:[#allocation71_spill] sm:$0xff] }
 0x2db   : > { %2516 = vmatmul.bf16.gmra.mxu3 %v2415_v41  ;;  %3024 = vmatmul.bf16.gmra.mxu1 %v5209_v63  ;;  %v2391_v41 = vld [vmem:[#allocation2 + $0x7f] sm:$0xff] }
 0x2de   : > { %v1621_v2 = vpop.f32.mrf.mxu3 }
 0x2df   : > { %v5308_v24 = vadd.f32 %v1621_v2, %v5851_v23  ;;  %v5319_v2 = vpop.f32.mrf.mxu1  ;;  %v5855_v23 = vld [vmem:[#allocation74_spill] sm:$0xff] }
 0x2e6   : > { %v1623_v10 = vpop.f32.mrf.mxu3 }
 0x2e7   : > { %v5311_v15 = vadd.f32 %v1623_v10, %v5852_v60  ;;  %v2390_v10 = vld [vmem:[#allocation2 + $0x77] sm:$0xff]  ;;  %v5328_v33 = vpop.f32.mrf.mxu1 }
 0x2e8   : > { %v2417_v60 = vpack.c.bf16 %v2391_v41, %v2390_v10 }
 0x2eb   : > { %2521 = vmatmul.bf16.gmra.mxu3 %v2416_v59  ;;  %3029 = vmatmul.bf16.gmra.mxu1 %v5230_v57  ;;  %v5856_v57 = vld [vmem:[#allocation76_spill] sm:$0xff] }
 0x2ee   : > { %v1626_v62 = vpop.f32.mrf.mxu3 }
 0x2ef   : > { %v5317_v63 = vadd.f32 %v1626_v62, %v5853_v46  ;;  %v2393_v46 = vld [vmem:[#allocation2 + $0x8f] sm:$0xff] }
 0x2f1   : > { %5854 = vst [vmem:[#allocation62_spill] sm:$0xff] %v5317_v63  ;;  %v2392_v63 = vld [vmem:[#allocation2 + $0x87] sm:$0xff] }
 0x2f2   : > { %v2418_v40 = vpack.c.bf16 %v2393_v46, %v2392_v63  ;;  %v2397_v46 = vld [vmem:[#allocation2 + $0xaf] sm:$0xff] }
 0x2f6   : > { %v1628_v51 = vpop.f32.mrf.mxu3 }
 0x2f7   : > { %v5322_v21 = vadd.f32 %v1628_v51, %v5855_v23  ;;  %v5333_v51 = vpop.f32.mrf.mxu1 }
 0x2fb   : > { %2526 = vmatmul.bf16.gmra.mxu3 %v2417_v60  ;;  %3034 = vmatmul.bf16.gmra.mxu1 %v5248_v32  ;;  %v5860_v32 = vld [vmem:[#allocation82_spill] sm:$0xff]  ;;  %v2394_v60 = vld [vmem:[#allocation2 + $0x97] sm:$0xff] }
 0x2fe   : > { %v1631_v50 = vpop.f32.mrf.mxu3 }
 0x2ff   : > { %v5326_v59 = vadd.f32 %v1631_v50, %v5856_v57  ;;  %v2395_v50 = vld [vmem:[#allocation2 + $0x9f] sm:$0xff] }
 0x301   : > { %5857 = vst [vmem:[#allocation64_spill] sm:$0xff] %v5326_v59  ;;  %v2419_v59 = vpack.c.bf16 %v2395_v50, %v2394_v60  ;;  %v2399_v60 = vld [vmem:[#allocation2 + $0xbf] sm:$0xff] }
 0x306   : > { %v1633_v62 = vpop.f32.mrf.mxu3 }
 0x307   : > { %v5331_v19 = vadd.f32 %v1633_v62, %v5858_v37 }
 0x309   : > { %5859 = vst [vmem:[#allocation66_spill] sm:$0xff] %v5331_v19  ;;  %v5349_v19 = vpop.f32.mrf.mxu0 }
 0x30b   : > { %2531 = vmatmul.bf16.gmra.mxu3 %v2418_v40  ;;  %3039 = vmatmul.bf16.gmra.mxu1 %v5266_v38  ;;  %v2396_v40 = vld [vmem:[#allocation2 + $0xa7] sm:$0xff] }
 0x30e   : > { %v1636_v41 = vpop.f32.mrf.mxu3 }
 0x30f   : > { %v5337_v23 = vadd.f32 %v1636_v41, %v5860_v32  ;;  %v2420_v41 = vpack.c.bf16 %v2397_v46, %v2396_v40  ;;  %v5358_v46 = vpop.f32.mrf.mxu2 }
 0x311   : > { %5861 = vst [vmem:[#allocation69_spill] sm:$0xff] %v5337_v23  ;;  %v5356_v40 = vpop.f32.mrf.mxu0 }
 0x316   : > { %v1638_v10 = vpop.f32.mrf.mxu3 }
 0x317   : > { %v5340_v57 = vadd.f32 %v1638_v10, %v5091_v53  ;;  %v5351_v53 = vpop.f32.mrf.mxu1 }
 0x319   : > { %5862 = vst [vmem:[#allocation71_spill] sm:$0xff] %v5340_v57  ;;  %v5867_v57 = vld [vmem:[#allocation3_spill] sm:$0xff] }
 0x31b   : > { %2536 = vmatmul.bf16.gmra.mxu3 %v2419_v59 }
 0x31e   : > { %v1641_v37 = vpop.f32.mrf.mxu3 }
 0x31f   : > { %v5343_v63 = vadd.f32 %v1641_v37, %v5100_v47  ;;  %v2398_v47 = vld [vmem:[#allocation2 + $0xb7] sm:$0xff] }
 0x321   : > { %5863 = vst [vmem:[#allocation74_spill] sm:$0xff] %v5343_v63 }
 0x326   : > { %v1643_v62 = vpop.f32.mrf.mxu3 }
 0x327   : > { %v5346_v38 = vadd.f32 %v1643_v62, %v5108_v5  ;;  %v2421_v62 = vpack.c.bf16 %v2399_v60, %v2398_v47  ;;  %v5378_v60 = vpop.f32.mrf.mxu0 }
 0x329   : > { %5864 = vst [vmem:[#allocation76_spill] sm:$0xff] %v5346_v38  ;;  %v5361_v38 = vpop.f32.mrf.mxu1 }
 0x32b   : > { %2541 = vmatmul.bf16.gmra.mxu3 %v2420_v41 }
 0x32e   : > { %v2502_v32 = vpop.f32.mrf.mxu3 }
 0x32f   : > { %v2582_v23 = vadd.f32 %v2502_v32, %v5122_v6  ;;  %v5865_v6 = vld [vmem:[#allocation20_spill] sm:$0xff] }
 0x331   : > { %v2816_v59 = vadd.f32 %v5207_v44, %v2582_v23  ;;  %v5866_v44 = vld [vmem:[#allocation23_spill] sm:$0xff] }
 0x333   : > { %v3050_v50 = vadd.f32 %v2970_v48, %v2816_v59  ;;  %v5868_v48 = vunpack.c.l.bf16 %v5867_v57 }
 0x335   : > { %v3082_v41 = vmul.f32 %v3050_v50, %v5865_v6  ;;  %v5380_v50 = vpop.f32.mrf.mxu2 }
 0x336   : > { %v2504_v10 = vpop.f32.mrf.mxu3 }
 0x337   : > { %v2583_v37 = vadd.f32 %v2504_v10, %v5133_v36  ;;  %v3114_v59 = vadd.f32 %v5868_v48, %v3082_v41  ;;  %v5869_v36 = vunpack.c.h.bf16 %v5867_v57 }
 0x339   : > { %v2817_v5 = vadd.f32 %v5221_v9, %v2583_v37  ;;  %v5382_v37 = vpop.f32.mrf.mxu1 }
 0x33b   : > { %v3051_v32 = vadd.f32 %v2972_v55, %v2817_v5  ;;  %2546 = vmatmul.bf16.gmra.mxu3 %v2421_v62  ;;  %v2400_v5 = vld [vmem:[#allocation2 + $0xc7] sm:$0xff] }
 0x33d   : > { %v3083_v23 = vmul.f32 %v3051_v32, %v5866_v44  ;;  %v5870_v32 = vld [vmem:[#allocation26_spill] sm:$0xff] }
 0x33e   : > { %v2507_v63 = vpop.f32.mrf.mxu3 }
 0x33f   : > { %v3115_v9 = vadd.f32 %v5869_v36, %v3083_v23  ;;  %v2584_v10 = vadd.f32 %v2507_v63, %v5144_v0  ;;  %v2401_v0 = vld [vmem:[#allocation2 + $0xcf] sm:$0xff]  ;;  %v5871_v23 = vld [vmem:[#allocation28_spill] sm:$0xff] }
 0x340   : > { %v2422_v41 = vpack.c.bf16 %v2401_v0, %v2400_v5 }
 0x341   : > { %v3873_v55 = vpack.c.bf16 %v3115_v9, %v3114_v59  ;;  %v2818_v47 = vadd.f32 %v5234_v45, %v2584_v10  ;;  %v5390_v59 = vpop.f32.mrf.mxu0  ;;  %v5392_v9 = vpop.f32.mrf.mxu2  ;;  %v5872_v10 = vld [vmem:[#allocation5_spill] sm:$0xff] }
 0x343   : > { %3874 = vst [vmem:[%s5374_s22] sm:$0xff] %v3873_v55   ;;  %v3052_v63 = vadd.f32 %v5314_v7, %v2818_v47  ;;  %v5873_v7 = vunpack.c.l.bf16 %v5872_v10 }
 0x345   : > { %v3084_v44 = vmul.f32 %v3052_v63, %v5870_v32  ;;  %v2402_v63 = vld [vmem:[#allocation2 + $0xd7] sm:$0xff] }
 0x346   : > { %v2509_v57 = vpop.f32.mrf.mxu3 }
 0x347   : > { %v2585_v62 = vadd.f32 %v2509_v57, %v5155_v42  ;;  %v3116_v55 = vadd.f32 %v5873_v7, %v3084_v44  ;;  %v5874_v42 = vunpack.c.h.bf16 %v5872_v10  ;;  %v5399_v57 = vpop.f32.mrf.mxu1  ;;  %v5876_v10 = vld [vmem:[#allocation32_spill] sm:$0xff] }
 0x349   : > { %v2819_v6 = vadd.f32 %v5243_v29, %v2585_v62  ;;  %v2403_v62 = vld [vmem:[#allocation2 + $0xdf] sm:$0xff]  ;;  %v5405_v32 = vpop.f32.mrf.mxu0  ;;  %v5407_v44 = vpop.f32.mrf.mxu2 }
 0x34b   : > { %v3053_v45 = vadd.f32 %v5319_v2, %v2819_v6  ;;  %2551 = vmatmul.bf16.gmra.mxu3 %v2422_v41 }
 0x34d   : > { %v3085_v48 = vmul.f32 %v3053_v45, %v5871_v23  ;;  %v2423_v45 = vpack.c.bf16 %v2403_v62, %v2402_v63 }
 0x34e   : > { %v2512_v36 = vpop.f32.mrf.mxu3 }
 0x34f   : > { %v3117_v47 = vadd.f32 %v5874_v42, %v3085_v48  ;;  %v2586_v29 = vadd.f32 %v2512_v36, %v5171_v30  ;;  %v5410_v23 = vpop.f32.mrf.mxu1  ;;  %v5875_v48 = vld [vmem:[#allocation30_spill] sm:$0xff] }
 0x351   : > { %v3878_v5 = vpack.c.bf16 %v3117_v47, %v3116_v55  ;;  %v2820_v2 = vadd.f32 %v5257_v13, %v2586_v29  ;;  %v5877_v55 = vld [vmem:[#allocation7_spill] sm:$0xff] }
 0x352   : > { %v5879_v47 = vunpack.c.h.bf16 %v5877_v55 }
 0x353   : > { %3965 = vst [vmem:[%s5374_s22 + $0x8] sm:$0xff] %v3878_v5   ;;  %v3054_v6 = vadd.f32 %v5328_v33, %v2820_v2  ;;  %v5420_v2 = vpop.f32.mrf.mxu0 }
 0x355   : > { %v3086_v36 = vmul.f32 %v3054_v6, %v5875_v48  ;;  %v2404_v6 = vld [vmem:[#allocation2 + $0xe7] sm:$0xff] }
 0x356   : > { %v2514_v0 = vpop.f32.mrf.mxu3 }
 0x357   : > { %v2587_v41 = vadd.f32 %v2514_v0, %v5180_v26  ;;  %v5878_v26 = vunpack.c.l.bf16 %v5877_v55  ;;  %v5422_v0 = vpop.f32.mrf.mxu2  ;;  %v5426_v63 = vpop.f32.mrf.mxu1 }
 0x359   : > { %v2821_v30 = vadd.f32 %v5268_v12, %v2587_v41  ;;  %v3118_v42 = vadd.f32 %v5878_v26, %v3086_v36  ;;  %v2405_v41 = vld [vmem:[#allocation2 + $0xef] sm:$0xff] }
 0x35b   : > { %v3055_v13 = vadd.f32 %v5333_v51, %v2821_v30  ;;  %2556 = vmatmul.bf16.gmra.mxu3 %v2423_v45  ;;  %v5880_v30 = vld [vmem:[#allocation51_spill] sm:$0xff]  ;;  %v5436_v26 = vpop.f32.mrf.mxu0 }
 0x35c   : > { %v1888_v45 = vadd.f32 %v5880_v30, %v5205_v61 }
 0x35d   : > { %v3087_v7 = vmul.f32 %v3055_v13, %v5876_v10  ;;  %v2424_v13 = vpack.c.bf16 %v2405_v41, %v2404_v6  ;;  %v5881_v10 = vld [vmem:[#allocation67_spill] sm:$0xff] }
 0x35e   : > { %v2517_v33 = vpop.f32.mrf.mxu3 }
 0x35f   : > { %v3119_v29 = vadd.f32 %v5879_v47, %v3087_v7  ;;  %v2588_v5 = vadd.f32 %v2517_v33, %v5193_v49  ;;  %v2122_v7 = vadd.f32 %v5881_v10, %v1888_v45  ;;  %v5882_v33 = vld [vmem:[#allocation34_spill] sm:$0xff]  ;;  %v5439_v61 = vpop.f32.mrf.mxu2  ;;  %v2406_v10 = vld [vmem:[#allocation2 + $0xf7] sm:$0xff] }
 0x360   : > { %v5888_v45 = vld [vmem:[#allocation70_spill] sm:$0xff] }
 0x361   : > { %v3883_v12 = vpack.c.bf16 %v3119_v29, %v3118_v42  ;;  %v2822_v51 = vadd.f32 %v5349_v19, %v2588_v5  ;;  %v2356_v42 = vadd.f32 %v5358_v46, %v2122_v7  ;;  %v5884_v29 = vld [vmem:[#allocation52_spill] sm:$0xff]  ;;  %v5889_v7 = vld [vmem:[#allocation53_spill] sm:$0xff] }
 0x362   : > { %v1889_v5 = vadd.f32 %v5884_v29, %v5219_v1  ;;  %v2407_v1 = vld [vmem:[#allocation2 + $0xff] sm:$0xff]  ;;  %v5891_v29 = vld [vmem:[#allocation38_spill] sm:$0xff] }
 0x363   : > { %3966 = vst [vmem:[%s5374_s22 + $0x10] sm:$0xff] %v3883_v12   ;;  %v3056_v48 = vadd.f32 %v5351_v53, %v2822_v51  ;;  %v5883_v53 = vld [vmem:[#allocation36_spill] sm:$0xff]  ;;  %v5885_v12 = vld [vmem:[#allocation9_spill] sm:$0xff] }
 0x364   : > { %v5886_v51 = vunpack.c.l.bf16 %v5885_v12  ;;  %v2123_v46 = vadd.f32 %v5888_v45, %v1889_v5 }
 0x365   : > { %v3088_v19 = vmul.f32 %v3056_v48, %v5882_v33  ;;  %v1890_v33 = vadd.f32 %v5889_v7, %v5228_v54  ;;  %v5892_v54 = vld [vmem:[#allocation40_spill] sm:$0xff]  ;;  %v2879_v7 = vld [vmem:[#allocation2 + $0x121] sm:$0xff] }
 0x366   : > { %v2519_v62 = vpop.f32.mrf.mxu3 }
 0x367   : > { %v2589_v49 = vadd.f32 %v2519_v62, %v5202_v58  ;;  %v5442_v58 = vpop.f32.mrf.mxu1  ;;  %v3120_v62 = vadd.f32 %v5886_v51, %v3088_v19  ;;  %v5458_v19 = vpop.f32.mrf.mxu2 }
 0x369   : > { %v2823_v36 = vadd.f32 %v5356_v40, %v2589_v49  ;;  %v2357_v49 = vadd.f32 %v5380_v50, %v2123_v46 }
 0x36b   : > { %v3057_v55 = vadd.f32 %v5361_v38, %v2823_v36  ;;  %2561 = vmatmul.bf16.gmra.mxu3 %v2424_v13  ;;  %v5887_v38 = vunpack.c.h.bf16 %v5885_v12  ;;  %v5454_v36 = vpop.f32.mrf.mxu0 }
 0x36d   : > { %v3089_v47 = vmul.f32 %v3057_v55, %v5883_v53 }
 0x36e   : > { %v2522_v40 = vpop.f32.mrf.mxu3 }
 0x36f   : > { %v3121_v6 = vadd.f32 %v5887_v38, %v3089_v47  ;;  %v2590_v41 = vadd.f32 %v2522_v40, %v2356_v42  ;;  %v5461_v53 = vpop.f32.mrf.mxu1  ;;  %v5890_v40 = vld [vmem:[#allocation73_spill] sm:$0xff] }
 0x370   : > { %v2124_v50 = vadd.f32 %v5890_v40, %v1890_v33 }
 0x371   : > { %v3888_v30 = vpack.c.bf16 %v3121_v6, %v3120_v62  ;;  %v2824_v48 = vadd.f32 %v5378_v60, %v2590_v41  ;;  %v2425_v60 = vpack.c.bf16 %v2407_v1, %v2406_v10  ;;  %v5894_v41 = vld [vmem:[#allocation11_spill] sm:$0xff]  ;;  %v5477_v10 = vpop.f32.mrf.mxu2  ;;  %v2878_v1 = vld [vmem:[#allocation2 + $0x119] sm:$0xff] }
 0x372   : > { %v2358_v51 = vadd.f32 %v5392_v9, %v2124_v50  ;;  %v5896_v45 = vunpack.c.h.bf16 %v5894_v41  ;;  %v2409_v50 = vld [vmem:[#allocation2 + $0x10f] sm:$0xff] }
 0x373   : > { %3967 = vst [vmem:[%s5374_s22 + $0x18] sm:$0xff] %v3888_v30   ;;  %v3058_v55 = vadd.f32 %v5382_v37, %v2824_v48  ;;  %v5893_v37 = vld [vmem:[#allocation54_spill] sm:$0xff]  ;;  %v5895_v30 = vunpack.c.l.bf16 %v5894_v41 }
 0x374   : > { %v1891_v6 = vadd.f32 %v5893_v37, %v5237_v25  ;;  %v2895_v25 = vpack.c.bf16 %v2879_v7, %v2878_v1 }
 0x375   : > { %v3090_v5 = vmul.f32 %v3058_v55, %v5891_v29  ;;  %v5897_v55 = vld [vmem:[#allocation77_spill] sm:$0xff]  ;;  %v5898_v29 = vld [vmem:[#allocation55_spill] sm:$0xff] }
 0x376   : > { %v2524_v13 = vpop.f32.mrf.mxu3  ;;  %3044 = vmatmul.bf16.gmra.mxu1 %v2895_v25 }
 0x377   : > { %v2591_v42 = vadd.f32 %v2524_v13, %v2357_v49  ;;  %v5475_v49 = vpop.f32.mrf.mxu0  ;;  %v5479_v33 = vpop.f32.mrf.mxu1 }
 0x379   : > { %v2825_v47 = vadd.f32 %v5390_v59, %v2591_v42  ;;  %v3122_v59 = vadd.f32 %v5895_v30, %v3090_v5  ;;  %v2125_v42 = vadd.f32 %v5897_v55, %v1891_v6  ;;  %v1892_v5 = vadd.f32 %v5898_v29, %v5246_v56  ;;  %v5899_v6 = vld [vmem:[#allocation80_spill] sm:$0xff]  ;;  %v5900_v30 = vld [vmem:[#allocation42_spill] sm:$0xff] }
 0x37b   : > { %v3059_v12 = vadd.f32 %v5399_v57, %v2825_v47  ;;  %2566 = vmatmul.bf16.gmra.mxu3 %v2425_v60  ;;  %v4013_v57 = vld [vmem:[#allocation2] sm:$0xff]  ;;  %v2359_v60 = vadd.f32 %v5407_v44, %v2125_v42  ;;  %v2126_v41 = vadd.f32 %v5899_v6, %v1892_v5 }
 0x37c   : > { %v2661_v13 = vpack.c.bf16 %v4013_v57, %v4013_v57  ;;  %v5902_v57 = vld [vmem:[#allocation56_spill] sm:$0xff] }
 0x37d   : > { %v3091_v62 = vmul.f32 %v3059_v12, %v5892_v54  ;;  %v2408_v54 = vld [vmem:[#allocation2 + $0x107] sm:$0xff]  ;;  %v2360_v56 = vadd.f32 %v5422_v0, %v2126_v41 }
 0x37e   : > { %v2527_v38 = vpop.f32.mrf.mxu3  ;;  %2810 = vmatmul.bf16.gmra.mxu0 %v2661_v13  ;;  %v5903_v13 = vld [vmem:[#allocation13_spill] sm:$0xff] }
 0x37f   : > { %v3123_v46 = vadd.f32 %v5896_v45, %v3091_v62  ;;  %v2592_v48 = vadd.f32 %v2527_v38, %v2358_v51  ;;  %v2426_v38 = vpack.c.bf16 %v2409_v50, %v2408_v54  ;;  %v2773_v37 = vpop.f32.mrf.mxu0  ;;  %v3007_v45 = vpop.f32.mrf.mxu1  ;;  %v5905_v7 = vunpack.c.h.bf16 %v5903_v13 }
 0x381   : > { %v3893_v9 = vpack.c.bf16 %v3123_v46, %v3122_v59  ;;  %v2826_v47 = vadd.f32 %v5405_v32, %v2592_v48  ;;  %v2308_v32 = vpop.f32.mrf.mxu2  ;;  %v5901_v46 = vld [vmem:[#allocation44_spill] sm:$0xff] }
 0x383   : > { %3968 = vst [vmem:[%s5374_s22 + $0x20] sm:$0xff] %v3893_v9   ;;  %v3060_v12 = vadd.f32 %v5410_v23, %v2826_v47  ;;  %v5904_v9 = vunpack.c.l.bf16 %v5903_v13  ;;  %v5906_v47 = vld [vmem:[#allocation83_spill] sm:$0xff] }
 0x385   : > { %v3092_v59 = vmul.f32 %v3060_v12, %v5900_v30  ;;  %v2411_v12 = vld [vmem:[#allocation2 + $0x11f] sm:$0xff] }
 0x386   : > { %v2529_v40 = vpop.f32.mrf.mxu3 }
 0x387   : > { %v2593_v51 = vadd.f32 %v2529_v40, %v2359_v60  ;;  %v3124_v1 = vadd.f32 %v5904_v9, %v3092_v59  ;;  %v2776_v0 = vpop.f32.mrf.mxu0  ;;  %v3010_v29 = vpop.f32.mrf.mxu1 }
 0x389   : > { %v2827_v62 = vadd.f32 %v5420_v2, %v2593_v51  ;;  %v1893_v2 = vadd.f32 %v5902_v57, %v5255_v4  ;;  %v2310_v50 = vpop.f32.mrf.mxu2  ;;  %v2410_v4 = vld [vmem:[#allocation2 + $0x117] sm:$0xff]  ;;  %v5907_v51 = vld [vmem:[#allocation57_spill] sm:$0xff] }
 0x38a   : > { %v1894_v54 = vadd.f32 %v5907_v51, %v5264_v14  ;;  %v2427_v41 = vpack.c.bf16 %v2411_v12, %v2410_v4 }
 0x38b   : > { %v3061_v44 = vadd.f32 %v5426_v63, %v2827_v62  ;;  %2571 = vmatmul.bf16.gmra.mxu3 %v2426_v38  ;;  %v2127_v63 = vadd.f32 %v5906_v47, %v1893_v2 }
 0x38c   : > { %v2128_v30 = vadd.f32 %v5098_v20, %v1894_v54 }
 0x38d   : > { %v3093_v23 = vmul.f32 %v3061_v44, %v5901_v46  ;;  %v2361_v40 = vadd.f32 %v5439_v61, %v2127_v63 }
 0x38e   : > { %v2532_v48 = vpop.f32.mrf.mxu3  ;;  %v2362_v44 = vadd.f32 %v5458_v19, %v2128_v30  ;;  %v5918_v30 = vld [vmem:[#allocation17_spill] sm:$0xff] }
 0x38f   : > { %v3125_v25 = vadd.f32 %v5905_v7, %v3093_v23  ;;  %v2594_v55 = vadd.f32 %v2532_v48, %v2360_v56  ;;  %v5909_v56 = vld [vmem:[#allocation47_spill] sm:$0xff]  ;;  %v2778_v23 = vpop.f32.mrf.mxu0  ;;  %v3012_v7 = vpop.f32.mrf.mxu1 }
 0x391   : > { %v3898_v42 = vpack.c.bf16 %v3125_v25, %v3124_v1  ;;  %v2828_v60 = vadd.f32 %v5436_v26, %v2594_v55  ;;  %v5908_v26 = vld [vmem:[#allocation46_spill] sm:$0xff]  ;;  %v2313_v57 = vpop.f32.mrf.mxu2 }
 0x393   : > { %3969 = vst [vmem:[%s5374_s22 + $0x28] sm:$0xff] %v3898_v42   ;;  %v3062_v62 = vadd.f32 %v5442_v58, %v2828_v60  ;;  %v5910_v58 = vld [vmem:[#allocation58_spill] sm:$0xff] }
 0x394   : > { %v1895_v48 = vadd.f32 %v5910_v58, %v5275_v27  ;;  %v5914_v27 = vld [vmem:[#allocation61_spill] sm:$0xff] }
 0x395   : > { %v3094_v59 = vmul.f32 %v3062_v62, %v5908_v26  ;;  %v1896_v47 = vadd.f32 %v5914_v27, %v5279_v22  ;;  %v5924_v27 = vld [vmem:[#allocation68_spill] sm:$0xff] }
 0x396   : > { %v2534_v5 = vpop.f32.mrf.mxu3  ;;  %v2129_v25 = vadd.f32 %v5106_v35, %v1895_v48  ;;  %v5915_v35 = vld [vmem:[#allocation19_spill] sm:$0xff]  ;;  %v5921_v48 = vld [vmem:[#allocation65_spill] sm:$0xff] }
 0x397   : > { %v2595_v38 = vadd.f32 %v2534_v5, %v2361_v40  ;;  %v2781_v40 = vpop.f32.mrf.mxu0  ;;  %v3015_v12 = vpop.f32.mrf.mxu1  ;;  %v2130_v51 = vadd.f32 %v5125_v52, %v1896_v47  ;;  %v1899_v47 = vadd.f32 %v5924_v27, %v5295_v43 }
 0x398   : > { %v2363_v55 = vadd.f32 %v5477_v10, %v2129_v25 }
 0x399   : > { %v2829_v6 = vadd.f32 %v5454_v36, %v2595_v38  ;;  %v5911_v36 = vld [vmem:[#allocation15_spill] sm:$0xff]  ;;  %v2315_v5 = vpop.f32.mrf.mxu2  ;;  %v5916_v38 = vld [vmem:[#allocation22_spill] sm:$0xff] }
 0x39a   : > { %v5912_v2 = vunpack.c.l.bf16 %v5911_v36  ;;  %v5913_v20 = vunpack.c.h.bf16 %v5911_v36 }
 0x39b   : > { %v3063_v61 = vadd.f32 %v5461_v53, %v2829_v6  ;;  %2576 = vmatmul.bf16.gmra.mxu3 %v2427_v41  ;;  %v5917_v41 = vld [vmem:[#allocation63_spill] sm:$0xff] }
 0x39c   : > { %v3126_v13 = vadd.f32 %v5912_v2, %v3094_v59  ;;  %v1897_v22 = vadd.f32 %v5917_v41, %v5284_v16  ;;  %v5920_v59 = vunpack.c.h.bf16 %v5918_v30  ;;  %v1898_v16 = vadd.f32 %v5921_v48, %v5290_v18  ;;  %v5925_v18 = vld [vmem:[#allocation4_spill] sm:$0xff] }
 0x39d   : > { %v3095_v46 = vmul.f32 %v3063_v61, %v5909_v56 }
 0x39e   : > { %v2537_v14 = vpop.f32.mrf.mxu3  ;;  %v2131_v52 = vadd.f32 %v5139_v31, %v1897_v22 }
 0x39f   : > { %v3127_v9 = vadd.f32 %v5913_v20, %v3095_v46  ;;  %v2596_v1 = vadd.f32 %v2537_v14, %v2362_v44  ;;  %v2783_v56 = vpop.f32.mrf.mxu0  ;;  %v2132_v20 = vadd.f32 %v5152_v39, %v1898_v16 }
 0x3a0   : > { %v2365_v14 = vadd.f32 %v2310_v50, %v2131_v52 }
 0x3a1   : > { %v3903_v53 = vpack.c.bf16 %v3127_v9, %v3126_v13  ;;  %v2830_v19 = vadd.f32 %v5475_v49, %v2596_v1  ;;  %v2364_v49 = vadd.f32 %v2308_v32, %v2130_v51  ;;  %v2318_v46 = vpop.f32.mrf.mxu2  ;;  %v5922_v9 = vld [vmem:[#allocation21_spill] sm:$0xff]  ;;  %v2366_v31 = vadd.f32 %v2313_v57, %v2132_v20 }
 0x3a3   : > { %3970 = vst [vmem:[%s5374_s22 + $0x30] sm:$0xff] %v3903_v53   ;;  %v3064_v63 = vadd.f32 %v5479_v33, %v2830_v19  ;;  %v5919_v33 = vunpack.c.l.bf16 %v5918_v30  ;;  %v5929_v30 = vld [vmem:[#allocation25_spill] sm:$0xff] }
 0x3a5   : > { %v3096_v54 = vmul.f32 %v3064_v63, %v5915_v35 }
 0x3a6   : > { %v2539_v42 = vpop.f32.mrf.mxu3 }
 0x3a7   : > { %v2597_v60 = vadd.f32 %v2539_v42, %v2363_v55  ;;  %v3128_v26 = vadd.f32 %v5919_v33, %v3096_v54  ;;  %v2786_v25 = vpop.f32.mrf.mxu0  ;;  %v5923_v55 = vld [vmem:[#allocation24_spill] sm:$0xff] }
 0x3a9   : > { %v2831_v4 = vadd.f32 %v2773_v37, %v2597_v60  ;;  %v2320_v19 = vpop.f32.mrf.mxu2 }
 0x3ab   : > { %v3065_v62 = vadd.f32 %v3007_v45, %v2831_v4  ;;  %v3017_v45 = vpop.f32.mrf.mxu1 }
 0x3ad   : > { %v3097_v10 = vmul.f32 %v3065_v62, %v5916_v38  ;;  %v5928_v62 = vld [vmem:[#allocation72_spill] sm:$0xff] }
 0x3ae   : > { %v2542_v6 = vpop.f32.mrf.mxu3 }
 0x3af   : > { %v3129_v37 = vadd.f32 %v5920_v59, %v3097_v10  ;;  %v2598_v61 = vadd.f32 %v2542_v6, %v2364_v49  ;;  %v2788_v35 = vpop.f32.mrf.mxu0  ;;  %v1900_v49 = vadd.f32 %v5928_v62, %v5301_v8  ;;  %v5930_v59 = vld [vmem:[#allocation27_spill] sm:$0xff] }
 0x3b1   : > { %v3908_v44 = vpack.c.bf16 %v3129_v37, %v3128_v26  ;;  %v2832_v32 = vadd.f32 %v2776_v0, %v2598_v61  ;;  %v2323_v38 = vpop.f32.mrf.mxu2  ;;  %v2134_v22 = vadd.f32 %v5183_v17, %v1900_v49  ;;  %v5931_v37 = vld [vmem:[#allocation75_spill] sm:$0xff] }
 0x3b2   : > { %v1901_v61 = vadd.f32 %v5931_v37, %v5304_v28 }
 0x3b3   : > { %3971 = vst [vmem:[%s5374_s22 + $0x38] sm:$0xff] %v3908_v44   ;;  %v3066_v36 = vadd.f32 %v3010_v29, %v2832_v32  ;;  %v3020_v42 = vpop.f32.mrf.mxu1  ;;  %v5926_v29 = vunpack.c.l.bf16 %v5925_v18  ;;  %v5932_v44 = vld [vmem:[#allocation6_spill] sm:$0xff] }
 0x3b4   : > { %v5933_v8 = vunpack.c.l.bf16 %v5932_v44 }
 0x3b5   : > { %v3098_v1 = vmul.f32 %v3066_v36, %v5922_v9 }
 0x3b6   : > { %v2544_v58 = vpop.f32.mrf.mxu3 }
 0x3b7   : > { %v2599_v2 = vadd.f32 %v2544_v58, %v2365_v14  ;;  %v3130_v63 = vadd.f32 %v5926_v29, %v3098_v1  ;;  %v2791_v14 = vpop.f32.mrf.mxu0 }
 0x3b9   : > { %v2833_v13 = vadd.f32 %v2778_v23, %v2599_v2  ;;  %v5927_v23 = vunpack.c.h.bf16 %v5925_v18  ;;  %v2325_v58 = vpop.f32.mrf.mxu2  ;;  %v5935_v2 = vld [vmem:[#allocation78_spill] sm:$0xff]  ;;  %v5938_v18 = vld [vmem:[#allocation81_spill] sm:$0xff] }
 0x3ba   : > { %v1902_v28 = vadd.f32 %v5935_v2, %v5308_v24  ;;  %v1903_v29 = vadd.f32 %v5938_v18, %v5311_v15  ;;  %v5939_v24 = vld [vmem:[#allocation8_spill] sm:$0xff]  ;;  %v5957_v18 = vld [vmem:[#allocation39_spill] sm:$0xff] }
 0x3bb   : > { %v3067_v53 = vadd.f32 %v3012_v7, %v2833_v13  ;;  %v2133_v7 = vadd.f32 %v5169_v3, %v1899_v47  ;;  %v3022_v6 = vpop.f32.mrf.mxu1  ;;  %v2368_v3 = vadd.f32 %v2318_v46, %v2134_v22  ;;  %v5937_v47 = vld [vmem:[#allocation31_spill] sm:$0xff]  ;;  %v5945_v22 = vld [vmem:[#allocation93_spill] sm:$0xff] }
 0x3bd   : > { %v3099_v0 = vmul.f32 %v3067_v53, %v5923_v55  ;;  %v2367_v51 = vadd.f32 %v2315_v5, %v2133_v7  ;;  %v2136_v53 = vadd.f32 %v5216_v34, %v1902_v28  ;;  %v5936_v55 = vld [vmem:[#allocation29_spill] sm:$0xff] }
 0x3be   : > { %v2547_v50 = vpop.f32.mrf.mxu3 }
 0x3bf   : > { %v3131_v60 = vadd.f32 %v5927_v23, %v3099_v0  ;;  %v2600_v39 = vadd.f32 %v2547_v50, %v2366_v31  ;;  %v2793_v1 = vpop.f32.mrf.mxu0  ;;  %v5941_v23 = vunpack.c.h.bf16 %v5939_v24 }
 0x3c1   : > { %v3913_v4 = vpack.c.bf16 %v3131_v60, %v3130_v63  ;;  %v2834_v57 = vadd.f32 %v2781_v40, %v2600_v39  ;;  %v2328_v31 = vpop.f32.mrf.mxu2 }
 0x3c3   : > { %3972 = vst [vmem:[%s5374_s22 + $0x40] sm:$0xff] %v3913_v4   ;;  %v3068_v43 = vadd.f32 %v3015_v12, %v2834_v57  ;;  %v5934_v12 = vunpack.c.h.bf16 %v5932_v44  ;;  %v3025_v48 = vpop.f32.mrf.mxu1  ;;  %v5942_v4 = vld [vmem:[#allocation92_spill] sm:$0xff]  ;;  %v5948_v44 = vld [vmem:[#allocation85_spill] sm:$0xff] }
 0x3c4   : > { %v2137_v7 = vadd.f32 %v5942_v4, %v1903_v29 }
 0x3c5   : > { %v3100_v33 = vmul.f32 %v3068_v43, %v5929_v30  ;;  %v5944_v43 = vld [vmem:[#allocation84_spill] sm:$0xff] }
 0x3c6   : > { %v2549_v54 = vpop.f32.mrf.mxu3 }
 0x3c7   : > { %v2601_v10 = vadd.f32 %v2549_v54, %v2367_v51  ;;  %v3132_v52 = vadd.f32 %v5933_v8, %v3100_v33  ;;  %v2796_v51 = vpop.f32.mrf.mxu0  ;;  %v5946_v33 = vld [vmem:[#allocation33_spill] sm:$0xff]  ;;  %v1905_v8 = vadd.f32 %v5948_v44, %v5322_v21 }
 0x3c9   : > { %v2835_v41 = vadd.f32 %v2783_v56, %v2601_v10  ;;  %v2330_v54 = vpop.f32.mrf.mxu2 }
 0x3cb   : > { %v3069_v26 = vadd.f32 %v3017_v45, %v2835_v41  ;;  %v2135_v45 = vadd.f32 %v5197_v11, %v1901_v61  ;;  %v3027_v27 = vpop.f32.mrf.mxu1  ;;  %v2370_v11 = vadd.f32 %v2323_v38, %v2136_v53  ;;  %v5943_v38 = vld [vmem:[#allocation62_spill] sm:$0xff] }
 0x3cc   : > { %v1904_v15 = vadd.f32 %v5944_v43, %v5943_v38 }
 0x3cd   : > { %v3101_v40 = vmul.f32 %v3069_v26, %v5930_v59  ;;  %v2369_v16 = vadd.f32 %v2320_v19, %v2135_v45 }
 0x3ce   : > { %v2552_v5 = vpop.f32.mrf.mxu3  ;;  %v2138_v30 = vadd.f32 %v5945_v22, %v1904_v15 }
 0x3cf   : > { %v3133_v32 = vadd.f32 %v5934_v12, %v3101_v40  ;;  %v2602_v56 = vadd.f32 %v2552_v5, %v2368_v3  ;;  %v5947_v40 = vld [vmem:[#allocation35_spill] sm:$0xff]  ;;  %v2798_v37 = vpop.f32.mrf.mxu0  ;;  %v5949_v12 = vld [vmem:[#allocation10_spill] sm:$0xff] }
 0x3d0   : > { %v2372_v59 = vadd.f32 %v2328_v31, %v2138_v30 }
 0x3d1   : > { %v3918_v17 = vpack.c.bf16 %v3133_v32, %v3132_v52  ;;  %v2836_v46 = vadd.f32 %v2786_v25, %v2602_v56  ;;  %v2333_v52 = vpop.f32.mrf.mxu2  ;;  %v5950_v32 = vunpack.c.l.bf16 %v5949_v12 }
 0x3d3   : > { %3973 = vst [vmem:[%s5374_s22 + $0x48] sm:$0xff] %v3918_v17   ;;  %v3070_v13 = vadd.f32 %v3020_v42, %v2836_v46  ;;  %v5940_v42 = vunpack.c.l.bf16 %v5939_v24  ;;  %v3030_v62 = vpop.f32.mrf.mxu1  ;;  %v5952_v46 = vld [vmem:[#allocation94_spill] sm:$0xff] }
 0x3d5   : > { %v3102_v0 = vmul.f32 %v3070_v13, %v5936_v55  ;;  %v5953_v13 = vld [vmem:[#allocation64_spill] sm:$0xff] }
 0x3d6   : > { %v2554_v36 = vpop.f32.mrf.mxu3 }
 0x3d7   : > { %v2603_v20 = vadd.f32 %v2554_v36, %v2369_v16  ;;  %v3134_v63 = vadd.f32 %v5940_v42, %v3102_v0  ;;  %v2139_v16 = vadd.f32 %v5952_v46, %v1905_v8  ;;  %v2801_v53 = vpop.f32.mrf.mxu0  ;;  %v5958_v42 = vld [vmem:[#allocation66_spill] sm:$0xff] }
 0x3d9   : > { %v2837_v9 = vadd.f32 %v2788_v35, %v2603_v20  ;;  %v2371_v35 = vadd.f32 %v2325_v58, %v2137_v7  ;;  %v2373_v2 = vadd.f32 %v2330_v54, %v2139_v16  ;;  %v5954_v20 = vld [vmem:[#allocation86_spill] sm:$0xff]  ;;  %v2335_v31 = vpop.f32.mrf.mxu2  ;;  %v5963_v54 = vld [vmem:[#allocation96_spill] sm:$0xff] }
 0x3db   : > { %v3071_v50 = vadd.f32 %v3022_v6, %v2837_v9  ;;  %v1906_v9 = vadd.f32 %v5954_v20, %v5953_v13  ;;  %v5974_v13 = vld [vmem:[#allocation98_spill] sm:$0xff] }
 0x3dd   : > { %v3103_v25 = vmul.f32 %v3071_v50, %v5937_v47  ;;  %v5955_v50 = vld [vmem:[#allocation95_spill] sm:$0xff] }
 0x3de   : > { %v2557_v19 = vpop.f32.mrf.mxu3 }
 0x3df   : > { %v3135_v60 = vadd.f32 %v5941_v23, %v3103_v25  ;;  %v2604_v39 = vadd.f32 %v2557_v19, %v2370_v11  ;;  %v5956_v11 = vld [vmem:[#allocation37_spill] sm:$0xff] }
 0x3e1   : > { %v3923_v34 = vpack.c.bf16 %v3135_v60, %v3134_v63  ;;  %v2838_v57 = vadd.f32 %v2791_v14, %v2604_v39  ;;  %v5951_v14 = vunpack.c.h.bf16 %v5949_v12  ;;  %v5959_v63 = vld [vmem:[#allocation87_spill] sm:$0xff]  ;;  %v5960_v60 = vld [vmem:[#allocation12_spill] sm:$0xff] }
 0x3e2   : > { %v1907_v23 = vadd.f32 %v5959_v63, %v5958_v42  ;;  %v5961_v39 = vunpack.c.l.bf16 %v5960_v60  ;;  %v5962_v4 = vunpack.c.h.bf16 %v5960_v60 }
 0x3e3   : > { %3974 = vst [vmem:[%s5374_s22 + $0x50] sm:$0xff] %v3923_v34   ;;  %v3072_v10 = vadd.f32 %v3025_v48, %v2838_v57  ;;  %v3032_v48 = vpop.f32.mrf.mxu1 }
 0x3e5   : > { %v3104_v26 = vmul.f32 %v3072_v10, %v5946_v33 }
 0x3e6   : > { %v2559_v49 = vpop.f32.mrf.mxu3 }
 0x3e7   : > { %v2605_v6 = vadd.f32 %v2559_v49, %v2371_v35  ;;  %v3136_v56 = vadd.f32 %v5950_v32, %v3104_v26  ;;  %v2803_v35 = vpop.f32.mrf.mxu0  ;;  %v2338_v49 = vpop.f32.mrf.mxu2 }
 0x3e9   : > { %v2839_v41 = vadd.f32 %v2793_v1, %v2605_v6  ;;  %v5964_v6 = vld [vmem:[#allocation69_spill] sm:$0xff] }
 0x3eb   : > { %v3073_v3 = vadd.f32 %v3027_v27, %v2839_v41  ;;  %v3035_v0 = vpop.f32.mrf.mxu1  ;;  %v2140_v27 = vadd.f32 %v5955_v50, %v1906_v9  ;;  %v5965_v41 = vld [vmem:[#allocation88_spill] sm:$0xff] }
 0x3ec   : > { %v1908_v22 = vadd.f32 %v5965_v41, %v5964_v6  ;;  %v5985_v6 = vld [vmem:[#allocation60_spill] sm:$0xff] }
 0x3ed   : > { %v3105_v5 = vmul.f32 %v3073_v3, %v5947_v40  ;;  %v2374_v19 = vadd.f32 %v2333_v52, %v2140_v27  ;;  %v5966_v3 = vld [vmem:[#allocation97_spill] sm:$0xff]  ;;  %v5968_v52 = vld [vmem:[#allocation43_spill] sm:$0xff] }
 0x3ee   : > { %v2562_v61 = vpop.f32.mrf.mxu3  ;;  %v5967_v40 = vld [vmem:[#allocation41_spill] sm:$0xff] }
 0x3ef   : > { %v3137_v58 = vadd.f32 %v5951_v14, %v3105_v5  ;;  %v2606_v17 = vadd.f32 %v2562_v61, %v2372_v59  ;;  %v2142_v59 = vadd.f32 %v5966_v3, %v1908_v22  ;;  %v2806_v61 = vpop.f32.mrf.mxu0  ;;  %v2340_v8 = vpop.f32.mrf.mxu2  ;;  %v5969_v14 = vld [vmem:[#allocation71_spill] sm:$0xff] }
 0x3f1   : > { %v3928_v45 = vpack.c.bf16 %v3137_v58, %v3136_v56  ;;  %v2840_v36 = vadd.f32 %v2796_v51, %v2606_v17  ;;  %v2376_v44 = vadd.f32 %v2338_v49, %v2142_v59  ;;  %v5970_v58 = vld [vmem:[#allocation89_spill] sm:$0xff] }
 0x3f2   : > { %v1909_v17 = vadd.f32 %v5970_v58, %v5969_v14 }
 0x3f3   : > { %3975 = vst [vmem:[%s5374_s22 + $0x58] sm:$0xff] %v3928_v45   ;;  %v3074_v21 = vadd.f32 %v3030_v62, %v2840_v36  ;;  %v2141_v62 = vadd.f32 %v5963_v54, %v1907_v23  ;;  %v3037_v43 = vpop.f32.mrf.mxu1  ;;  %v5979_v23 = vld [vmem:[#allocation48_spill] sm:$0xff] }
 0x3f4   : > { %v2143_v20 = vadd.f32 %v5974_v13, %v1909_v17 }
 0x3f5   : > { %v3106_v47 = vmul.f32 %v3074_v21, %v5956_v11  ;;  %v2375_v15 = vadd.f32 %v2335_v31, %v2141_v62  ;;  %v5975_v31 = vld [vmem:[#allocation74_spill] sm:$0xff] }
 0x3f6   : > { %v2564_v28 = vpop.f32.mrf.mxu3  ;;  %v2377_v21 = vadd.f32 %v2340_v8, %v2143_v20  ;;  %v5987_v8 = vld [vmem:[#allocation50_spill] sm:$0xff] }
 0x3f7   : > { %v2607_v1 = vadd.f32 %v2564_v28, %v2373_v2  ;;  %v3138_v34 = vadd.f32 %v5961_v39, %v3106_v47  ;;  %v2343_v11 = vpop.f32.mrf.mxu2 }
 0x3f9   : > { %v2841_v55 = vadd.f32 %v2798_v37, %v2607_v1  ;;  %v2808_v1 = vpop.f32.mrf.mxu0 }
 0x3fb   : > { %v3075_v25 = vadd.f32 %v3032_v48, %v2841_v55  ;;  %v3040_v32 = vpop.f32.mrf.mxu1  ;;  %v5971_v48 = vld [vmem:[#allocation14_spill] sm:$0xff] }
 0x3fc   : > { %v5972_v45 = vunpack.c.l.bf16 %v5971_v48  ;;  %v5973_v16 = vunpack.c.h.bf16 %v5971_v48  ;;  %v5976_v55 = vld [vmem:[#allocation90_spill] sm:$0xff] }
 0x3fd   : > { %v3107_v29 = vmul.f32 %v3075_v25, %v5957_v18 }
 0x3fe   : > { %v2567_v24 = vpop.f32.mrf.mxu3 }
 0x3ff   : > { %v3139_v7 = vadd.f32 %v5962_v4, %v3107_v29  ;;  %v2608_v57 = vadd.f32 %v2567_v24, %v2374_v19  ;;  %v5977_v19 = vld [vmem:[#allocation59_spill] sm:$0xff]  ;;  %v5978_v29 = vld [vmem:[#allocation45_spill] sm:$0xff]  ;;  %v5980_v4 = vld [vmem:[#allocation76_spill] sm:$0xff] }
 0x401   : > { %v3933_v51 = vpack.c.bf16 %v3139_v7, %v3138_v34  ;;  %v2842_v38 = vadd.f32 %v2801_v53, %v2608_v57  ;;  %v2811_v39 = vpop.f32.mrf.mxu0  ;;  %v5981_v7 = vld [vmem:[#allocation91_spill] sm:$0xff] }
 0x402   : > { %v1911_v57 = vadd.f32 %v5981_v7, %v5980_v4 }
 0x403   : > { %3976 = vst [vmem:[%s5374_s22 + $0x60] sm:$0xff] %v3933_v51   ;;  %v3076_v30 = vadd.f32 %v3035_v0, %v2842_v38  ;;  %v1910_v0 = vadd.f32 %v5976_v55, %v5975_v31  ;;  %v3042_v47 = vpop.f32.mrf.mxu1  ;;  %v5982_v51 = vld [vmem:[#allocation16_spill] sm:$0xff] }
 0x404   : > { %v5984_v62 = vunpack.c.h.bf16 %v5982_v51  ;;  %v2145_v41 = vadd.f32 %v5985_v6, %v1911_v57 }
 0x405   : > { %v3108_v5 = vmul.f32 %v3076_v30, %v5967_v40  ;;  %v2144_v18 = vadd.f32 %v5977_v19, %v1910_v0 }
 0x406   : > { %v2569_v10 = vpop.f32.mrf.mxu3 }
 0x407   : > { %v2609_v33 = vadd.f32 %v2569_v10, %v2375_v15  ;;  %v3140_v46 = vadd.f32 %v5972_v45, %v3108_v5  ;;  %v2378_v63 = vadd.f32 %v2343_v11, %v2144_v18  ;;  %v2345_v10 = vpop.f32.mrf.mxu2 }
 0x408   : > { %v2379_v30 = vadd.f32 %v2345_v10, %v2145_v41 }
 0x409   : > { %v2843_v26 = vadd.f32 %v2803_v35, %v2609_v33  ;;  %v5983_v35 = vunpack.c.l.bf16 %v5982_v51  ;;  %v2813_v59 = vpop.f32.mrf.mxu0 }
 0x40b   : > { %v3077_v37 = vadd.f32 %v3037_v43, %v2843_v26  ;;  %v3045_v43 = vpop.f32.mrf.mxu1 }
 0x40d   : > { %v3109_v12 = vmul.f32 %v3077_v37, %v5968_v52  ;;  %v5986_v37 = vld [vmem:[#allocation49_spill] sm:$0xff] }
 0x40e   : > { %v2572_v56 = vpop.f32.mrf.mxu3 }
 0x40f   : > { %v3141_v36 = vadd.f32 %v5973_v16, %v3109_v12  ;;  %v2610_v2 = vadd.f32 %v2572_v56, %v2376_v44  ;;  %v5988_v12 = vld [vmem:[#allocation18_spill] sm:$0xff] }
 0x410   : > { %v5990_v14 = vunpack.c.h.bf16 %v5988_v12 }
 0x411   : > { %v3938_v28 = vpack.c.bf16 %v3141_v36, %v3140_v46  ;;  %v2844_v9 = vadd.f32 %v2806_v61, %v2610_v2 }
 0x413   : > { %3977 = vst [vmem:[%s5374_s22 + $0x68] sm:$0xff] %v3938_v28   ;;  %v3078_v50 = vadd.f32 %v3040_v32, %v2844_v9  ;;  %v3047_v5 = vpop.f32.mrf.mxu1  ;;  %v5989_v32 = vunpack.c.l.bf16 %v5988_v12 }
 0x415   : > { %v3110_v24 = vmul.f32 %v3078_v50, %v5978_v29 }
 0x416   : > { %v2574_v53 = vpop.f32.mrf.mxu3 }
 0x417   : > { %v2611_v27 = vadd.f32 %v2574_v53, %v2377_v21  ;;  %v3142_v54 = vadd.f32 %v5983_v35, %v3110_v24 }
 0x419   : > { %v2845_v25 = vadd.f32 %v2808_v1, %v2611_v27 }
 0x41b   : > { %v3079_v42 = vadd.f32 %v3042_v47, %v2845_v25 }
 0x41d   : > { %v3111_v60 = vmul.f32 %v3079_v42, %v5979_v23 }
 0x41e   : > { %v2577_v34 = vpop.f32.mrf.mxu3 }
 0x41f   : > { %v3143_v49 = vadd.f32 %v5984_v62, %v3111_v60  ;;  %v2612_v38 = vadd.f32 %v2577_v34, %v2378_v63 }
 0x421   : > { %v3943_v15 = vpack.c.bf16 %v3143_v49, %v3142_v54  ;;  %v2846_v22 = vadd.f32 %v2811_v39, %v2612_v38 }
 0x423   : > { %3978 = vst [vmem:[%s5374_s22 + $0x70] sm:$0xff] %v3943_v15   ;;  %v3080_v26 = vadd.f32 %v3045_v43, %v2846_v22 }
 0x425   : > { %v3112_v61 = vmul.f32 %v3080_v26, %v5986_v37 }
 0x426   : > { %v2579_v33 = vpop.f32.mrf.mxu3 }
 0x427   : > { %v2613_v3 = vadd.f32 %v2579_v33, %v2379_v30  ;;  %v3144_v56 = vadd.f32 %v5989_v32, %v3112_v61 }
 0x429   : > { %v2847_v40 = vadd.f32 %v2813_v59, %v2613_v3 }
 0x42b   : > { %v3081_v44 = vadd.f32 %v3047_v5, %v2847_v40 }
 0x42d   : > { %v3113_v52 = vmul.f32 %v3081_v44, %v5987_v8 }
 0x42f   : > { %v3145_v58 = vadd.f32 %v5990_v14, %v3113_v52 }
 0x431   : > { %v3948_v17 = vpack.c.bf16 %v3145_v58, %v3144_v56 }
 0x433   : > { %3979 = vst [vmem:[%s5374_s22 + $0x78] sm:$0xff] %v3948_v17  }
 0x434 PF: > { %s18_s27 = sadd.s32 1, %s4020_s27  }
 0x435   : > { %p15_p4 = scmp.ge.s32.totalorder %s18_s27, 4  }
 0x437   :  { %17 = sbr.rel (!%p15_p4) target bundleno = 1 (0x1), region = 90 }

// kernel: forward.13
= control target key start
LH: loop header
LB: loop body
LE: loop exit
PB: predicated region body
PF: predicated region fallthrough
CT: control target
= control target key end

     0   :  { %v491_v2 = vmov 0   ;;  %s704_s0 = inlined_call_operand.vmem [shape: bf16[2,81,128], index: 0, kind: input, shape index: {}]   ;;  %s705_s1 = inlined_call_operand.vmem [shape: f32[1,81,1], index: 1, kind: input, shape index: {}]   ;;  %s706_s2 = inlined_call_operand.vmem [shape: f32[1,128], index: 2, kind: input, shape index: {}]   ;;  %s707_s3 = inlined_call_operand.vmem [shape: f32[1,128], index: 3, kind: input, shape index: {}]   ;;  %s708_s4 = inlined_call_operand.vmem [shape: bf16[128,128], index: 4, kind: input, shape index: {}]   ;;  %s709_s5 = inlined_call_operand.vmem [shape: f32[1,128], index: 5, kind: input, shape index: {}]   ;;  %s710_s6 = inlined_call_operand.hbm [shape: f32[2,128], index: 6, kind: output, shape index: {}]  }
   0x1   :  { %v144_v0 = vld [vmem:[%s705_s1 + $0x10] sm:$0xff]  ;;  %v142_v1 = vld [vmem:[%s705_s1] sm:$0xff]  ;;  %460 = vset.pattern.permute.xlu1 %v491_v2  ;;  %459 = vset.pattern.permute.xlu0 %v491_v2 }
   0x2   :  { %v146_v3 = vld [vmem:[%s705_s1 + $0x20] sm:$0xff]  ;;  %165 = vperm.xlu1 %460, %v144_v0   ;;  %155 = vperm.xlu0 %459, %v142_v1  }
   0x3   :  { %461 = vset.pattern.permute.xlu2 %v491_v2 }
   0x4   :  { %175 = vperm.xlu2 %461, %v146_v3  }
   0x5   :  { %11 = vsyncpa [#allocation3], 0  ;;  %v145_v4 = vld [vmem:[%s705_s1 + $0x18] sm:$0xff]  ;;  %v143_v5 = vld [vmem:[%s705_s1 + $0x8] sm:$0xff]  ;;  %vm239_vm0 = vcmask 1040384   ;;  %vm291_vm1 = vcmask 1041409  }
   0x6   :  { %v147_v6 = vld [vmem:[%s705_s1 + $0x28] sm:$0xff]  ;;  %v149_v7 = vld [vmem:[%s705_s1 + $0x38] sm:$0xff]  ;;  %v148_v8 = vld [vmem:[%s705_s1 + $0x30] sm:$0xff]  ;;  %s492_s12 = smov [#allocation2]   ;;  %s364_s16 = sshll.u32 %s710_s6, 4  ;;  %s365_s16 = int_to_ptr.hbm [resolvable:$true] %s364_s16 }
   0x7   :  { %v150_v9 = vld [vmem:[%s705_s1 + $0x40] sm:$0xff]  ;;  %v152_v10 = vld [vmem:[%s705_s1 + $0x50] sm:$0x1]  ;;  %v151_v11 = vld [vmem:[%s705_s1 + $0x48] sm:$0xff]  ;;  %s362_s13 = sshll.u32 %s492_s12, 4  ;;  %s363_s13 = int_to_ptr.vmem [resolvable:$true] %s362_s13 }
   0x8   :  { %v450_v12 = vld [vmem:[%s704_s0 + $0x10] sm:$0xff]   ;;  %v454_v13 = vld [vmem:[%s704_s0 + $0x38] sm:$0xff]   ;;  %v414_v14 = vld [vmem:[%s704_s0] sm:$0xff]  }
   0x9   :  { %v35_v15 = vld [vmem:[%s704_s0 + $0x2c] sm:$0xf]  ;;  %v412_v16 = vld [vmem:[%s708_s4 + $0x38] sm:$0xff]  ;;  %v423_v17 = vunpack.c.l.bf16 %v450_v12  ;;  %v440_v18 = vunpack.c.h.bf16 %v454_v13  ;;  %v579_v19 = vld [vmem:[%s706_s2] ss:$0 sm:$0xff]  ;;  %v415_v22 = vunpack.c.l.bf16 %v414_v14  ;;  %v416_v29 = vunpack.c.h.bf16 %v414_v14 }
   0xa   :  { %170 = vperm.xlu1 %460, %v145_v4   ;;  %160 = vperm.xlu0 %459, %v143_v5   ;;  %v449_v20 = vld [vmem:[%s704_s0 + $0x8] sm:$0xff]   ;;  %v453_v21 = vld [vmem:[%s704_s0 + $0x30] sm:$0xff]   ;;  %v57_v23 = vunpack.c.l.bf16 %v35_v15  ;;  %v595_v31 = vld [vmem:[%s707_s3] ss:$0 sm:$0xff]  ;;  %v439_v39 = vunpack.c.l.bf16 %v454_v13  ;;  %v424_v44 = vunpack.c.h.bf16 %v450_v12 }
   0xb   :  { %343 = vmatpush.bf16.msra.mxu0 %v412_v16  ;;  %v411_v24 = vld [vmem:[%s708_s4 + $0x30] sm:$0xff]  ;;  %v76_v25 = vmul.f32 %v579_v19, %v423_v17  ;;  %v87_v26 = vmul.f32 %v579_v19, %v440_v18  ;;  %v419_v27 = vunpack.c.l.bf16 %v449_v20  ;;  %v436_v28 = vunpack.c.h.bf16 %v453_v21  ;;  %v455_v34 = vld [vmem:[%s704_s0 + $0x40] sm:$0xff]   ;;  %v410_v35 = vld [vmem:[%s708_s4 + $0x28] sm:$0xff] }
   0xc   :  { %180 = vperm.xlu2 %461, %v147_v6   ;;  %v435_v30 = vunpack.c.l.bf16 %v453_v21  ;;  %v72_v32 = vmul.f32 %v579_v19, %v415_v22  ;;  %v83_v33 = vmul.f32 %v579_v19, %v57_v23  ;;  %v420_v38 = vunpack.c.h.bf16 %v449_v20  ;;  %v409_v48 = vld [vmem:[%s708_s4 + $0x20] sm:$0xff]  ;;  %v451_v53 = vld [vmem:[%s704_s0 + $0x18] sm:$0xff]   ;;  %v456_v59 = vld [vmem:[%s704_s0 + $0x48] sm:$0xff]  }
   0xd   :  { %v606_v36 = vadd.f32 %v595_v31, %v76_v25  ;;  %v609_v37 = vadd.f32 %v595_v31, %v87_v26  ;;  %v74_v40 = vmul.f32 %v579_v19, %v419_v27  ;;  %v85_v41 = vmul.f32 %v579_v19, %v436_v28  ;;  %v452_v58 = vld [vmem:[%s704_s0 + $0x20] sm:$0xff]   ;;  %v34_v18 = vld [vmem:[%s704_s0 + $0x28] sm:$0x1]  ;;  %v45_v20 = vld [vmem:[%s704_s0 + $0x54] sm:$0x1] }
   0xe   :  { %v73_v42 = vmul.f32 %v579_v19, %v416_v29  ;;  %v84_v43 = vmul.f32 %v579_v19, %v435_v30  ;;  %v443_v45 = vunpack.c.l.bf16 %v455_v34  ;;  %v98_v46 = vadd.f32 %v595_v31, %v72_v32  ;;  %v44_v21 = vld [vmem:[%s704_s0 + $0x50] sm:$0xf] }
   0xf   :  { %344 = vmatpush.bf16.msra.mxu0 %v411_v24  ;;  %v109_v47 = vadd.f32 %v595_v31, %v83_v33  ;;  %v124_v49 = vmax.f32 %v606_v36, 0.0  ;;  %v135_v50 = vmax.f32 %v609_v37, 0.0  ;;  %v75_v51 = vmul.f32 %v579_v19, %v420_v38  ;;  %v407_v26 = vld [vmem:[%s708_s4 + $0x10] sm:$0xff] }
  0x10   :  { %v86_v52 = vmul.f32 %v579_v19, %v439_v39  ;;  %v100_v55 = vadd.f32 %v595_v31, %v74_v40  ;;  %v111_v56 = vadd.f32 %v595_v31, %v85_v41  ;;  %v99_v60 = vadd.f32 %v595_v31, %v73_v42  ;;  %v406_v40 = vld [vmem:[%s708_s4 + $0x8] sm:$0xff] }
  0x11   :  { %v110_v61 = vadd.f32 %v595_v31, %v84_v43  ;;  %v77_v63 = vmul.f32 %v579_v19, %v424_v44  ;;  %v88_v0 = vmul.f32 %v579_v19, %v443_v45  ;;  %v120_v1 = vmax.f32 %v98_v46, 0.0 }
  0x12   :  { %190 = vperm.xlu1 %460, %v149_v7   ;;  %185 = vperm.xlu0 %459, %v148_v8   ;;  %v131_v2 = vmax.f32 %v109_v47, 0.0  ;;  %v428_v3 = vunpack.c.h.bf16 %v451_v53  ;;  %v447_v4 = vunpack.c.l.bf16 %v456_v59  ;;  %v427_v5 = vunpack.c.l.bf16 %v451_v53  ;;  %v408_v7 = vld [vmem:[%s708_s4 + $0x18] sm:$0xff] }
  0x13   :  { %345 = vmatpush.bf16.msra.mxu0 %v410_v35  ;;  %v444_v6 = vunpack.c.h.bf16 %v455_v34  ;;  %v431_v8 = vunpack.c.l.bf16 %v452_v58  ;;  %v122_v12 = vmax.f32 %v100_v55, 0.0  ;;  %v133_v13 = vmax.f32 %v111_v56, 0.0 }
  0x14   :  { %195 = vperm.xlu2 %461, %v150_v9   ;;  %v448_v9 = vunpack.c.h.bf16 %v456_v59  ;;  %v121_v14 = vmax.f32 %v99_v60, 0.0  ;;  %v132_v15 = vmax.f32 %v110_v61, 0.0  ;;  %v647_v16 = vadd.f32 %v595_v31, %v77_v63  ;;  %v405_v61 = vld [vmem:[%s708_s4] sm:$0xff] }
  0x15   :  { %v650_v17 = vadd.f32 %v595_v31, %v88_v0  ;;  %v79_v22 = vmul.f32 %v579_v19, %v428_v3  ;;  %v90_v23 = vmul.f32 %v579_v19, %v447_v4  ;;  %v78_v24 = vmul.f32 %v579_v19, %v427_v5 }
  0x16   :  { %v89_v25 = vmul.f32 %v579_v19, %v444_v6  ;;  %v80_v27 = vmul.f32 %v579_v19, %v431_v8  ;;  %v91_v28 = vmul.f32 %v579_v19, %v448_v9  ;;  %v56_v34 = vunpack.c.l.bf16 %v34_v18 }
  0x17   :  { %346 = vmatpush.bf16.msra.mxu0 %v409_v48  ;;  %v67_v35 = vunpack.c.l.bf16 %v45_v20  ;;  %v432_v38 = vunpack.c.h.bf16 %v452_v58  ;;  %v66_v39 = vunpack.c.l.bf16 %v44_v21  ;;  %v105_v45 = vadd.f32 %v595_v31, %v79_v22 }
  0x18   :  { %v116_v46 = vadd.f32 %v595_v31, %v90_v23  ;;  %v104_v47 = vadd.f32 %v595_v31, %v78_v24  ;;  %v115_v48 = vadd.f32 %v595_v31, %v89_v25  ;;  %v82_v58 = vmul.f32 %v579_v19, %v56_v34 }
  0x19   :  { %v93_v59 = vmul.f32 %v579_v19, %v67_v35  ;;  %v92_v60 = vmul.f32 %v579_v19, %v66_v39  ;;  %v136_v3 = vmax.f32 %v650_v17, 0.0  ;;  %v106_v4 = vadd.f32 %v595_v31, %v80_v27 }
  0x1a   :  { %205 = vperm.xlu1 %460, %v152_v10   ;;  %200 = vperm.xlu0 %459, %v151_v11   ;;  %v101_v10 = vadd.f32 %v595_v31, %v75_v51  ;;  %v112_v11 = vadd.f32 %v595_v31, %v86_v52  ;;  %v117_v5 = vadd.f32 %v595_v31, %v91_v28 }
  0x1b   :  { %347 = vmatpush.bf16.msra.mxu0 %v408_v7  ;;  %v128_v18 = vmax.f32 %v106_v4, 0.0 }
  0x1c   :  { %v123_v29 = vmax.f32 %v101_v10, 0.0  ;;  %v134_v30 = vmax.f32 %v112_v11, 0.0  ;;  %v127_v10 = vmax.f32 %v105_v45, 0.0  ;;  %v138_v11 = vmax.f32 %v116_v46, 0.0 }
  0x1d   :  { %v139_v20 = vmax.f32 %v117_v5, 0.0 }
  0x1f   :  { %348 = vmatpush.bf16.msra.mxu0 %v407_v26 }
  0x23   :  { %349 = vmatpush.bf16.msra.mxu0 %v406_v40 }
  0x27   :  { %350 = vmatpush.bf16.msra.mxu0 %v405_v61 }
  0x5e   :  { %v637_v62 = vpop.permute.xlu2 %175 }
  0x5f   :  { %v223_v6 = vmul.f32 %v637_v62, %v135_v50 }
  0x66   :  { %v181_v51 = vpop.permute.xlu2 %180 }
  0x67   :  { %v224_v17 = vmul.f32 %v181_v51, %v136_v3 }
  0x6e   :  { %v196_v25 = vpop.permute.xlu2 %195 }
  0x6f   :  { %v227_v35 = vmul.f32 %v196_v25, %v139_v20 }
  0x74   :  { %v166_v54 = vpop.permute.xlu1 %165  ;;  %v156_v57 = vpop.permute.xlu0 %155 }
  0x75   :  { %v208_v41 = vmul.f32 %v156_v57, %v120_v1  ;;  %v219_v42 = vmul.f32 %v156_v57, %v131_v2  ;;  %v210_v52 = vmul.f32 %v166_v54, %v122_v12  ;;  %v221_v53 = vmul.f32 %v166_v54, %v133_v13 }
  0x76   :  { %v81_v57 = vmul.f32 %v579_v19, %v432_v38  ;;  %v125_v54 = vmax.f32 %v647_v16, 0.0  ;;  %v212_v19 = vmul.f32 %v637_v62, %v124_v49  ;;  %v126_v13 = vmax.f32 %v104_v47, 0.0 }
  0x77   :  { %v119_v16 = vadd.f32 %v595_v31, %v93_v59  ;;  %v118_v49 = vadd.f32 %v595_v31, %v92_v60 }
  0x78   :  { %v107_v36 = vadd.f32 %v595_v31, %v81_v57  ;;  %v213_v37 = vmul.f32 %v181_v51, %v125_v54 }
  0x79   :  { %v141_v27 = vmax.f32 %v119_v16, 0.0 }
  0x7a   :  { %v129_v28 = vmax.f32 %v107_v36, 0.0 }
  0x7c   :  { %v171_v32 = vpop.permute.xlu1 %170  ;;  %v161_v33 = vpop.permute.xlu0 %160 }
  0x7d   :  { %v209_v43 = vmul.f32 %v161_v33, %v121_v14  ;;  %v220_v44 = vmul.f32 %v161_v33, %v132_v15  ;;  %v211_v63 = vmul.f32 %v171_v32, %v123_v29  ;;  %v222_v0 = vmul.f32 %v171_v32, %v134_v30 }
  0x7e   :  { %v137_v14 = vmax.f32 %v115_v48, 0.0  ;;  %v108_v15 = vadd.f32 %v595_v31, %v82_v58  ;;  %v140_v29 = vmax.f32 %v118_v49, 0.0  ;;  %v216_v31 = vmul.f32 %v196_v25, %v128_v18 }
  0x7f   :  { %v230_v55 = vadd.f32 %v209_v43, %v208_v41  ;;  %v248_v56 = vadd.f32 %v220_v44, %v219_v42 }
  0x80   :  { %v130_v26 = vmax.f32 %v108_v15, 0.0 }
  0x81   :  { %v231_v1 = vadd.f32 %v230_v55, %v210_v52  ;;  %v249_v2 = vadd.f32 %v248_v56, %v221_v53 }
  0x83   :  { %v232_v7 = vadd.f32 %v231_v1, %v211_v63  ;;  %v250_v8 = vadd.f32 %v249_v2, %v222_v0 }
  0x84   :  { %v191_v9 = vpop.permute.xlu1 %190  ;;  %v186_v12 = vpop.permute.xlu0 %185 }
  0x85   :  { %v233_v50 = vadd.f32 %v232_v7, %v212_v19  ;;  %v251_v62 = vadd.f32 %v250_v8, %v223_v6  ;;  %v214_v21 = vmul.f32 %v186_v12, %v126_v13  ;;  %v225_v22 = vmul.f32 %v186_v12, %v137_v14 }
  0x86   :  { %v215_v30 = vmul.f32 %v191_v9, %v127_v10  ;;  %v226_v32 = vmul.f32 %v191_v9, %v138_v11  ;;  %v464_v10 = vld [vmem:[%s709_s5] ss:$0 sm:$0xff] }
  0x87   :  { %v234_v23 = vadd.f32 %v233_v50, %v213_v37  ;;  %v252_v24 = vadd.f32 %v251_v62, %v224_v17 }
  0x89   :  { %v235_v33 = vadd.f32 %v234_v23, %v214_v21  ;;  %v253_v34 = vadd.f32 %v252_v24, %v225_v22 }
  0x8b   :  { %v236_v38 = vadd.f32 %v235_v33, %v215_v30  ;;  %v254_v39 = vadd.f32 %v253_v34, %v226_v32 }
  0x8c   :  { %v206_v40 = vpop.permute.xlu1 %205  ;;  %v201_v41 = vpop.permute.xlu0 %200 }
  0x8d   :  { %v218_v42 = vmul.f32 %v206_v40, %v130_v26  ;;  %v229_v43 = vmul.f32 %v206_v40, %v141_v27  ;;  %v217_v44 = vmul.f32 %v201_v41, %v129_v28  ;;  %v228_v45 = vmul.f32 %v201_v41, %v140_v29 }
  0x8e   :  { %v237_v46 = vadd.f32 %v236_v38, %v216_v31  ;;  %v255_v47 = vadd.f32 %v254_v39, %v227_v35 }
  0x8f   :  { %v240_v48 = vsel %vm239_vm0, %v218_v42, 0.0  ;;  %v257_v51 = vsel %vm239_vm0, %v229_v43, 0.0 }
  0x90   :  { %v238_v52 = vadd.f32 %v237_v46, %v217_v44  ;;  %v256_v53 = vadd.f32 %v255_v47, %v228_v45 }
  0x92   :  { %v241_v55 = vadd.f32 %v240_v48, %v238_v52  ;;  %v258_v56 = vadd.f32 %v257_v51, %v256_v53 }
  0x94   :  { %v242_v58 = vrot.slane %v241_v55, 4  ;;  %v259_v59 = vrot.slane %v258_v56, 4 }
  0x96   :  { %v243_v57 = vadd.f32 %v242_v58, %v241_v55  ;;  %v260_v60 = vadd.f32 %v259_v59, %v258_v56 }
  0x98   :  { %v244_v61 = vrot.slane %v243_v57, 2  ;;  %v261_v63 = vrot.slane %v260_v60, 2 }
  0x9a   :  { %v245_v0 = vadd.f32 %v244_v61, %v243_v57  ;;  %v262_v1 = vadd.f32 %v261_v63, %v260_v60 }
  0x9c   :  { %v246_v2 = vrot.slane %v245_v0, 1  ;;  %v263_v54 = vrot.slane %v262_v1, 1 }
  0x9e   :  { %v247_v3 = vadd.f32 %v246_v2, %v245_v0  ;;  %v264_v4 = vadd.f32 %v263_v54, %v262_v1 }
  0xa0   :  { %v265_v5 = vpack.c.bf16 %v247_v3, %v247_v3  ;;  %v266_v19 = vpack.c.bf16 %v264_v4, %v264_v4 }
  0xa2   :  { %v289_v6 = vunpack.c.l.b16 %v265_v5  ;;  %v290_v7 = vunpack.c.l.b16 %v266_v19 }
  0xa4   :  { %v292_v8 = vsel %vm291_vm1, %v290_v7, %v289_v6 }
  0xa5   :  { %v293_v9 = vpack.c.b16 %v292_v8, %v292_v8 }
  0xa7   :  { %351 = vmatmul.bf16.vlgmr.msra.gmra.mxu0 %v293_v9 }
 0x124   :  { %v352_v11 = vpop.f32.mrf.mxu0 }
 0x125   :  { %v353_v12 = vadd.f32 %v464_v10, %v352_v11 }
 0x127   :  { %356 = vst [vmem:[#allocation2] sm:$0x3] %v353_v12 }
 0x128   :  { %367 = dma.vmem_to_hbm [thread:$0]  %s363_s13, 32, %s365_s16, [#allocation3]  }
 0x12c   :  { %v354_v13 = vpop.f32.mrf.mxu0 }
 0x12d   :  { %489 = dma.done.wait [#allocation3], 32  }
 0x12e   :  { %490 = vsyncadd [#allocation3], 4294967264 }
 0x12f   :  { %372 = vsyncpa [#allocation3], 1 }

// kernel: forward.11
= control target key start
LH: loop header
LB: loop body
LE: loop exit
PB: predicated region body
PF: predicated region fallthrough
CT: control target
= control target key end

     0   :  { %s2559_s27 = smov 0   ;;  %s3222_s0 = inlined_call_operand.vmem [shape: bf16[2,81,128], index: 0, kind: input, shape index: {}]   ;;  %s3223_s1 = inlined_call_operand.vmem [shape: f32[81,1], index: 1, kind: input, shape index: {}]   ;;  %s3224_s2 = inlined_call_operand.vmem [shape: f32[1,128], index: 2, kind: input, shape index: {}]   ;;  %s3225_s3 = inlined_call_operand.vmem [shape: f32[1,128], index: 3, kind: input, shape index: {}]   ;;  %s3226_s4 = inlined_call_operand.vmem [shape: bf16[128,128], index: 4, kind: input, shape index: {}]   ;;  %s3227_s5 = inlined_call_operand.vmem [shape: f32[1,128], index: 5, kind: input, shape index: {}]   ;;  %s3228_s6 = inlined_call_operand.vmem [shape: f32[1,128], index: 6, kind: input, shape index: {}]   ;;  %s3229_s7 = inlined_call_operand.vmem [shape: bf16[9,128,128], index: 7, kind: input, shape index: {}]   ;;  %s3230_s8 = inlined_call_operand.vmem [shape: bf16[2,81,128], index: 8, kind: output, shape index: {}]  }
   0x1 LB: > { %s1880_s28 = sadd.s32 4294967295, %s2510_s27   ;;  %p1884_p0 = scmp.ge.s32.totalorder %s2510_s27, 1  ;;  %s2510_s27 = sphi %s2559_s27, %s18_s27  }
   0x2   : > { %p262_p1 = scmp.lt.s32.totalorder %s2510_s27, 3 }
   0x4   : > { %p263_p2 = pnand %p1884_p0, %p262_p1 }
   0x5   : > { %p296_p3 = scmp.lt.s32.totalorder (!%p263_p2), %s1880_s28, 1 }
   0x6   : > { %266 = sbr.rel (%p263_p2) target bundleno = 597 (0x255), region = 52 }
   0xb   : > { %v2344_v0 = vld [vmem:[%s3226_s4 + $0x38] sm:$0xff]  ;;  %v2343_v1 = vld [vmem:[%s3226_s4 + $0x30] sm:$0xff]  ;;  %s3252_s28 = smov (!%p296_p3, %s1880_s28), 1  ;;  %v2512_v2 = vmov 0   ;;  %v321_v4 = vld [vmem:[%s3223_s1 + $0x20] sm:$0xff]  ;;  %vm1819_vm0 = vcmask 1040384  }
   0xc   : > { %450 = vmatpush.bf16.msra.mxu0 %v2344_v0  ;;  %2470 = vmatpush.bf16.msra.mxu2 %v2344_v0  ;;  %s2486_s11 = smul.u32 44, %s3252_s28  ;;  %v323_v3 = vld [vmem:[%s3223_s1 + $0x30] sm:$0xff]  ;;  %v2342_v5 = vld [vmem:[%s3226_s4 + $0x28] sm:$0xff]  ;;  %v2341_v6 = vld [vmem:[%s3226_s4 + $0x20] sm:$0xff]  ;;  %vm1820_vm1 = vsmask.f32 256 }
   0xd   : > { %2498 = vset.pattern.permute.xlu1 %v2512_v2  ;;  %2497 = vset.pattern.permute.xlu0 %v2512_v2  ;;  %v2606_v11 = vld [vmem:[%s3224_s2] ss:$0 sm:$0xff]  ;;  %v2340_v14 = vld [vmem:[%s3226_s4 + $0x18] sm:$0xff]  ;;  %v322_v20 = vld [vmem:[%s3223_s1 + $0x28] sm:$0xff] }
   0xe   : > { %2499 = vset.pattern.permute.xlu2 %v2512_v2  ;;  %561 = vperm.xlu1 %2498, %v323_v3   ;;  %s2590_s20 = scalar_lea.vmem %s3222_s0, %s2486_s11  ;;  %v2622_v17 = vld [vmem:[%s3225_s3] ss:$0 sm:$0xff]  ;;  %v2339_v22 = vld [vmem:[%s3226_s4 + $0x10] sm:$0xff]  ;;  %v2338_v27 = vld [vmem:[%s3226_s4 + $0x8] sm:$0xff]  ;;  %s3175_s14 = scalar_lea.vmem %s3230_s8, %s2486_s11 }
   0xf   : > { %551 = vperm.xlu0 %2497, %v321_v4   ;;  %v2596_v7 = vld [vmem:[%s2590_s20] sm:$0xff]   ;;  %v2599_v8 = vld [vmem:[%s2590_s20 + $0x18] sm:$0xff]   ;;  %v318_v28 = vld [vmem:[%s3223_s1 + $0x8] sm:$0xff] }
  0x10   : > { %451 = vmatpush.bf16.msra.mxu0 %v2343_v1  ;;  %2471 = vmatpush.bf16.msra.mxu2 %v2343_v1  ;;  %v2419_v9 = vunpack.c.l.bf16 %v2596_v7  ;;  %v3240_v10 = vunpack.c.h.bf16 %v2596_v7  ;;  %v3235_v12 = vunpack.c.l.bf16 %v2599_v8  ;;  %v3234_v13 = vunpack.c.h.bf16 %v2599_v8  ;;  %v317_v21 = vld [vmem:[%s3223_s1] sm:$0xff]  ;;  %v2650_v33 = vld [vmem:[%s2590_s20 + $0x8] sm:$0xff]   ;;  %v319_v46 = vld [vmem:[%s3223_s1 + $0x10] sm:$0xff] }
  0x11   : > { %v2337_v34 = vld [vmem:[%s3226_s4] sm:$0xff]  ;;  %v3239_v36 = vunpack.c.l.bf16 %v2650_v33  ;;  %v3238_v37 = vunpack.c.h.bf16 %v2650_v33  ;;  %v324_v47 = vld [vmem:[%s3223_s1 + $0x38] sm:$0xff]  ;;  %v326_v48 = vld [vmem:[%s3223_s1 + $0x48] sm:$0xff] }
  0x12   : > { %v343_v15 = vmul.f32 %v2606_v11, %v2419_v9  ;;  %v344_v16 = vmul.f32 %v2606_v11, %v3240_v10  ;;  %v349_v18 = vmul.f32 %v2606_v11, %v3235_v12  ;;  %v350_v19 = vmul.f32 %v2606_v11, %v3234_v13  ;;  %v2656_v35 = vld [vmem:[%s2590_s20 + $0x20] sm:$0xff]   ;;  %566 = vperm.xlu2 %2499, %v324_v47   ;;  %v2360_v49 = vld [vmem:[%s3229_s7 + $0x78] sm:$0xff]  ;;  %v2359_v55 = vld [vmem:[%s3229_s7 + $0x70] sm:$0xff] }
  0x13   : > { %v3233_v40 = vunpack.c.l.bf16 %v2656_v35  ;;  %v3232_v41 = vunpack.c.h.bf16 %v2656_v35  ;;  %v345_v42 = vmul.f32 %v2606_v11, %v3239_v36  ;;  %v346_v43 = vmul.f32 %v2606_v11, %v3238_v37  ;;  %v2352_v50 = vld [vmem:[%s3229_s7 + $0x38] sm:$0xff]  ;;  %735 = vmatpush.bf16.msra.mxu1 %v2360_v49  ;;  %v2351_v56 = vld [vmem:[%s3229_s7 + $0x30] sm:$0xff]  ;;  %2478 = vmatpush.bf16.msra.mxu3 %v2360_v49  ;;  %v325_v59 = vld [vmem:[%s3223_s1 + $0x40] sm:$0xff] }
  0x14   : > { %452 = vmatpush.bf16.msra.mxu0 %v2342_v5  ;;  %2472 = vmatpush.bf16.msra.mxu2 %v2342_v5  ;;  %v358_v23 = vadd.f32 %v2622_v17, %v343_v15  ;;  %v359_v24 = vadd.f32 %v2622_v17, %v344_v16  ;;  %v364_v25 = vadd.f32 %v2622_v17, %v349_v18  ;;  %v2376_v57 = vld [vmem:[%s3229_s7 + $0xf8] sm:$0xff]  ;;  %v327_v58 = vld [vmem:[%s3223_s1 + $0x50] sm:$0x1]  ;;  %v2358_v0 = vld [vmem:[%s3229_s7 + $0x68] sm:$0xff] }
  0x15   : > { %v365_v26 = vadd.f32 %v2622_v17, %v350_v19  ;;  %v351_v44 = vmul.f32 %v2606_v11, %v3233_v40  ;;  %v352_v45 = vmul.f32 %v2606_v11, %v3232_v41  ;;  %v360_v51 = vadd.f32 %v2622_v17, %v345_v42  ;;  %v2350_v1 = vld [vmem:[%s3229_s7 + $0x28] sm:$0xff]  ;;  %v2715_v2 = vld [vmem:[%s2590_s20 + $0x10] sm:$0xff]   ;;  %v320_v16 = vld [vmem:[%s3223_s1 + $0x18] sm:$0xff] }
  0x16   : > { %531 = vperm.xlu1 %2498, %v317_v21   ;;  %v369_v29 = vmax.f32 %v358_v23, 0.0  ;;  %v370_v30 = vmax.f32 %v359_v24, 0.0  ;;  %v375_v31 = vmax.f32 %v364_v25, 0.0  ;;  %v361_v52 = vadd.f32 %v2622_v17, %v346_v43  ;;  %v2718_v3 = vld [vmem:[%s2590_s20 + $0x28] sm:$0x1]  ;;  %v2373_v42 = vld [vmem:[%s3229_s7 + $0xe0] sm:$0xff]  ;;  %vm1821_vm2 = vmand %vm1819_vm0, %vm1820_vm1 }
  0x17   : > { %556 = vperm.xlu0 %2497, %v322_v20   ;;  %v376_v32 = vmax.f32 %v365_v26, 0.0  ;;  %v366_v53 = vadd.f32 %v2622_v17, %v351_v44  ;;  %v367_v54 = vadd.f32 %v2622_v17, %v352_v45  ;;  %v371_v60 = vmax.f32 %v360_v51, 0.0  ;;  %736 = vmatpush.bf16.msra.mxu1 %v2359_v55  ;;  %v2354_v43 = vld [vmem:[%s3229_s7 + $0x48] sm:$0xff]  ;;  %v2372_v45 = vld [vmem:[%s3229_s7 + $0xd8] sm:$0xff]  ;;  %v2345_v47 = vld [vmem:[%s3229_s7] sm:$0xff] }
  0x18   : > { %453 = vmatpush.bf16.msra.mxu0 %v2341_v6  ;;  %2473 = vmatpush.bf16.msra.mxu2 %v2341_v6  ;;  %v380_v38 = vpack.c.bf16 %v370_v30, %v369_v29  ;;  %v372_v61 = vmax.f32 %v361_v52, 0.0  ;;  %v3237_v6 = vunpack.c.l.bf16 %v2715_v2  ;;  %v3231_v15 = vunpack.c.l.bf16 %v2718_v3  ;;  %v2357_v29 = vld [vmem:[%s3229_s7 + $0x60] sm:$0xff]  ;;  %v2375_v30 = vld [vmem:[%s3229_s7 + $0xf0] sm:$0xff]  ;;  %v2346_v44 = vld [vmem:[%s3229_s7 + $0x8] sm:$0xff] }
  0x19   : > { %v383_v39 = vpack.c.bf16 %v376_v32, %v375_v31  ;;  %v377_v62 = vmax.f32 %v366_v53, 0.0  ;;  %v378_v63 = vmax.f32 %v367_v54, 0.0  ;;  %2479 = vmatpush.bf16.msra.mxu3 %v2359_v55  ;;  %v2348_v31 = vld [vmem:[%s3229_s7 + $0x18] sm:$0xff]  ;;  %v2374_v32 = vld [vmem:[%s3229_s7 + $0xe8] sm:$0xff]  ;;  %v2796_v53 = vld [vmem:[%s3227_s5] ss:$0 sm:$0xff] }
  0x1a   : > { %571 = vperm.xlu2 %2499, %v325_v59   ;;  %v381_v4 = vpack.c.bf16 %v372_v61, %v371_v60  ;;  %v347_v18 = vmul.f32 %v2606_v11, %v3237_v6  ;;  %v353_v20 = vmul.f32 %v2606_v11, %v3231_v15  ;;  %v2370_v49 = vld [vmem:[%s3229_s7 + $0xc8] sm:$0xff]  ;;  %v2801_v54 = vld [vmem:[%s3228_s6] ss:$0 sm:$0xff] }
  0x1b   : > { %v384_v5 = vpack.c.bf16 %v378_v63, %v377_v62  ;;  %737 = vmatpush.bf16.msra.mxu1 %v2358_v0  ;;  %v2383_v63 = vld [vmem:[%s3229_s7 + $0x130] sm:$0xff] }
  0x1c   : > { %454 = vmatpush.bf16.msra.mxu0 %v2340_v14  ;;  %2474 = vmatpush.bf16.msra.mxu2 %v2340_v14  ;;  %v3236_v14 = vunpack.c.h.bf16 %v2715_v2  ;;  %v362_v21 = vadd.f32 %v2622_v17, %v347_v18  ;;  %v368_v23 = vadd.f32 %v2622_v17, %v353_v20  ;;  %v2382_v20 = vld [vmem:[%s3229_s7 + $0x128] sm:$0xff] }
  0x1d   : > { %2480 = vmatpush.bf16.msra.mxu3 %v2358_v0 }
  0x1e   : > { %541 = vperm.xlu1 %2498, %v319_v46   ;;  %v348_v19 = vmul.f32 %v2606_v11, %v3236_v14  ;;  %v373_v24 = vmax.f32 %v362_v21, 0.0  ;;  %v379_v26 = vmax.f32 %v368_v23, 0.0  ;;  %v2349_v11 = vld [vmem:[%s3229_s7 + $0x20] sm:$0xff] }
  0x1f   : > { %536 = vperm.xlu0 %2497, %v318_v28   ;;  %738 = vmatpush.bf16.msra.mxu1 %v2357_v29  ;;  %v2353_v46 = vld [vmem:[%s3229_s7 + $0x40] sm:$0xff] }
  0x20   : > { %455 = vmatpush.bf16.msra.mxu0 %v2339_v22  ;;  %2475 = vmatpush.bf16.msra.mxu2 %v2339_v22  ;;  %v363_v22 = vadd.f32 %v2622_v17, %v348_v19  ;;  %v385_v28 = vpack.c.bf16 %v379_v26, %v379_v26  ;;  %v2356_v17 = vld [vmem:[%s3229_s7 + $0x58] sm:$0xff] }
  0x21   : > { %2481 = vmatpush.bf16.msra.mxu3 %v2357_v29  ;;  %v2381_v29 = vld [vmem:[%s3229_s7 + $0x120] sm:$0xff] }
  0x22   : > { %546 = vperm.xlu2 %2499, %v320_v16   ;;  %v374_v25 = vmax.f32 %v363_v22, 0.0 }
  0x23   : > { %739 = vmatpush.bf16.msra.mxu1 %v2356_v17 }
  0x24   : > { %456 = vmatpush.bf16.msra.mxu0 %v2338_v27  ;;  %2476 = vmatpush.bf16.msra.mxu2 %v2338_v27  ;;  %v382_v27 = vpack.c.bf16 %v374_v25, %v373_v24 }
  0x25   : > { %2482 = vmatpush.bf16.msra.mxu3 %v2356_v17 }
  0x26   : > { %581 = vperm.xlu1 %2498, %v327_v58   ;;  %v2384_v58 = vld [vmem:[%s3229_s7 + $0x138] sm:$0xff] }
  0x27   : > { %576 = vperm.xlu0 %2497, %v326_v48   ;;  %v2371_v48 = vld [vmem:[%s3229_s7 + $0xd0] sm:$0xff] }
  0x28   : > { %457 = vmatpush.bf16.msra.mxu0 %v2337_v34  ;;  %2477 = vmatpush.bf16.msra.mxu2 %v2337_v34  ;;  %v2513_v34 = vmov 0.0  }
  0x29   : > { %595 = vst [vmem:[#allocation2] sm:$0xff] %v2513_v34 }
  0x2a   : > { %596 = vst [vmem:[#allocation2 + $0x8] sm:$0xff] %v2513_v34 }
  0x2b   : > { %458 = vmatmul.bf16.vlgmr.msra.gmra.mxu0 %v380_v38  ;;  %473 = vmatmul.bf16.vlgmr.msra.gmra.mxu2 %v383_v39  ;;  %v2355_v38 = vld [vmem:[%s3229_s7 + $0x50] sm:$0xff]  ;;  %607 = vst [vmem:[#allocation2 + $0x60] sm:$0xff] %v2513_v34 }
  0x2c   : > { %821 = vmatpush.bf16.msrb.mxu2 %v2352_v50  ;;  %1072 = vmatpush.bf16.msrb.mxu0 %v2376_v57  ;;  %v2347_v39 = vld [vmem:[%s3229_s7 + $0x10] sm:$0xff]  ;;  %608 = vst [vmem:[#allocation2 + $0x68] sm:$0x7] %v2513_v34  ;;  %v2369_v50 = vld [vmem:[%s3229_s7 + $0xc0] sm:$0xff] }
  0x2d   : > { %740 = vmatpush.bf16.msra.mxu1 %v2355_v38  ;;  %2483 = vmatpush.bf16.msra.mxu3 %v2355_v38 }
  0x30   : > { %822 = vmatpush.bf16.msrb.mxu2 %v2351_v56  ;;  %1073 = vmatpush.bf16.msrb.mxu0 %v2375_v30 }
  0x31   : > { %741 = vmatpush.bf16.msra.mxu1 %v2354_v43  ;;  %2484 = vmatpush.bf16.msra.mxu3 %v2354_v43 }
  0x33   : > { %v1654_v41 = vld [vmem:[#allocation2 + $0x62] sm:$0xff] }
  0x34   : > { %823 = vmatpush.bf16.msrb.mxu2 %v2350_v1  ;;  %1074 = vmatpush.bf16.msrb.mxu0 %v2374_v32 }
  0x35   : > { %742 = vmatpush.bf16.msra.mxu1 %v2353_v46  ;;  %2485 = vmatpush.bf16.msra.mxu3 %v2353_v46 }
  0x38   : > { %824 = vmatpush.bf16.msrb.mxu2 %v2349_v11  ;;  %1075 = vmatpush.bf16.msrb.mxu0 %v2373_v42 }
  0x39   : > { %1203 = vmatpush.bf16.msrb.mxu1 %v2384_v58 }
  0x3b   : > { %463 = vmatmul.bf16.gmra.mxu0 %v381_v4  ;;  %478 = vmatmul.bf16.gmra.mxu2 %v384_v5 }
  0x3c   : > { %825 = vmatpush.bf16.msrb.mxu2 %v2348_v31  ;;  %1076 = vmatpush.bf16.msrb.mxu0 %v2372_v45 }
  0x3d   : > { %1204 = vmatpush.bf16.msrb.mxu1 %v2383_v63 }
  0x40   : > { %826 = vmatpush.bf16.msrb.mxu2 %v2347_v39  ;;  %1077 = vmatpush.bf16.msrb.mxu0 %v2371_v48  ;;  %v2379_v48 = vld [vmem:[%s3229_s7 + $0x110] sm:$0xff] }
  0x41   : > { %1205 = vmatpush.bf16.msrb.mxu1 %v2382_v20 }
  0x44   : > { %827 = vmatpush.bf16.msrb.mxu2 %v2346_v44  ;;  %1078 = vmatpush.bf16.msrb.mxu0 %v2370_v49  ;;  %v2380_v44 = vld [vmem:[%s3229_s7 + $0x118] sm:$0xff] }
  0x45   : > { %1206 = vmatpush.bf16.msrb.mxu1 %v2381_v29 }
  0x48   : > { %828 = vmatpush.bf16.msrb.mxu2 %v2345_v47  ;;  %1079 = vmatpush.bf16.msrb.mxu0 %v2369_v50 }
  0x49   : > { %1207 = vmatpush.bf16.msrb.mxu1 %v2380_v44 }
  0x4b   : > { %468 = vmatmul.bf16.gmra.mxu0 %v382_v27  ;;  %483 = vmatmul.bf16.gmra.mxu2 %v385_v28  ;;  %v653_v27 = vld [vmem:[#allocation2 + $0x7] sm:$0xff] }
  0x4c   : > { %v620_v28 = vld [vmem:[#allocation2 + $0x6] sm:$0xff] }
  0x4d   : > { %1208 = vmatpush.bf16.msrb.mxu1 %v2379_v48 }
  0x6c   : > { %v2819_v5 = vpop.permute.xlu2 %566 }
  0x74   : > { %v2847_v43 = vpop.permute.xlu2 %571 }
  0x80   : > { %v2791_v52 = vpop.permute.xlu1 %561 }
  0x81   : > { %v2789_v51 = vpop.permute.xlu0 %551 }
  0x88   : > { %v2810_v60 = vpop.permute.xlu1 %531 }
  0x89   : > { %v2804_v57 = vpop.permute.xlu0 %556 }
  0x90   : > { %v2853_v47 = vpop.permute.xlu1 %541 }
  0x91   : > { %v2831_v23 = vpop.permute.xlu0 %536 }
  0xa8   : > { %v459_v55 = vpop.f32.mrf.mxu0 }
  0xa9   : > { %v492_v56 = vmul.f32 %v2796_v53, %v459_v55 }
  0xab   : > { %v507_v59 = vadd.f32 %v2801_v54, %v492_v56 }
  0xad   : > { %v518_v61 = vmax.f32 %v507_v59, 0.0 }
  0xae   : > { %v474_v62 = vpop.f32.mrf.mxu2 }
  0xaf   : > { %v2816_v0 = vmul.f32 %v2810_v60, %v518_v61  ;;  %v498_v1 = vmul.f32 %v2796_v53, %v474_v62 }
  0xb0   : > { %v461_v4 = vpop.f32.mrf.mxu0 }
  0xb1   : > { %609 = vst [vmem:[#allocation2 + $0x10] sm:$0xff] %v2816_v0  ;;  %v513_v16 = vadd.f32 %v2801_v54, %v498_v1  ;;  %v493_v18 = vmul.f32 %v2796_v53, %v461_v4  ;;  %v2825_v19 = vpack.c.bf16 %v2816_v0, %v2513_v34 }
  0xb3   : > { %v524_v21 = vmax.f32 %v513_v16, 0.0  ;;  %v508_v22 = vadd.f32 %v2801_v54, %v493_v18  ;;  %v2378_v18 = vld [vmem:[%s3229_s7 + $0x108] sm:$0xff] }
  0xb4   : > { %1209 = vmatpush.bf16.msrb.mxu1 %v2378_v18 }
  0xb5   : > { %v2834_v24 = vmul.f32 %v2791_v52, %v524_v21  ;;  %v519_v25 = vmax.f32 %v508_v22, 0.0  ;;  %v2368_v22 = vld [vmem:[%s3229_s7 + $0xb8] sm:$0xff] }
  0xb6   : > { %v476_v26 = vpop.f32.mrf.mxu2  ;;  %941 = vmatpush.bf16.msrb.mxu3 %v2368_v22 }
  0xb7   : > { %615 = vst [vmem:[#allocation2 + $0x40] sm:$0xff] %v2834_v24  ;;  %v2841_v11 = vmul.f32 %v2831_v23, %v519_v25  ;;  %v499_v30 = vmul.f32 %v2796_v53, %v476_v26  ;;  %v2882_v25 = vpop.permute.xlu2 %546  ;;  %v2377_v26 = vld [vmem:[%s3229_s7 + $0x100] sm:$0xff] }
  0xb8   : > { %v464_v17 = vpop.f32.mrf.mxu0  ;;  %v654_v31 = vld [vmem:[#allocation2 + $0xf] sm:$0xff]  ;;  %1210 = vmatpush.bf16.msrb.mxu1 %v2377_v26 }
  0xb9   : > { %v621_v32 = vld [vmem:[#allocation2 + $0xe] sm:$0xff]  ;;  %610 = vst [vmem:[#allocation2 + $0x18] sm:$0xff] %v2841_v11  ;;  %v514_v34 = vadd.f32 %v2801_v54, %v499_v30  ;;  %v494_v38 = vmul.f32 %v2796_v53, %v464_v17  ;;  %v664_v39 = vpack.c.bf16 %v654_v31, %v653_v27 }
  0xba   : > { %v631_v42 = vpack.c.bf16 %v621_v32, %v620_v28  ;;  %v2367_v30 = vld [vmem:[%s3229_s7 + $0xb0] sm:$0xff] }
  0xbb   : > { %v525_v45 = vmax.f32 %v514_v34, 0.0  ;;  %v509_v46 = vadd.f32 %v2801_v54, %v494_v38  ;;  %743 = vmatmul.bf16.vlgmr.msra.gmra.mxu1 %v664_v39  ;;  %942 = vmatpush.bf16.msrb.mxu3 %v2367_v30  ;;  %v2922_v30 = vpop.permute.xlu1 %581 }
  0xbc   : > { %829 = vmatmul.bf16.vlgmr.msrb.gmra.mxu2 %v631_v42 }
  0xbd   : > { %v2859_v49 = vmul.f32 %v2819_v5, %v525_v45  ;;  %v520_v50 = vmax.f32 %v509_v46, 0.0 }
  0xbe   : > { %v479_v55 = vpop.f32.mrf.mxu2 }
  0xbf   : > { %616 = vst [vmem:[#allocation2 + $0x48] sm:$0xff] %v2859_v49  ;;  %v2863_v56 = vmul.f32 %v2853_v47, %v520_v50  ;;  %v500_v58 = vmul.f32 %v2796_v53, %v479_v55  ;;  %v1135_v59 = vpack.c.bf16 %v2859_v49, %v2834_v24  ;;  %v2903_v50 = vpop.permute.xlu0 %576 }
  0xc0   : > { %v466_v61 = vpop.f32.mrf.mxu0  ;;  %v991_v62 = vld [vmem:[#allocation2 + $0x17] sm:$0xff] }
  0xc1   : > { %611 = vst [vmem:[#allocation2 + $0x20] sm:$0xff] %v2863_v56  ;;  %v515_v63 = vadd.f32 %v2801_v54, %v500_v58  ;;  %v495_v1 = vmul.f32 %v2796_v53, %v466_v61  ;;  %v1001_v4 = vpack.c.bf16 %v991_v62, %v654_v31  ;;  %v2873_v16 = vpack.c.bf16 %v2863_v56, %v2841_v11  ;;  %v622_v39 = vld [vmem:[#allocation2 + $0x16] sm:$0xff]  ;;  %v2366_v61 = vld [vmem:[%s3229_s7 + $0xa8] sm:$0xff] }
  0xc2   : > { %943 = vmatpush.bf16.msrb.mxu3 %v2366_v61 }
  0xc3   : > { %v526_v20 = vmax.f32 %v515_v63, 0.0  ;;  %1080 = vmatmul.bf16.vlgmr.msrb.gmra.mxu0 %v1001_v4  ;;  %v510_v21 = vadd.f32 %v2801_v54, %v495_v1 }
  0xc5   : > { %v2888_v27 = vmul.f32 %v2847_v43, %v526_v20  ;;  %v521_v28 = vmax.f32 %v510_v21, 0.0 }
  0xc6   : > { %v481_v29 = vpop.f32.mrf.mxu2  ;;  %v1389_v36 = vld [vmem:[#allocation2 + $0x48] sm:$0xff] }
  0xc7   : > { %617 = vst [vmem:[#allocation2 + $0x50] sm:$0xff] %v2888_v27  ;;  %v2895_v17 = vmul.f32 %v2882_v25, %v521_v28  ;;  %v501_v31 = vmul.f32 %v2796_v53, %v481_v29  ;;  %v874_v32 = vpack.c.bf16 %v2888_v27, %v2859_v49 }
  0xc8   : > { %v469_v34 = vpop.f32.mrf.mxu0  ;;  %v656_v38 = vld [vmem:[#allocation2 + $0x1f] sm:$0xff] }
  0xc9   : > { %v623_v42 = vld [vmem:[#allocation2 + $0x1e] sm:$0xff]  ;;  %612 = vst [vmem:[#allocation2 + $0x28] sm:$0xff] %v2895_v17  ;;  %v496_v44 = vmul.f32 %v2796_v53, %v469_v34  ;;  %v665_v45 = vpack.c.bf16 %v656_v38, %v991_v62  ;;  %v516_v48 = vadd.f32 %v2801_v54, %v501_v31 }
  0xca   : > { %v632_v46 = vpack.c.bf16 %v623_v42, %v622_v39  ;;  %v2365_v42 = vld [vmem:[%s3229_s7 + $0xa0] sm:$0xff] }
  0xcb   : > { %v511_v55 = vadd.f32 %v2801_v54, %v496_v44  ;;  %748 = vmatmul.bf16.gmra.mxu1 %v665_v45  ;;  %v527_v58 = vmax.f32 %v516_v48, 0.0  ;;  %944 = vmatpush.bf16.msrb.mxu3 %v2365_v42  ;;  %v2362_v42 = vld [vmem:[%s3229_s7 + $0x88] sm:$0xff] }
  0xcc   : > { %834 = vmatmul.bf16.gmra.mxu2 %v632_v46 }
  0xcd   : > { %v522_v63 = vmax.f32 %v511_v55, 0.0  ;;  %v2910_v1 = vmul.f32 %v2903_v50, %v527_v58 }
  0xce   : > { %v484_v62 = vpop.f32.mrf.mxu2 }
  0xcf   : > { %v2913_v4 = vmul.f32 %v2789_v51, %v522_v63  ;;  %618 = vst [vmem:[#allocation2 + $0x58] sm:$0xff] %v2910_v1  ;;  %v502_v18 = vmul.f32 %v2796_v53, %v484_v62  ;;  %v1136_v22 = vpack.c.bf16 %v2910_v1, %v2888_v27  ;;  %v2364_v63 = vld [vmem:[%s3229_s7 + $0x98] sm:$0xff] }
  0xd0   : > { %v471_v20 = vpop.f32.mrf.mxu0  ;;  %v993_v21 = vld [vmem:[#allocation2 + $0x27] sm:$0xff]  ;;  %v2392_v62 = vld [vmem:[%s3229_s7 + $0x178] sm:$0xff]  ;;  %945 = vmatpush.bf16.msrb.mxu3 %v2364_v63 }
  0xd1   : > { %613 = vst [vmem:[#allocation2 + $0x30] sm:$0xff] %v2913_v4  ;;  %v517_v26 = vadd.f32 %v2801_v54, %v502_v18  ;;  %v497_v28 = vmul.f32 %v2796_v53, %v471_v20  ;;  %v1002_v29 = vpack.c.bf16 %v993_v21, %v656_v38  ;;  %v2926_v31 = vpack.c.bf16 %v2913_v4, %v2895_v17  ;;  %v624_v48 = vld [vmem:[#allocation2 + $0x26] sm:$0xff]  ;;  %v2391_v18 = vld [vmem:[%s3229_s7 + $0x170] sm:$0xff] }
  0xd2   : > { %1334 = vmatpush.bf16.msra.mxu2 %v2392_v62  ;;  %v2363_v20 = vld [vmem:[%s3229_s7 + $0x90] sm:$0xff]  ;;  %v2361_v63 = vld [vmem:[%s3229_s7 + $0x80] sm:$0xff] }
  0xd3   : > { %v512_v34 = vadd.f32 %v2801_v54, %v497_v28  ;;  %1085 = vmatmul.bf16.gmra.mxu0 %v1002_v29  ;;  %v528_v39 = vmax.f32 %v517_v26, 0.0  ;;  %v661_v62 = vld [vmem:[#allocation2 + $0x47] sm:$0xff] }
  0xd4   : > { %946 = vmatpush.bf16.msrb.mxu3 %v2363_v20 }
  0xd5   : > { %v523_v44 = vmax.f32 %v512_v34, 0.0  ;;  %v594_v45 = vmul.f32 %v2922_v30, %v528_v39  ;;  %v2390_v34 = vld [vmem:[%s3229_s7 + $0x168] sm:$0xff]  ;;  %v2408_v39 = vld [vmem:[%s3229_s7 + $0x1f8] sm:$0xff] }
  0xd6   : > { %v486_v53 = vpop.f32.mrf.mxu2  ;;  %1335 = vmatpush.bf16.msra.mxu2 %v2391_v18  ;;  %1596 = vmatpush.bf16.msra.mxu0 %v2408_v39  ;;  %v662_v18 = vld [vmem:[#allocation2 + $0x4f] sm:$0xff]  ;;  %v628_v39 = vld [vmem:[#allocation2 + $0x46] sm:$0xff] }
  0xd7   : > { %v2934_v38 = vmul.f32 %v2804_v57, %v523_v44  ;;  %619 = vst [vmem:[#allocation2 + $0x60] sm:$0x1] %v594_v45  ;;  %v2389_v44 = vld [vmem:[%s3229_s7 + $0x160] sm:$0xff]  ;;  %v2407_v45 = vld [vmem:[%s3229_s7 + $0x1f0] sm:$0xff]  ;;  %v668_v20 = vpack.c.bf16 %v662_v18, %v661_v62 }
  0xd8   : > { %v658_v46 = vld [vmem:[#allocation2 + $0x2f] sm:$0xff]  ;;  %947 = vmatpush.bf16.msrb.mxu3 %v2362_v42 }
  0xd9   : > { %v625_v55 = vld [vmem:[#allocation2 + $0x2e] sm:$0xff]  ;;  %614 = vst [vmem:[#allocation2 + $0x38] sm:$0xff] %v2934_v38  ;;  %v666_v54 = vpack.c.bf16 %v658_v46, %v993_v21  ;;  %v873_v61 = vpack.c.bf16 %v2834_v24, %v2934_v38 }
  0xda   : > { %v633_v58 = vpack.c.bf16 %v625_v55, %v624_v48  ;;  %1336 = vmatpush.bf16.msra.mxu2 %v2390_v34  ;;  %v1132_v55 = vpack.c.bf16 %v2841_v11, %v2816_v0  ;;  %1597 = vmatpush.bf16.msra.mxu0 %v2407_v45  ;;  %v2387_v0 = vld [vmem:[%s3229_s7 + $0x150] sm:$0xff]  ;;  %v2405_v11 = vld [vmem:[%s3229_s7 + $0x1e0] sm:$0xff]  ;;  %v2404_v34 = vld [vmem:[%s3229_s7 + $0x1d8] sm:$0xff] }
  0xdb   : > { %753 = vmatmul.bf16.gmra.mxu1 %v666_v54  ;;  %v2388_v54 = vld [vmem:[%s3229_s7 + $0x158] sm:$0xff]  ;;  %v629_v42 = vld [vmem:[#allocation2 + $0x4e] sm:$0xff] }
  0xdc   : > { %839 = vmatmul.bf16.gmra.mxu2 %v633_v58  ;;  %v2406_v58 = vld [vmem:[%s3229_s7 + $0x1e8] sm:$0xff]  ;;  %948 = vmatpush.bf16.msrb.mxu3 %v2361_v63  ;;  %v635_v45 = vpack.c.bf16 %v629_v42, %v628_v39  ;;  %v1252_v39 = vld [vmem:[#allocation2 + $0x11] sm:$0xff] }
  0xde   : > { %1337 = vmatpush.bf16.msra.mxu2 %v2389_v44  ;;  %1598 = vmatpush.bf16.msra.mxu0 %v2406_v58  ;;  %v2403_v44 = vld [vmem:[%s3229_s7 + $0x1d0] sm:$0xff]  ;;  %v1653_v15 = vld [vmem:[#allocation2 + $0x5a] sm:$0xff] }
  0xe0   : > { %v659_v21 = vld [vmem:[#allocation2 + $0x37] sm:$0xff]  ;;  %v660_v26 = vld [vmem:[#allocation2 + $0x3f] sm:$0xff] }
  0xe1   : > { %v667_v28 = vpack.c.bf16 %v660_v26, %v659_v21  ;;  %v1003_v29 = vpack.c.bf16 %v659_v21, %v658_v46  ;;  %v626_v53 = vld [vmem:[#allocation2 + $0x36] sm:$0xff]  ;;  %v627_v46 = vld [vmem:[#allocation2 + $0x3e] sm:$0xff]  ;;  %v1004_v21 = vpack.c.bf16 %v661_v62, %v660_v26 }
  0xe2   : > { %v634_v48 = vpack.c.bf16 %v627_v46, %v626_v53  ;;  %1338 = vmatpush.bf16.msra.mxu2 %v2388_v54  ;;  %1599 = vmatpush.bf16.msra.mxu0 %v2405_v11  ;;  %v2385_v26 = vld [vmem:[%s3229_s7 + $0x140] sm:$0xff]  ;;  %v1133_v53 = vpack.c.bf16 %v2895_v17, %v2863_v56  ;;  %v2402_v46 = vld [vmem:[%s3229_s7 + $0x1c8] sm:$0xff]  ;;  %v663_v54 = vld [vmem:[#allocation2 + $0x57] sm:$0x1] }
  0xe3   : > { %758 = vmatmul.bf16.vlgmr.msra.gmra.mxu3 %v667_v28  ;;  %1090 = vmatmul.bf16.gmra.mxu0 %v1003_v29  ;;  %v2400_v28 = vld [vmem:[%s3229_s7 + $0x1b8] sm:$0xff]  ;;  %v2386_v29 = vld [vmem:[%s3229_s7 + $0x148] sm:$0xff]  ;;  %v2401_v17 = vld [vmem:[%s3229_s7 + $0x1c0] sm:$0xff]  ;;  %v669_v58 = vpack.c.bf16 %v663_v54, %v663_v54 }
  0xe4   : > { %1465 = vmatpush.bf16.msra.mxu3 %v2400_v28  ;;  %v999_v56 = vld [vmem:[#allocation2 + $0x57] sm:$0xff]  ;;  %v630_v11 = vld [vmem:[#allocation2 + $0x56] sm:$0x1] }
  0xe5   : > { %v1005_v63 = vpack.c.bf16 %v999_v56, %v662_v18  ;;  %v636_v62 = vpack.c.bf16 %v630_v11, %v630_v11  ;;  %v1000_v18 = vld [vmem:[#allocation2 + $0x5f] sm:$0x1]  ;;  %v1517_v56 = vld [vmem:[#allocation2 + $0x31] sm:$0xff] }
  0xe6   : > { %1339 = vmatpush.bf16.msra.mxu2 %v2387_v0  ;;  %1600 = vmatpush.bf16.msra.mxu0 %v2404_v34  ;;  %v2415_v0 = vld [vmem:[%s3229_s7 + $0x230] sm:$0xff]  ;;  %v1006_v28 = vpack.c.bf16 %v1000_v18, %v1000_v18  ;;  %v1253_v34 = vld [vmem:[#allocation2 + $0x19] sm:$0xff]  ;;  %v1519_v18 = vld [vmem:[#allocation2 + $0x41] sm:$0xff] }
  0xe7   : > { %v1263_v42 = vpack.c.bf16 %v1253_v34, %v1252_v39  ;;  %v1646_v39 = vld [vmem:[#allocation2 + $0x22] sm:$0xff] }
  0xea   : > { %1340 = vmatpush.bf16.msra.mxu2 %v2386_v29  ;;  %1601 = vmatpush.bf16.msra.mxu0 %v2403_v44  ;;  %v2414_v29 = vld [vmem:[%s3229_s7 + $0x228] sm:$0xff] }
  0xeb   : > { %1211 = vmatmul.bf16.vlgmr.msrb.gmra.mxu1 %v1132_v55  ;;  %v2399_v55 = vld [vmem:[%s3229_s7 + $0x1b0] sm:$0xff]  ;;  %v1515_v44 = vld [vmem:[#allocation2 + $0x21] sm:$0xff] }
  0xec   : > { %844 = vmatmul.bf16.gmra.mxu2 %v634_v48  ;;  %v2416_v48 = vld [vmem:[%s3229_s7 + $0x238] sm:$0xff]  ;;  %1466 = vmatpush.bf16.msra.mxu3 %v2399_v55  ;;  %v2409_v55 = vld [vmem:[%s3229_s7 + $0x200] sm:$0xff] }
  0xed   : > { %1727 = vmatpush.bf16.msra.mxu1 %v2416_v48  ;;  %v1255_v48 = vld [vmem:[#allocation2 + $0x29] sm:$0xff] }
  0xee   : > { %1341 = vmatpush.bf16.msra.mxu2 %v2385_v26  ;;  %1602 = vmatpush.bf16.msra.mxu0 %v2402_v46  ;;  %v2413_v26 = vld [vmem:[%s3229_s7 + $0x220] sm:$0xff]  ;;  %v2410_v46 = vld [vmem:[%s3229_s7 + $0x208] sm:$0xff]  ;;  %v1264_v54 = vpack.c.bf16 %v1255_v48, %v1515_v44 }
  0xf1   : > { %1728 = vmatpush.bf16.msra.mxu1 %v2415_v0  ;;  %v1257_v0 = vld [vmem:[#allocation2 + $0x39] sm:$0xff] }
  0xf2   : > { %1603 = vmatpush.bf16.msra.mxu0 %v2401_v17  ;;  %v2395_v17 = vld [vmem:[%s3229_s7 + $0x190] sm:$0xff] }
  0xf3   : > { %763 = vmatmul.bf16.gmra.mxu3 %v668_v20  ;;  %1095 = vmatmul.bf16.gmra.mxu0 %v1004_v21  ;;  %v1134_v20 = vpack.c.bf16 %v2934_v38, %v2913_v4  ;;  %v2398_v21 = vld [vmem:[%s3229_s7 + $0x1a8] sm:$0xff]  ;;  %v2397_v4 = vld [vmem:[%s3229_s7 + $0x1a0] sm:$0xff] }
  0xf4   : > { %1467 = vmatpush.bf16.msra.mxu3 %v2398_v21 }
  0xf5   : > { %1729 = vmatpush.bf16.msra.mxu1 %v2414_v29 }
  0xf8   : > { %1468 = vmatpush.bf16.msra.mxu3 %v2397_v4 }
  0xf9   : > { %1730 = vmatpush.bf16.msra.mxu1 %v2413_v26 }
  0xfb   : > { %1216 = vmatmul.bf16.gmra.mxu1 %v1133_v53  ;;  %v1525_v53 = vpack.c.bf16 %v1515_v44, %v1253_v34  ;;  %v1527_v34 = vpack.c.bf16 %v1519_v18, %v1257_v0 }
  0xfc   : > { %849 = vmatmul.bf16.gmra.mxu2 %v635_v45  ;;  %v2411_v45 = vld [vmem:[%s3229_s7 + $0x210] sm:$0xff] }
 0x103   : > { %768 = vmatmul.bf16.gmra.mxu3 %v669_v58  ;;  %1100 = vmatmul.bf16.gmra.mxu0 %v1005_v63  ;;  %v1526_v58 = vpack.c.bf16 %v1517_v56, %v1255_v48  ;;  %v1131_v63 = vld [vmem:[#allocation2 + $0x60] sm:$0x1] }
 0x10b   : > { %1221 = vmatmul.bf16.gmra.mxu1 %v1134_v20  ;;  %v1265_v20 = vpack.c.bf16 %v1257_v0, %v1517_v56  ;;  %v1648_v0 = vld [vmem:[#allocation2 + $0x32] sm:$0xff] }
 0x10c   : > { %854 = vmatmul.bf16.gmra.mxu2 %v636_v62  ;;  %v1137_v62 = vpack.c.bf16 %v1131_v63, %v1131_v63  ;;  %v1261_v63 = vld [vmem:[#allocation2 + $0x59] sm:$0xff] }
 0x113   : > { %949 = vmatmul.bf16.vlgmr.msrb.gmra.mxu3 %v2825_v19  ;;  %1105 = vmatmul.bf16.gmra.mxu0 %v1006_v28  ;;  %v2412_v19 = vld [vmem:[%s3229_s7 + $0x218] sm:$0xff] }
 0x114   : > { %1731 = vmatpush.bf16.msra.mxu1 %v2412_v19  ;;  %v2393_v19 = vld [vmem:[%s3229_s7 + $0x180] sm:$0xff] }
 0x118   : > { %1732 = vmatpush.bf16.msra.mxu1 %v2411_v45 }
 0x11b   : > { %1226 = vmatmul.bf16.gmra.mxu1 %v1135_v59  ;;  %v2396_v59 = vld [vmem:[%s3229_s7 + $0x198] sm:$0xff] }
 0x11c   : > { %1342 = vmatmul.bf16.vlgmr.msra.gmra.mxu2 %v1263_v42  ;;  %1469 = vmatpush.bf16.msra.mxu3 %v2396_v59  ;;  %v1645_v59 = vld [vmem:[#allocation2 + $0x1a] sm:$0xff] }
 0x11d   : > { %1733 = vmatpush.bf16.msra.mxu1 %v2410_v46  ;;  %v1656_v48 = vpack.c.bf16 %v1646_v39, %v1645_v59 }
 0x120   : > { %1470 = vmatpush.bf16.msra.mxu3 %v2395_v17 }
 0x121   : > { %1734 = vmatpush.bf16.msra.mxu1 %v2409_v55 }
 0x123   : > { %954 = vmatmul.bf16.gmra.mxu3 %v2873_v16  ;;  %1604 = vmatmul.bf16.vlgmr.msra.gmra.mxu0 %v1525_v53  ;;  %v1259_v53 = vld [vmem:[#allocation2 + $0x49] sm:$0xff] }
 0x124   : > { %v1266_v46 = vpack.c.bf16 %v1259_v53, %v1519_v18 }
 0x12b   : > { %1231 = vmatmul.bf16.gmra.mxu1 %v1136_v22  ;;  %v2394_v22 = vld [vmem:[%s3229_s7 + $0x188] sm:$0xff] }
 0x12c   : > { %1347 = vmatmul.bf16.gmra.mxu2 %v1264_v54  ;;  %1471 = vmatpush.bf16.msra.mxu3 %v2394_v22  ;;  %v1647_v22 = vld [vmem:[#allocation2 + $0x2a] sm:$0xff] }
 0x12d   : > { %v1657_v18 = vpack.c.bf16 %v1648_v0, %v1647_v22 }
 0x130   : > { %1472 = vmatpush.bf16.msra.mxu3 %v2393_v19 }
 0x133   : > { %959 = vmatmul.bf16.gmra.mxu3 %v2926_v31  ;;  %1609 = vmatmul.bf16.gmra.mxu0 %v1526_v58 }
 0x138   : > { %v744_v11 = vpop.f32.mrf.mxu1 }
 0x13b   : > { %1236 = vmatmul.bf16.gmra.mxu1 %v1137_v62 }
 0x13c   : > { %1352 = vmatmul.bf16.gmra.mxu2 %v1265_v20 }
 0x13f   : > { %v830_v21 = vpop.f32.mrf.mxu2 }
 0x140   : > { %v3059_v28 = vadd.f32 %v830_v21, %v744_v11  ;;  %v746_v29 = vpop.f32.mrf.mxu1  ;;  %v3061_v4 = vpop.f32.mrf.mxu0 }
 0x143   : > { %964 = vmatmul.bf16.gmra.mxu3 %v873_v61  ;;  %1614 = vmatmul.bf16.gmra.mxu0 %v1527_v34  ;;  %v1521_v61 = vld [vmem:[#allocation2 + $0x51] sm:$0xff] }
 0x144   : > { %v1528_v17 = vpack.c.bf16 %v1521_v61, %v1259_v53  ;;  %v1267_v21 = vpack.c.bf16 %v1261_v63, %v1521_v61  ;;  %v869_v34 = vld [vmem:[#allocation2 + $0x58] sm:$0x1]  ;;  %v1262_v53 = vld [vmem:[#allocation2 + $0x61] sm:$0x1] }
 0x145   : > { %v875_v19 = vpack.c.bf16 %v869_v34, %v869_v34 }
 0x147   : > { %v832_v26 = vpop.f32.mrf.mxu2 }
 0x148   : > { %v3066_v42 = vadd.f32 %v832_v26, %v746_v29  ;;  %v749_v44 = vpop.f32.mrf.mxu1  ;;  %v3071_v45 = vpop.f32.mrf.mxu0  ;;  %v1523_v26 = vld [vmem:[#allocation2 + $0x61] sm:$0xff] }
 0x14b   : > { %1735 = vmatmul.bf16.vlgmr.msra.gmra.mxu1 %v1656_v48  ;;  %v1649_v48 = vld [vmem:[#allocation2 + $0x3a] sm:$0xff] }
 0x14c   : > { %1357 = vmatmul.bf16.gmra.mxu2 %v1266_v46 }
 0x14f   : > { %v835_v24 = vpop.f32.mrf.mxu2 }
 0x150   : > { %v3073_v55 = vadd.f32 %v835_v24, %v749_v44  ;;  %v751_v54 = vpop.f32.mrf.mxu1  ;;  %v3075_v56 = vpop.f32.mrf.mxu0  ;;  %v1529_v44 = vpack.c.bf16 %v1523_v26, %v1261_v63  ;;  %v1650_v24 = vld [vmem:[#allocation2 + $0x42] sm:$0xff]  ;;  %v1651_v26 = vld [vmem:[#allocation2 + $0x4a] sm:$0xff] }
 0x151   : > { %v1658_v0 = vpack.c.bf16 %v1650_v24, %v1649_v48 }
 0x153   : > { %969 = vmatmul.bf16.gmra.mxu3 %v874_v32  ;;  %1619 = vmatmul.bf16.gmra.mxu0 %v1528_v17 }
 0x157   : > { %v837_v58 = vpop.f32.mrf.mxu2 }
 0x158   : > { %v3080_v11 = vadd.f32 %v837_v58, %v751_v54  ;;  %v754_v62 = vpop.f32.mrf.mxu1  ;;  %v3082_v20 = vpop.f32.mrf.mxu0  ;;  %v1268_v54 = vpack.c.bf16 %v1262_v53, %v1262_v53 }
 0x15b   : > { %1740 = vmatmul.bf16.gmra.mxu1 %v1657_v18 }
 0x15c   : > { %1362 = vmatmul.bf16.gmra.mxu2 %v1267_v21 }
 0x15f   : > { %v840_v29 = vpop.f32.mrf.mxu2 }
 0x160   : > { %v3084_v39 = vadd.f32 %v840_v29, %v754_v62  ;;  %v756_v49 = vpop.f32.mrf.mxu1  ;;  %v3086_v32 = vpop.f32.mrf.mxu0 }
 0x163   : > { %974 = vmatmul.bf16.gmra.mxu3 %v875_v19  ;;  %1624 = vmatmul.bf16.gmra.mxu0 %v1529_v44 }
 0x166   : > { %v759_v59 = vpop.f32.mrf.mxu3 }
 0x167   : > { %v842_v46 = vpop.f32.mrf.mxu2 }
 0x168   : > { %v3088_v61 = vadd.f32 %v842_v46, %v756_v49  ;;  %v3090_v17 = vpop.f32.mrf.mxu0  ;;  %v1212_v58 = vpop.f32.mrf.mxu1  ;;  %v1652_v49 = vld [vmem:[#allocation2 + $0x52] sm:$0xff] }
 0x169   : > { %v1659_v46 = vpack.c.bf16 %v1652_v49, %v1651_v26  ;;  %v1660_v26 = vpack.c.bf16 %v1654_v41, %v1653_v15 }
 0x16b   : > { %1745 = vmatmul.bf16.gmra.mxu1 %v1658_v0 }
 0x16c   : > { %1367 = vmatmul.bf16.gmra.mxu2 %v1268_v54 }
 0x16e   : > { %v761_v62 = vpop.f32.mrf.mxu3 }
 0x16f   : > { %v845_v22 = vpop.f32.mrf.mxu2 }
 0x170   : > { %v3092_v21 = vadd.f32 %v845_v22, %v759_v59  ;;  %v3094_v63 = vpop.f32.mrf.mxu0  ;;  %v1214_v18 = vpop.f32.mrf.mxu1 }
 0x173   : > { %1473 = vmatmul.bf16.vlgmr.msra.gmra.mxu3 %v2873_v16 }
 0x176   : > { %v764_v29 = vpop.f32.mrf.mxu3 }
 0x177   : > { %v847_v34 = vpop.f32.mrf.mxu2 }
 0x178   : > { %v3097_v19 = vadd.f32 %v847_v34, %v761_v62  ;;  %v3099_v44 = vpop.f32.mrf.mxu0  ;;  %v1217_v53 = vpop.f32.mrf.mxu1 }
 0x17b   : > { %1750 = vmatmul.bf16.gmra.mxu1 %v1659_v46 }
 0x17e   : > { %v766_v48 = vpop.f32.mrf.mxu3 }
 0x17f   : > { %v850_v24 = vpop.f32.mrf.mxu2 }
 0x180   : > { %v3101_v59 = vadd.f32 %v850_v24, %v764_v29  ;;  %v3103_v54 = vpop.f32.mrf.mxu0  ;;  %v1219_v0 = vpop.f32.mrf.mxu1  ;;  %v1388_v29 = vld [vmem:[#allocation2 + $0x40] sm:$0xff] }
 0x183   : > { %1478 = vmatmul.bf16.gmra.mxu3 %v2926_v31  ;;  %v1396_v31 = vpack.c.bf16 %v1388_v29, %v2934_v38  ;;  %v1524_v29 = vld [vmem:[#allocation2 + $0x69] sm:$0x1] }
 0x186   : > { %v769_v16 = vpop.f32.mrf.mxu3 }
 0x187   : > { %v852_v22 = vpop.f32.mrf.mxu2 }
 0x188   : > { %v3106_v62 = vadd.f32 %v852_v22, %v766_v48  ;;  %v3108_v34 = vpop.f32.mrf.mxu0  ;;  %v1222_v40 = vpop.f32.mrf.mxu1 }
 0x18b   : > { %1755 = vmatmul.bf16.gmra.mxu1 %v1660_v26 }
 0x18e   : > { %v771_v49 = vpop.f32.mrf.mxu3 }
 0x18f   : > { %v855_v46 = vpop.f32.mrf.mxu2 }
 0x190   : > { %v3110_v24 = vadd.f32 %v855_v46, %v769_v16  ;;  %v3112_v13 = vpop.f32.mrf.mxu0  ;;  %v1224_v12 = vpop.f32.mrf.mxu1 }
 0x193   : > { %1483 = vmatmul.bf16.gmra.mxu3 %v1396_v31  ;;  %v1655_v31 = vld [vmem:[#allocation2 + $0x6a] sm:$0x1] }
 0x196   : > { %v950_v6 = vpop.f32.mrf.mxu3 }
 0x197   : > { %v857_v14 = vpop.f32.mrf.mxu2  ;;  %v979_v48 = vadd.f32 %v950_v6, %v3059_v28  ;;  %v1530_v28 = vpack.c.bf16 %v1524_v29, %v1524_v29 }
 0x198   : > { %v1108_v22 = vpop.f32.mrf.mxu0  ;;  %v1227_v37 = vpop.f32.mrf.mxu1  ;;  %v1397_v14 = vpack.c.bf16 %v2888_v27, %v1389_v36  ;;  %v1392_v27 = vld [vmem:[#allocation2 + $0x60] sm:$0xff] }
 0x199   : > { %v1110_v41 = vadd.f32 %v3061_v4, %v979_v48  ;;  %v1661_v22 = vpack.c.bf16 %v1655_v31, %v1655_v31  ;;  %1629 = vmatmul.bf16.gmra.mxu0 %v1530_v28 }
 0x19b   : > { %v1241_v15 = vadd.f32 %v1212_v58, %v1110_v41  ;;  %1760 = vmatmul.bf16.gmra.mxu1 %v1661_v22 }
 0x19e   : > { %v952_v26 = vpop.f32.mrf.mxu3 }
 0x19f   : > { %v1343_v49 = vpop.f32.mrf.mxu2  ;;  %v980_v16 = vadd.f32 %v952_v26, %v3066_v42 }
 0x1a0   : > { %v3118_v46 = vadd.f32 %v1343_v49, %v1241_v15  ;;  %v1229_v10 = vpop.f32.mrf.mxu1 }
 0x1a1   : > { %v1111_v38 = vadd.f32 %v3071_v45, %v980_v16 }
 0x1a3   : > { %1488 = vmatmul.bf16.gmra.mxu3 %v1397_v14  ;;  %v1242_v6 = vadd.f32 %v1214_v18, %v1111_v38  ;;  %v1398_v14 = vpack.c.bf16 %v1392_v27, %v2910_v1 }
 0x1a6   : > { %v955_v4 = vpop.f32.mrf.mxu3 }
 0x1a7   : > { %v1345_v58 = vpop.f32.mrf.mxu2  ;;  %v981_v48 = vadd.f32 %v955_v4, %v3073_v55 }
 0x1a8   : > { %v3123_v42 = vadd.f32 %v1345_v58, %v1242_v6  ;;  %v1232_v41 = vpop.f32.mrf.mxu1 }
 0x1a9   : > { %v1112_v15 = vadd.f32 %v3075_v56, %v981_v48  ;;  %v1605_v48 = vpop.f32.mrf.mxu0 }
 0x1ab   : > { %v1243_v45 = vadd.f32 %v1217_v53, %v1112_v15 }
 0x1ae   : > { %v957_v26 = vpop.f32.mrf.mxu3 }
 0x1af   : > { %v1348_v36 = vpop.f32.mrf.mxu2  ;;  %v982_v18 = vadd.f32 %v957_v26, %v3080_v11  ;;  %v1393_v11 = vld [vmem:[#allocation2 + $0x68] sm:$0x1] }
 0x1b0   : > { %v3127_v49 = vadd.f32 %v1348_v36, %v1243_v45  ;;  %v1234_v16 = vpop.f32.mrf.mxu1  ;;  %v1399_v1 = vpack.c.bf16 %v1393_v11, %v1393_v11 }
 0x1b1   : > { %v1113_v38 = vadd.f32 %v3082_v20, %v982_v18  ;;  %v1607_v18 = vpop.f32.mrf.mxu0 }
 0x1b3   : > { %1493 = vmatmul.bf16.gmra.mxu3 %v1398_v14  ;;  %v1244_v55 = vadd.f32 %v1219_v0, %v1113_v38 }
 0x1b6   : > { %v960_v29 = vpop.f32.mrf.mxu3 }
 0x1b7   : > { %v1350_v6 = vpop.f32.mrf.mxu2  ;;  %v983_v28 = vadd.f32 %v960_v29, %v3084_v39 }
 0x1b8   : > { %v3132_v56 = vadd.f32 %v1350_v6, %v1244_v55  ;;  %v1237_v53 = vpop.f32.mrf.mxu1 }
 0x1b9   : > { %v1114_v31 = vadd.f32 %v3086_v32, %v983_v28  ;;  %v1610_v28 = vpop.f32.mrf.mxu0 }
 0x1bb   : > { %v1245_v22 = vadd.f32 %v1222_v40, %v1114_v31 }
 0x1be   : > { %v962_v4 = vpop.f32.mrf.mxu3 }
 0x1bf   : > { %v1353_v58 = vpop.f32.mrf.mxu2  ;;  %v984_v20 = vadd.f32 %v962_v4, %v3088_v61 }
 0x1c0   : > { %v3136_v15 = vadd.f32 %v1353_v58, %v1245_v22  ;;  %v1239_v0 = vpop.f32.mrf.mxu1 }
 0x1c1   : > { %v1115_v45 = vadd.f32 %v3090_v17, %v984_v20  ;;  %v1612_v20 = vpop.f32.mrf.mxu0 }
 0x1c3   : > { %1498 = vmatmul.bf16.gmra.mxu3 %v1399_v1  ;;  %v1246_v39 = vadd.f32 %v1224_v12, %v1115_v45 }
 0x1c6   : > { %v965_v26 = vpop.f32.mrf.mxu3 }
 0x1c7   : > { %v1355_v36 = vpop.f32.mrf.mxu2  ;;  %v985_v27 = vadd.f32 %v965_v26, %v3092_v21 }
 0x1c8   : > { %v3140_v32 = vadd.f32 %v1355_v36, %v1246_v39  ;;  %v1736_v40 = vpop.f32.mrf.mxu1 }
 0x1c9   : > { %v1116_v38 = vadd.f32 %v3094_v63, %v985_v27 }
 0x1cb   : > { %v1247_v14 = vadd.f32 %v1227_v37, %v1116_v38  ;;  %v1615_v38 = vpop.f32.mrf.mxu0 }
 0x1ce   : > { %v967_v61 = vpop.f32.mrf.mxu3 }
 0x1cf   : > { %v1358_v55 = vpop.f32.mrf.mxu2  ;;  %v986_v29 = vadd.f32 %v967_v61, %v3097_v19 }
 0x1d0   : > { %v3144_v6 = vadd.f32 %v1358_v55, %v1247_v14  ;;  %v1738_v17 = vpop.f32.mrf.mxu1 }
 0x1d1   : > { %v1117_v12 = vadd.f32 %v3099_v44, %v986_v29 }
 0x1d3   : > { %v1248_v31 = vadd.f32 %v1229_v10, %v1117_v12  ;;  %v1617_v29 = vpop.f32.mrf.mxu0 }
 0x1d6   : > { %v970_v22 = vpop.f32.mrf.mxu3 }
 0x1d7   : > { %v1360_v21 = vpop.f32.mrf.mxu2  ;;  %v987_v11 = vadd.f32 %v970_v22, %v3101_v59 }
 0x1d8   : > { %v3148_v4 = vadd.f32 %v1360_v21, %v1248_v31  ;;  %v1741_v58 = vpop.f32.mrf.mxu1 }
 0x1d9   : > { %v1118_v37 = vadd.f32 %v3103_v54, %v987_v11 }
 0x1db   : > { %v1249_v63 = vadd.f32 %v1232_v41, %v1118_v37 }
 0x1de   : > { %v972_v1 = vpop.f32.mrf.mxu3 }
 0x1df   : > { %v1363_v19 = vpop.f32.mrf.mxu2  ;;  %v988_v0 = vadd.f32 %v972_v1, %v3106_v62 }
 0x1e0   : > { %v3152_v45 = vadd.f32 %v1363_v19, %v1249_v63  ;;  %v1743_v44 = vpop.f32.mrf.mxu1 }
 0x1e1   : > { %v1119_v10 = vadd.f32 %v3108_v34, %v988_v0 }
 0x1e3   : > { %v1250_v39 = vadd.f32 %v1234_v16, %v1119_v10 }
 0x1e6   : > { %v975_v26 = vpop.f32.mrf.mxu3 }
 0x1e7   : > { %v1365_v36 = vpop.f32.mrf.mxu2  ;;  %v989_v59 = vadd.f32 %v975_v26, %v3110_v24  ;;  %v1620_v24 = vpop.f32.mrf.mxu0 }
 0x1e8   : > { %v3156_v27 = vadd.f32 %v1365_v36, %v1250_v39  ;;  %v1746_v41 = vpop.f32.mrf.mxu1 }
 0x1e9   : > { %v1120_v54 = vadd.f32 %v3112_v13, %v989_v59 }
 0x1eb   : > { %v1251_v14 = vadd.f32 %v1237_v53, %v1120_v54 }
 0x1ee   : > { %v977_v61 = vpop.f32.mrf.mxu3 }
 0x1ef   : > { %v1368_v55 = vpop.f32.mrf.mxu2  ;;  %v1622_v0 = vpop.f32.mrf.mxu0  ;;  %v3242_v61 = vunpack.c.l.bf16 %v2650_v33 }
 0x1f0   : > { %v3159_v62 = vadd.f32 %v1368_v55, %v1251_v14  ;;  %v1748_v12 = vpop.f32.mrf.mxu1 }
 0x1f6   : > { %v1474_v31 = vpop.f32.mrf.mxu3 }
 0x1f7   : > { %v1370_v34 = vpop.f32.mrf.mxu2  ;;  %v1503_v16 = vadd.f32 %v1474_v31, %v3118_v46  ;;  %v3241_v46 = vunpack.c.h.bf16 %v2596_v7  ;;  %v1625_v7 = vpop.f32.mrf.mxu0  ;;  %v3243_v31 = vunpack.c.h.bf16 %v2650_v33 }
 0x1f8   : > { %v1751_v21 = vpop.f32.mrf.mxu1 }
 0x1f9   : > { %v1634_v22 = vadd.f32 %v1605_v48, %v1503_v16 }
 0x1fb   : > { %v1765_v37 = vadd.f32 %v1736_v40, %v1634_v22 }
 0x1fd   : > { %v1776_v53 = vmul.f32 %v1765_v37, %v2810_v60 }
 0x1fe   : > { %v1476_v11 = vpop.f32.mrf.mxu3 }
 0x1ff   : > { %v1504_v13 = vadd.f32 %v1476_v11, %v3123_v42  ;;  %v1787_v39 = vadd.f32 %v2419_v9, %v1776_v53  ;;  %v1627_v16 = vpop.f32.mrf.mxu0 }
 0x200   : > { %v1753_v60 = vpop.f32.mrf.mxu1 }
 0x201   : > { %v1635_v63 = vadd.f32 %v1607_v18, %v1504_v13 }
 0x203   : > { %v1766_v1 = vadd.f32 %v1738_v17, %v1635_v63 }
 0x205   : > { %v1777_v19 = vmul.f32 %v1766_v1, %v2831_v23 }
 0x206   : > { %v1479_v10 = vpop.f32.mrf.mxu3 }
 0x207   : > { %v1788_v48 = vadd.f32 %v3241_v46, %v1777_v19  ;;  %v1505_v26 = vadd.f32 %v1479_v10, %v3127_v49 }
 0x208   : > { %v1756_v36 = vpop.f32.mrf.mxu1 }
 0x209   : > { %v2440_v42 = vpack.c.bf16 %v1788_v48, %v1787_v39  ;;  %v1636_v23 = vadd.f32 %v1610_v28, %v1505_v26 }
 0x20b   : > { %2441 = vst [vmem:[%s3175_s14] sm:$0xff] %v2440_v42   ;;  %v1767_v18 = vadd.f32 %v1741_v58, %v1636_v23  ;;  %v3246_v23 = vunpack.c.l.bf16 %v2599_v8 }
 0x20d   : > { %v1778_v49 = vmul.f32 %v1767_v18, %v2853_v47 }
 0x20e   : > { %v1481_v40 = vpop.f32.mrf.mxu3 }
 0x20f   : > { %v1506_v9 = vadd.f32 %v1481_v40, %v3132_v56  ;;  %v1789_v55 = vadd.f32 %v3242_v61, %v1778_v49  ;;  %v3247_v40 = vunpack.c.h.bf16 %v2599_v8  ;;  %v3248_v8 = vunpack.c.l.bf16 %v2656_v35 }
 0x211   : > { %v1637_v17 = vadd.f32 %v1612_v20, %v1506_v9  ;;  %v1758_v20 = vpop.f32.mrf.mxu1 }
 0x213   : > { %v1768_v59 = vadd.f32 %v1743_v44, %v1637_v17 }
 0x215   : > { %v1779_v54 = vmul.f32 %v1768_v59, %v2882_v25 }
 0x216   : > { %v1484_v14 = vpop.f32.mrf.mxu3  ;;  %v1630_v11 = vpop.f32.mrf.mxu0 }
 0x217   : > { %v1790_v28 = vadd.f32 %v3243_v31, %v1779_v54  ;;  %v1507_v34 = vadd.f32 %v1484_v14, %v3136_v15  ;;  %v3244_v15 = vunpack.c.l.bf16 %v2715_v2 }
 0x219   : > { %v2445_v58 = vpack.c.bf16 %v1790_v28, %v1789_v55  ;;  %v1638_v56 = vadd.f32 %v1615_v38, %v1507_v34  ;;  %v1761_v63 = vpop.f32.mrf.mxu1  ;;  %v3245_v38 = vunpack.c.h.bf16 %v2715_v2  ;;  %v1822_v28 = vld [vmem:[%s3175_s14 + $0x28] sm:$0x1] }
 0x21b   : > { %2466 = vst [vmem:[%s3175_s14 + $0x8] sm:$0xff] %v2445_v58   ;;  %v1769_v47 = vadd.f32 %v1746_v41, %v1638_v56 }
 0x21d   : > { %v1780_v37 = vmul.f32 %v1769_v47, %v2789_v51 }
 0x21e   : > { %v1486_v22 = vpop.f32.mrf.mxu3  ;;  %v1632_v39 = vpop.f32.mrf.mxu0 }
 0x21f   : > { %v1508_v44 = vadd.f32 %v1486_v22, %v3140_v32  ;;  %v1791_v1 = vadd.f32 %v3244_v15, %v1780_v37 }
 0x221   : > { %v1639_v25 = vadd.f32 %v1617_v29, %v1508_v44  ;;  %v1763_v29 = vpop.f32.mrf.mxu1 }
 0x223   : > { %v1770_v13 = vadd.f32 %v1748_v12, %v1639_v25 }
 0x225   : > { %v1781_v33 = vmul.f32 %v1770_v13, %v2804_v57 }
 0x226   : > { %v1489_v53 = vpop.f32.mrf.mxu3 }
 0x227   : > { %v1792_v19 = vadd.f32 %v3245_v38, %v1781_v33  ;;  %v1509_v10 = vadd.f32 %v1489_v53, %v3144_v6 }
 0x229   : > { %v2450_v41 = vpack.c.bf16 %v1792_v19, %v1791_v1  ;;  %v1640_v32 = vadd.f32 %v1620_v24, %v1509_v10 }
 0x22b   : > { %2467 = vst [vmem:[%s3175_s14 + $0x10] sm:$0xff] %v2450_v41   ;;  %v1771_v12 = vadd.f32 %v1751_v21, %v1640_v32 }
 0x22d   : > { %v1782_v48 = vmul.f32 %v1771_v12, %v2791_v52 }
 0x22e   : > { %v1491_v51 = vpop.f32.mrf.mxu3 }
 0x22f   : > { %v1510_v46 = vadd.f32 %v1491_v51, %v3148_v4  ;;  %v1793_v6 = vadd.f32 %v3246_v23, %v1782_v48 }
 0x231   : > { %v1641_v57 = vadd.f32 %v1622_v0, %v1510_v46 }
 0x233   : > { %v1772_v26 = vadd.f32 %v1753_v60, %v1641_v57 }
 0x235   : > { %v1783_v42 = vmul.f32 %v1772_v26, %v2819_v5 }
 0x236   : > { %v1494_v2 = vpop.f32.mrf.mxu3 }
 0x237   : > { %v1794_v18 = vadd.f32 %v3247_v40, %v1783_v42  ;;  %v1511_v24 = vadd.f32 %v1494_v2, %v3152_v45  ;;  %v3249_v45 = vunpack.c.h.bf16 %v2656_v35 }
 0x239   : > { %v2455_v9 = vpack.c.bf16 %v1794_v18, %v1793_v6  ;;  %v1642_v21 = vadd.f32 %v1625_v7, %v1511_v24 }
 0x23b   : > { %2468 = vst [vmem:[%s3175_s14 + $0x18] sm:$0xff] %v2455_v9   ;;  %v1773_v0 = vadd.f32 %v1756_v36, %v1642_v21 }
 0x23d   : > { %v1784_v5 = vmul.f32 %v1773_v0, %v2847_v43 }
 0x23e   : > { %v1496_v4 = vpop.f32.mrf.mxu3 }
 0x23f   : > { %v1512_v52 = vadd.f32 %v1496_v4, %v3156_v27  ;;  %v1795_v54 = vadd.f32 %v3248_v8, %v1784_v5 }
 0x241   : > { %v1643_v60 = vadd.f32 %v1627_v16, %v1512_v52 }
 0x243   : > { %v1774_v17 = vadd.f32 %v1758_v20, %v1643_v60 }
 0x245   : > { %v1785_v49 = vmul.f32 %v1774_v17, %v2903_v50  ;;  %v3250_v50 = vunpack.c.l.bf16 %v2718_v3 }
 0x246   : > { %v1499_v59 = vpop.f32.mrf.mxu3 }
 0x247   : > { %v1796_v14 = vadd.f32 %v3249_v45, %v1785_v49  ;;  %v1513_v7 = vadd.f32 %v1499_v59, %v3159_v62 }
 0x249   : > { %v2460_v36 = vpack.c.bf16 %v1796_v14, %v1795_v54  ;;  %v1644_v61 = vadd.f32 %v1630_v11, %v1513_v7 }
 0x24b   : > { %2469 = vst [vmem:[%s3175_s14 + $0x20] sm:$0xff] %v2460_v36   ;;  %v1775_v27 = vadd.f32 %v1761_v63, %v1644_v61 }
 0x24d   : > { %v1786_v43 = vmul.f32 %v1775_v27, %v2922_v30 }
 0x24e   : > { %v1501_v55 = vpop.f32.mrf.mxu3 }
 0x24f   : > { %v1797_v31 = vadd.f32 %v1786_v43, %v3250_v50 }
 0x251   : > { %v1808_v34 = vpack.c.bf16 %v1797_v31, %v1797_v31 }
 0x253   : > { %v1823_v35 = vsel %vm1821_vm2, %v1808_v34, %v1822_v28 }
 0x254   : > { %1824 = vst [vmem:[%s3175_s14 + $0x28] sm:$0x1] %v1823_v35 }
 0x255 PF: > { %s18_s27 = sadd.s32 1, %s2510_s27  }
 0x256   : > { %p15_p4 = scmp.ge.s32.totalorder %s18_s27, 4  }
 0x258   :  { %17 = sbr.rel (!%p15_p4) target bundleno = 1 (0x1), region = 90 }

</bundles_post_ra>
